<compile_context>
chip_gen: v7x
topology: tpu7x:2x2x1
jax: 0.10.0
libtpu: 0.0.40
codegen_flags: <defaults>
</compile_context>

<pallas_src>
import jax
import jax.numpy as jnp
from jax.experimental import pallas as pl
from jax.experimental.pallas import tpu as pltpu

HIDDEN = 10000           # nn.Linear(D, 10000, bias=False)
HIDDEN_PAD = 10240       # HIDDEN rounded up to a multiple of TK (and of 128)
OUT = 600                # nn.Linear(10000, 600, bias=False)
TK = 2560                # layer-3 K tile; HIDDEN_PAD // TK = 4 weight slabs
NP = 2                   # parallel K-halves (engages both v7x TCs; no-op cost elsewhere)
KP = (HIDDEN_PAD // TK) // NP   # K steps per parallel half (= 2)
assert NP * KP * TK == HIDDEN_PAD


def _fused_metric_kernel(x_ref, w1_ref, b_ref, w2_ref, w3_ref, o_ref):
    """One grid step consumes one (TK, OUT) slab of the layer-3 weight.

    Layers 1/2 are tiny (D=32), so the needed K-chunk of the LeakyReLU output is
    recomputed per step instead of materializing the full (M, HIDDEN) intermediate.
    Layer-3 partials accumulate directly into the resident output block.
    """
    k = pl.program_id(1)

    @pl.when(k == 0)
    def _():
        o_ref[...] = jnp.zeros_like(o_ref)

    # layer 1: Linear(D, D) with bias
    h = jnp.dot(x_ref[...], w1_ref[...], preferred_element_type=jnp.float32)
    h = h + b_ref[...]                                  # (M,D) + (1,D)
    # layer 2 (current K chunk only): Linear(D, HIDDEN) no bias, LeakyReLU(0.01)
    y = jnp.dot(h, w2_ref[...], preferred_element_type=jnp.float32)
    y = jnp.where(y > 0, y, 0.01 * y)
    # layer 3 partial: accumulate (M, OUT)
    o_ref[...] += jnp.dot(y, w3_ref[...], preferred_element_type=jnp.float32)


def metric_model_pallas(prepped, x):
    """x: (M, D) float32; prepped: output of prepare_params. Returns (M, OUT)."""
    M, D = x.shape
    partials = pl.pallas_call(
        _fused_metric_kernel,
        out_shape=jax.ShapeDtypeStruct((NP, M, OUT), jnp.float32),
        grid_spec=pltpu.PrefetchScalarGridSpec(
            num_scalar_prefetch=0,
            grid=(NP, KP),
            in_specs=[
                pl.BlockSpec((M, D), lambda p, k: (0, 0)),              # x (fetched once)
                pl.BlockSpec((D, D), lambda p, k: (0, 0)),              # w1 (fetched once)
                pl.BlockSpec((1, D), lambda p, k: (0, 0)),              # bias (fetched once)
                pl.BlockSpec((D, TK), lambda p, k: (0, p * KP + k)),    # w2 K-chunk
                pl.BlockSpec((TK, OUT), lambda p, k: (p * KP + k, 0)),  # w3 K-slab (dominant stream)
            ],
            out_specs=pl.BlockSpec((None, M, OUT), lambda p, k: (p, 0, 0)),
        ),
        compiler_params=pltpu.CompilerParams(
            dimension_semantics=("parallel", "arbitrary"),
            vmem_limit_bytes=32 * 1024 * 1024,
        ),
    )(x, prepped["w1"], prepped["b1"], prepped["w2"], prepped["w3"])
    # Combine the two K-half partial sums (tiny (NP, M, OUT) reduction in XLA).
    return partials.sum(axis=0)


# ---------------------------------------------------------------------------
# Parameters
# ---------------------------------------------------------------------------
def init_params(key, input_data_dim):
    """Torch-convention (out_features, in_features) weights, U(-1/sqrt(fan_in), ...)."""
    D = input_data_dim
    k1, k2, k3, k4 = jax.random.split(key, 4)

    def u(k, shape, fan_in):
        bound = 1.0 / jnp.sqrt(jnp.float32(fan_in))
        return jax.random.uniform(k, shape, jnp.float32, -bound, bound)

    return {
        "w_lin": u(k1, (D, D), D),
        "b_lin": u(k2, (D,), D),
        "w_m1": u(k3, (HIDDEN, D), D),
        "w_m2": u(k4, (OUT, HIDDEN), HIDDEN),
    }


def prepare_params(params):
    """One-time layout prep: transpose to (in, out) and zero-pad HIDDEN -> HIDDEN_PAD.

    Padded w2 columns are zero => LeakyReLU(0) = 0, and padded w3 rows are zero, so the
    extra lanes contribute nothing to the output.
    """
    D = params["w_lin"].shape[0]
    w1 = jnp.asarray(params["w_lin"].T, jnp.float32)                      # (D, D)
    b1 = jnp.asarray(params["b_lin"], jnp.float32).reshape(1, D)          # (1, D)
    w2 = jnp.zeros((D, HIDDEN_PAD), jnp.float32).at[:, :HIDDEN].set(params["w_m1"].T)
    w3 = jnp.zeros((HIDDEN_PAD, OUT), jnp.float32).at[:HIDDEN, :].set(params["w_m2"].T)
    # TODO(synk): optionally cast w2/w3 to bfloat16 here (halves the dominant HBM stream)
    # if the accuracy tradeoff is acceptable; the kernel already accumulates in f32.
    return {"w1": w1, "b1": b1, "w2": w2, "w3": w3}


if __name__ == "__main__":
    key = jax.random.PRNGKey(0)
    D = 32                                  # input_data_dim (small)
    kp, kx = jax.random.split(key)
    params = init_params(kp, D)
    prepped = jax.tree_util.tree_map(jax.block_until_ready, prepare_params(params))
    x = jax.random.normal(kx, (2, D), jnp.float32)     # batch = 2

    fwd = jax.jit(metric_model_pallas)
    out = jax.block_until_ready(fwd(prepped, x))
    assert out.shape == (2, OUT), out.shape

    # Pure-JAX reference of the exact torch semantics (original param layout).
    ref = x @ params["w_lin"].T + params["b_lin"]
    ref = ref @ params["w_m1"].T
    ref = jnp.where(ref > 0, ref, 0.01 * ref)          # LeakyReLU default slope
    ref = ref @ params["w_m2"].T
    max_err = float(jnp.max(jnp.abs(out - ref)))
    assert jnp.allclose(out, ref, atol=1e-3, rtol=1e-3), max_err

    print("KERNEL_OK")
</pallas_src>

<mosaic_0001>
module attributes {stable_mosaic.version = 11 : i64} {
  func.func @_fused_metric_kernel(%arg0: i32, %arg1: i32, %arg2: memref<2x32xf32, #tpu.memory_space<vmem>>, %arg3: memref<32x32xf32, #tpu.memory_space<vmem>>, %arg4: memref<1x32xf32, #tpu.memory_space<vmem>>, %arg5: memref<32x2560xf32, #tpu.memory_space<vmem>>, %arg6: memref<2560x600xf32, #tpu.memory_space<vmem>>, %arg7: memref<1x2x600xf32, #tpu.memory_space<vmem>>) attributes {dimension_semantics = [#tpu.dimension_semantics<parallel>, #tpu.dimension_semantics<arbitrary>], iteration_bounds = array<i64: 2, 2>, scalar_prefetch = 0 : i64, scratch_operands = 0 : i64, tpu.core_type = #tpu.core_type<tc>, window_params = [{pipeline_mode = #tpu.pipeline_mode<synchronous>, transform_indices = @transform_0, window_bounds = array<i64: 2, 32>}, {pipeline_mode = #tpu.pipeline_mode<synchronous>, transform_indices = @transform_1, window_bounds = array<i64: 32, 32>}, {pipeline_mode = #tpu.pipeline_mode<synchronous>, transform_indices = @transform_2, window_bounds = array<i64: 1, 32>}, {transform_indices = @transform_3, window_bounds = array<i64: 32, 2560>}, {transform_indices = @transform_4, window_bounds = array<i64: 2560, 600>}, {transform_indices = @transform_5, window_bounds = array<i64: 1, 2, 600>}]} {
    %c0_i32 = arith.constant 0 : i32
    %0 = arith.cmpi eq, %arg1, %c0_i32 : i32
    %1 = arith.extui %0 : i1 to i32
    %c0_i32_0 = arith.constant 0 : i32
    %2 = arith.cmpi ne, %1, %c0_i32_0 : i32
    scf.if %2 {
      %cst_20 = arith.constant 0.000000e+00 : f32
      %24 = vector.broadcast %cst_20 : f32 to vector<2x600xf32>
      %c0_21 = arith.constant 0 : index
      %c0_22 = arith.constant 0 : index
      %c0_23 = arith.constant 0 : index
      %25 = vector.load %arg7[%c0_21, %c0_22, %c0_23] : memref<1x2x600xf32, #tpu.memory_space<vmem>>, vector<1x2x600xf32>
      %26 = vector.shape_cast %25 : vector<1x2x600xf32> to vector<2x600xf32>
      %27 = vector.shape_cast %24 : vector<2x600xf32> to vector<1x2x600xf32>
      tpu.vector_store %arg7[%c0_21, %c0_22, %c0_23], %27 {strides = array<i32>} : memref<1x2x600xf32, #tpu.memory_space<vmem>>, vector<1x2x600xf32>,
    } else {
    }
    %c0 = arith.constant 0 : index
    %c0_1 = arith.constant 0 : index
    %3 = vector.load %arg2[%c0, %c0_1] : memref<2x32xf32, #tpu.memory_space<vmem>>, vector<2x32xf32>
    %c0_2 = arith.constant 0 : index
    %c0_3 = arith.constant 0 : index
    %4 = vector.load %arg3[%c0_2, %c0_3] : memref<32x32xf32, #tpu.memory_space<vmem>>, vector<32x32xf32>
    %cst = arith.constant dense<0.000000e+00> : vector<2x32xf32>
    %5 = tpu.matmul %3, %4, %cst {dimension_numbers = #tpu.dot_dimension_numbers<[1], [0], [0], [1], [0, 0, 1, 1], [], []>} : vector<2x32xf32>, vector<32x32xf32>, vector<2x32xf32> -> vector<2x32xf32>
    %c0_4 = arith.constant 0 : index
    %c0_5 = arith.constant 0 : index
    %6 = vector.load %arg4[%c0_4, %c0_5] : memref<1x32xf32, #tpu.memory_space<vmem>>, vector<1x32xf32>
    %7 = vector.broadcast %6 : vector<1x32xf32> to vector<2x32xf32>
    %8 = arith.addf %5, %7 : vector<2x32xf32>
    %c0_6 = arith.constant 0 : index
    %c0_7 = arith.constant 0 : index
    %9 = vector.load %arg5[%c0_6, %c0_7] : memref<32x2560xf32, #tpu.memory_space<vmem>>, vector<32x2560xf32>
    %cst_8 = arith.constant dense<0.000000e+00> : vector<2x2560xf32>
    %10 = tpu.matmul %8, %9, %cst_8 {dimension_numbers = #tpu.dot_dimension_numbers<[1], [0], [0], [1], [0, 0, 1, 1], [], []>} : vector<2x32xf32>, vector<32x2560xf32>, vector<2x2560xf32> -> vector<2x2560xf32>
    %cst_9 = arith.constant 0.000000e+00 : f32
    %11 = vector.broadcast %cst_9 : f32 to vector<2x2560xf32>
    %12 = arith.cmpf ogt, %10, %11 : vector<2x2560xf32>
    %cst_10 = arith.constant 0.00999999977 : f32
    %13 = vector.broadcast %cst_10 : f32 to vector<2x2560xf32>
    %14 = arith.mulf %13, %10 : vector<2x2560xf32>
    %15 = arith.select %12, %10, %14 : vector<2x2560xi1>, vector<2x2560xf32>
    %c0_11 = arith.constant 0 : index
    %c0_12 = arith.constant 0 : index
    %c0_13 = arith.constant 0 : index
    %16 = vector.load %arg7[%c0_11, %c0_12, %c0_13] : memref<1x2x600xf32, #tpu.memory_space<vmem>>, vector<1x2x600xf32>
    %17 = vector.shape_cast %16 : vector<1x2x600xf32> to vector<2x600xf32>
    %c0_14 = arith.constant 0 : index
    %c0_15 = arith.constant 0 : index
    %18 = vector.load %arg6[%c0_14, %c0_15] : memref<2560x600xf32, #tpu.memory_space<vmem>>, vector<2560x600xf32>
    %cst_16 = arith.constant dense<0.000000e+00> : vector<2x600xf32>
    %19 = tpu.matmul %15, %18, %cst_16 {dimension_numbers = #tpu.dot_dimension_numbers<[1], [0], [0], [1], [0, 0, 1, 1], [], []>} : vector<2x2560xf32>, vector<2560x600xf32>, vector<2x600xf32> -> vector<2x600xf32>
    %20 = arith.addf %17, %19 : vector<2x600xf32>
    %c0_17 = arith.constant 0 : index
    %c0_18 = arith.constant 0 : index
    %c0_19 = arith.constant 0 : index
    %21 = vector.load %arg7[%c0_17, %c0_18, %c0_19] : memref<1x2x600xf32, #tpu.memory_space<vmem>>, vector<1x2x600xf32>
    %22 = vector.shape_cast %21 : vector<1x2x600xf32> to vector<2x600xf32>
    %23 = vector.shape_cast %20 : vector<2x600xf32> to vector<1x2x600xf32>
    tpu.vector_store %arg7[%c0_17, %c0_18, %c0_19], %23 {strides = array<i32>} : memref<1x2x600xf32, #tpu.memory_space<vmem>>, vector<1x2x600xf32>,
    return
  }
  func.func @transform_0(%arg0: i32, %arg1: i32) -> (i32, i32) {
    %c0_i32 = arith.constant 0 : i32
    %c0_i32_0 = arith.constant 0 : i32
    %c0_i32_1 = arith.constant 0 : i32
    return %c0_i32, %c0_i32_0 : i32, i32
  }
  func.func @transform_1(%arg0: i32, %arg1: i32) -> (i32, i32) {
    %c0_i32 = arith.constant 0 : i32
    %c0_i32_0 = arith.constant 0 : i32
    %c0_i32_1 = arith.constant 0 : i32
    return %c0_i32, %c0_i32_0 : i32, i32
  }
  func.func @transform_2(%arg0: i32, %arg1: i32) -> (i32, i32) {
    %c0_i32 = arith.constant 0 : i32
    %c0_i32_0 = arith.constant 0 : i32
    %c0_i32_1 = arith.constant 0 : i32
    return %c0_i32, %c0_i32_0 : i32, i32
  }
  func.func @transform_3(%arg0: i32, %arg1: i32) -> (i32, i32) {
    %c2_i32 = arith.constant 2 : i32
    %0 = arith.muli %arg0, %c2_i32 : i32
    %1 = arith.addi %0, %arg1 : i32
    %c0_i32 = arith.constant 0 : i32
    %c0_i32_0 = arith.constant 0 : i32
    return %c0_i32, %1 : i32, i32
  }
  func.func @transform_4(%arg0: i32, %arg1: i32) -> (i32, i32) {
    %c2_i32 = arith.constant 2 : i32
    %0 = arith.muli %arg0, %c2_i32 : i32
    %1 = arith.addi %0, %arg1 : i32
    %c0_i32 = arith.constant 0 : i32
    %c0_i32_0 = arith.constant 0 : i32
    return %1, %c0_i32 : i32, i32
  }
  func.func @transform_5(%arg0: i32, %arg1: i32) -> (i32, i32, i32) {
    %c0_i32 = arith.constant 0 : i32
    %c0_i32_0 = arith.constant 0 : i32
    %c0_i32_1 = arith.constant 0 : i32
    return %arg0, %c0_i32, %c0_i32_0 : i32, i32, i32
  }
}

</mosaic_0001>

<bundles_post_ra>
// kernel: metric_model_pallas.1
= control target key start
LH: loop header
LB: loop body
LE: loop exit
PB: predicated region body
PF: predicated region fallthrough
CT: control target
= control target key end

     0   :  { %s7527_s18 = smov 0   ;;  %s7529_s19 = smov 0   ;;  %s9731_s0 = inlined_call_operand.vmem [shape: f32[2,32], index: 0, kind: input, shape index: {}]   ;;  %s9732_s1 = inlined_call_operand.vmem [shape: f32[32,32], index: 1, kind: input, shape index: {}]   ;;  %s9733_s2 = inlined_call_operand.vmem [shape: f32[1,32], index: 2, kind: input, shape index: {}]   ;;  %s9734_s3 = inlined_call_operand.vmem [shape: f32[32,10240], index: 3, kind: input, shape index: {}]   ;;  %s9735_s4 = inlined_call_operand.vmem [shape: f32[10240,600], index: 4, kind: input, shape index: {}]   ;;  %s9736_s5 = inlined_call_operand.vmem [shape: f32[2,2,600], index: 5, kind: output, shape index: {}]  }
   0x1   :  { %s7531_s20 = smov 0   ;;  %s7533_s21 = smov 0  }
   0x2   :  { %s7535_s22 = smov 0   ;;  %s7537_s23 = smov 0  }
   0x3   :  { %s7539_s24 = smov 0  }
   0x4 LB: > { %s24_s25 = sadd.s32 1, %s7482_s22  ;;  %s27_s26 = sadd.s32 1, %s7486_s23  ;;  %s7490_s24 = sphi %s7539_s24, %s15_s24   ;;  %s7486_s23 = sphi %s7537_s23, %s9742_s23   ;;  %s7482_s22 = sphi %s7535_s22, %s9741_s22   ;;  %s7478_s21 = sphi %s7533_s21, %s9740_s21   ;;  %s7474_s20 = sphi %s7531_s20, %s9739_s20   ;;  %s7470_s19 = sphi %s7529_s19, %s9738_s19   ;;  %s7466_s18 = sphi %s7527_s18, %s9737_s18  }
   0x5   : > { %p25_p0 = scmp.ge.s32.totalorder %s24_s25, 2  ;;  %p108_p1 = scmp.ne.s32.totalorder %s7470_s19, %s7466_s18 }
   0x6   : > { %p109_p2 = scmp.eq.s32.totalorder %s7490_s24, 0  ;;  %s5255_s27 = sshll.u32 %s7486_s23, 1 }
   0x7   : > { %s9744_s25 = smov (%p25_p0, %s24_s25), 0  ;;  %s9746_s26 = smov (!%p25_p0, %s27_s26), %s7486_s23 }
   0x8   : > { %p29_p3 = scmp.ge.s32.totalorder %s9746_s26, 2  ;;  %p110_p4 = por %p109_p2, %p108_p1 }
   0x9   : > { %s95_s28 = sadd.s32 %s7482_s22, %s5255_s27  ;;  %s101_s7 = sadd.s32 1, %s7470_s19 }
   0xa   : > { %s9748_s26 = smov (%p29_p3, %s9746_s26), 0  ;;  %p5260_p6 = scmp.ge.s32.totalorder %s7490_s24, 4 }
   0xb   : > { %s5256_s29 = sshll.u32 %s9748_s26, 1 }
   0xc   : > { %s97_s30 = sadd.s32 %s5256_s29, %s9744_s25  ;;  %199 = sbr.rel (%p5260_p6) target bundleno = 64 (0x40), region = 28 }
   0xd   : > { %s98_s6 = ssub.s32 %s95_s28, %s97_s30 }
   0xe   : > { %p99_p5 = scmp.eq.s32.totalorder %s98_s6, 0 }
  0x10   : > { %s7578_s8 = scalar_select %p99_p5, %s7470_s19, %s101_s7  }
  0x13   : > { %202 = sbr.rel (!%p110_p4) target bundleno = 64 (0x40), region = 32  ;;  %s204_s9 = sand.u32 (%p110_p4), 1, %s7470_s19  }
  0x14   : > { %s5282_s10 = smul.u32 (%p110_p4), 160, %s95_s28 }
  0x15   : > { %s7371_s11 = smul.u32 (%p110_p4), 640, %s204_s9 }
  0x16   : > { %s7585_s14 = scalar_lea.vmem (%p110_p4), %s9734_s3, %s5282_s10 }
  0x17   : > { %v224_v0 = vld [vmem:[%s7585_s14] sm:$0xff] (%p110_p4)  ;;  %v226_v1 = vld [vmem:[%s7585_s14 + $0x8] sm:$0xff] (%p110_p4)  ;;  %v228_v2 = vld [vmem:[%s7585_s14 + $0x10] sm:$0xff] (%p110_p4)  ;;  %s7590_s15 = scalar_lea.vmem (%p110_p4), [#allocation2], %s7371_s11 }
  0x18   : > { %225 = vst [vmem:[%s7590_s15] sm:$0xff] (%p110_p4), %v224_v0  ;;  %227 = vst [vmem:[%s7590_s15 + $0x8] sm:$0xff] (%p110_p4), %v226_v1  ;;  %v230_v3 = vld [vmem:[%s7585_s14 + $0x18] sm:$0xff] (%p110_p4)  ;;  %v232_v4 = vld [vmem:[%s7585_s14 + $0x20] sm:$0xff] (%p110_p4) }
  0x19   : > { %229 = vst [vmem:[%s7590_s15 + $0x10] sm:$0xff] (%p110_p4), %v228_v2  ;;  %v234_v5 = vld [vmem:[%s7585_s14 + $0x28] sm:$0xff] (%p110_p4)  ;;  %231 = vst [vmem:[%s7590_s15 + $0x18] sm:$0xff] (%p110_p4), %v230_v3  ;;  %v236_v6 = vld [vmem:[%s7585_s14 + $0x30] sm:$0xff] (%p110_p4) }
  0x1a   : > { %233 = vst [vmem:[%s7590_s15 + $0x20] sm:$0xff] %v232_v4  ;;  %235 = vst [vmem:[%s7590_s15 + $0x28] sm:$0xff] %v234_v5  ;;  %v238_v7 = vld [vmem:[%s7585_s14 + $0x38] sm:$0xff]  ;;  %v240_v8 = vld [vmem:[%s7585_s14 + $0x40] sm:$0xff] }
  0x1b   : > { %237 = vst [vmem:[%s7590_s15 + $0x30] sm:$0xff] %v236_v6  ;;  %239 = vst [vmem:[%s7590_s15 + $0x38] sm:$0xff] %v238_v7  ;;  %v242_v9 = vld [vmem:[%s7585_s14 + $0x48] sm:$0xff]  ;;  %v244_v10 = vld [vmem:[%s7585_s14 + $0x50] sm:$0xff] }
  0x1c   : > { %241 = vst [vmem:[%s7590_s15 + $0x40] sm:$0xff] %v240_v8  ;;  %v246_v11 = vld [vmem:[%s7585_s14 + $0x58] sm:$0xff]  ;;  %243 = vst [vmem:[%s7590_s15 + $0x48] sm:$0xff] %v242_v9  ;;  %v248_v12 = vld [vmem:[%s7585_s14 + $0x60] sm:$0xff] }
  0x1d   : > { %245 = vst [vmem:[%s7590_s15 + $0x50] sm:$0xff] %v244_v10  ;;  %247 = vst [vmem:[%s7590_s15 + $0x58] sm:$0xff] %v246_v11  ;;  %v250_v13 = vld [vmem:[%s7585_s14 + $0x68] sm:$0xff]  ;;  %v252_v14 = vld [vmem:[%s7585_s14 + $0x70] sm:$0xff] }
  0x1e   : > { %249 = vst [vmem:[%s7590_s15 + $0x60] sm:$0xff] %v248_v12  ;;  %251 = vst [vmem:[%s7590_s15 + $0x68] sm:$0xff] %v250_v13  ;;  %v254_v15 = vld [vmem:[%s7585_s14 + $0x78] sm:$0xff]  ;;  %v256_v16 = vld [vmem:[%s7585_s14 + $0x80] sm:$0xff] }
  0x1f   : > { %253 = vst [vmem:[%s7590_s15 + $0x70] sm:$0xff] %v252_v14  ;;  %v258_v17 = vld [vmem:[%s7585_s14 + $0x88] sm:$0xff]  ;;  %255 = vst [vmem:[%s7590_s15 + $0x78] sm:$0xff] %v254_v15  ;;  %v260_v18 = vld [vmem:[%s7585_s14 + $0x90] sm:$0xff] }
  0x20   : > { %257 = vst [vmem:[%s7590_s15 + $0x80] sm:$0xff] %v256_v16  ;;  %259 = vst [vmem:[%s7590_s15 + $0x88] sm:$0xff] %v258_v17  ;;  %v262_v19 = vld [vmem:[%s7585_s14 + $0x98] sm:$0xff]  ;;  %v264_v20 = vld [vmem:[%s7585_s14 + $0x280] sm:$0xff] }
  0x21   : > { %261 = vst [vmem:[%s7590_s15 + $0x90] sm:$0xff] %v260_v18  ;;  %263 = vst [vmem:[%s7590_s15 + $0x98] sm:$0xff] %v262_v19  ;;  %v266_v21 = vld [vmem:[%s7585_s14 + $0x288] sm:$0xff]  ;;  %v268_v22 = vld [vmem:[%s7585_s14 + $0x290] sm:$0xff] }
  0x22   : > { %265 = vst [vmem:[%s7590_s15 + $0xa0] sm:$0xff] %v264_v20  ;;  %v270_v23 = vld [vmem:[%s7585_s14 + $0x298] sm:$0xff]  ;;  %267 = vst [vmem:[%s7590_s15 + $0xa8] sm:$0xff] %v266_v21  ;;  %v272_v24 = vld [vmem:[%s7585_s14 + $0x2a0] sm:$0xff] }
  0x23   : > { %269 = vst [vmem:[%s7590_s15 + $0xb0] sm:$0xff] %v268_v22  ;;  %271 = vst [vmem:[%s7590_s15 + $0xb8] sm:$0xff] %v270_v23  ;;  %v274_v25 = vld [vmem:[%s7585_s14 + $0x2a8] sm:$0xff]  ;;  %v276_v26 = vld [vmem:[%s7585_s14 + $0x2b0] sm:$0xff] }
  0x24   : > { %273 = vst [vmem:[%s7590_s15 + $0xc0] sm:$0xff] %v272_v24  ;;  %275 = vst [vmem:[%s7590_s15 + $0xc8] sm:$0xff] %v274_v25  ;;  %v278_v27 = vld [vmem:[%s7585_s14 + $0x2b8] sm:$0xff]  ;;  %v280_v28 = vld [vmem:[%s7585_s14 + $0x2c0] sm:$0xff] }
  0x25   : > { %277 = vst [vmem:[%s7590_s15 + $0xd0] sm:$0xff] %v276_v26  ;;  %v282_v29 = vld [vmem:[%s7585_s14 + $0x2c8] sm:$0xff]  ;;  %279 = vst [vmem:[%s7590_s15 + $0xd8] sm:$0xff] %v278_v27  ;;  %v284_v30 = vld [vmem:[%s7585_s14 + $0x2d0] sm:$0xff] }
  0x26   : > { %281 = vst [vmem:[%s7590_s15 + $0xe0] sm:$0xff] %v280_v28  ;;  %283 = vst [vmem:[%s7590_s15 + $0xe8] sm:$0xff] %v282_v29  ;;  %v286_v31 = vld [vmem:[%s7585_s14 + $0x2d8] sm:$0xff]  ;;  %v288_v32 = vld [vmem:[%s7585_s14 + $0x2e0] sm:$0xff] }
  0x27   : > { %285 = vst [vmem:[%s7590_s15 + $0xf0] sm:$0xff] %v284_v30  ;;  %287 = vst [vmem:[%s7590_s15 + $0xf8] sm:$0xff] %v286_v31  ;;  %v290_v33 = vld [vmem:[%s7585_s14 + $0x2e8] sm:$0xff]  ;;  %v292_v34 = vld [vmem:[%s7585_s14 + $0x2f0] sm:$0xff] }
  0x28   : > { %289 = vst [vmem:[%s7590_s15 + $0x100] sm:$0xff] %v288_v32  ;;  %v294_v35 = vld [vmem:[%s7585_s14 + $0x2f8] sm:$0xff]  ;;  %291 = vst [vmem:[%s7590_s15 + $0x108] sm:$0xff] %v290_v33  ;;  %v296_v36 = vld [vmem:[%s7585_s14 + $0x300] sm:$0xff] }
  0x29   : > { %293 = vst [vmem:[%s7590_s15 + $0x110] sm:$0xff] %v292_v34  ;;  %295 = vst [vmem:[%s7590_s15 + $0x118] sm:$0xff] %v294_v35  ;;  %v298_v37 = vld [vmem:[%s7585_s14 + $0x308] sm:$0xff]  ;;  %v300_v38 = vld [vmem:[%s7585_s14 + $0x310] sm:$0xff] }
  0x2a   : > { %297 = vst [vmem:[%s7590_s15 + $0x120] sm:$0xff] %v296_v36  ;;  %299 = vst [vmem:[%s7590_s15 + $0x128] sm:$0xff] %v298_v37  ;;  %v302_v39 = vld [vmem:[%s7585_s14 + $0x318] sm:$0xff]  ;;  %v304_v40 = vld [vmem:[%s7585_s14 + $0x500] sm:$0xff] }
  0x2b   : > { %301 = vst [vmem:[%s7590_s15 + $0x130] sm:$0xff] %v300_v38  ;;  %v306_v41 = vld [vmem:[%s7585_s14 + $0x508] sm:$0xff]  ;;  %303 = vst [vmem:[%s7590_s15 + $0x138] sm:$0xff] %v302_v39  ;;  %v308_v42 = vld [vmem:[%s7585_s14 + $0x510] sm:$0xff] }
  0x2c   : > { %305 = vst [vmem:[%s7590_s15 + $0x140] sm:$0xff] %v304_v40  ;;  %307 = vst [vmem:[%s7590_s15 + $0x148] sm:$0xff] %v306_v41  ;;  %v310_v43 = vld [vmem:[%s7585_s14 + $0x518] sm:$0xff]  ;;  %v312_v44 = vld [vmem:[%s7585_s14 + $0x520] sm:$0xff] }
  0x2d   : > { %309 = vst [vmem:[%s7590_s15 + $0x150] sm:$0xff] %v308_v42  ;;  %311 = vst [vmem:[%s7590_s15 + $0x158] sm:$0xff] %v310_v43  ;;  %v314_v45 = vld [vmem:[%s7585_s14 + $0x528] sm:$0xff]  ;;  %v316_v46 = vld [vmem:[%s7585_s14 + $0x530] sm:$0xff] }
  0x2e   : > { %313 = vst [vmem:[%s7590_s15 + $0x160] sm:$0xff] %v312_v44  ;;  %v318_v47 = vld [vmem:[%s7585_s14 + $0x538] sm:$0xff]  ;;  %315 = vst [vmem:[%s7590_s15 + $0x168] sm:$0xff] %v314_v45  ;;  %v320_v48 = vld [vmem:[%s7585_s14 + $0x540] sm:$0xff] }
  0x2f   : > { %317 = vst [vmem:[%s7590_s15 + $0x170] sm:$0xff] %v316_v46  ;;  %319 = vst [vmem:[%s7590_s15 + $0x178] sm:$0xff] %v318_v47  ;;  %v322_v49 = vld [vmem:[%s7585_s14 + $0x548] sm:$0xff]  ;;  %v324_v50 = vld [vmem:[%s7585_s14 + $0x550] sm:$0xff] }
  0x30   : > { %321 = vst [vmem:[%s7590_s15 + $0x180] sm:$0xff] %v320_v48  ;;  %323 = vst [vmem:[%s7590_s15 + $0x188] sm:$0xff] %v322_v49  ;;  %v326_v51 = vld [vmem:[%s7585_s14 + $0x558] sm:$0xff]  ;;  %v328_v52 = vld [vmem:[%s7585_s14 + $0x560] sm:$0xff] }
  0x31   : > { %325 = vst [vmem:[%s7590_s15 + $0x190] sm:$0xff] %v324_v50  ;;  %v330_v53 = vld [vmem:[%s7585_s14 + $0x568] sm:$0xff]  ;;  %327 = vst [vmem:[%s7590_s15 + $0x198] sm:$0xff] %v326_v51  ;;  %v332_v54 = vld [vmem:[%s7585_s14 + $0x570] sm:$0xff] }
  0x32   : > { %329 = vst [vmem:[%s7590_s15 + $0x1a0] sm:$0xff] %v328_v52  ;;  %331 = vst [vmem:[%s7590_s15 + $0x1a8] sm:$0xff] %v330_v53  ;;  %v334_v55 = vld [vmem:[%s7585_s14 + $0x578] sm:$0xff]  ;;  %v336_v56 = vld [vmem:[%s7585_s14 + $0x580] sm:$0xff] }
  0x33   : > { %333 = vst [vmem:[%s7590_s15 + $0x1b0] sm:$0xff] %v332_v54  ;;  %335 = vst [vmem:[%s7590_s15 + $0x1b8] sm:$0xff] %v334_v55  ;;  %v338_v57 = vld [vmem:[%s7585_s14 + $0x588] sm:$0xff]  ;;  %v340_v58 = vld [vmem:[%s7585_s14 + $0x590] sm:$0xff] }
  0x34   : > { %337 = vst [vmem:[%s7590_s15 + $0x1c0] sm:$0xff] %v336_v56  ;;  %v342_v59 = vld [vmem:[%s7585_s14 + $0x598] sm:$0xff]  ;;  %339 = vst [vmem:[%s7590_s15 + $0x1c8] sm:$0xff] %v338_v57  ;;  %v344_v60 = vld [vmem:[%s7585_s14 + $0x780] sm:$0xff] }
  0x35   : > { %341 = vst [vmem:[%s7590_s15 + $0x1d0] sm:$0xff] %v340_v58  ;;  %343 = vst [vmem:[%s7590_s15 + $0x1d8] sm:$0xff] %v342_v59  ;;  %v346_v61 = vld [vmem:[%s7585_s14 + $0x788] sm:$0xff]  ;;  %v348_v62 = vld [vmem:[%s7585_s14 + $0x790] sm:$0xff] }
  0x36   : > { %345 = vst [vmem:[%s7590_s15 + $0x1e0] sm:$0xff] %v344_v60  ;;  %347 = vst [vmem:[%s7590_s15 + $0x1e8] sm:$0xff] %v346_v61  ;;  %v350_v63 = vld [vmem:[%s7585_s14 + $0x798] sm:$0xff]  ;;  %v352_v0 = vld [vmem:[%s7585_s14 + $0x7a0] sm:$0xff] }
  0x37   : > { %349 = vst [vmem:[%s7590_s15 + $0x1f0] sm:$0xff] %v348_v62  ;;  %v354_v1 = vld [vmem:[%s7585_s14 + $0x7a8] sm:$0xff]  ;;  %351 = vst [vmem:[%s7590_s15 + $0x1f8] sm:$0xff] %v350_v63  ;;  %v356_v2 = vld [vmem:[%s7585_s14 + $0x7b0] sm:$0xff] }
  0x38   : > { %353 = vst [vmem:[%s7590_s15 + $0x200] sm:$0xff] %v352_v0  ;;  %355 = vst [vmem:[%s7590_s15 + $0x208] sm:$0xff] %v354_v1  ;;  %v358_v3 = vld [vmem:[%s7585_s14 + $0x7b8] sm:$0xff]  ;;  %v360_v4 = vld [vmem:[%s7585_s14 + $0x7c0] sm:$0xff] }
  0x39   : > { %357 = vst [vmem:[%s7590_s15 + $0x210] sm:$0xff] %v356_v2  ;;  %359 = vst [vmem:[%s7590_s15 + $0x218] sm:$0xff] %v358_v3  ;;  %v362_v5 = vld [vmem:[%s7585_s14 + $0x7c8] sm:$0xff]  ;;  %v364_v6 = vld [vmem:[%s7585_s14 + $0x7d0] sm:$0xff] }
  0x3a   : > { %361 = vst [vmem:[%s7590_s15 + $0x220] sm:$0xff] %v360_v4  ;;  %v366_v7 = vld [vmem:[%s7585_s14 + $0x7d8] sm:$0xff]  ;;  %363 = vst [vmem:[%s7590_s15 + $0x228] sm:$0xff] %v362_v5  ;;  %v368_v8 = vld [vmem:[%s7585_s14 + $0x7e0] sm:$0xff] }
  0x3b   : > { %365 = vst [vmem:[%s7590_s15 + $0x230] sm:$0xff] %v364_v6  ;;  %367 = vst [vmem:[%s7590_s15 + $0x238] sm:$0xff] %v366_v7  ;;  %v370_v9 = vld [vmem:[%s7585_s14 + $0x7e8] sm:$0xff]  ;;  %v372_v10 = vld [vmem:[%s7585_s14 + $0x7f0] sm:$0xff] }
  0x3c   : > { %369 = vst [vmem:[%s7590_s15 + $0x240] sm:$0xff] %v368_v8  ;;  %371 = vst [vmem:[%s7590_s15 + $0x248] sm:$0xff] %v370_v9  ;;  %v374_v11 = vld [vmem:[%s7585_s14 + $0x7f8] sm:$0xff]  ;;  %v376_v12 = vld [vmem:[%s7585_s14 + $0x800] sm:$0xff] }
  0x3d   : > { %373 = vst [vmem:[%s7590_s15 + $0x250] sm:$0xff] %v372_v10  ;;  %v378_v13 = vld [vmem:[%s7585_s14 + $0x808] sm:$0xff]  ;;  %375 = vst [vmem:[%s7590_s15 + $0x258] sm:$0xff] %v374_v11  ;;  %v380_v14 = vld [vmem:[%s7585_s14 + $0x810] sm:$0xff] }
  0x3e   : > { %377 = vst [vmem:[%s7590_s15 + $0x260] sm:$0xff] %v376_v12  ;;  %379 = vst [vmem:[%s7590_s15 + $0x268] sm:$0xff] %v378_v13  ;;  %v382_v15 = vld [vmem:[%s7585_s14 + $0x818] sm:$0xff] }
  0x3f   : > { %381 = vst [vmem:[%s7590_s15 + $0x270] sm:$0xff] %v380_v14  ;;  %383 = vst [vmem:[%s7590_s15 + $0x278] sm:$0xff] %v382_v15 }
  0x40 PF: > { %p5263_p7 = scmp.ge.s32.totalorder %s7490_s24, 1  ;;  %p402_p8 = scmp.lt.s32.totalorder %s7490_s24, 5 }
  0x42   : > { %p403_p9 = pnand %p5263_p7, %p402_p8 }
  0x43   : > { %s409_s16 = sand.u32 (!%p403_p9), 1, %s7466_s18   ;;  %s5264_s17 = sshll.u32 (!%p403_p9), %s7478_s21, 1 }
  0x44   : > { %406 = sbr.rel (%p403_p9) target bundleno = 1486 (0x5ce), region = 59  ;;  %s448_s28 = sadd.s32 (!%p403_p9), %s7474_s20, %s5264_s17 }
  0x45   : > { %s7372_s27 = smul.u32 (!%p403_p9), 640, %s409_s16  ;;  %p458_p10 = scmp.lt.s32.totalorder (!%p403_p9), %s7478_s21, 1 }
  0x46   : > { %s449_s29 = smul.u32 (!%p403_p9), 320, %s448_s28  ;;  %p5267_p12 = scmp.ne.s32.totalorder (!%p403_p9), %s7474_s20, 0 }
  0x47   : > { %s7766_s18 = scalar_lea.vmem (!%p403_p9), [#allocation2], %s7372_s27 }
  0x48   : > { %p450_p11 = scmp.lt.s32.totalorder (!%p403_p9), %s449_s29, 1279 }
  0x4b   : > { %s9750_s21 = smov (!%p458_p10, %s7478_s21), 1  ;;  %s9752_s29 = smov (!%p450_p11, %s449_s29), 1279 }
  0x4c   : > { %s7374_s30 = smul.u32 10, %s9750_s21  ;;  %vm468_vm0 = vcmask (!%p5267_p12), 713728   ;;  %v7492_v16 = vmov (!%p5267_p12), 0.0  }
  0x4d   : > { %s7373_s6 = smul.u32 40, %s9752_s29 }
  0x4e   : > { %s7759_s10 = scalar_lea.vmem %s9736_s5, %s7374_s30  ;;  %466 = sbr.rel (%p5267_p12) target bundleno = 85 (0x55), region = 67 }
  0x4f   : > { %s7764_s13 = scalar_lea.vmem %s9735_s4, %s7373_s6  ;;  %467 = vst [vmem:[%s7759_s10] sm:$0xff] (!%p5267_p12), %v7492_v16  ;;  %469 = vst.msk [vmem:[%s7759_s10 + $0x8] sm:$0x3] (!%p5267_p12), %vm468_vm0, %v7492_v16 }
  0x55 PF: > { %v471_v17 = vld [vmem:[%s9732_s1] sm:$0xff]  ;;  %v472_v18 = vld [vmem:[%s9732_s1 + $0x8] sm:$0xff]  ;;  %v473_v19 = vld [vmem:[%s9732_s1 + $0x10] sm:$0xff]  ;;  %v7493_v20 = vmov 0.0|0.0   ;;  %vm7494_vm1 = vmmov 0   ;;  %v7495_v23 = vmov 0.0  }
  0x56   : > { %5649 = vmatprep.subr.bf16.mxu0 %v7493_v20  ;;  %v5650_v21 = vpack.c.bf16 %v472_v18, %v471_v17  ;;  %v474_v22 = vld [vmem:[%s9732_s1 + $0x18] sm:$0xff]  ;;  %5646 = vmatprep.mubr.msk.f32.mxu0 %vm7494_vm1, %v7495_v23  ;;  %v557_v24 = vld [vmem:[%s7766_s18 + $0x8] sm:$0xff]  ;;  %v556_v30 = vld [vmem:[%s7766_s18] sm:$0xff]  ;;  %vm482_vm2 = vcmask 261120  }
  0x57   : > { %v577_v25 = vld [vmem:[%s7766_s18 + $0xa8] sm:$0xff]  ;;  %v559_v26 = vld [vmem:[%s7766_s18 + $0x18] sm:$0xff]  ;;  %703 = vmatprep.mubr.f32.mxu1 %v7495_v23  ;;  %v5653_v28 = vpack.c.bf16 %v474_v22, %v473_v19  ;;  %v576_v31 = vld [vmem:[%s7766_s18 + $0xa0] sm:$0xff] }
  0x58   : > { %v579_v27 = vld [vmem:[%s7766_s18 + $0xb8] sm:$0xff]  ;;  %5651 = vmatpush3.bf16.msra.mxu0 %v5650_v21  ;;  %v5655_v29 = vpack.c.bf16 %v577_v25, %v557_v24  ;;  %v558_v32 = vld [vmem:[%s7766_s18 + $0x10] sm:$0xff]  ;;  %v5657_v34 = vpack.c.bf16 %v576_v31, %v556_v30  ;;  %v597_v36 = vld [vmem:[%s7766_s18 + $0x148] sm:$0xff] }
  0x59   : > { %5652 = vmatprep.subr.bf16.mxu0 %v7493_v20  ;;  %v5663_v33 = vpack.c.bf16 %v579_v27, %v559_v26  ;;  %v578_v35 = vld [vmem:[%s7766_s18 + $0xb0] sm:$0xff]  ;;  %v617_v37 = vld [vmem:[%s7766_s18 + $0x1e8] sm:$0xff]  ;;  %v599_v39 = vld [vmem:[%s7766_s18 + $0x158] sm:$0xff] }
  0x5a   : > { %5656 = vmatprep.subr.bf16.mxu1 %v5655_v29  ;;  %v5659_v38 = vpack.c.bf16 %v617_v37, %v597_v36  ;;  %v619_v40 = vld [vmem:[%s7766_s18 + $0x1f8] sm:$0xff]  ;;  %v596_v41 = vld [vmem:[%s7766_s18 + $0x140] sm:$0xff]  ;;  %v5665_v44 = vpack.c.bf16 %v578_v35, %v558_v32  ;;  %v598_v47 = vld [vmem:[%s7766_s18 + $0x150] sm:$0xff] }
  0x5b   : > { %5658 = vmatpush1.bf16.msra.mxu1 %v5657_v34  ;;  %v616_v42 = vld [vmem:[%s7766_s18 + $0x1e0] sm:$0xff]  ;;  %v5667_v46 = vpack.c.bf16 %v619_v40, %v599_v39  ;;  %v618_v48 = vld [vmem:[%s7766_s18 + $0x1f0] sm:$0xff]  ;;  %v561_v50 = vld [vmem:[%s7766_s18 + $0x28] sm:$0xff] }
  0x5c   : > { %5654 = vmatpush3.bf16.msra.mxu0 %v5653_v28  ;;  %v470_v43 = vld [vmem:[%s9731_s0] sm:$0x3]  ;;  %5660 = vmatprep.subr.bf16.mxu1 %v5659_v38  ;;  %v5661_v45 = vpack.c.bf16 %v616_v42, %v596_v41  ;;  %v5669_v49 = vpack.c.bf16 %v618_v48, %v598_v47  ;;  %v581_v51 = vld [vmem:[%s7766_s18 + $0xc8] sm:$0xff]  ;;  %v563_v52 = vld [vmem:[%s7766_s18 + $0x38] sm:$0xff] }
  0x5d   : > { %5664 = vmatprep.subr.bf16.mxu0 %v5663_v33  ;;  %v5671_v53 = vpack.c.bf16 %v581_v51, %v561_v50  ;;  %v583_v54 = vld [vmem:[%s7766_s18 + $0xd8] sm:$0xff]  ;;  %v5268_v56 = vld [vmem:[%s9733_s2] ss:$0 sm:$0xff]  ;;  %v562_v59 = vld [vmem:[%s7766_s18 + $0x30] sm:$0xff] }
  0x5e   : > { %v5679_v55 = vpack.c.bf16 %v583_v54, %v563_v52  ;;  %v560_v57 = vld [vmem:[%s7766_s18 + $0x20] sm:$0xff]  ;;  %v582_v60 = vld [vmem:[%s7766_s18 + $0xd0] sm:$0xff]  ;;  %v601_v61 = vld [vmem:[%s7766_s18 + $0x168] sm:$0xff] }
  0x5f   : > { %5647 = vmatmul.mubr.msk.f32.vlgmr.msra.gmra.mrb[0].mxu0 %vm482_vm2, %v470_v43  ;;  %5662 = vmatpush1.bf16.msra.mxu1 %v5661_v45  ;;  %v580_v58 = vld [vmem:[%s7766_s18 + $0xc0] sm:$0xff]  ;;  %v621_v62 = vld [vmem:[%s7766_s18 + $0x208] sm:$0xff]  ;;  %v603_v63 = vld [vmem:[%s7766_s18 + $0x178] sm:$0xff]  ;;  %v5681_v3 = vpack.c.bf16 %v582_v60, %v562_v59 }
  0x60   : > { %5666 = vmatpush1.bf16.msra.mxu0 %v5665_v44  ;;  %774 = vmatprep.mubr.f32.mxu0 %v7495_v23  ;;  %v623_v0 = vld [vmem:[%s7766_s18 + $0x218] sm:$0xff]  ;;  %v5673_v2 = vpack.c.bf16 %v580_v58, %v560_v57  ;;  %v600_v4 = vld [vmem:[%s7766_s18 + $0x160] sm:$0xff]  ;;  %v5675_v8 = vpack.c.bf16 %v621_v62, %v601_v61  ;;  %v602_v10 = vld [vmem:[%s7766_s18 + $0x170] sm:$0xff] }
  0x61   : > { %5668 = vmatprep.subr.bf16.mxu0 %v5667_v46  ;;  %5672 = vmatprep.subr.bf16.mxu1 %v5671_v53  ;;  %v620_v5 = vld [vmem:[%s7766_s18 + $0x200] sm:$0xff]  ;;  %v5683_v9 = vpack.c.bf16 %v623_v0, %v603_v63  ;;  %v622_v11 = vld [vmem:[%s7766_s18 + $0x210] sm:$0xff]  ;;  %v565_v12 = vld [vmem:[%s7766_s18 + $0x48] sm:$0xff] }
  0x62   : > { %v585_v13 = vld [vmem:[%s7766_s18 + $0xe8] sm:$0xff]  ;;  %v567_v14 = vld [vmem:[%s7766_s18 + $0x58] sm:$0xff]  ;;  %v5677_v16 = vpack.c.bf16 %v620_v5, %v600_v4  ;;  %v5685_v17 = vpack.c.bf16 %v622_v11, %v602_v10  ;;  %v564_v18 = vld [vmem:[%s7766_s18 + $0x40] sm:$0xff] }
  0x63   : > { %v587_v15 = vld [vmem:[%s7766_s18 + $0xf8] sm:$0xff]  ;;  %v584_v19 = vld [vmem:[%s7766_s18 + $0xe0] sm:$0xff]  ;;  %v5687_v20 = vpack.c.bf16 %v585_v13, %v565_v12  ;;  %v566_v22 = vld [vmem:[%s7766_s18 + $0x50] sm:$0xff] }
  0x64   : > { %5670 = vmatpush1.bf16.msra.mxu0 %v5669_v49  ;;  %v5695_v21 = vpack.c.bf16 %v587_v15, %v567_v14  ;;  %v586_v24 = vld [vmem:[%s7766_s18 + $0xf0] sm:$0xff]  ;;  %v605_v25 = vld [vmem:[%s7766_s18 + $0x188] sm:$0xff]  ;;  %v607_v27 = vld [vmem:[%s7766_s18 + $0x198] sm:$0xff]  ;;  %v5689_v29 = vpack.c.bf16 %v584_v19, %v564_v18 }
  0x65   : > { %5680 = vmatprep.subr.bf16.mxu0 %v5679_v55  ;;  %v625_v26 = vld [vmem:[%s7766_s18 + $0x228] sm:$0xff]  ;;  %v627_v28 = vld [vmem:[%s7766_s18 + $0x238] sm:$0xff]  ;;  %v5697_v30 = vpack.c.bf16 %v586_v24, %v566_v22  ;;  %v604_v31 = vld [vmem:[%s7766_s18 + $0x180] sm:$0xff] }
  0x66   : > { %v624_v32 = vld [vmem:[%s7766_s18 + $0x220] sm:$0xff]  ;;  %v5691_v33 = vpack.c.bf16 %v625_v26, %v605_v25  ;;  %v5699_v34 = vpack.c.bf16 %v627_v28, %v607_v27  ;;  %v606_v35 = vld [vmem:[%s7766_s18 + $0x190] sm:$0xff]  ;;  %v569_v37 = vld [vmem:[%s7766_s18 + $0x68] sm:$0xff] }
  0x67   : > { %v626_v36 = vld [vmem:[%s7766_s18 + $0x230] sm:$0xff]  ;;  %v589_v38 = vld [vmem:[%s7766_s18 + $0x108] sm:$0xff]  ;;  %v571_v39 = vld [vmem:[%s7766_s18 + $0x78] sm:$0xff]  ;;  %v5693_v41 = vpack.c.bf16 %v624_v32, %v604_v31 }
  0x68   : > { %v591_v40 = vld [vmem:[%s7766_s18 + $0x118] sm:$0xff]  ;;  %v5701_v42 = vpack.c.bf16 %v626_v36, %v606_v35  ;;  %v568_v43 = vld [vmem:[%s7766_s18 + $0x60] sm:$0xff]  ;;  %v5703_v45 = vpack.c.bf16 %v589_v38, %v569_v37  ;;  %v570_v47 = vld [vmem:[%s7766_s18 + $0x70] sm:$0xff] }
  0x69   : > { %v588_v44 = vld [vmem:[%s7766_s18 + $0x100] sm:$0xff]  ;;  %v5711_v46 = vpack.c.bf16 %v591_v40, %v571_v39  ;;  %v590_v48 = vld [vmem:[%s7766_s18 + $0x110] sm:$0xff]  ;;  %v609_v49 = vld [vmem:[%s7766_s18 + $0x1a8] sm:$0xff] }
  0x6a   : > { %v629_v50 = vld [vmem:[%s7766_s18 + $0x248] sm:$0xff]  ;;  %v611_v51 = vld [vmem:[%s7766_s18 + $0x1b8] sm:$0xff]  ;;  %v5705_v53 = vpack.c.bf16 %v588_v44, %v568_v43  ;;  %v5713_v54 = vpack.c.bf16 %v590_v48, %v570_v47  ;;  %v608_v55 = vld [vmem:[%s7766_s18 + $0x1a0] sm:$0xff] }
  0x6b   : > { %v631_v52 = vld [vmem:[%s7766_s18 + $0x258] sm:$0xff]  ;;  %v5707_v57 = vpack.c.bf16 %v629_v50, %v609_v49  ;;  %v610_v59 = vld [vmem:[%s7766_s18 + $0x1b0] sm:$0xff]  ;;  %v573_v61 = vld [vmem:[%s7766_s18 + $0x88] sm:$0xff] }
  0x6c   : > { %v5715_v58 = vpack.c.bf16 %v631_v52, %v611_v51  ;;  %v630_v60 = vld [vmem:[%s7766_s18 + $0x250] sm:$0xff]  ;;  %v593_v62 = vld [vmem:[%s7766_s18 + $0x128] sm:$0xff]  ;;  %v575_v63 = vld [vmem:[%s7766_s18 + $0x98] sm:$0xff] }
  0x6d   : > { %v595_v0 = vld [vmem:[%s7766_s18 + $0x138] sm:$0xff]  ;;  %v592_v4 = vld [vmem:[%s7766_s18 + $0x120] sm:$0xff]  ;;  %v5719_v5 = vpack.c.bf16 %v593_v62, %v573_v61  ;;  %v613_v10 = vld [vmem:[%s7766_s18 + $0x1c8] sm:$0xff] }
  0x6e   : > { %v633_v11 = vld [vmem:[%s7766_s18 + $0x268] sm:$0xff]  ;;  %v615_v12 = vld [vmem:[%s7766_s18 + $0x1d8] sm:$0xff]  ;;  %v1417_v24 = vld [vmem:[%s7764_s13 + $0x30] sm:$0xff] }
  0x6f   : > { %v635_v13 = vld [vmem:[%s7766_s18 + $0x278] sm:$0xff]  ;;  %v5723_v18 = vpack.c.bf16 %v633_v11, %v613_v10  ;;  %v1412_v22 = vld [vmem:[%s7764_s13 + $0x8] sm:$0xff]  ;;  %v1419_v26 = vld [vmem:[%s7764_s13 + $0x40] sm:$0xff] }
  0x70   : > { %v5731_v19 = vpack.c.bf16 %v635_v13, %v615_v12  ;;  %v1414_v25 = vld [vmem:[%s7764_s13 + $0x18] sm:$0xff]  ;;  %v5735_v31 = vpack.c.bf16 %v1417_v24, %v1412_v22  ;;  %v1427_v36 = vld [vmem:[%s7764_s13 + $0x80] sm:$0xff]  ;;  %v1424_v37 = vld [vmem:[%s7764_s13 + $0x68] sm:$0xff] }
  0x71   : > { %v6375_v32 = vpack.c.bf16 %v1419_v26, %v1414_v25  ;;  %v1422_v35 = vld [vmem:[%s7764_s13 + $0x58] sm:$0xff]  ;;  %v1429_v38 = vld [vmem:[%s7764_s13 + $0x90] sm:$0xff]  ;;  %v1439_v49 = vld [vmem:[%s7764_s13 + $0xe0] sm:$0xff] }
  0x72   : > { %v5739_v43 = vpack.c.bf16 %v1427_v36, %v1422_v35  ;;  %v6379_v44 = vpack.c.bf16 %v1429_v38, %v1424_v37  ;;  %v1437_v47 = vld [vmem:[%s7764_s13 + $0xd0] sm:$0xff]  ;;  %v1434_v48 = vld [vmem:[%s7764_s13 + $0xb8] sm:$0xff]  ;;  %v1431_v52 = vld [vmem:[%s7764_s13 + $0xa0] sm:$0xff] }
  0x73   : > { %v1451_v12 = vld [vmem:[%s7764_s13 + $0x140] sm:$0xff]  ;;  %v1456_v13 = vld [vmem:[%s7764_s13 + $0x168] sm:$0xff]  ;;  %v1461_v25 = vld [vmem:[%s7764_s13 + $0x190] sm:$0xff] }
  0x74   : > { %v5753_v22 = vpack.c.bf16 %v1456_v13, %v1451_v12  ;;  %v1466_v26 = vld [vmem:[%s7764_s13 + $0x1b8] sm:$0xff]  ;;  %v1471_v37 = vld [vmem:[%s7764_s13 + $0x1e0] sm:$0xff]  ;;  %v1476_v38 = vld [vmem:[%s7764_s13 + $0x208] sm:$0xff] }
  0x75   : > { %v5757_v35 = vpack.c.bf16 %v1466_v26, %v1461_v25  ;;  %v1503_v12 = vld [vmem:[%s7764_s13 + $0x2e0] sm:$0xff]  ;;  %v1508_v13 = vld [vmem:[%s7764_s13 + $0x308] sm:$0xff]  ;;  %v1513_v25 = vld [vmem:[%s7764_s13 + $0x330] sm:$0xff] }
  0x76   : > { %v1518_v26 = vld [vmem:[%s7764_s13 + $0x358] sm:$0xff] }
 0x132   : > { %v552_v1 = vpop.f32.mrb[0].mxu0 }
 0x133   : > { %v7823_v6 = vadd.f32 %v5268_v56, %v552_v1  ;;  %v5648_v7 = vpop.f32.mrb[1].mxu0  ;;  %v628_v56 = vld [vmem:[%s7766_s18 + $0x240] sm:$0xff] }
 0x134   : > { %v5709_v1 = vpack.c.bf16 %v628_v56, %v608_v55  ;;  %v5727_v7 = vpack.c.bf16 %v595_v0, %v575_v63  ;;  %v6383_v55 = vpack.c.bf16 %v1439_v49, %v1434_v48  ;;  %v1433_v56 = vld [vmem:[%s7764_s13 + $0xb0] sm:$0xff]  ;;  %v1446_v0 = vld [vmem:[%s7764_s13 + $0x118] sm:$0xff] }
 0x135   : > { %5270 = vmatmul.mubr.msk.f32.vlgmr.msra.gmra.mrb[0].mxu1 %vm482_vm2, %v7823_v6  ;;  %5271 = vmatmul.mubr.msk.f32.vlgmr.msra.gmra.mrb[2].mxu0 %vm482_vm2, %v7823_v6  ;;  %v1441_v63 = vld [vmem:[%s7764_s13 + $0xf0] sm:$0xff]  ;;  %v1486_v49 = vld [vmem:[%s7764_s13 + $0x258] sm:$0xff] }
 0x136   : > { %5674 = vmatpush1.bf16.msra.mxu1 %v5673_v2  ;;  %5682 = vmatpush1.bf16.msra.mxu0 %v5681_v3  ;;  %v5717_v2 = vpack.c.bf16 %v630_v60, %v610_v59  ;;  %v572_v3 = vld [vmem:[%s7766_s18 + $0x80] sm:$0xff]  ;;  %v1444_v59 = vld [vmem:[%s7764_s13 + $0x108] sm:$0xff]  ;;  %v1449_v60 = vld [vmem:[%s7764_s13 + $0x130] sm:$0xff]  ;;  %v5749_v10 = vpack.c.bf16 %v1446_v0, %v1441_v63 }
 0x137   : > { %5676 = vmatprep.subr.bf16.mxu1 %v5675_v8  ;;  %5684 = vmatprep.subr.bf16.mxu0 %v5683_v9  ;;  %v574_v8 = vld [vmem:[%s7766_s18 + $0x90] sm:$0xff]  ;;  %v5721_v14 = vpack.c.bf16 %v592_v4, %v572_v3  ;;  %v1443_v3 = vld [vmem:[%s7764_s13 + $0x100] sm:$0xff]  ;;  %v1448_v4 = vld [vmem:[%s7764_s13 + $0x128] sm:$0xff] }
 0x138   : > { %845 = vmatprep.mubr.f32.mxu1 %v7495_v23  ;;  %916 = vmatprep.mubr.f32.mxu0 %v7495_v23  ;;  %v594_v9 = vld [vmem:[%s7766_s18 + $0x130] sm:$0xff]  ;;  %v6389_v11 = vpack.c.bf16 %v1448_v4, %v1443_v3  ;;  %v1498_v0 = vld [vmem:[%s7764_s13 + $0x2b8] sm:$0xff]  ;;  %v1504_v3 = vld [vmem:[%s7764_s13 + $0x2e8] sm:$0xff] }
 0x139   : > { %v5729_v15 = vpack.c.bf16 %v594_v9, %v574_v8  ;;  %v1454_v8 = vld [vmem:[%s7764_s13 + $0x158] sm:$0xff]  ;;  %v1459_v9 = vld [vmem:[%s7764_s13 + $0x180] sm:$0xff]  ;;  %v1481_v48 = vld [vmem:[%s7764_s13 + $0x230] sm:$0xff] }
 0x13a   : > { %5678 = vmatpush1.bf16.msra.mxu1 %v5677_v16  ;;  %5686 = vmatpush1.bf16.msra.mxu0 %v5685_v17  ;;  %v612_v16 = vld [vmem:[%s7766_s18 + $0x1c0] sm:$0xff]  ;;  %v1493_v63 = vld [vmem:[%s7764_s13 + $0x290] sm:$0xff] }
 0x13b   : > { %5688 = vmatprep.subr.bf16.mxu1 %v5687_v20  ;;  %5696 = vmatprep.subr.bf16.mxu0 %v5695_v21  ;;  %v632_v17 = vld [vmem:[%s7766_s18 + $0x260] sm:$0xff]  ;;  %v614_v20 = vld [vmem:[%s7766_s18 + $0x1d0] sm:$0xff] }
 0x13c   : > { %v634_v21 = vld [vmem:[%s7766_s18 + $0x270] sm:$0xff]  ;;  %v5725_v27 = vpack.c.bf16 %v632_v17, %v612_v16  ;;  %v1458_v17 = vld [vmem:[%s7764_s13 + $0x178] sm:$0xff] }
 0x13d   : > { %5272 = vmatmul.mubr.msk.f32.vlgmr.msra.gmra.mrb[2].mxu1 %vm482_vm2, %v7823_v6  ;;  %5273 = vmatmul.mubr.msk.f32.vlgmr.msra.gmra.mrb[4].mxu0 %vm482_vm2, %v7823_v6  ;;  %v5733_v28 = vpack.c.bf16 %v634_v21, %v614_v20  ;;  %v1453_v16 = vld [vmem:[%s7764_s13 + $0x150] sm:$0xff]  ;;  %v1464_v20 = vld [vmem:[%s7764_s13 + $0x1a8] sm:$0xff] }
 0x13e   : > { %5690 = vmatpush1.bf16.msra.mxu1 %v5689_v29  ;;  %5698 = vmatpush1.bf16.msra.mxu0 %v5697_v30  ;;  %v1411_v29 = vld [vmem:[%s7764_s13] sm:$0xff]  ;;  %v1416_v30 = vld [vmem:[%s7764_s13 + $0x28] sm:$0xff]  ;;  %v1469_v21 = vld [vmem:[%s7764_s13 + $0x1d0] sm:$0xff]  ;;  %v6393_v24 = vpack.c.bf16 %v1458_v17, %v1453_v16 }
 0x13f   : > { %5692 = vmatprep.subr.bf16.mxu1 %v5691_v33  ;;  %5700 = vmatprep.subr.bf16.mxu0 %v5699_v34  ;;  %v1413_v33 = vld [vmem:[%s7764_s13 + $0x10] sm:$0xff]  ;;  %v1418_v34 = vld [vmem:[%s7764_s13 + $0x38] sm:$0xff]  ;;  %v5737_v39 = vpack.c.bf16 %v1416_v30, %v1411_v29  ;;  %v1463_v29 = vld [vmem:[%s7764_s13 + $0x1a0] sm:$0xff] }
 0x140   : > { %987 = vmatprep.mubr.f32.mxu1 %v7495_v23  ;;  %1058 = vmatprep.mubr.f32.mxu0 %v7495_v23  ;;  %v6377_v40 = vpack.c.bf16 %v1418_v34, %v1413_v33  ;;  %v1468_v30 = vld [vmem:[%s7764_s13 + $0x1c8] sm:$0xff]  ;;  %v1474_v33 = vld [vmem:[%s7764_s13 + $0x1f8] sm:$0xff]  ;;  %v1479_v34 = vld [vmem:[%s7764_s13 + $0x220] sm:$0xff] }
 0x141   : > { %v6397_v36 = vpack.c.bf16 %v1468_v30, %v1463_v29  ;;  %v1509_v4 = vld [vmem:[%s7764_s13 + $0x310] sm:$0xff]  ;;  %v1514_v16 = vld [vmem:[%s7764_s13 + $0x338] sm:$0xff]  ;;  %v1519_v17 = vld [vmem:[%s7764_s13 + $0x360] sm:$0xff] }
 0x142   : > { %5694 = vmatpush1.bf16.msra.mxu1 %v5693_v41  ;;  %5702 = vmatpush1.bf16.msra.mxu0 %v5701_v42  ;;  %v1421_v41 = vld [vmem:[%s7764_s13 + $0x50] sm:$0xff]  ;;  %v1426_v42 = vld [vmem:[%s7764_s13 + $0x78] sm:$0xff]  ;;  %v1524_v29 = vld [vmem:[%s7764_s13 + $0x388] sm:$0xff] }
 0x143   : > { %5704 = vmatprep.subr.bf16.mxu1 %v5703_v45  ;;  %5712 = vmatprep.subr.bf16.mxu0 %v5711_v46  ;;  %v1428_v45 = vld [vmem:[%s7764_s13 + $0x88] sm:$0xff]  ;;  %v5741_v50 = vpack.c.bf16 %v1426_v42, %v1421_v41  ;;  %v1473_v41 = vld [vmem:[%s7764_s13 + $0x1f0] sm:$0xff]  ;;  %v1478_v42 = vld [vmem:[%s7764_s13 + $0x218] sm:$0xff] }
 0x144   : > { %v1432_v46 = vld [vmem:[%s7764_s13 + $0xa8] sm:$0xff]  ;;  %v1529_v30 = vld [vmem:[%s7764_s13 + $0x3b0] sm:$0xff] }
 0x145   : > { %5274 = vmatmul.mubr.msk.f32.vlgmr.msra.gmra.mrb[4].mxu1 %vm482_vm2, %v7823_v6  ;;  %5275 = vmatmul.mubr.msk.f32.vlgmr.msra.gmra.mrb[6].mxu0 %vm482_vm2, %v7823_v6 }
 0x146   : > { %5706 = vmatpush1.bf16.msra.mxu1 %v5705_v53  ;;  %5714 = vmatpush1.bf16.msra.mxu0 %v5713_v54  ;;  %v1436_v53 = vld [vmem:[%s7764_s13 + $0xc8] sm:$0xff]  ;;  %v5743_v54 = vpack.c.bf16 %v1437_v47, %v1432_v46  ;;  %v5761_v46 = vpack.c.bf16 %v1476_v38, %v1471_v37  ;;  %v6401_v47 = vpack.c.bf16 %v1478_v42, %v1473_v41  ;;  %v1523_v37 = vld [vmem:[%s7764_s13 + $0x380] sm:$0xff]  ;;  %v1534_v41 = vld [vmem:[%s7764_s13 + $0x3d8] sm:$0xff] }
 0x147   : > { %5708 = vmatprep.subr.bf16.mxu1 %v5707_v57  ;;  %5716 = vmatprep.subr.bf16.mxu0 %v5715_v58  ;;  %v1438_v57 = vld [vmem:[%s7764_s13 + $0xd8] sm:$0xff]  ;;  %v5745_v61 = vpack.c.bf16 %v1436_v53, %v1431_v52  ;;  %v1483_v52 = vld [vmem:[%s7764_s13 + $0x240] sm:$0xff]  ;;  %v1488_v53 = vld [vmem:[%s7764_s13 + $0x268] sm:$0xff] }
 0x148   : > { %1129 = vmatprep.mubr.f32.mxu1 %v7495_v23  ;;  %1200 = vmatprep.mubr.f32.mxu0 %v7495_v23  ;;  %v1442_v58 = vld [vmem:[%s7764_s13 + $0xf8] sm:$0xff]  ;;  %v6385_v62 = vpack.c.bf16 %v1438_v57, %v1433_v56  ;;  %v1499_v57 = vld [vmem:[%s7764_s13 + $0x2c0] sm:$0xff]  ;;  %v1528_v38 = vld [vmem:[%s7764_s13 + $0x3a8] sm:$0xff] }
 0x149   : > { %v1494_v56 = vld [vmem:[%s7764_s13 + $0x298] sm:$0xff]  ;;  %v1539_v42 = vld [vmem:[%s7764_s13 + $0x400] sm:$0xff] }
 0x14a   : > { %5710 = vmatpush1.bf16.msra.mxu1 %v5709_v1  ;;  %5718 = vmatpush1.bf16.msra.mxu0 %v5717_v2  ;;  %v6387_v2 = vpack.c.bf16 %v1449_v60, %v1444_v59  ;;  %v1491_v59 = vld [vmem:[%s7764_s13 + $0x280] sm:$0xff]  ;;  %v1496_v60 = vld [vmem:[%s7764_s13 + $0x2a8] sm:$0xff] }
 0x14b   : > { %5720 = vmatprep.subr.bf16.mxu1 %v5719_v5  ;;  %5728 = vmatprep.subr.bf16.mxu0 %v5727_v7  ;;  %v1452_v5 = vld [vmem:[%s7764_s13 + $0x148] sm:$0xff]  ;;  %v1457_v7 = vld [vmem:[%s7764_s13 + $0x170] sm:$0xff] }
 0x14d   : > { %5276 = vmatmul.mubr.msk.f32.vlgmr.msra.gmra.mrb[6].mxu1 %vm482_vm2, %v7823_v6  ;;  %5277 = vmatmul.mubr.msk.f32.vlgmr.msra.gmra.mrb[8].mxu0 %vm482_vm2, %v7823_v6 }
 0x14e   : > { %5722 = vmatpush1.bf16.msra.mxu1 %v5721_v14  ;;  %5730 = vmatpush1.bf16.msra.mxu0 %v5729_v15  ;;  %v5751_v14 = vpack.c.bf16 %v1457_v7, %v1452_v5  ;;  %v6391_v15 = vpack.c.bf16 %v1459_v9, %v1454_v8  ;;  %v5769_v5 = vpack.c.bf16 %v1496_v60, %v1491_v59  ;;  %v1501_v8 = vld [vmem:[%s7764_s13 + $0x2d0] sm:$0xff]  ;;  %v1506_v9 = vld [vmem:[%s7764_s13 + $0x2f8] sm:$0xff]  ;;  %v1543_v59 = vld [vmem:[%s7764_s13 + $0x420] sm:$0xff] }
 0x14f   : > { %5724 = vmatprep.subr.bf16.mxu1 %v5723_v18  ;;  %5732 = vmatprep.subr.bf16.mxu0 %v5731_v19  ;;  %v1462_v18 = vld [vmem:[%s7764_s13 + $0x198] sm:$0xff]  ;;  %v1467_v19 = vld [vmem:[%s7764_s13 + $0x1c0] sm:$0xff]  ;;  %v6409_v7 = vpack.c.bf16 %v1498_v0, %v1493_v63  ;;  %v1548_v60 = vld [vmem:[%s7764_s13 + $0x448] sm:$0xff] }
 0x150   : > { %1271 = vmatprep.mubr.f32.mxu1 %v7495_v23  ;;  %1342 = vmatprep.mubr.f32.mxu0 %v7495_v23  ;;  %v1423_v23 = vld [vmem:[%s7764_s13 + $0x60] sm:$0xff]  ;;  %v1554_v63 = vld [vmem:[%s7764_s13 + $0x478] sm:$0xff] }
 0x151   : > { %v6381_v51 = vpack.c.bf16 %v1428_v45, %v1423_v23  ;;  %v1484_v23 = vld [vmem:[%s7764_s13 + $0x248] sm:$0xff]  ;;  %v1489_v45 = vld [vmem:[%s7764_s13 + $0x270] sm:$0xff]  ;;  %v1559_v0 = vld [vmem:[%s7764_s13 + $0x4a0] sm:$0xff] }
 0x152   : > { %5726 = vmatpush1.bf16.msra.mxu1 %v5725_v27  ;;  %5734 = vmatpush1.bf16.msra.mxu0 %v5733_v28  ;;  %v5755_v27 = vpack.c.bf16 %v1467_v19, %v1462_v18  ;;  %v6395_v28 = vpack.c.bf16 %v1469_v21, %v1464_v20  ;;  %v5773_v18 = vpack.c.bf16 %v1506_v9, %v1501_v8  ;;  %v1511_v20 = vld [vmem:[%s7764_s13 + $0x320] sm:$0xff]  ;;  %v1516_v21 = vld [vmem:[%s7764_s13 + $0x348] sm:$0xff]  ;;  %v1553_v8 = vld [vmem:[%s7764_s13 + $0x470] sm:$0xff] }
 0x153   : > { %5736 = vmatprep.subr.bf16.mxu1 %v5735_v31  ;;  %6376 = vmatprep.subr.bf16.mxu0 %v6375_v32  ;;  %v1472_v31 = vld [vmem:[%s7764_s13 + $0x1e8] sm:$0xff]  ;;  %v1477_v32 = vld [vmem:[%s7764_s13 + $0x210] sm:$0xff]  ;;  %v6413_v19 = vpack.c.bf16 %v1508_v13, %v1503_v12  ;;  %v1558_v9 = vld [vmem:[%s7764_s13 + $0x498] sm:$0xff] }
 0x154   : > { %v1564_v12 = vld [vmem:[%s7764_s13 + $0x4c8] sm:$0xff]  ;;  %v1569_v13 = vld [vmem:[%s7764_s13 + $0x4f0] sm:$0xff] }
 0x155   : > { %5278 = vmatmul.mubr.msk.f32.vlgmr.msra.gmra.mrb[8].mxu1 %vm482_vm2, %v7823_v6  ;;  %5279 = vmatmul.mubr.msk.f32.vlgmr.msra.gmra.mrb[10].mxu0 %vm482_vm2, %v7823_v6  ;;  %v1447_v6 = vld [vmem:[%s7764_s13 + $0x120] sm:$0xff] }
 0x156   : > { %5738 = vmatpush1.bf16.msra.mxu1 %v5737_v39  ;;  %6378 = vmatpush1.bf16.msra.mxu0 %v6377_v40  ;;  %v5747_v1 = vpack.c.bf16 %v1447_v6, %v1442_v58  ;;  %v5759_v39 = vpack.c.bf16 %v1477_v32, %v1472_v31  ;;  %v6399_v40 = vpack.c.bf16 %v1479_v34, %v1474_v33  ;;  %v1521_v33 = vld [vmem:[%s7764_s13 + $0x370] sm:$0xff]  ;;  %v1526_v34 = vld [vmem:[%s7764_s13 + $0x398] sm:$0xff] }
 0x157   : > { %5740 = vmatprep.subr.bf16.mxu1 %v5739_v43  ;;  %6380 = vmatprep.subr.bf16.mxu0 %v6379_v44  ;;  %v1482_v43 = vld [vmem:[%s7764_s13 + $0x238] sm:$0xff]  ;;  %v1487_v44 = vld [vmem:[%s7764_s13 + $0x260] sm:$0xff]  ;;  %v5765_v58 = vpack.c.bf16 %v1486_v49, %v1481_v48  ;;  %v6405_v6 = vpack.c.bf16 %v1488_v53, %v1483_v52  ;;  %v5777_v31 = vpack.c.bf16 %v1516_v21, %v1511_v20  ;;  %v1533_v48 = vld [vmem:[%s7764_s13 + $0x3d0] sm:$0xff] }
 0x158   : > { %v6417_v32 = vpack.c.bf16 %v1518_v26, %v1513_v25  ;;  %v1538_v49 = vld [vmem:[%s7764_s13 + $0x3f8] sm:$0xff]  ;;  %v1544_v52 = vld [vmem:[%s7764_s13 + $0x428] sm:$0xff]  ;;  %v1549_v53 = vld [vmem:[%s7764_s13 + $0x450] sm:$0xff] }
 0x159   : > { %v1563_v20 = vld [vmem:[%s7764_s13 + $0x4c0] sm:$0xff]  ;;  %v1568_v21 = vld [vmem:[%s7764_s13 + $0x4e8] sm:$0xff]  ;;  %v1574_v25 = vld [vmem:[%s7764_s13 + $0x518] sm:$0xff] }
 0x15a   : > { %5742 = vmatpush1.bf16.msra.mxu1 %v5741_v50  ;;  %6382 = vmatpush1.bf16.msra.mxu0 %v6381_v51  ;;  %v5763_v50 = vpack.c.bf16 %v1487_v44, %v1482_v43  ;;  %v6403_v51 = vpack.c.bf16 %v1489_v45, %v1484_v23  ;;  %v5781_v43 = vpack.c.bf16 %v1526_v34, %v1521_v33  ;;  %v1531_v23 = vld [vmem:[%s7764_s13 + $0x3c0] sm:$0xff]  ;;  %v1536_v45 = vld [vmem:[%s7764_s13 + $0x3e8] sm:$0xff] }
 0x15b   : > { %5744 = vmatprep.subr.bf16.mxu1 %v5743_v54  ;;  %6384 = vmatprep.subr.bf16.mxu0 %v6383_v55  ;;  %v1492_v54 = vld [vmem:[%s7764_s13 + $0x288] sm:$0xff]  ;;  %v1497_v55 = vld [vmem:[%s7764_s13 + $0x2b0] sm:$0xff]  ;;  %v6421_v44 = vpack.c.bf16 %v1528_v38, %v1523_v37  ;;  %v1579_v26 = vld [vmem:[%s7764_s13 + $0x540] sm:$0xff] }
 0x15c   : > { %v1571_v33 = vld [vmem:[%s7764_s13 + $0x500] sm:$0xff]  ;;  %v1576_v34 = vld [vmem:[%s7764_s13 + $0x528] sm:$0xff] }
 0x15e   : > { %5746 = vmatpush1.bf16.msra.mxu1 %v5745_v61  ;;  %6386 = vmatpush1.bf16.msra.mxu0 %v6385_v62  ;;  %v5767_v61 = vpack.c.bf16 %v1497_v55, %v1492_v54  ;;  %v6407_v62 = vpack.c.bf16 %v1499_v57, %v1494_v56  ;;  %v5785_v54 = vpack.c.bf16 %v1536_v45, %v1531_v23  ;;  %v1541_v56 = vld [vmem:[%s7764_s13 + $0x410] sm:$0xff]  ;;  %v1546_v57 = vld [vmem:[%s7764_s13 + $0x438] sm:$0xff] }
 0x15f   : > { %5748 = vmatprep.subr.bf16.mxu1 %v5747_v1  ;;  %6388 = vmatprep.subr.bf16.mxu0 %v6387_v2  ;;  %v1502_v1 = vld [vmem:[%s7764_s13 + $0x2d8] sm:$0xff]  ;;  %v1507_v2 = vld [vmem:[%s7764_s13 + $0x300] sm:$0xff]  ;;  %v6425_v55 = vpack.c.bf16 %v1538_v49, %v1533_v48  ;;  %v5801_v45 = vpack.c.bf16 %v1576_v34, %v1571_v33  ;;  %v1613_v34 = vld [vmem:[%s7764_s13 + $0x650] sm:$0xff] }
 0x160   : > { %v1586_v48 = vld [vmem:[%s7764_s13 + $0x578] sm:$0xff] }
 0x162   : > { %5750 = vmatpush1.bf16.msra.mxu1 %v5749_v10  ;;  %6390 = vmatpush1.bf16.msra.mxu0 %v6389_v11  ;;  %v5771_v10 = vpack.c.bf16 %v1507_v2, %v1502_v1  ;;  %v6411_v11 = vpack.c.bf16 %v1509_v4, %v1504_v3  ;;  %v5789_v1 = vpack.c.bf16 %v1546_v57, %v1541_v56  ;;  %v1551_v3 = vld [vmem:[%s7764_s13 + $0x460] sm:$0xff]  ;;  %v1556_v4 = vld [vmem:[%s7764_s13 + $0x488] sm:$0xff]  ;;  %v1597_v56 = vld [vmem:[%s7764_s13 + $0x5d0] sm:$0xff] }
 0x163   : > { %5752 = vmatprep.subr.bf16.mxu1 %v5751_v14  ;;  %6392 = vmatprep.subr.bf16.mxu0 %v6391_v15  ;;  %v1512_v14 = vld [vmem:[%s7764_s13 + $0x328] sm:$0xff]  ;;  %v1517_v15 = vld [vmem:[%s7764_s13 + $0x350] sm:$0xff]  ;;  %v6429_v2 = vpack.c.bf16 %v1548_v60, %v1543_v59  ;;  %v1594_v57 = vld [vmem:[%s7764_s13 + $0x5b8] sm:$0xff] }
 0x166   : > { %5754 = vmatpush1.bf16.msra.mxu1 %v5753_v22  ;;  %6394 = vmatpush1.bf16.msra.mxu0 %v6393_v24  ;;  %v5775_v22 = vpack.c.bf16 %v1517_v15, %v1512_v14  ;;  %v6415_v24 = vpack.c.bf16 %v1519_v17, %v1514_v16  ;;  %v5793_v14 = vpack.c.bf16 %v1556_v4, %v1551_v3  ;;  %v1561_v16 = vld [vmem:[%s7764_s13 + $0x4b0] sm:$0xff]  ;;  %v1566_v17 = vld [vmem:[%s7764_s13 + $0x4d8] sm:$0xff] }
 0x167   : > { %5756 = vmatprep.subr.bf16.mxu1 %v5755_v27  ;;  %6396 = vmatprep.subr.bf16.mxu0 %v6395_v28  ;;  %v1522_v27 = vld [vmem:[%s7764_s13 + $0x378] sm:$0xff]  ;;  %v1527_v28 = vld [vmem:[%s7764_s13 + $0x3a0] sm:$0xff]  ;;  %v6433_v15 = vpack.c.bf16 %v1558_v9, %v1553_v8  ;;  %v1593_v3 = vld [vmem:[%s7764_s13 + $0x5b0] sm:$0xff] }
 0x168   : > { %v1598_v4 = vld [vmem:[%s7764_s13 + $0x5d8] sm:$0xff]  ;;  %v1607_v9 = vld [vmem:[%s7764_s13 + $0x620] sm:$0xff] }
 0x16a   : > { %5758 = vmatpush1.bf16.msra.mxu1 %v5757_v35  ;;  %6398 = vmatpush1.bf16.msra.mxu0 %v6397_v36  ;;  %v5779_v35 = vpack.c.bf16 %v1527_v28, %v1522_v27  ;;  %v6419_v36 = vpack.c.bf16 %v1529_v30, %v1524_v29  ;;  %v5797_v27 = vpack.c.bf16 %v1566_v17, %v1561_v16 }
 0x16b   : > { %5760 = vmatprep.subr.bf16.mxu1 %v5759_v39  ;;  %6400 = vmatprep.subr.bf16.mxu0 %v6399_v40  ;;  %v1532_v39 = vld [vmem:[%s7764_s13 + $0x3c8] sm:$0xff]  ;;  %v1537_v40 = vld [vmem:[%s7764_s13 + $0x3f0] sm:$0xff]  ;;  %v6437_v28 = vpack.c.bf16 %v1568_v21, %v1563_v20  ;;  %v6439_v30 = vpack.c.bf16 %v1579_v26, %v1574_v25 }
 0x16c   : > { %v1612_v20 = vld [vmem:[%s7764_s13 + $0x648] sm:$0xff]  ;;  %v1617_v21 = vld [vmem:[%s7764_s13 + $0x670] sm:$0xff] }
 0x16e   : > { %5762 = vmatpush1.bf16.msra.mxu1 %v5761_v46  ;;  %6402 = vmatpush1.bf16.msra.mxu0 %v6401_v47  ;;  %v5783_v46 = vpack.c.bf16 %v1537_v40, %v1532_v39  ;;  %v6423_v47 = vpack.c.bf16 %v1539_v42, %v1534_v41  ;;  %v1582_v40 = vld [vmem:[%s7764_s13 + $0x558] sm:$0xff]  ;;  %v1587_v41 = vld [vmem:[%s7764_s13 + $0x580] sm:$0xff] }
 0x16f   : > { %5764 = vmatprep.subr.bf16.mxu1 %v5763_v50  ;;  %6404 = vmatprep.subr.bf16.mxu0 %v6403_v51  ;;  %v1542_v50 = vld [vmem:[%s7764_s13 + $0x418] sm:$0xff]  ;;  %v1547_v51 = vld [vmem:[%s7764_s13 + $0x440] sm:$0xff] }
 0x172   : > { %5766 = vmatpush1.bf16.msra.mxu1 %v5765_v58  ;;  %6406 = vmatpush1.bf16.msra.mxu0 %v6405_v6  ;;  %v5787_v58 = vpack.c.bf16 %v1547_v51, %v1542_v50  ;;  %v6427_v6 = vpack.c.bf16 %v1549_v53, %v1544_v52  ;;  %v1583_v50 = vld [vmem:[%s7764_s13 + $0x560] sm:$0xff]  ;;  %v1588_v51 = vld [vmem:[%s7764_s13 + $0x588] sm:$0xff] }
 0x173   : > { %5768 = vmatprep.subr.bf16.mxu1 %v5767_v61  ;;  %6408 = vmatprep.subr.bf16.mxu0 %v6407_v62  ;;  %v1552_v61 = vld [vmem:[%s7764_s13 + $0x468] sm:$0xff]  ;;  %v1557_v62 = vld [vmem:[%s7764_s13 + $0x490] sm:$0xff] }
 0x174   : > { %v1592_v52 = vld [vmem:[%s7764_s13 + $0x5a8] sm:$0xff] }
 0x176   : > { %5770 = vmatpush1.bf16.msra.mxu1 %v5769_v5  ;;  %6410 = vmatpush1.bf16.msra.mxu0 %v6409_v7  ;;  %v5791_v5 = vpack.c.bf16 %v1557_v62, %v1552_v61  ;;  %v6431_v7 = vpack.c.bf16 %v1559_v0, %v1554_v63  ;;  %v6445_v62 = vpack.c.bf16 %v1588_v51, %v1583_v50  ;;  %v1591_v63 = vld [vmem:[%s7764_s13 + $0x5a0] sm:$0xff]  ;;  %v1596_v0 = vld [vmem:[%s7764_s13 + $0x5c8] sm:$0xff]  ;;  %v1637_v51 = vld [vmem:[%s7764_s13 + $0x710] sm:$0xff] }
 0x177   : > { %5772 = vmatprep.subr.bf16.mxu1 %v5771_v10  ;;  %6412 = vmatprep.subr.bf16.mxu0 %v6411_v11  ;;  %v1562_v10 = vld [vmem:[%s7764_s13 + $0x4b8] sm:$0xff]  ;;  %v1567_v11 = vld [vmem:[%s7764_s13 + $0x4e0] sm:$0xff]  ;;  %v1632_v50 = vld [vmem:[%s7764_s13 + $0x6e8] sm:$0xff] }
 0x17a   : > { %5774 = vmatpush1.bf16.msra.mxu1 %v5773_v18  ;;  %6414 = vmatpush1.bf16.msra.mxu0 %v6413_v19  ;;  %v5795_v18 = vpack.c.bf16 %v1567_v11, %v1562_v10  ;;  %v6435_v19 = vpack.c.bf16 %v1569_v13, %v1564_v12  ;;  %v1604_v10 = vld [vmem:[%s7764_s13 + $0x608] sm:$0xff]  ;;  %v1609_v11 = vld [vmem:[%s7764_s13 + $0x630] sm:$0xff]  ;;  %v5809_v12 = vpack.c.bf16 %v1596_v0, %v1591_v63 }
 0x17b   : > { %5776 = vmatprep.subr.bf16.mxu1 %v5775_v22  ;;  %6416 = vmatprep.subr.bf16.mxu0 %v6415_v24  ;;  %v1572_v22 = vld [vmem:[%s7764_s13 + $0x508] sm:$0xff]  ;;  %v1577_v24 = vld [vmem:[%s7764_s13 + $0x530] sm:$0xff]  ;;  %v6449_v13 = vpack.c.bf16 %v1598_v4, %v1593_v3  ;;  %v6451_v17 = vpack.c.bf16 %v1609_v11, %v1604_v10  ;;  %v5823_v63 = vpack.c.bf16 %v1637_v51, %v1632_v50  ;;  %v1642_v3 = vld [vmem:[%s7764_s13 + $0x738] sm:$0xff] }
 0x17c   : > { %v5799_v29 = vpack.c.bf16 %v1577_v24, %v1572_v22  ;;  %v1614_v22 = vld [vmem:[%s7764_s13 + $0x658] sm:$0xff]  ;;  %v1619_v24 = vld [vmem:[%s7764_s13 + $0x680] sm:$0xff]  ;;  %v1644_v10 = vld [vmem:[%s7764_s13 + $0x748] sm:$0xff] }
 0x17d   : > { %v6455_v33 = vpack.c.bf16 %v1619_v24, %v1614_v22  ;;  %v1649_v11 = vld [vmem:[%s7764_s13 + $0x770] sm:$0xff]  ;;  %v1654_v22 = vld [vmem:[%s7764_s13 + $0x798] sm:$0xff]  ;;  %v1659_v24 = vld [vmem:[%s7764_s13 + $0x7c0] sm:$0xff] }
 0x17e   : > { %5778 = vmatpush1.bf16.msra.mxu1 %v5777_v31  ;;  %6418 = vmatpush1.bf16.msra.mxu0 %v6417_v32 }
 0x17f   : > { %5780 = vmatprep.subr.bf16.mxu1 %v5779_v35  ;;  %6420 = vmatprep.subr.bf16.mxu0 %v6419_v36  ;;  %v1573_v35 = vld [vmem:[%s7764_s13 + $0x510] sm:$0xff]  ;;  %v1578_v36 = vld [vmem:[%s7764_s13 + $0x538] sm:$0xff] }
 0x182   : > { %5782 = vmatpush1.bf16.msra.mxu1 %v5781_v43  ;;  %6422 = vmatpush1.bf16.msra.mxu0 %v6421_v44  ;;  %v1584_v43 = vld [vmem:[%s7764_s13 + $0x568] sm:$0xff]  ;;  %v1589_v44 = vld [vmem:[%s7764_s13 + $0x590] sm:$0xff] }
 0x183   : > { %5784 = vmatprep.subr.bf16.mxu1 %v5783_v46  ;;  %6424 = vmatprep.subr.bf16.mxu0 %v6423_v47  ;;  %v6441_v46 = vpack.c.bf16 %v1578_v36, %v1573_v35  ;;  %v1581_v47 = vld [vmem:[%s7764_s13 + $0x550] sm:$0xff]  ;;  %v1618_v35 = vld [vmem:[%s7764_s13 + $0x678] sm:$0xff] }
 0x184   : > { %v5805_v61 = vpack.c.bf16 %v1586_v48, %v1581_v47  ;;  %v1622_v36 = vld [vmem:[%s7764_s13 + $0x698] sm:$0xff]  ;;  %v1623_v47 = vld [vmem:[%s7764_s13 + $0x6a0] sm:$0xff]  ;;  %v1628_v48 = vld [vmem:[%s7764_s13 + $0x6c8] sm:$0xff] }
 0x186   : > { %5786 = vmatpush1.bf16.msra.mxu1 %v5785_v54  ;;  %6426 = vmatpush1.bf16.msra.mxu0 %v6425_v55  ;;  %v5803_v54 = vpack.c.bf16 %v1587_v41, %v1582_v40  ;;  %v6443_v55 = vpack.c.bf16 %v1589_v44, %v1584_v43  ;;  %v1624_v40 = vld [vmem:[%s7764_s13 + $0x6a8] sm:$0xff]  ;;  %v1629_v41 = vld [vmem:[%s7764_s13 + $0x6d0] sm:$0xff]  ;;  %v6457_v43 = vpack.c.bf16 %v1618_v35, %v1613_v34 }
 0x187   : > { %5788 = vmatprep.subr.bf16.mxu1 %v5787_v58  ;;  %6428 = vmatprep.subr.bf16.mxu0 %v6427_v6  ;;  %v1599_v58 = vld [vmem:[%s7764_s13 + $0x5e0] sm:$0xff]  ;;  %v1621_v44 = vld [vmem:[%s7764_s13 + $0x690] sm:$0xff]  ;;  %v6471_v35 = vpack.c.bf16 %v1659_v24, %v1654_v22  ;;  %v1688_v24 = vld [vmem:[%s7764_s13 + $0x8a8] sm:$0xff] }
 0x188   : > { %v1683_v22 = vld [vmem:[%s7764_s13 + $0x880] sm:$0xff] }
 0x18a   : > { %5790 = vmatpush1.bf16.msra.mxu1 %v5789_v1  ;;  %6430 = vmatpush1.bf16.msra.mxu0 %v6429_v2  ;;  %v5807_v1 = vpack.c.bf16 %v1597_v56, %v1592_v52  ;;  %v6447_v2 = vpack.c.bf16 %v1599_v58, %v1594_v57  ;;  %v1634_v52 = vld [vmem:[%s7764_s13 + $0x6f8] sm:$0xff]  ;;  %v6461_v58 = vpack.c.bf16 %v1628_v48, %v1623_v47  ;;  %v1661_v47 = vld [vmem:[%s7764_s13 + $0x7d0] sm:$0xff] }
 0x18b   : > { %5792 = vmatprep.subr.bf16.mxu1 %v5791_v5  ;;  %6432 = vmatprep.subr.bf16.mxu0 %v6431_v7  ;;  %v1602_v5 = vld [vmem:[%s7764_s13 + $0x5f8] sm:$0xff] }
 0x18c   : > { %v5811_v16 = vpack.c.bf16 %v1607_v9, %v1602_v5  ;;  %v1647_v9 = vld [vmem:[%s7764_s13 + $0x760] sm:$0xff]  ;;  %v1666_v48 = vld [vmem:[%s7764_s13 + $0x7f8] sm:$0xff] }
 0x18e   : > { %5794 = vmatpush1.bf16.msra.mxu1 %v5793_v14  ;;  %6434 = vmatpush1.bf16.msra.mxu0 %v6433_v15  ;;  %v1601_v14 = vld [vmem:[%s7764_s13 + $0x5f0] sm:$0xff]  ;;  %v1606_v15 = vld [vmem:[%s7764_s13 + $0x618] sm:$0xff] }
 0x18f   : > { %5796 = vmatprep.subr.bf16.mxu1 %v5795_v18  ;;  %6436 = vmatprep.subr.bf16.mxu0 %v6435_v19  ;;  %v1603_v18 = vld [vmem:[%s7764_s13 + $0x600] sm:$0xff]  ;;  %v1608_v19 = vld [vmem:[%s7764_s13 + $0x628] sm:$0xff] }
 0x192   : > { %5798 = vmatpush1.bf16.msra.mxu1 %v5797_v27  ;;  %6438 = vmatpush1.bf16.msra.mxu0 %v6437_v28  ;;  %v5813_v27 = vpack.c.bf16 %v1606_v15, %v1601_v14  ;;  %v6453_v28 = vpack.c.bf16 %v1608_v19, %v1603_v18  ;;  %v1641_v14 = vld [vmem:[%s7764_s13 + $0x730] sm:$0xff]  ;;  %v1646_v15 = vld [vmem:[%s7764_s13 + $0x758] sm:$0xff]  ;;  %v1643_v18 = vld [vmem:[%s7764_s13 + $0x740] sm:$0xff] }
 0x193   : > { %5800 = vmatprep.subr.bf16.mxu1 %v5799_v29  ;;  %6440 = vmatprep.subr.bf16.mxu0 %v6439_v30  ;;  %v1611_v29 = vld [vmem:[%s7764_s13 + $0x640] sm:$0xff]  ;;  %v1616_v30 = vld [vmem:[%s7764_s13 + $0x668] sm:$0xff] }
 0x194   : > { %v1648_v19 = vld [vmem:[%s7764_s13 + $0x768] sm:$0xff] }
 0x208   : > { %v705_v31 = vpop.f32.mrb[0].mxu1  ;;  %v8035_v32 = vpop.f32.mrb[2].mxu0 }
 0x209   : > { %v1369_v37 = vmul.f32 0.01, %v705_v31  ;;  %v707_v38 = vpop.f32.mrb[1].mxu1  ;;  %v778_v39 = vpop.f32.mrb[3].mxu0  ;;  %vm1349_vm3 = vcmp.gt.f32.partialorder %v705_v31, 0.0  ;;  %vm1351_vm6 = vcmp.gt.f32.partialorder %v8035_v32, 0.0 }
 0x20a   : > { %vm1350_vm4 = vcmp.gt.f32.partialorder %v707_v38, 0.0  ;;  %v1370_v42 = vmul.f32 0.01, %v707_v38  ;;  %v1372_v23 = vmul.f32 0.01, %v778_v39  ;;  %vm1352_vm5 = vcmp.gt.f32.partialorder %v778_v39, 0.0 }
 0x20b   : > { %v8055_v53 = vsel %vm1349_vm3, %v705_v31, %v1369_v37  ;;  %v5815_v31 = vpack.c.bf16 %v1617_v21, %v1612_v20  ;;  %v1652_v20 = vld [vmem:[%s7764_s13 + $0x788] sm:$0xff]  ;;  %v1657_v21 = vld [vmem:[%s7764_s13 + $0x7b0] sm:$0xff] }
 0x20c   : > { %v8047_v49 = vsel %vm1350_vm4, %v707_v38, %v1370_v42  ;;  %v8067_v60 = vsel %vm1352_vm5, %v778_v39, %v1372_v23  ;;  %v1627_v39 = vld [vmem:[%s7764_s13 + $0x6c0] sm:$0xff]  ;;  %v5817_v42 = vpack.c.bf16 %v1616_v30, %v1611_v29  ;;  %v1626_v23 = vld [vmem:[%s7764_s13 + $0x6b8] sm:$0xff]  ;;  %v5829_v29 = vpack.c.bf16 %v1646_v15, %v1641_v14  ;;  %v1684_v14 = vld [vmem:[%s7764_s13 + $0x888] sm:$0xff] }
 0x20d   : > { %3075 = vmatprep.mubr.f32.mxu1 %v8047_v49  ;;  %3785 = vmatprep.mubr.f32.mxu0 %v8047_v49  ;;  %v5821_v57 = vpack.c.bf16 %v1626_v23, %v1621_v44  ;;  %v6469_v30 = vpack.c.bf16 %v1648_v19, %v1643_v18  ;;  %v5831_v34 = vpack.c.bf16 %v1657_v21, %v1652_v20  ;;  %v1664_v44 = vld [vmem:[%s7764_s13 + $0x7e8] sm:$0xff]  ;;  %v1669_v23 = vld [vmem:[%s7764_s13 + $0x810] sm:$0xff]  ;;  %v1686_v19 = vld [vmem:[%s7764_s13 + $0x898] sm:$0xff] }
 0x20e   : > { %3076 = vmatmul.mubr.f32.vlgmr.msra.gmra.mrb[10].mxu1 %v8055_v53  ;;  %3786 = vmatmul.mubr.f32.vlgmr.msra.gmra.mrb[12].mxu0 %v8055_v53  ;;  %v6475_v51 = vpack.c.bf16 %v1669_v23, %v1664_v44  ;;  %v1689_v15 = vld [vmem:[%s7764_s13 + $0x8b0] sm:$0xff]  ;;  %v1698_v23 = vld [vmem:[%s7764_s13 + $0x8f8] sm:$0xff] }
 0x20f   : > { %5802 = vmatpush1.bf16.msra.mxu1 %v5801_v45  ;;  %6442 = vmatpush1.bf16.msra.mxu0 %v6441_v46  ;;  %v5819_v45 = vpack.c.bf16 %v1627_v39, %v1622_v36  ;;  %v6459_v46 = vpack.c.bf16 %v1629_v41, %v1624_v40  ;;  %v1653_v36 = vld [vmem:[%s7764_s13 + $0x790] sm:$0xff]  ;;  %v1658_v39 = vld [vmem:[%s7764_s13 + $0x7b8] sm:$0xff]  ;;  %v6483_v21 = vpack.c.bf16 %v1689_v15, %v1684_v14 }
 0x210   : > { %v8062_v6 = vpop.f32.mrb[2].mxu1  ;;  %v8064_v59 = vpop.f32.mrb[4].mxu0  ;;  %3146 = vmatprep.mubr.f32.mxu1 %v8067_v60  ;;  %3856 = vmatprep.mubr.f32.mxu0 %v8067_v60  ;;  %v1662_v40 = vld [vmem:[%s7764_s13 + $0x7d8] sm:$0xff]  ;;  %v1681_v18 = vld [vmem:[%s7764_s13 + $0x870] sm:$0xff] }
 0x211   : > { %v8076_v7 = vpop.f32.mrb[3].mxu1  ;;  %v8078_v8 = vpop.f32.mrb[5].mxu0  ;;  %5804 = vmatprep.subr.bf16.mxu1 %v5803_v54  ;;  %6444 = vmatprep.subr.bf16.mxu0 %v6443_v55  ;;  %v1639_v54 = vld [vmem:[%s7764_s13 + $0x720] sm:$0xff]  ;;  %v1693_v44 = vld [vmem:[%s7764_s13 + $0x8d0] sm:$0xff]  ;;  %v1718_v15 = vld [vmem:[%s7764_s13 + $0x998] sm:$0xff]  ;;  %vm1353_vm8 = vcmp.gt.f32.partialorder %v8062_v6, 0.0 }
 0x212   : > { %v6463_v0 = vpack.c.bf16 %v1639_v54, %v1634_v52  ;;  %v1663_v52 = vld [vmem:[%s7764_s13 + $0x7e0] sm:$0xff]  ;;  %v1668_v54 = vld [vmem:[%s7764_s13 + $0x808] sm:$0xff]  ;;  %v1713_v14 = vld [vmem:[%s7764_s13 + $0x970] sm:$0xff]  ;;  %vm1354_vm7 = vcmp.gt.f32.partialorder %v8076_v7, 0.0  ;;  %vm1356_vm9 = vcmp.gt.f32.partialorder %v8078_v8, 0.0  ;;  %vm1355_vm10 = vcmp.gt.f32.partialorder %v8064_v59, 0.0 }
 0x213   : > { %5806 = vmatpush1.bf16.msra.mxu1 %v5805_v61  ;;  %6446 = vmatpush1.bf16.msra.mxu0 %v6445_v62  ;;  %v1631_v61 = vld [vmem:[%s7764_s13 + $0x6e0] sm:$0xff]  ;;  %v1636_v62 = vld [vmem:[%s7764_s13 + $0x708] sm:$0xff] }
 0x214   : > { %5808 = vmatprep.subr.bf16.mxu1 %v5807_v1  ;;  %6448 = vmatprep.subr.bf16.mxu0 %v6447_v2  ;;  %v1633_v1 = vld [vmem:[%s7764_s13 + $0x6f0] sm:$0xff]  ;;  %v1638_v2 = vld [vmem:[%s7764_s13 + $0x718] sm:$0xff] }
 0x217   : > { %5810 = vmatpush1.bf16.msra.mxu1 %v5809_v12  ;;  %6450 = vmatpush1.bf16.msra.mxu0 %v6449_v13  ;;  %v5825_v12 = vpack.c.bf16 %v1636_v62, %v1631_v61  ;;  %v6465_v13 = vpack.c.bf16 %v1638_v2, %v1633_v1  ;;  %v1674_v61 = vld [vmem:[%s7764_s13 + $0x838] sm:$0xff]  ;;  %v1679_v62 = vld [vmem:[%s7764_s13 + $0x860] sm:$0xff]  ;;  %v1676_v2 = vld [vmem:[%s7764_s13 + $0x848] sm:$0xff] }
 0x218   : > { %v8091_v25 = vpop.f32.mrb[4].mxu1  ;;  %v8093_v26 = vpop.f32.mrb[6].mxu0  ;;  %5812 = vmatprep.subr.bf16.mxu1 %v5811_v16  ;;  %6452 = vmatprep.subr.bf16.mxu0 %v6451_v17  ;;  %v5827_v16 = vpack.c.bf16 %v1647_v9, %v1642_v3  ;;  %v6467_v17 = vpack.c.bf16 %v1649_v11, %v1644_v10  ;;  %v1671_v1 = vld [vmem:[%s7764_s13 + $0x820] sm:$0xff]  ;;  %v6479_v9 = vpack.c.bf16 %v1679_v62, %v1674_v61  ;;  %v1673_v10 = vld [vmem:[%s7764_s13 + $0x830] sm:$0xff]  ;;  %v1678_v11 = vld [vmem:[%s7764_s13 + $0x858] sm:$0xff] }
 0x219   : > { %v8100_v37 = vpop.f32.mrb[5].mxu1  ;;  %v8102_v38 = vpop.f32.mrb[7].mxu0  ;;  %v1703_v61 = vld [vmem:[%s7764_s13 + $0x920] sm:$0xff]  ;;  %v1708_v62 = vld [vmem:[%s7764_s13 + $0x948] sm:$0xff]  ;;  %vm1357_vm12 = vcmp.gt.f32.partialorder %v8091_v25, 0.0  ;;  %vm1359_vm14 = vcmp.gt.f32.partialorder %v8093_v26, 0.0 }
 0x21a   : > { %vm1358_vm11 = vcmp.gt.f32.partialorder %v8100_v37, 0.0  ;;  %vm1360_vm13 = vcmp.gt.f32.partialorder %v8102_v38, 0.0 }
 0x21b   : > { %5814 = vmatpush1.bf16.msra.mxu1 %v5813_v27  ;;  %6454 = vmatpush1.bf16.msra.mxu0 %v6453_v28 }
 0x21c   : > { %5816 = vmatprep.subr.bf16.mxu1 %v5815_v31  ;;  %6456 = vmatprep.subr.bf16.mxu0 %v6455_v33  ;;  %v1651_v31 = vld [vmem:[%s7764_s13 + $0x780] sm:$0xff]  ;;  %v1656_v33 = vld [vmem:[%s7764_s13 + $0x7a8] sm:$0xff] }
 0x21f   : > { %5818 = vmatpush1.bf16.msra.mxu1 %v5817_v42  ;;  %6458 = vmatpush1.bf16.msra.mxu0 %v6457_v43  ;;  %v1667_v43 = vld [vmem:[%s7764_s13 + $0x800] sm:$0xff] }
 0x220   : > { %v8115_v55 = vpop.f32.mrb[6].mxu1  ;;  %v8117_v56 = vpop.f32.mrb[8].mxu0  ;;  %5820 = vmatprep.subr.bf16.mxu1 %v5819_v45  ;;  %6460 = vmatprep.subr.bf16.mxu0 %v6459_v46  ;;  %v5833_v45 = vpack.c.bf16 %v1656_v33, %v1651_v31  ;;  %v6473_v46 = vpack.c.bf16 %v1658_v39, %v1653_v36  ;;  %v5835_v50 = vpack.c.bf16 %v1667_v43, %v1662_v40  ;;  %v1694_v31 = vld [vmem:[%s7764_s13 + $0x8d8] sm:$0xff]  ;;  %v1699_v33 = vld [vmem:[%s7764_s13 + $0x900] sm:$0xff]  ;;  %v1696_v39 = vld [vmem:[%s7764_s13 + $0x8e8] sm:$0xff] }
 0x221   : > { %v8124_v4 = vpop.f32.mrb[7].mxu1  ;;  %v8126_v5 = vpop.f32.mrb[9].mxu0  ;;  %v1691_v36 = vld [vmem:[%s7764_s13 + $0x8c0] sm:$0xff]  ;;  %v6487_v43 = vpack.c.bf16 %v1699_v33, %v1694_v31  ;;  %v1728_v33 = vld [vmem:[%s7764_s13 + $0x9e8] sm:$0xff]  ;;  %vm1361_vm0 = vcmp.gt.f32.partialorder %v8115_v55, 0.0  ;;  %vm1363_vm2 = vcmp.gt.f32.partialorder %v8117_v56, 0.0 }
 0x222   : > { %v1723_v31 = vld [vmem:[%s7764_s13 + $0x9c0] sm:$0xff]  ;;  %vm1362_vm15 = vcmp.gt.f32.partialorder %v8124_v4, 0.0  ;;  %vm1364_vm1 = vcmp.gt.f32.partialorder %v8126_v5, 0.0 }
 0x223   : > { %5822 = vmatpush1.bf16.msra.mxu1 %v5821_v57  ;;  %6462 = vmatpush1.bf16.msra.mxu0 %v6461_v58  ;;  %v1672_v57 = vld [vmem:[%s7764_s13 + $0x828] sm:$0xff]  ;;  %v1677_v58 = vld [vmem:[%s7764_s13 + $0x850] sm:$0xff] }
 0x224   : > { %5824 = vmatprep.subr.bf16.mxu1 %v5823_v63  ;;  %6464 = vmatprep.subr.bf16.mxu0 %v6463_v0  ;;  %v5837_v63 = vpack.c.bf16 %v1666_v48, %v1661_v47  ;;  %v6477_v0 = vpack.c.bf16 %v1668_v54, %v1663_v52  ;;  %v5839_v3 = vpack.c.bf16 %v1677_v58, %v1672_v57  ;;  %v1704_v47 = vld [vmem:[%s7764_s13 + $0x928] sm:$0xff]  ;;  %v1709_v48 = vld [vmem:[%s7764_s13 + $0x950] sm:$0xff]  ;;  %v1706_v54 = vld [vmem:[%s7764_s13 + $0x938] sm:$0xff] }
 0x225   : > { %v1701_v52 = vld [vmem:[%s7764_s13 + $0x910] sm:$0xff]  ;;  %v6491_v58 = vpack.c.bf16 %v1709_v48, %v1704_v47  ;;  %v1371_v47 = vmul.f32 0.01, %v8035_v32 }
 0x226   : > { %v1733_v48 = vld [vmem:[%s7764_s13 + $0xa10] sm:$0xff] }
 0x227   : > { %5826 = vmatpush1.bf16.msra.mxu1 %v5825_v12  ;;  %6466 = vmatpush1.bf16.msra.mxu0 %v6465_v13  ;;  %v1682_v12 = vld [vmem:[%s7764_s13 + $0x878] sm:$0xff]  ;;  %v1687_v13 = vld [vmem:[%s7764_s13 + $0x8a0] sm:$0xff] }
 0x228   : > { %v8139_v27 = vpop.f32.mrb[8].mxu1  ;;  %v8141_v28 = vpop.f32.mrb[10].mxu0  ;;  %5828 = vmatprep.subr.bf16.mxu1 %v5827_v16  ;;  %6468 = vmatprep.subr.bf16.mxu0 %v6467_v17  ;;  %v5841_v16 = vpack.c.bf16 %v1676_v2, %v1671_v1  ;;  %v6481_v17 = vpack.c.bf16 %v1678_v11, %v1673_v10  ;;  %v5843_v20 = vpack.c.bf16 %v1687_v13, %v1682_v12  ;;  %v1714_v1 = vld [vmem:[%s7764_s13 + $0x978] sm:$0xff]  ;;  %v1719_v2 = vld [vmem:[%s7764_s13 + $0x9a0] sm:$0xff]  ;;  %v1716_v11 = vld [vmem:[%s7764_s13 + $0x988] sm:$0xff] }
 0x229   : > { %v8148_v41 = vpop.f32.mrb[9].mxu1  ;;  %v8150_v42 = vpop.f32.mrb[11].mxu0  ;;  %v1711_v10 = vld [vmem:[%s7764_s13 + $0x960] sm:$0xff]  ;;  %v6495_v13 = vpack.c.bf16 %v1719_v2, %v1714_v1  ;;  %v8227_v2 = vsel %vm1351_vm6, %v8035_v32, %v1371_v47  ;;  %v1754_v32 = vld [vmem:[%s7764_s13 + $0xab8] sm:$0xff]  ;;  %vm1365_vm4 = vcmp.gt.f32.partialorder %v8139_v27, 0.0  ;;  %vm1367_vm6 = vcmp.gt.f32.partialorder %v8141_v28, 0.0 }
 0x22a   : > { %v1743_v1 = vld [vmem:[%s7764_s13 + $0xa60] sm:$0xff]  ;;  %vm1366_vm3 = vcmp.gt.f32.partialorder %v8148_v41, 0.0  ;;  %vm1368_vm5 = vcmp.gt.f32.partialorder %v8150_v42, 0.0 }
 0x22b   : > { %5830 = vmatpush1.bf16.msra.mxu1 %v5829_v29  ;;  %6470 = vmatpush1.bf16.msra.mxu0 %v6469_v30  ;;  %v1692_v29 = vld [vmem:[%s7764_s13 + $0x8c8] sm:$0xff]  ;;  %v1697_v30 = vld [vmem:[%s7764_s13 + $0x8f0] sm:$0xff] }
 0x22c   : > { %5832 = vmatprep.subr.bf16.mxu1 %v5831_v34  ;;  %6472 = vmatprep.subr.bf16.mxu0 %v6471_v35  ;;  %v5845_v34 = vpack.c.bf16 %v1686_v19, %v1681_v18  ;;  %v6485_v35 = vpack.c.bf16 %v1688_v24, %v1683_v22  ;;  %v5847_v40 = vpack.c.bf16 %v1697_v30, %v1692_v29  ;;  %v1724_v18 = vld [vmem:[%s7764_s13 + $0x9c8] sm:$0xff]  ;;  %v1729_v19 = vld [vmem:[%s7764_s13 + $0x9f0] sm:$0xff]  ;;  %v1726_v24 = vld [vmem:[%s7764_s13 + $0x9d8] sm:$0xff] }
 0x22d   : > { %v1721_v22 = vld [vmem:[%s7764_s13 + $0x9b0] sm:$0xff]  ;;  %v6499_v30 = vpack.c.bf16 %v1729_v19, %v1724_v18  ;;  %v1751_v18 = vld [vmem:[%s7764_s13 + $0xaa0] sm:$0xff]  ;;  %v1756_v19 = vld [vmem:[%s7764_s13 + $0xac8] sm:$0xff] }
 0x22f   : > { %5834 = vmatpush1.bf16.msra.mxu1 %v5833_v45  ;;  %6474 = vmatpush1.bf16.msra.mxu0 %v6473_v46  ;;  %v1702_v45 = vld [vmem:[%s7764_s13 + $0x918] sm:$0xff]  ;;  %v1707_v46 = vld [vmem:[%s7764_s13 + $0x940] sm:$0xff] }
 0x230   : > { %5836 = vmatprep.subr.bf16.mxu1 %v5835_v50  ;;  %6476 = vmatprep.subr.bf16.mxu0 %v6475_v51  ;;  %v5849_v50 = vpack.c.bf16 %v1696_v39, %v1691_v36  ;;  %v6489_v51 = vpack.c.bf16 %v1698_v23, %v1693_v44  ;;  %v5851_v57 = vpack.c.bf16 %v1707_v46, %v1702_v45  ;;  %v1734_v36 = vld [vmem:[%s7764_s13 + $0xa18] sm:$0xff]  ;;  %v1739_v39 = vld [vmem:[%s7764_s13 + $0xa40] sm:$0xff]  ;;  %v1736_v46 = vld [vmem:[%s7764_s13 + $0xa28] sm:$0xff] }
 0x231   : > { %v6503_v23 = vpack.c.bf16 %v1739_v39, %v1734_v36  ;;  %v1731_v45 = vld [vmem:[%s7764_s13 + $0xa00] sm:$0xff]  ;;  %v1766_v36 = vld [vmem:[%s7764_s13 + $0xb18] sm:$0xff] }
 0x232   : > { %v1763_v39 = vld [vmem:[%s7764_s13 + $0xb00] sm:$0xff] }
 0x233   : > { %5838 = vmatpush1.bf16.msra.mxu1 %v5837_v63  ;;  %6478 = vmatpush1.bf16.msra.mxu0 %v6477_v0  ;;  %v1712_v63 = vld [vmem:[%s7764_s13 + $0x968] sm:$0xff]  ;;  %v1717_v0 = vld [vmem:[%s7764_s13 + $0x990] sm:$0xff] }
 0x234   : > { %5840 = vmatprep.subr.bf16.mxu1 %v5839_v3  ;;  %6480 = vmatprep.subr.bf16.mxu0 %v6479_v9  ;;  %v5853_v3 = vpack.c.bf16 %v1706_v54, %v1701_v52  ;;  %v6493_v9 = vpack.c.bf16 %v1708_v62, %v1703_v61  ;;  %v5855_v12 = vpack.c.bf16 %v1717_v0, %v1712_v63  ;;  %v1374_v52 = vmul.f32 0.01, %v8076_v7  ;;  %v1747_v54 = vld [vmem:[%s7764_s13 + $0xa80] sm:$0xff]  ;;  %v1741_v63 = vld [vmem:[%s7764_s13 + $0xa50] sm:$0xff]  ;;  %v1746_v0 = vld [vmem:[%s7764_s13 + $0xa78] sm:$0xff] }
 0x235   : > { %v5865_v61 = vpack.c.bf16 %v1736_v46, %v1731_v45  ;;  %v1774_v45 = vld [vmem:[%s7764_s13 + $0xb58] sm:$0xff]  ;;  %v1779_v46 = vld [vmem:[%s7764_s13 + $0xb80] sm:$0xff] }
 0x237   : > { %5842 = vmatpush1.bf16.msra.mxu1 %v5841_v16  ;;  %6482 = vmatpush1.bf16.msra.mxu0 %v6481_v17  ;;  %v1722_v16 = vld [vmem:[%s7764_s13 + $0x9b8] sm:$0xff]  ;;  %v1727_v17 = vld [vmem:[%s7764_s13 + $0x9e0] sm:$0xff] }
 0x238   : > { %5844 = vmatprep.subr.bf16.mxu1 %v5843_v20  ;;  %6484 = vmatprep.subr.bf16.mxu0 %v6483_v21  ;;  %v5857_v20 = vpack.c.bf16 %v1716_v11, %v1711_v10  ;;  %v6497_v21 = vpack.c.bf16 %v1718_v15, %v1713_v14  ;;  %v5859_v29 = vpack.c.bf16 %v1727_v17, %v1722_v16  ;;  %v1748_v10 = vld [vmem:[%s7764_s13 + $0xa88] sm:$0xff]  ;;  %v1759_v14 = vld [vmem:[%s7764_s13 + $0xae0] sm:$0xff] }
 0x239   : > { %v1752_v11 = vld [vmem:[%s7764_s13 + $0xaa8] sm:$0xff]  ;;  %v5869_v15 = vpack.c.bf16 %v1746_v0, %v1741_v63  ;;  %v6509_v16 = vpack.c.bf16 %v1748_v10, %v1743_v1  ;;  %v1789_v0 = vld [vmem:[%s7764_s13 + $0xbd0] sm:$0xff] }
 0x23a   : > { %v1784_v63 = vld [vmem:[%s7764_s13 + $0xba8] sm:$0xff]  ;;  %v1781_v10 = vld [vmem:[%s7764_s13 + $0xb90] sm:$0xff] }
 0x23b   : > { %5846 = vmatpush1.bf16.msra.mxu1 %v5845_v34  ;;  %6486 = vmatpush1.bf16.msra.mxu0 %v6485_v35  ;;  %v1732_v34 = vld [vmem:[%s7764_s13 + $0xa08] sm:$0xff]  ;;  %v1737_v35 = vld [vmem:[%s7764_s13 + $0xa30] sm:$0xff] }
 0x23c   : > { %5848 = vmatprep.subr.bf16.mxu1 %v5847_v40  ;;  %6488 = vmatprep.subr.bf16.mxu0 %v6487_v43  ;;  %v5861_v40 = vpack.c.bf16 %v1726_v24, %v1721_v22  ;;  %v6501_v43 = vpack.c.bf16 %v1728_v33, %v1723_v31  ;;  %v5863_v44 = vpack.c.bf16 %v1737_v35, %v1732_v34  ;;  %v1762_v22 = vld [vmem:[%s7764_s13 + $0xaf8] sm:$0xff]  ;;  %v1767_v24 = vld [vmem:[%s7764_s13 + $0xb20] sm:$0xff]  ;;  %v1761_v35 = vld [vmem:[%s7764_s13 + $0xaf0] sm:$0xff] }
 0x23d   : > { %v5873_v31 = vpack.c.bf16 %v1756_v19, %v1751_v18  ;;  %v5875_v34 = vpack.c.bf16 %v1767_v24, %v1762_v22  ;;  %v5877_v47 = vpack.c.bf16 %v1766_v36, %v1761_v35  ;;  %v1799_v18 = vld [vmem:[%s7764_s13 + $0xc20] sm:$0xff]  ;;  %v1796_v22 = vld [vmem:[%s7764_s13 + $0xc08] sm:$0xff]  ;;  %v1793_v24 = vld [vmem:[%s7764_s13 + $0xbf0] sm:$0xff] }
 0x23e   : > { %v1809_v35 = vld [vmem:[%s7764_s13 + $0xc70] sm:$0xff] }
 0x23f   : > { %5850 = vmatpush1.bf16.msra.mxu1 %v5849_v50  ;;  %6490 = vmatpush1.bf16.msra.mxu0 %v6489_v51  ;;  %v1738_v50 = vld [vmem:[%s7764_s13 + $0xa38] sm:$0xff] }
 0x240   : > { %5852 = vmatprep.subr.bf16.mxu1 %v5851_v57  ;;  %6492 = vmatprep.subr.bf16.mxu0 %v6491_v58  ;;  %v1742_v51 = vld [vmem:[%s7764_s13 + $0xa58] sm:$0xff]  ;;  %v1744_v57 = vld [vmem:[%s7764_s13 + $0xa68] sm:$0xff]  ;;  %v1749_v58 = vld [vmem:[%s7764_s13 + $0xa90] sm:$0xff]  ;;  %v6505_v62 = vpack.c.bf16 %v1738_v50, %v1733_v48 }
 0x243   : > { %5854 = vmatpush1.bf16.msra.mxu1 %v5853_v3  ;;  %6494 = vmatpush1.bf16.msra.mxu0 %v6493_v9  ;;  %v5867_v3 = vpack.c.bf16 %v1747_v54, %v1742_v51  ;;  %v6507_v9 = vpack.c.bf16 %v1749_v58, %v1744_v57  ;;  %v1771_v51 = vld [vmem:[%s7764_s13 + $0xb40] sm:$0xff]  ;;  %v1773_v54 = vld [vmem:[%s7764_s13 + $0xb50] sm:$0xff]  ;;  %v6519_v57 = vpack.c.bf16 %v1779_v46, %v1774_v45  ;;  %v1778_v58 = vld [vmem:[%s7764_s13 + $0xb78] sm:$0xff] }
 0x244   : > { %5856 = vmatprep.subr.bf16.mxu1 %v5855_v12  ;;  %6496 = vmatprep.subr.bf16.mxu0 %v6495_v13  ;;  %v1757_v12 = vld [vmem:[%s7764_s13 + $0xad0] sm:$0xff]  ;;  %v8237_v13 = vsel %vm1354_vm7, %v8076_v7, %v1374_v52  ;;  %v1776_v52 = vld [vmem:[%s7764_s13 + $0xb68] sm:$0xff]  ;;  %vm5165_vm7 = vcmask 713728  }
 0x245   : > { %v5871_v17 = vpack.c.bf16 %v1757_v12, %v1752_v11  ;;  %v1753_v7 = vld [vmem:[%s7764_s13 + $0xab0] sm:$0xff]  ;;  %v5881_v1 = vpack.c.bf16 %v1776_v52, %v1771_v51  ;;  %v1786_v11 = vld [vmem:[%s7764_s13 + $0xbb8] sm:$0xff]  ;;  %v1783_v12 = vld [vmem:[%s7764_s13 + $0xba0] sm:$0xff] }
 0x246   : > { %v5885_v19 = vpack.c.bf16 %v1786_v11, %v1781_v10  ;;  %v1808_v46 = vld [vmem:[%s7764_s13 + $0xc68] sm:$0xff]  ;;  %v1819_v51 = vld [vmem:[%s7764_s13 + $0xcc0] sm:$0xff]  ;;  %v1829_v10 = vld [vmem:[%s7764_s13 + $0xd10] sm:$0xff] }
 0x247   : > { %5858 = vmatpush1.bf16.msra.mxu1 %v5857_v20  ;;  %6498 = vmatpush1.bf16.msra.mxu0 %v6497_v21  ;;  %v6511_v20 = vpack.c.bf16 %v1759_v14, %v1754_v32  ;;  %v1758_v21 = vld [vmem:[%s7764_s13 + $0xad8] sm:$0xff]  ;;  %v6523_v32 = vpack.c.bf16 %v1789_v0, %v1784_v63  ;;  %v1788_v14 = vld [vmem:[%s7764_s13 + $0xbc8] sm:$0xff] }
 0x248   : > { %5860 = vmatprep.subr.bf16.mxu1 %v5859_v29  ;;  %6500 = vmatprep.subr.bf16.mxu0 %v6499_v30  ;;  %v1764_v29 = vld [vmem:[%s7764_s13 + $0xb08] sm:$0xff]  ;;  %v1769_v30 = vld [vmem:[%s7764_s13 + $0xb30] sm:$0xff]  ;;  %v6513_v33 = vpack.c.bf16 %v1758_v21, %v1753_v7  ;;  %v6525_v7 = vpack.c.bf16 %v1788_v14, %v1783_v12  ;;  %v1791_v21 = vld [vmem:[%s7764_s13 + $0xbe0] sm:$0xff] }
 0x249   : > { %v5889_v36 = vpack.c.bf16 %v1796_v22, %v1791_v21  ;;  %v1818_v0 = vld [vmem:[%s7764_s13 + $0xcb8] sm:$0xff]  ;;  %v1821_v14 = vld [vmem:[%s7764_s13 + $0xcd0] sm:$0xff]  ;;  %v1839_v21 = vld [vmem:[%s7764_s13 + $0xd60] sm:$0xff] }
 0x24b   : > { %5862 = vmatpush1.bf16.msra.mxu1 %v5861_v40  ;;  %6502 = vmatpush1.bf16.msra.mxu0 %v6501_v43  ;;  %v6515_v40 = vpack.c.bf16 %v1769_v30, %v1764_v29  ;;  %v1768_v43 = vld [vmem:[%s7764_s13 + $0xb28] sm:$0xff]  ;;  %v1798_v30 = vld [vmem:[%s7764_s13 + $0xc18] sm:$0xff] }
 0x24c   : > { %5864 = vmatprep.subr.bf16.mxu1 %v5863_v44  ;;  %6504 = vmatprep.subr.bf16.mxu0 %v6503_v23  ;;  %v1772_v44 = vld [vmem:[%s7764_s13 + $0xb48] sm:$0xff]  ;;  %v1777_v23 = vld [vmem:[%s7764_s13 + $0xb70] sm:$0xff]  ;;  %v6517_v48 = vpack.c.bf16 %v1768_v43, %v1763_v39  ;;  %v6529_v39 = vpack.c.bf16 %v1798_v30, %v1793_v24  ;;  %v1831_v30 = vld [vmem:[%s7764_s13 + $0xd20] sm:$0xff] }
 0x24d   : > { %v5879_v50 = vpack.c.bf16 %v1777_v23, %v1772_v44  ;;  %v1801_v43 = vld [vmem:[%s7764_s13 + $0xc30] sm:$0xff]  ;;  %v1806_v44 = vld [vmem:[%s7764_s13 + $0xc58] sm:$0xff]  ;;  %v1803_v23 = vld [vmem:[%s7764_s13 + $0xc40] sm:$0xff] }
 0x24e   : > { %3147 = vmatmul.mubr.f32.vlgmr.msra.gmra.mrb[10].mxu1 %v8227_v2  ;;  %3857 = vmatmul.mubr.f32.vlgmr.msra.gmra.mrb[12].mxu0 %v8227_v2  ;;  %v5893_v52 = vpack.c.bf16 %v1806_v44, %v1801_v43  ;;  %v1849_v43 = vld [vmem:[%s7764_s13 + $0xdb0] sm:$0xff] }
 0x24f   : > { %5866 = vmatpush1.bf16.msra.mxu1 %v5865_v61  ;;  %3217 = vmatprep.mubr.f32.mxu1 %v8237_v13  ;;  %v1782_v61 = vld [vmem:[%s7764_s13 + $0xb98] sm:$0xff] }
 0x250   : > { %6506 = vmatpush1.bf16.msra.mxu0 %v6505_v62  ;;  %3927 = vmatprep.mubr.f32.mxu0 %v8237_v13  ;;  %v1787_v62 = vld [vmem:[%s7764_s13 + $0xbc0] sm:$0xff] }
 0x251   : > { %5868 = vmatprep.subr.bf16.mxu1 %v5867_v3  ;;  %6508 = vmatprep.subr.bf16.mxu0 %v6507_v9  ;;  %v6521_v3 = vpack.c.bf16 %v1778_v58, %v1773_v54  ;;  %v5883_v9 = vpack.c.bf16 %v1787_v62, %v1782_v61  ;;  %v6533_v54 = vpack.c.bf16 %v1808_v46, %v1803_v23  ;;  %v1811_v58 = vld [vmem:[%s7764_s13 + $0xc80] sm:$0xff]  ;;  %v1816_v61 = vld [vmem:[%s7764_s13 + $0xca8] sm:$0xff]  ;;  %v1813_v62 = vld [vmem:[%s7764_s13 + $0xc90] sm:$0xff] }
 0x252   : > { %v5897_v11 = vpack.c.bf16 %v1816_v61, %v1811_v58  ;;  %v6537_v12 = vpack.c.bf16 %v1818_v0, %v1813_v62  ;;  %v1841_v46 = vld [vmem:[%s7764_s13 + $0xd70] sm:$0xff]  ;;  %v1859_v58 = vld [vmem:[%s7764_s13 + $0xe00] sm:$0xff] }
 0x253   : > { %5870 = vmatpush1.bf16.msra.mxu1 %v5869_v15  ;;  %v1792_v15 = vld [vmem:[%s7764_s13 + $0xbe8] sm:$0xff]  ;;  %v1851_v0 = vld [vmem:[%s7764_s13 + $0xdc0] sm:$0xff] }
 0x254   : > { %6510 = vmatpush1.bf16.msra.mxu0 %v6509_v16  ;;  %5872 = vmatprep.subr.bf16.mxu1 %v5871_v17  ;;  %v1797_v16 = vld [vmem:[%s7764_s13 + $0xc10] sm:$0xff]  ;;  %v1794_v17 = vld [vmem:[%s7764_s13 + $0xbf8] sm:$0xff] }
 0x255   : > { %6512 = vmatprep.subr.bf16.mxu0 %v6511_v20  ;;  %v5887_v20 = vpack.c.bf16 %v1797_v16, %v1792_v15  ;;  %v6527_v29 = vpack.c.bf16 %v1799_v18, %v1794_v17  ;;  %v1826_v15 = vld [vmem:[%s7764_s13 + $0xcf8] sm:$0xff]  ;;  %v1823_v16 = vld [vmem:[%s7764_s13 + $0xce0] sm:$0xff]  ;;  %v1828_v18 = vld [vmem:[%s7764_s13 + $0xd08] sm:$0xff] }
 0x256   : > { %v5901_v22 = vpack.c.bf16 %v1826_v15, %v1821_v14  ;;  %v6541_v24 = vpack.c.bf16 %v1828_v18, %v1823_v16  ;;  %v1869_v14 = vld [vmem:[%s7764_s13 + $0xe50] sm:$0xff] }
 0x257   : > { %5874 = vmatpush1.bf16.msra.mxu1 %v5873_v31  ;;  %v1802_v31 = vld [vmem:[%s7764_s13 + $0xc38] sm:$0xff]  ;;  %v1861_v18 = vld [vmem:[%s7764_s13 + $0xe10] sm:$0xff] }
 0x258   : > { %6514 = vmatpush1.bf16.msra.mxu0 %v6513_v33  ;;  %5876 = vmatprep.subr.bf16.mxu1 %v5875_v34  ;;  %v1807_v33 = vld [vmem:[%s7764_s13 + $0xc60] sm:$0xff]  ;;  %v1804_v34 = vld [vmem:[%s7764_s13 + $0xc48] sm:$0xff] }
 0x259   : > { %6516 = vmatprep.subr.bf16.mxu0 %v6515_v40  ;;  %v5891_v40 = vpack.c.bf16 %v1807_v33, %v1802_v31  ;;  %v6531_v45 = vpack.c.bf16 %v1809_v35, %v1804_v34  ;;  %v1836_v31 = vld [vmem:[%s7764_s13 + $0xd48] sm:$0xff]  ;;  %v1833_v33 = vld [vmem:[%s7764_s13 + $0xd30] sm:$0xff]  ;;  %v1838_v35 = vld [vmem:[%s7764_s13 + $0xd58] sm:$0xff] }
 0x25a   : > { %v5905_v44 = vpack.c.bf16 %v1836_v31, %v1831_v30  ;;  %v6545_v23 = vpack.c.bf16 %v1838_v35, %v1833_v33  ;;  %v1879_v30 = vld [vmem:[%s7764_s13 + $0xea0] sm:$0xff] }
 0x25b   : > { %5878 = vmatpush1.bf16.msra.mxu1 %v5877_v47  ;;  %v1812_v47 = vld [vmem:[%s7764_s13 + $0xc88] sm:$0xff]  ;;  %v1871_v35 = vld [vmem:[%s7764_s13 + $0xe60] sm:$0xff] }
 0x25c   : > { %6518 = vmatpush1.bf16.msra.mxu0 %v6517_v48  ;;  %5880 = vmatprep.subr.bf16.mxu1 %v5879_v50  ;;  %v1817_v48 = vld [vmem:[%s7764_s13 + $0xcb0] sm:$0xff]  ;;  %v1814_v50 = vld [vmem:[%s7764_s13 + $0xc98] sm:$0xff] }
 0x25d   : > { %6520 = vmatprep.subr.bf16.mxu0 %v6519_v57  ;;  %v5895_v57 = vpack.c.bf16 %v1817_v48, %v1812_v47  ;;  %v6535_v63 = vpack.c.bf16 %v1819_v51, %v1814_v50  ;;  %v1846_v47 = vld [vmem:[%s7764_s13 + $0xd98] sm:$0xff]  ;;  %v1843_v48 = vld [vmem:[%s7764_s13 + $0xd80] sm:$0xff]  ;;  %v1848_v51 = vld [vmem:[%s7764_s13 + $0xda8] sm:$0xff] }
 0x25e   : > { %v5909_v61 = vpack.c.bf16 %v1846_v47, %v1841_v46  ;;  %v6549_v62 = vpack.c.bf16 %v1848_v51, %v1843_v48  ;;  %v1889_v46 = vld [vmem:[%s7764_s13 + $0xef0] sm:$0xff] }
 0x25f   : > { %5882 = vmatpush1.bf16.msra.mxu1 %v5881_v1  ;;  %v1822_v1 = vld [vmem:[%s7764_s13 + $0xcd8] sm:$0xff]  ;;  %v1881_v51 = vld [vmem:[%s7764_s13 + $0xeb0] sm:$0xff] }
 0x260   : > { %6522 = vmatpush1.bf16.msra.mxu0 %v6521_v3  ;;  %5884 = vmatprep.subr.bf16.mxu1 %v5883_v9  ;;  %v1827_v3 = vld [vmem:[%s7764_s13 + $0xd00] sm:$0xff]  ;;  %v1824_v9 = vld [vmem:[%s7764_s13 + $0xce8] sm:$0xff] }
 0x261   : > { %6524 = vmatprep.subr.bf16.mxu0 %v6523_v32  ;;  %v5899_v32 = vpack.c.bf16 %v1827_v3, %v1822_v1  ;;  %v6539_v17 = vpack.c.bf16 %v1829_v10, %v1824_v9  ;;  %v1856_v1 = vld [vmem:[%s7764_s13 + $0xde8] sm:$0xff]  ;;  %v1853_v3 = vld [vmem:[%s7764_s13 + $0xdd0] sm:$0xff]  ;;  %v1858_v10 = vld [vmem:[%s7764_s13 + $0xdf8] sm:$0xff] }
 0x262   : > { %v5913_v15 = vpack.c.bf16 %v1856_v1, %v1851_v0  ;;  %v6553_v16 = vpack.c.bf16 %v1858_v10, %v1853_v3  ;;  %v1899_v0 = vld [vmem:[%s7764_s13 + $0xf40] sm:$0xff] }
 0x263   : > { %5886 = vmatpush1.bf16.msra.mxu1 %v5885_v19  ;;  %v1832_v19 = vld [vmem:[%s7764_s13 + $0xd28] sm:$0xff]  ;;  %v1891_v10 = vld [vmem:[%s7764_s13 + $0xf00] sm:$0xff] }
 0x264   : > { %6526 = vmatpush1.bf16.msra.mxu0 %v6525_v7  ;;  %5888 = vmatprep.subr.bf16.mxu1 %v5887_v20  ;;  %v1837_v7 = vld [vmem:[%s7764_s13 + $0xd50] sm:$0xff]  ;;  %v1834_v20 = vld [vmem:[%s7764_s13 + $0xd38] sm:$0xff] }
 0x265   : > { %6528 = vmatprep.subr.bf16.mxu0 %v6527_v29  ;;  %v5903_v29 = vpack.c.bf16 %v1837_v7, %v1832_v19  ;;  %v6543_v34 = vpack.c.bf16 %v1839_v21, %v1834_v20  ;;  %v1866_v19 = vld [vmem:[%s7764_s13 + $0xe38] sm:$0xff]  ;;  %v1863_v7 = vld [vmem:[%s7764_s13 + $0xe20] sm:$0xff]  ;;  %v1868_v21 = vld [vmem:[%s7764_s13 + $0xe48] sm:$0xff] }
 0x266   : > { %v5917_v31 = vpack.c.bf16 %v1866_v19, %v1861_v18  ;;  %v6557_v33 = vpack.c.bf16 %v1868_v21, %v1863_v7  ;;  %v1376_v18 = vmul.f32 0.01, %v8078_v8  ;;  %v1904_v7 = vld [vmem:[%s7764_s13 + $0xf68] sm:$0xff] }
 0x267   : > { %5890 = vmatpush1.bf16.msra.mxu1 %v5889_v36  ;;  %v1842_v36 = vld [vmem:[%s7764_s13 + $0xd78] sm:$0xff] }
 0x268   : > { %6530 = vmatpush1.bf16.msra.mxu0 %v6529_v39  ;;  %5892 = vmatprep.subr.bf16.mxu1 %v5891_v40  ;;  %v1847_v39 = vld [vmem:[%s7764_s13 + $0xda0] sm:$0xff]  ;;  %v1844_v40 = vld [vmem:[%s7764_s13 + $0xd88] sm:$0xff] }
 0x269   : > { %6532 = vmatprep.subr.bf16.mxu0 %v6531_v45  ;;  %v5907_v45 = vpack.c.bf16 %v1847_v39, %v1842_v36  ;;  %v6547_v50 = vpack.c.bf16 %v1849_v43, %v1844_v40  ;;  %v1876_v36 = vld [vmem:[%s7764_s13 + $0xe88] sm:$0xff]  ;;  %v1873_v39 = vld [vmem:[%s7764_s13 + $0xe70] sm:$0xff]  ;;  %v1878_v43 = vld [vmem:[%s7764_s13 + $0xe98] sm:$0xff] }
 0x26a   : > { %v5921_v47 = vpack.c.bf16 %v1876_v36, %v1871_v35  ;;  %v6561_v48 = vpack.c.bf16 %v1878_v43, %v1873_v39  ;;  %v1917_v35 = vld [vmem:[%s7764_s13 + $0xfd0] sm:$0xff]  ;;  %v1914_v39 = vld [vmem:[%s7764_s13 + $0xfb8] sm:$0xff] }
 0x26b   : > { %5894 = vmatpush1.bf16.msra.mxu1 %v5893_v52  ;;  %v1852_v52 = vld [vmem:[%s7764_s13 + $0xdc8] sm:$0xff] }
 0x26c   : > { %6534 = vmatpush1.bf16.msra.mxu0 %v6533_v54  ;;  %5896 = vmatprep.subr.bf16.mxu1 %v5895_v57  ;;  %v1857_v54 = vld [vmem:[%s7764_s13 + $0xdf0] sm:$0xff]  ;;  %v1854_v57 = vld [vmem:[%s7764_s13 + $0xdd8] sm:$0xff] }
 0x26d   : > { %6536 = vmatprep.subr.bf16.mxu0 %v6535_v63  ;;  %v5911_v63 = vpack.c.bf16 %v1857_v54, %v1852_v52  ;;  %v6551_v9 = vpack.c.bf16 %v1859_v58, %v1854_v57  ;;  %v1886_v52 = vld [vmem:[%s7764_s13 + $0xed8] sm:$0xff]  ;;  %v1883_v54 = vld [vmem:[%s7764_s13 + $0xec0] sm:$0xff]  ;;  %v1888_v58 = vld [vmem:[%s7764_s13 + $0xee8] sm:$0xff] }
 0x26e   : > { %v5925_v1 = vpack.c.bf16 %v1886_v52, %v1881_v51  ;;  %v6565_v3 = vpack.c.bf16 %v1888_v58, %v1883_v54  ;;  %v1927_v51 = vld [vmem:[%s7764_s13 + $0x1020] sm:$0xff]  ;;  %v1924_v52 = vld [vmem:[%s7764_s13 + $0x1008] sm:$0xff]  ;;  %v1929_v54 = vld [vmem:[%s7764_s13 + $0x1030] sm:$0xff] }
 0x26f   : > { %5898 = vmatpush1.bf16.msra.mxu1 %v5897_v11  ;;  %v1862_v11 = vld [vmem:[%s7764_s13 + $0xe18] sm:$0xff] }
 0x270   : > { %6538 = vmatpush1.bf16.msra.mxu0 %v6537_v12  ;;  %5900 = vmatprep.subr.bf16.mxu1 %v5899_v32  ;;  %v1867_v12 = vld [vmem:[%s7764_s13 + $0xe40] sm:$0xff]  ;;  %v1864_v32 = vld [vmem:[%s7764_s13 + $0xe28] sm:$0xff] }
 0x271   : > { %6540 = vmatprep.subr.bf16.mxu0 %v6539_v17  ;;  %v5915_v17 = vpack.c.bf16 %v1867_v12, %v1862_v11  ;;  %v6555_v20 = vpack.c.bf16 %v1869_v14, %v1864_v32  ;;  %v1896_v11 = vld [vmem:[%s7764_s13 + $0xf28] sm:$0xff]  ;;  %v1373_v12 = vmul.f32 0.01, %v8062_v6  ;;  %v1893_v14 = vld [vmem:[%s7764_s13 + $0xf10] sm:$0xff] }
 0x272   : > { %v5929_v19 = vpack.c.bf16 %v1896_v11, %v1891_v10  ;;  %v1937_v10 = vld [vmem:[%s7764_s13 + $0x1070] sm:$0xff]  ;;  %v1934_v11 = vld [vmem:[%s7764_s13 + $0x1058] sm:$0xff] }
 0x273   : > { %5902 = vmatpush1.bf16.msra.mxu1 %v5901_v22  ;;  %v1872_v22 = vld [vmem:[%s7764_s13 + $0xe68] sm:$0xff] }
 0x274   : > { %6542 = vmatpush1.bf16.msra.mxu0 %v6541_v24  ;;  %5904 = vmatprep.subr.bf16.mxu1 %v5903_v29  ;;  %v1877_v24 = vld [vmem:[%s7764_s13 + $0xe90] sm:$0xff]  ;;  %v1874_v29 = vld [vmem:[%s7764_s13 + $0xe78] sm:$0xff] }
 0x275   : > { %6544 = vmatprep.subr.bf16.mxu0 %v6543_v34  ;;  %v5919_v34 = vpack.c.bf16 %v1877_v24, %v1872_v22  ;;  %v6559_v40 = vpack.c.bf16 %v1879_v30, %v1874_v29  ;;  %v1901_v22 = vld [vmem:[%s7764_s13 + $0xf50] sm:$0xff]  ;;  %v1906_v24 = vld [vmem:[%s7764_s13 + $0xf78] sm:$0xff]  ;;  %v1903_v29 = vld [vmem:[%s7764_s13 + $0xf60] sm:$0xff]  ;;  %v8371_v30 = vsel %vm1353_vm8, %v8062_v6, %v1373_v12  ;;  %v8383_v6 = vsel %vm1356_vm9, %v8078_v8, %v1376_v18 }
 0x276   : > { %v5933_v43 = vpack.c.bf16 %v1906_v24, %v1901_v22  ;;  %v1918_v8 = vld [vmem:[%s7764_s13 + $0xfd8] sm:$0xff]  ;;  %v1939_v12 = vld [vmem:[%s7764_s13 + $0x1080] sm:$0xff]  ;;  %v1933_v18 = vld [vmem:[%s7764_s13 + $0x1050] sm:$0xff] }
 0x277   : > { %5906 = vmatpush1.bf16.msra.mxu1 %v5905_v44  ;;  %v1882_v44 = vld [vmem:[%s7764_s13 + $0xeb8] sm:$0xff]  ;;  %v1944_v22 = vld [vmem:[%s7764_s13 + $0x10a8] sm:$0xff]  ;;  %v1949_v24 = vld [vmem:[%s7764_s13 + $0x10d0] sm:$0xff] }
 0x278   : > { %6546 = vmatpush1.bf16.msra.mxu0 %v6545_v23  ;;  %5908 = vmatprep.subr.bf16.mxu1 %v5907_v45  ;;  %v1887_v23 = vld [vmem:[%s7764_s13 + $0xee0] sm:$0xff]  ;;  %v1884_v45 = vld [vmem:[%s7764_s13 + $0xec8] sm:$0xff] }
 0x279   : > { %6548 = vmatprep.subr.bf16.mxu0 %v6547_v50  ;;  %v5923_v50 = vpack.c.bf16 %v1887_v23, %v1882_v44  ;;  %v6563_v57 = vpack.c.bf16 %v1889_v46, %v1884_v45  ;;  %v1911_v45 = vld [vmem:[%s7764_s13 + $0xfa0] sm:$0xff]  ;;  %v1916_v46 = vld [vmem:[%s7764_s13 + $0xfc8] sm:$0xff] }
 0x27b   : > { %5910 = vmatpush1.bf16.msra.mxu1 %v5909_v61  ;;  %v1892_v61 = vld [vmem:[%s7764_s13 + $0xf08] sm:$0xff] }
 0x27c   : > { %6550 = vmatpush1.bf16.msra.mxu0 %v6549_v62  ;;  %5912 = vmatprep.subr.bf16.mxu1 %v5911_v63  ;;  %v1897_v62 = vld [vmem:[%s7764_s13 + $0xf30] sm:$0xff]  ;;  %v1894_v63 = vld [vmem:[%s7764_s13 + $0xf18] sm:$0xff] }
 0x27d   : > { %6552 = vmatprep.subr.bf16.mxu0 %v6551_v9  ;;  %v5927_v9 = vpack.c.bf16 %v1897_v62, %v1892_v61  ;;  %v6567_v32 = vpack.c.bf16 %v1899_v0, %v1894_v63  ;;  %v1921_v62 = vld [vmem:[%s7764_s13 + $0xff0] sm:$0xff]  ;;  %v1926_v63 = vld [vmem:[%s7764_s13 + $0x1018] sm:$0xff]  ;;  %v1923_v0 = vld [vmem:[%s7764_s13 + $0x1000] sm:$0xff] }
 0x27f   : > { %5914 = vmatpush1.bf16.msra.mxu1 %v5913_v15  ;;  %v1898_v15 = vld [vmem:[%s7764_s13 + $0xf38] sm:$0xff] }
 0x280   : > { %6554 = vmatpush1.bf16.msra.mxu0 %v6553_v16  ;;  %5916 = vmatprep.subr.bf16.mxu1 %v5915_v17  ;;  %v1902_v16 = vld [vmem:[%s7764_s13 + $0xf58] sm:$0xff]  ;;  %v1907_v17 = vld [vmem:[%s7764_s13 + $0xf80] sm:$0xff]  ;;  %v6569_v21 = vpack.c.bf16 %v1898_v15, %v1893_v14 }
 0x281   : > { %6556 = vmatprep.subr.bf16.mxu0 %v6555_v20  ;;  %v1909_v20 = vld [vmem:[%s7764_s13 + $0xf90] sm:$0xff] }
 0x282   : > { %v6571_v36 = vpack.c.bf16 %v1909_v20, %v1904_v7  ;;  %v1938_v7 = vld [vmem:[%s7764_s13 + $0x1078] sm:$0xff] }
 0x283   : > { %5918 = vmatpush1.bf16.msra.mxu1 %v5917_v31  ;;  %v5931_v31 = vpack.c.bf16 %v1907_v17, %v1902_v16  ;;  %v1931_v16 = vld [vmem:[%s7764_s13 + $0x1040] sm:$0xff]  ;;  %v1936_v17 = vld [vmem:[%s7764_s13 + $0x1068] sm:$0xff]  ;;  %v1942_v20 = vld [vmem:[%s7764_s13 + $0x1098] sm:$0xff] }
 0x284   : > { %6558 = vmatpush1.bf16.msra.mxu0 %v6557_v33  ;;  %5920 = vmatprep.subr.bf16.mxu1 %v5919_v34  ;;  %v1908_v33 = vld [vmem:[%s7764_s13 + $0xf88] sm:$0xff] }
 0x285   : > { %6560 = vmatprep.subr.bf16.mxu0 %v6559_v40  ;;  %v1912_v34 = vld [vmem:[%s7764_s13 + $0xfa8] sm:$0xff]  ;;  %v1919_v40 = vld [vmem:[%s7764_s13 + $0xfe0] sm:$0xff]  ;;  %v6573_v44 = vpack.c.bf16 %v1908_v33, %v1903_v29  ;;  %v5945_v29 = vpack.c.bf16 %v1936_v17, %v1931_v16 }
 0x286   : > { %v5935_v23 = vpack.c.bf16 %v1917_v35, %v1912_v34  ;;  %v1941_v34 = vld [vmem:[%s7764_s13 + $0x1090] sm:$0xff]  ;;  %v1946_v35 = vld [vmem:[%s7764_s13 + $0x10b8] sm:$0xff]  ;;  %v1979_v16 = vld [vmem:[%s7764_s13 + $0x11c0] sm:$0xff] }
 0x287   : > { %5922 = vmatpush1.bf16.msra.mxu1 %v5921_v47  ;;  %v1913_v47 = vld [vmem:[%s7764_s13 + $0xfb0] sm:$0xff] }
 0x288   : > { %6562 = vmatpush1.bf16.msra.mxu0 %v6561_v48  ;;  %5924 = vmatprep.subr.bf16.mxu1 %v5923_v50  ;;  %v6575_v48 = vpack.c.bf16 %v1919_v40, %v1914_v39  ;;  %v1922_v50 = vld [vmem:[%s7764_s13 + $0xff8] sm:$0xff]  ;;  %v6577_v58 = vpack.c.bf16 %v1918_v8, %v1913_v47  ;;  %v6587_v39 = vpack.c.bf16 %v1949_v24, %v1944_v22  ;;  %v1948_v40 = vld [vmem:[%s7764_s13 + $0x10c8] sm:$0xff]  ;;  %v1951_v8 = vld [vmem:[%s7764_s13 + $0x10e0] sm:$0xff] }
 0x289   : > { %6564 = vmatprep.subr.bf16.mxu0 %v6563_v57  ;;  %v5937_v57 = vpack.c.bf16 %v1916_v46, %v1911_v45  ;;  %v5939_v61 = vpack.c.bf16 %v1927_v51, %v1922_v50  ;;  %v1959_v45 = vld [vmem:[%s7764_s13 + $0x1120] sm:$0xff]  ;;  %v5949_v46 = vpack.c.bf16 %v1946_v35, %v1941_v34  ;;  %v1956_v50 = vld [vmem:[%s7764_s13 + $0x1108] sm:$0xff]  ;;  %v1953_v51 = vld [vmem:[%s7764_s13 + $0x10f0] sm:$0xff] }
 0x28a   : > { %v1978_v24 = vld [vmem:[%s7764_s13 + $0x11b8] sm:$0xff]  ;;  %v1989_v34 = vld [vmem:[%s7764_s13 + $0x1210] sm:$0xff] }
 0x28b   : > { %5926 = vmatpush1.bf16.msra.mxu1 %v5925_v1  ;;  %v6579_v1 = vpack.c.bf16 %v1929_v54, %v1924_v52  ;;  %v1958_v54 = vld [vmem:[%s7764_s13 + $0x1118] sm:$0xff] }
 0x28c   : > { %6566 = vmatpush1.bf16.msra.mxu0 %v6565_v3  ;;  %5928 = vmatprep.subr.bf16.mxu1 %v5927_v9  ;;  %v1928_v3 = vld [vmem:[%s7764_s13 + $0x1028] sm:$0xff] }
 0x28d   : > { %6568 = vmatprep.subr.bf16.mxu0 %v6567_v32  ;;  %v1932_v9 = vld [vmem:[%s7764_s13 + $0x1048] sm:$0xff]  ;;  %v5941_v32 = vpack.c.bf16 %v1926_v63, %v1921_v62  ;;  %v6581_v14 = vpack.c.bf16 %v1928_v3, %v1923_v0  ;;  %v1969_v62 = vld [vmem:[%s7764_s13 + $0x1170] sm:$0xff]  ;;  %v5953_v63 = vpack.c.bf16 %v1956_v50, %v1951_v8  ;;  %v6593_v0 = vpack.c.bf16 %v1958_v54, %v1953_v51  ;;  %v1999_v8 = vld [vmem:[%s7764_s13 + $0x1260] sm:$0xff] }
 0x28e   : > { %3218 = vmatmul.mubr.f32.vlgmr.msra.gmra.mrb[10].mxu1 %v8371_v30  ;;  %v5943_v15 = vpack.c.bf16 %v1937_v10, %v1932_v9  ;;  %v1961_v3 = vld [vmem:[%s7764_s13 + $0x1130] sm:$0xff]  ;;  %v1966_v9 = vld [vmem:[%s7764_s13 + $0x1158] sm:$0xff]  ;;  %v1963_v10 = vld [vmem:[%s7764_s13 + $0x1140] sm:$0xff] }
 0x28f   : > { %3928 = vmatmul.mubr.f32.vlgmr.msra.gmra.mrb[12].mxu0 %v8371_v30  ;;  %5930 = vmatpush1.bf16.msra.mxu1 %v5929_v19  ;;  %v6583_v19 = vpack.c.bf16 %v1939_v12, %v1934_v11  ;;  %v1968_v12 = vld [vmem:[%s7764_s13 + $0x1168] sm:$0xff]  ;;  %v5957_v17 = vpack.c.bf16 %v1966_v9, %v1961_v3  ;;  %v1991_v54 = vld [vmem:[%s7764_s13 + $0x1220] sm:$0xff]  ;;  %v2009_v3 = vld [vmem:[%s7764_s13 + $0x12b0] sm:$0xff] }
 0x290   : > { %3288 = vmatprep.mubr.f32.mxu1 %v8383_v6  ;;  %6570 = vmatpush1.bf16.msra.mxu0 %v6569_v21  ;;  %v1947_v21 = vld [vmem:[%s7764_s13 + $0x10c0] sm:$0xff] }
 0x291   : > { %3998 = vmatprep.mubr.f32.mxu0 %v8383_v6  ;;  %5932 = vmatprep.subr.bf16.mxu1 %v5931_v31  ;;  %v6585_v31 = vpack.c.bf16 %v1938_v7, %v1933_v18  ;;  %v5947_v33 = vpack.c.bf16 %v1947_v21, %v1942_v20  ;;  %v6597_v18 = vpack.c.bf16 %v1968_v12, %v1963_v10  ;;  %v1971_v7 = vld [vmem:[%s7764_s13 + $0x1180] sm:$0xff]  ;;  %v1976_v20 = vld [vmem:[%s7764_s13 + $0x11a8] sm:$0xff]  ;;  %v1973_v21 = vld [vmem:[%s7764_s13 + $0x1190] sm:$0xff] }
 0x292   : > { %6572 = vmatprep.subr.bf16.mxu0 %v6571_v36  ;;  %v1943_v36 = vld [vmem:[%s7764_s13 + $0x10a0] sm:$0xff]  ;;  %v5961_v35 = vpack.c.bf16 %v1976_v20, %v1971_v7  ;;  %v2001_v12 = vld [vmem:[%s7764_s13 + $0x1270] sm:$0xff] }
 0x293   : > { %5934 = vmatpush1.bf16.msra.mxu1 %v5933_v43  ;;  %v1952_v43 = vld [vmem:[%s7764_s13 + $0x10e8] sm:$0xff]  ;;  %v6589_v47 = vpack.c.bf16 %v1948_v40, %v1943_v36  ;;  %v6601_v36 = vpack.c.bf16 %v1978_v24, %v1973_v21  ;;  %v1981_v40 = vld [vmem:[%s7764_s13 + $0x11d0] sm:$0xff]  ;;  %v2019_v7 = vld [vmem:[%s7764_s13 + $0x1300] sm:$0xff] }
 0x294   : > { %6574 = vmatpush1.bf16.msra.mxu0 %v6573_v44  ;;  %5936 = vmatprep.subr.bf16.mxu1 %v5935_v23  ;;  %v1957_v44 = vld [vmem:[%s7764_s13 + $0x1110] sm:$0xff]  ;;  %v1954_v23 = vld [vmem:[%s7764_s13 + $0x10f8] sm:$0xff]  ;;  %v2011_v24 = vld [vmem:[%s7764_s13 + $0x12c0] sm:$0xff] }
 0x295   : > { %6576 = vmatprep.subr.bf16.mxu0 %v6575_v48  ;;  %v5951_v48 = vpack.c.bf16 %v1957_v44, %v1952_v43  ;;  %v6591_v52 = vpack.c.bf16 %v1959_v45, %v1954_v23  ;;  %v1986_v43 = vld [vmem:[%s7764_s13 + $0x11f8] sm:$0xff]  ;;  %v1983_v44 = vld [vmem:[%s7764_s13 + $0x11e0] sm:$0xff]  ;;  %v1988_v45 = vld [vmem:[%s7764_s13 + $0x1208] sm:$0xff] }
 0x296   : > { %v5965_v50 = vpack.c.bf16 %v1986_v43, %v1981_v40  ;;  %v6605_v51 = vpack.c.bf16 %v1988_v45, %v1983_v44  ;;  %v2029_v40 = vld [vmem:[%s7764_s13 + $0x1350] sm:$0xff] }
 0x297   : > { %5938 = vmatpush1.bf16.msra.mxu1 %v5937_v57  ;;  %v1962_v57 = vld [vmem:[%s7764_s13 + $0x1138] sm:$0xff]  ;;  %v2021_v45 = vld [vmem:[%s7764_s13 + $0x1310] sm:$0xff] }
 0x298   : > { %6578 = vmatpush1.bf16.msra.mxu0 %v6577_v58  ;;  %5940 = vmatprep.subr.bf16.mxu1 %v5939_v61  ;;  %v1967_v58 = vld [vmem:[%s7764_s13 + $0x1160] sm:$0xff]  ;;  %v1964_v61 = vld [vmem:[%s7764_s13 + $0x1148] sm:$0xff] }
 0x299   : > { %6580 = vmatprep.subr.bf16.mxu0 %v6579_v1  ;;  %v5955_v1 = vpack.c.bf16 %v1967_v58, %v1962_v57  ;;  %v6595_v11 = vpack.c.bf16 %v1969_v62, %v1964_v61  ;;  %v1996_v57 = vld [vmem:[%s7764_s13 + $0x1248] sm:$0xff]  ;;  %v1993_v58 = vld [vmem:[%s7764_s13 + $0x1230] sm:$0xff]  ;;  %v1998_v62 = vld [vmem:[%s7764_s13 + $0x1258] sm:$0xff] }
 0x29a   : > { %v5969_v9 = vpack.c.bf16 %v1996_v57, %v1991_v54  ;;  %v6609_v10 = vpack.c.bf16 %v1998_v62, %v1993_v58  ;;  %v2039_v54 = vld [vmem:[%s7764_s13 + $0x13a0] sm:$0xff] }
 0x29b   : > { %5942 = vmatpush1.bf16.msra.mxu1 %v5941_v32  ;;  %v1972_v32 = vld [vmem:[%s7764_s13 + $0x1188] sm:$0xff]  ;;  %v2031_v62 = vld [vmem:[%s7764_s13 + $0x1360] sm:$0xff] }
 0x29c   : > { %6582 = vmatpush1.bf16.msra.mxu0 %v6581_v14  ;;  %5944 = vmatprep.subr.bf16.mxu1 %v5943_v15  ;;  %v1977_v14 = vld [vmem:[%s7764_s13 + $0x11b0] sm:$0xff]  ;;  %v1974_v15 = vld [vmem:[%s7764_s13 + $0x1198] sm:$0xff] }
 0x29d   : > { %6584 = vmatprep.subr.bf16.mxu0 %v6583_v19  ;;  %v5959_v19 = vpack.c.bf16 %v1977_v14, %v1972_v32  ;;  %v6599_v22 = vpack.c.bf16 %v1979_v16, %v1974_v15  ;;  %v2006_v32 = vld [vmem:[%s7764_s13 + $0x1298] sm:$0xff]  ;;  %v2003_v14 = vld [vmem:[%s7764_s13 + $0x1280] sm:$0xff]  ;;  %v2008_v16 = vld [vmem:[%s7764_s13 + $0x12a8] sm:$0xff] }
 0x29e   : > { %v5973_v20 = vpack.c.bf16 %v2006_v32, %v2001_v12  ;;  %v6613_v21 = vpack.c.bf16 %v2008_v16, %v2003_v14  ;;  %v2049_v12 = vld [vmem:[%s7764_s13 + $0x13f0] sm:$0xff] }
 0x29f   : > { %5946 = vmatpush1.bf16.msra.mxu1 %v5945_v29  ;;  %v1982_v29 = vld [vmem:[%s7764_s13 + $0x11d8] sm:$0xff]  ;;  %v2041_v16 = vld [vmem:[%s7764_s13 + $0x13b0] sm:$0xff] }
 0x2a0   : > { %6586 = vmatpush1.bf16.msra.mxu0 %v6585_v31  ;;  %5948 = vmatprep.subr.bf16.mxu1 %v5947_v33  ;;  %v1987_v31 = vld [vmem:[%s7764_s13 + $0x1200] sm:$0xff]  ;;  %v1984_v33 = vld [vmem:[%s7764_s13 + $0x11e8] sm:$0xff] }
 0x2a1   : > { %6588 = vmatprep.subr.bf16.mxu0 %v6587_v39  ;;  %v5963_v39 = vpack.c.bf16 %v1987_v31, %v1982_v29  ;;  %v6603_v23 = vpack.c.bf16 %v1989_v34, %v1984_v33  ;;  %v2016_v29 = vld [vmem:[%s7764_s13 + $0x12e8] sm:$0xff]  ;;  %v2013_v31 = vld [vmem:[%s7764_s13 + $0x12d0] sm:$0xff]  ;;  %v2018_v34 = vld [vmem:[%s7764_s13 + $0x12f8] sm:$0xff] }
 0x2a2   : > { %v5977_v43 = vpack.c.bf16 %v2016_v29, %v2011_v24  ;;  %v6617_v44 = vpack.c.bf16 %v2018_v34, %v2013_v31  ;;  %v2059_v24 = vld [vmem:[%s7764_s13 + $0x1440] sm:$0xff] }
 0x2a3   : > { %5950 = vmatpush1.bf16.msra.mxu1 %v5949_v46  ;;  %v1992_v46 = vld [vmem:[%s7764_s13 + $0x1228] sm:$0xff]  ;;  %v2051_v34 = vld [vmem:[%s7764_s13 + $0x1400] sm:$0xff] }
 0x2a4   : > { %6590 = vmatpush1.bf16.msra.mxu0 %v6589_v47  ;;  %5952 = vmatprep.subr.bf16.mxu1 %v5951_v48  ;;  %v1997_v47 = vld [vmem:[%s7764_s13 + $0x1250] sm:$0xff]  ;;  %v1994_v48 = vld [vmem:[%s7764_s13 + $0x1238] sm:$0xff] }
 0x2a5   : > { %6592 = vmatprep.subr.bf16.mxu0 %v6591_v52  ;;  %v5967_v52 = vpack.c.bf16 %v1997_v47, %v1992_v46  ;;  %v6607_v61 = vpack.c.bf16 %v1999_v8, %v1994_v48  ;;  %v2026_v46 = vld [vmem:[%s7764_s13 + $0x1338] sm:$0xff]  ;;  %v2023_v47 = vld [vmem:[%s7764_s13 + $0x1320] sm:$0xff]  ;;  %v2028_v8 = vld [vmem:[%s7764_s13 + $0x1348] sm:$0xff] }
 0x2a6   : > { %v5981_v57 = vpack.c.bf16 %v2026_v46, %v2021_v45  ;;  %v6621_v58 = vpack.c.bf16 %v2028_v8, %v2023_v47  ;;  %v1378_v45 = vmul.f32 0.01, %v8100_v37  ;;  %v2064_v47 = vld [vmem:[%s7764_s13 + $0x1468] sm:$0xff] }
 0x2a7   : > { %5954 = vmatpush1.bf16.msra.mxu1 %v5953_v63  ;;  %v2002_v63 = vld [vmem:[%s7764_s13 + $0x1278] sm:$0xff] }
 0x2a8   : > { %6594 = vmatpush1.bf16.msra.mxu0 %v6593_v0  ;;  %5956 = vmatprep.subr.bf16.mxu1 %v5955_v1  ;;  %v2007_v0 = vld [vmem:[%s7764_s13 + $0x12a0] sm:$0xff]  ;;  %v2004_v1 = vld [vmem:[%s7764_s13 + $0x1288] sm:$0xff] }
 0x2a9   : > { %6596 = vmatprep.subr.bf16.mxu0 %v6595_v11  ;;  %v5971_v11 = vpack.c.bf16 %v2007_v0, %v2002_v63  ;;  %v6611_v15 = vpack.c.bf16 %v2009_v3, %v2004_v1  ;;  %v2036_v63 = vld [vmem:[%s7764_s13 + $0x1388] sm:$0xff]  ;;  %v2033_v0 = vld [vmem:[%s7764_s13 + $0x1370] sm:$0xff]  ;;  %v2038_v3 = vld [vmem:[%s7764_s13 + $0x1398] sm:$0xff] }
 0x2aa   : > { %v5985_v32 = vpack.c.bf16 %v2036_v63, %v2031_v62  ;;  %v6625_v14 = vpack.c.bf16 %v2038_v3, %v2033_v0  ;;  %v2077_v62 = vld [vmem:[%s7764_s13 + $0x14d0] sm:$0xff]  ;;  %v2074_v0 = vld [vmem:[%s7764_s13 + $0x14b8] sm:$0xff] }
 0x2ab   : > { %5958 = vmatpush1.bf16.msra.mxu1 %v5957_v17  ;;  %v2012_v17 = vld [vmem:[%s7764_s13 + $0x12c8] sm:$0xff] }
 0x2ac   : > { %6598 = vmatpush1.bf16.msra.mxu0 %v6597_v18  ;;  %5960 = vmatprep.subr.bf16.mxu1 %v5959_v19  ;;  %v2017_v18 = vld [vmem:[%s7764_s13 + $0x12f0] sm:$0xff]  ;;  %v2014_v19 = vld [vmem:[%s7764_s13 + $0x12d8] sm:$0xff] }
 0x2ad   : > { %6600 = vmatprep.subr.bf16.mxu0 %v6599_v22  ;;  %v5975_v22 = vpack.c.bf16 %v2017_v18, %v2012_v17  ;;  %v6615_v33 = vpack.c.bf16 %v2019_v7, %v2014_v19  ;;  %v2046_v17 = vld [vmem:[%s7764_s13 + $0x13d8] sm:$0xff]  ;;  %v2043_v18 = vld [vmem:[%s7764_s13 + $0x13c0] sm:$0xff]  ;;  %v2048_v7 = vld [vmem:[%s7764_s13 + $0x13e8] sm:$0xff] }
 0x2ae   : > { %v5989_v29 = vpack.c.bf16 %v2046_v17, %v2041_v16  ;;  %v6629_v31 = vpack.c.bf16 %v2048_v7, %v2043_v18  ;;  %v2087_v16 = vld [vmem:[%s7764_s13 + $0x1520] sm:$0xff]  ;;  %v2084_v17 = vld [vmem:[%s7764_s13 + $0x1508] sm:$0xff]  ;;  %v2089_v18 = vld [vmem:[%s7764_s13 + $0x1530] sm:$0xff] }
 0x2af   : > { %5962 = vmatpush1.bf16.msra.mxu1 %v5961_v35  ;;  %v2022_v35 = vld [vmem:[%s7764_s13 + $0x1318] sm:$0xff] }
 0x2b0   : > { %6602 = vmatpush1.bf16.msra.mxu0 %v6601_v36  ;;  %5964 = vmatprep.subr.bf16.mxu1 %v5963_v39  ;;  %v2027_v36 = vld [vmem:[%s7764_s13 + $0x1340] sm:$0xff]  ;;  %v2024_v39 = vld [vmem:[%s7764_s13 + $0x1328] sm:$0xff] }
 0x2b1   : > { %6604 = vmatprep.subr.bf16.mxu0 %v6603_v23  ;;  %v5979_v23 = vpack.c.bf16 %v2027_v36, %v2022_v35  ;;  %v6619_v48 = vpack.c.bf16 %v2029_v40, %v2024_v39  ;;  %v2056_v35 = vld [vmem:[%s7764_s13 + $0x1428] sm:$0xff]  ;;  %v1375_v36 = vmul.f32 0.01, %v8064_v59  ;;  %v2053_v40 = vld [vmem:[%s7764_s13 + $0x1410] sm:$0xff] }
 0x2b2   : > { %v5993_v46 = vpack.c.bf16 %v2056_v35, %v2051_v34  ;;  %v2097_v34 = vld [vmem:[%s7764_s13 + $0x1570] sm:$0xff]  ;;  %v2094_v35 = vld [vmem:[%s7764_s13 + $0x1558] sm:$0xff] }
 0x2b3   : > { %5966 = vmatpush1.bf16.msra.mxu1 %v5965_v50  ;;  %v2032_v50 = vld [vmem:[%s7764_s13 + $0x1368] sm:$0xff] }
 0x2b4   : > { %6606 = vmatpush1.bf16.msra.mxu0 %v6605_v51  ;;  %5968 = vmatprep.subr.bf16.mxu1 %v5967_v52  ;;  %v2037_v51 = vld [vmem:[%s7764_s13 + $0x1390] sm:$0xff]  ;;  %v2034_v52 = vld [vmem:[%s7764_s13 + $0x1378] sm:$0xff] }
 0x2b5   : > { %6608 = vmatprep.subr.bf16.mxu0 %v6607_v61  ;;  %v5983_v61 = vpack.c.bf16 %v2037_v51, %v2032_v50  ;;  %v6623_v1 = vpack.c.bf16 %v2039_v54, %v2034_v52  ;;  %v2061_v50 = vld [vmem:[%s7764_s13 + $0x1450] sm:$0xff]  ;;  %v2066_v51 = vld [vmem:[%s7764_s13 + $0x1478] sm:$0xff]  ;;  %v2063_v52 = vld [vmem:[%s7764_s13 + $0x1460] sm:$0xff]  ;;  %v8515_v54 = vsel %vm1355_vm10, %v8064_v59, %v1375_v36  ;;  %v8527_v59 = vsel %vm1358_vm11, %v8100_v37, %v1378_v45 }
 0x2b6   : > { %v5997_v3 = vpack.c.bf16 %v2066_v51, %v2061_v50  ;;  %v2078_v37 = vld [vmem:[%s7764_s13 + $0x14d8] sm:$0xff]  ;;  %v2099_v36 = vld [vmem:[%s7764_s13 + $0x1580] sm:$0xff]  ;;  %v2093_v45 = vld [vmem:[%s7764_s13 + $0x1550] sm:$0xff] }
 0x2b7   : > { %5970 = vmatpush1.bf16.msra.mxu1 %v5969_v9  ;;  %v2042_v9 = vld [vmem:[%s7764_s13 + $0x13b8] sm:$0xff]  ;;  %v2104_v50 = vld [vmem:[%s7764_s13 + $0x15a8] sm:$0xff]  ;;  %v2109_v51 = vld [vmem:[%s7764_s13 + $0x15d0] sm:$0xff] }
 0x2b8   : > { %6610 = vmatpush1.bf16.msra.mxu0 %v6609_v10  ;;  %5972 = vmatprep.subr.bf16.mxu1 %v5971_v11  ;;  %v2047_v10 = vld [vmem:[%s7764_s13 + $0x13e0] sm:$0xff]  ;;  %v2044_v11 = vld [vmem:[%s7764_s13 + $0x13c8] sm:$0xff] }
 0x2b9   : > { %6612 = vmatprep.subr.bf16.mxu0 %v6611_v15  ;;  %v5987_v15 = vpack.c.bf16 %v2047_v10, %v2042_v9  ;;  %v6627_v19 = vpack.c.bf16 %v2049_v12, %v2044_v11  ;;  %v2071_v11 = vld [vmem:[%s7764_s13 + $0x14a0] sm:$0xff]  ;;  %v2076_v12 = vld [vmem:[%s7764_s13 + $0x14c8] sm:$0xff] }
 0x2bb   : > { %5974 = vmatpush1.bf16.msra.mxu1 %v5973_v20  ;;  %v2052_v20 = vld [vmem:[%s7764_s13 + $0x1408] sm:$0xff] }
 0x2bc   : > { %6614 = vmatpush1.bf16.msra.mxu0 %v6613_v21  ;;  %5976 = vmatprep.subr.bf16.mxu1 %v5975_v22  ;;  %v2057_v21 = vld [vmem:[%s7764_s13 + $0x1430] sm:$0xff]  ;;  %v2054_v22 = vld [vmem:[%s7764_s13 + $0x1418] sm:$0xff] }
 0x2bd   : > { %6616 = vmatprep.subr.bf16.mxu0 %v6615_v33  ;;  %v5991_v33 = vpack.c.bf16 %v2057_v21, %v2052_v20  ;;  %v6631_v39 = vpack.c.bf16 %v2059_v24, %v2054_v22  ;;  %v2081_v21 = vld [vmem:[%s7764_s13 + $0x14f0] sm:$0xff]  ;;  %v2086_v22 = vld [vmem:[%s7764_s13 + $0x1518] sm:$0xff]  ;;  %v2083_v24 = vld [vmem:[%s7764_s13 + $0x1500] sm:$0xff] }
 0x2bf   : > { %5978 = vmatpush1.bf16.msra.mxu1 %v5977_v43  ;;  %v2058_v43 = vld [vmem:[%s7764_s13 + $0x1438] sm:$0xff] }
 0x2c0   : > { %6618 = vmatpush1.bf16.msra.mxu0 %v6617_v44  ;;  %5980 = vmatprep.subr.bf16.mxu1 %v5979_v23  ;;  %v2062_v44 = vld [vmem:[%s7764_s13 + $0x1458] sm:$0xff]  ;;  %v2067_v23 = vld [vmem:[%s7764_s13 + $0x1480] sm:$0xff]  ;;  %v6633_v8 = vpack.c.bf16 %v2058_v43, %v2053_v40 }
 0x2c1   : > { %6620 = vmatprep.subr.bf16.mxu0 %v6619_v48  ;;  %v2069_v48 = vld [vmem:[%s7764_s13 + $0x1490] sm:$0xff] }
 0x2c2   : > { %v6635_v63 = vpack.c.bf16 %v2069_v48, %v2064_v47  ;;  %v2098_v47 = vld [vmem:[%s7764_s13 + $0x1578] sm:$0xff] }
 0x2c3   : > { %5982 = vmatpush1.bf16.msra.mxu1 %v5981_v57  ;;  %v5995_v57 = vpack.c.bf16 %v2067_v23, %v2062_v44  ;;  %v2091_v44 = vld [vmem:[%s7764_s13 + $0x1540] sm:$0xff]  ;;  %v2096_v23 = vld [vmem:[%s7764_s13 + $0x1568] sm:$0xff]  ;;  %v2102_v48 = vld [vmem:[%s7764_s13 + $0x1598] sm:$0xff] }
 0x2c4   : > { %6622 = vmatpush1.bf16.msra.mxu0 %v6621_v58  ;;  %5984 = vmatprep.subr.bf16.mxu1 %v5983_v61  ;;  %v2068_v58 = vld [vmem:[%s7764_s13 + $0x1488] sm:$0xff] }
 0x2c5   : > { %6624 = vmatprep.subr.bf16.mxu0 %v6623_v1  ;;  %v2072_v61 = vld [vmem:[%s7764_s13 + $0x14a8] sm:$0xff]  ;;  %v2079_v1 = vld [vmem:[%s7764_s13 + $0x14e0] sm:$0xff]  ;;  %v6637_v9 = vpack.c.bf16 %v2068_v58, %v2063_v52  ;;  %v6009_v52 = vpack.c.bf16 %v2096_v23, %v2091_v44 }
 0x2c6   : > { %v5999_v10 = vpack.c.bf16 %v2077_v62, %v2072_v61  ;;  %v2101_v61 = vld [vmem:[%s7764_s13 + $0x1590] sm:$0xff]  ;;  %v2106_v62 = vld [vmem:[%s7764_s13 + $0x15b8] sm:$0xff]  ;;  %v2139_v44 = vld [vmem:[%s7764_s13 + $0x16c0] sm:$0xff] }
 0x2c7   : > { %5986 = vmatpush1.bf16.msra.mxu1 %v5985_v32  ;;  %v2073_v32 = vld [vmem:[%s7764_s13 + $0x14b0] sm:$0xff] }
 0x2c8   : > { %6626 = vmatpush1.bf16.msra.mxu0 %v6625_v14  ;;  %5988 = vmatprep.subr.bf16.mxu1 %v5987_v15  ;;  %v6639_v14 = vpack.c.bf16 %v2079_v1, %v2074_v0  ;;  %v2082_v15 = vld [vmem:[%s7764_s13 + $0x14f8] sm:$0xff]  ;;  %v6641_v7 = vpack.c.bf16 %v2078_v37, %v2073_v32  ;;  %v6651_v0 = vpack.c.bf16 %v2109_v51, %v2104_v50  ;;  %v2108_v1 = vld [vmem:[%s7764_s13 + $0x15c8] sm:$0xff]  ;;  %v2111_v37 = vld [vmem:[%s7764_s13 + $0x15e0] sm:$0xff] }
 0x2c9   : > { %6628 = vmatprep.subr.bf16.mxu0 %v6627_v19  ;;  %v6001_v19 = vpack.c.bf16 %v2076_v12, %v2071_v11  ;;  %v6003_v20 = vpack.c.bf16 %v2087_v16, %v2082_v15  ;;  %v2119_v11 = vld [vmem:[%s7764_s13 + $0x1620] sm:$0xff]  ;;  %v6013_v12 = vpack.c.bf16 %v2106_v62, %v2101_v61  ;;  %v2116_v15 = vld [vmem:[%s7764_s13 + $0x1608] sm:$0xff]  ;;  %v2113_v16 = vld [vmem:[%s7764_s13 + $0x15f0] sm:$0xff] }
 0x2ca   : > { %v2138_v51 = vld [vmem:[%s7764_s13 + $0x16b8] sm:$0xff]  ;;  %v2149_v61 = vld [vmem:[%s7764_s13 + $0x1710] sm:$0xff] }
 0x2cb   : > { %5990 = vmatpush1.bf16.msra.mxu1 %v5989_v29  ;;  %v6643_v29 = vpack.c.bf16 %v2089_v18, %v2084_v17  ;;  %v2118_v18 = vld [vmem:[%s7764_s13 + $0x1618] sm:$0xff] }
 0x2cc   : > { %6630 = vmatpush1.bf16.msra.mxu0 %v6629_v31  ;;  %5992 = vmatprep.subr.bf16.mxu1 %v5991_v33  ;;  %v2088_v31 = vld [vmem:[%s7764_s13 + $0x1528] sm:$0xff] }
 0x2cd   : > { %6632 = vmatprep.subr.bf16.mxu0 %v6631_v39  ;;  %v2092_v33 = vld [vmem:[%s7764_s13 + $0x1548] sm:$0xff]  ;;  %v6005_v39 = vpack.c.bf16 %v2086_v22, %v2081_v21  ;;  %v6645_v40 = vpack.c.bf16 %v2088_v31, %v2083_v24  ;;  %v2129_v21 = vld [vmem:[%s7764_s13 + $0x1670] sm:$0xff]  ;;  %v6017_v22 = vpack.c.bf16 %v2116_v15, %v2111_v37  ;;  %v6657_v24 = vpack.c.bf16 %v2118_v18, %v2113_v16  ;;  %v2159_v37 = vld [vmem:[%s7764_s13 + $0x1760] sm:$0xff] }
 0x2ce   : > { %3289 = vmatmul.mubr.f32.vlgmr.msra.gmra.mrb[10].mxu1 %v8515_v54  ;;  %v6007_v43 = vpack.c.bf16 %v2097_v34, %v2092_v33  ;;  %v2121_v31 = vld [vmem:[%s7764_s13 + $0x1630] sm:$0xff]  ;;  %v2126_v33 = vld [vmem:[%s7764_s13 + $0x1658] sm:$0xff]  ;;  %v2123_v34 = vld [vmem:[%s7764_s13 + $0x1640] sm:$0xff] }
 0x2cf   : > { %3999 = vmatmul.mubr.f32.vlgmr.msra.gmra.mrb[12].mxu0 %v8515_v54  ;;  %5994 = vmatpush1.bf16.msra.mxu1 %v5993_v46  ;;  %v6647_v46 = vpack.c.bf16 %v2099_v36, %v2094_v35  ;;  %v2128_v36 = vld [vmem:[%s7764_s13 + $0x1668] sm:$0xff]  ;;  %v6021_v23 = vpack.c.bf16 %v2126_v33, %v2121_v31  ;;  %v2151_v18 = vld [vmem:[%s7764_s13 + $0x1720] sm:$0xff]  ;;  %v2169_v31 = vld [vmem:[%s7764_s13 + $0x17b0] sm:$0xff] }
 0x2d0   : > { %3359 = vmatprep.mubr.f32.mxu1 %v8527_v59  ;;  %6634 = vmatpush1.bf16.msra.mxu0 %v6633_v8  ;;  %v2107_v8 = vld [vmem:[%s7764_s13 + $0x15c0] sm:$0xff] }
 0x2d1   : > { %4069 = vmatprep.mubr.f32.mxu0 %v8527_v59  ;;  %5996 = vmatprep.subr.bf16.mxu1 %v5995_v57  ;;  %v6649_v57 = vpack.c.bf16 %v2098_v47, %v2093_v45  ;;  %v6011_v58 = vpack.c.bf16 %v2107_v8, %v2102_v48  ;;  %v6661_v45 = vpack.c.bf16 %v2128_v36, %v2123_v34  ;;  %v2131_v47 = vld [vmem:[%s7764_s13 + $0x1680] sm:$0xff]  ;;  %v2136_v48 = vld [vmem:[%s7764_s13 + $0x16a8] sm:$0xff]  ;;  %v2133_v8 = vld [vmem:[%s7764_s13 + $0x1690] sm:$0xff] }
 0x2d2   : > { %6636 = vmatprep.subr.bf16.mxu0 %v6635_v63  ;;  %v2103_v63 = vld [vmem:[%s7764_s13 + $0x15a0] sm:$0xff]  ;;  %v6025_v62 = vpack.c.bf16 %v2136_v48, %v2131_v47  ;;  %v2161_v36 = vld [vmem:[%s7764_s13 + $0x1770] sm:$0xff] }
 0x2d3   : > { %5998 = vmatpush1.bf16.msra.mxu1 %v5997_v3  ;;  %v2112_v3 = vld [vmem:[%s7764_s13 + $0x15e8] sm:$0xff]  ;;  %v6653_v32 = vpack.c.bf16 %v2108_v1, %v2103_v63  ;;  %v6665_v63 = vpack.c.bf16 %v2138_v51, %v2133_v8  ;;  %v2141_v1 = vld [vmem:[%s7764_s13 + $0x16d0] sm:$0xff]  ;;  %v2179_v47 = vld [vmem:[%s7764_s13 + $0x1800] sm:$0xff] }
 0x2d4   : > { %6638 = vmatpush1.bf16.msra.mxu0 %v6637_v9  ;;  %6000 = vmatprep.subr.bf16.mxu1 %v5999_v10  ;;  %v2117_v9 = vld [vmem:[%s7764_s13 + $0x1610] sm:$0xff]  ;;  %v2114_v10 = vld [vmem:[%s7764_s13 + $0x15f8] sm:$0xff]  ;;  %v2171_v51 = vld [vmem:[%s7764_s13 + $0x17c0] sm:$0xff] }
 0x2d5   : > { %6640 = vmatprep.subr.bf16.mxu0 %v6639_v14  ;;  %v6015_v14 = vpack.c.bf16 %v2117_v9, %v2112_v3  ;;  %v6655_v17 = vpack.c.bf16 %v2119_v11, %v2114_v10  ;;  %v2146_v3 = vld [vmem:[%s7764_s13 + $0x16f8] sm:$0xff]  ;;  %v2143_v9 = vld [vmem:[%s7764_s13 + $0x16e0] sm:$0xff]  ;;  %v2148_v11 = vld [vmem:[%s7764_s13 + $0x1708] sm:$0xff] }
 0x2d6   : > { %v6029_v15 = vpack.c.bf16 %v2146_v3, %v2141_v1  ;;  %v6669_v16 = vpack.c.bf16 %v2148_v11, %v2143_v9  ;;  %v2189_v1 = vld [vmem:[%s7764_s13 + $0x1850] sm:$0xff] }
 0x2d7   : > { %6002 = vmatpush1.bf16.msra.mxu1 %v6001_v19  ;;  %v2122_v19 = vld [vmem:[%s7764_s13 + $0x1638] sm:$0xff]  ;;  %v2181_v11 = vld [vmem:[%s7764_s13 + $0x1810] sm:$0xff] }
 0x2d8   : > { %6642 = vmatpush1.bf16.msra.mxu0 %v6641_v7  ;;  %6004 = vmatprep.subr.bf16.mxu1 %v6003_v20  ;;  %v2127_v7 = vld [vmem:[%s7764_s13 + $0x1660] sm:$0xff]  ;;  %v2124_v20 = vld [vmem:[%s7764_s13 + $0x1648] sm:$0xff] }
 0x2d9   : > { %6644 = vmatprep.subr.bf16.mxu0 %v6643_v29  ;;  %v6019_v29 = vpack.c.bf16 %v2127_v7, %v2122_v19  ;;  %v6659_v35 = vpack.c.bf16 %v2129_v21, %v2124_v20  ;;  %v2156_v19 = vld [vmem:[%s7764_s13 + $0x1748] sm:$0xff]  ;;  %v2153_v7 = vld [vmem:[%s7764_s13 + $0x1730] sm:$0xff]  ;;  %v2158_v21 = vld [vmem:[%s7764_s13 + $0x1758] sm:$0xff] }
 0x2da   : > { %v6033_v33 = vpack.c.bf16 %v2156_v19, %v2151_v18  ;;  %v6673_v34 = vpack.c.bf16 %v2158_v21, %v2153_v7  ;;  %v2199_v18 = vld [vmem:[%s7764_s13 + $0x18a0] sm:$0xff] }
 0x2db   : > { %6006 = vmatpush1.bf16.msra.mxu1 %v6005_v39  ;;  %v2132_v39 = vld [vmem:[%s7764_s13 + $0x1688] sm:$0xff]  ;;  %v2191_v21 = vld [vmem:[%s7764_s13 + $0x1860] sm:$0xff] }
 0x2dc   : > { %6646 = vmatpush1.bf16.msra.mxu0 %v6645_v40  ;;  %6008 = vmatprep.subr.bf16.mxu1 %v6007_v43  ;;  %v2137_v40 = vld [vmem:[%s7764_s13 + $0x16b0] sm:$0xff]  ;;  %v2134_v43 = vld [vmem:[%s7764_s13 + $0x1698] sm:$0xff] }
 0x2dd   : > { %6648 = vmatprep.subr.bf16.mxu0 %v6647_v46  ;;  %v6023_v46 = vpack.c.bf16 %v2137_v40, %v2132_v39  ;;  %v6663_v50 = vpack.c.bf16 %v2139_v44, %v2134_v43  ;;  %v2166_v39 = vld [vmem:[%s7764_s13 + $0x1798] sm:$0xff]  ;;  %v2163_v40 = vld [vmem:[%s7764_s13 + $0x1780] sm:$0xff]  ;;  %v2168_v44 = vld [vmem:[%s7764_s13 + $0x17a8] sm:$0xff] }
 0x2de   : > { %v6037_v48 = vpack.c.bf16 %v2166_v39, %v2161_v36  ;;  %v6677_v8 = vpack.c.bf16 %v2168_v44, %v2163_v40  ;;  %v2209_v36 = vld [vmem:[%s7764_s13 + $0x18f0] sm:$0xff] }
 0x2df   : > { %6010 = vmatpush1.bf16.msra.mxu1 %v6009_v52  ;;  %v2142_v52 = vld [vmem:[%s7764_s13 + $0x16d8] sm:$0xff]  ;;  %v2201_v44 = vld [vmem:[%s7764_s13 + $0x18b0] sm:$0xff] }
 0x2e0   : > { %6650 = vmatpush1.bf16.msra.mxu0 %v6649_v57  ;;  %6012 = vmatprep.subr.bf16.mxu1 %v6011_v58  ;;  %v2147_v57 = vld [vmem:[%s7764_s13 + $0x1700] sm:$0xff]  ;;  %v2144_v58 = vld [vmem:[%s7764_s13 + $0x16e8] sm:$0xff] }
 0x2e1   : > { %6652 = vmatprep.subr.bf16.mxu0 %v6651_v0  ;;  %v6027_v0 = vpack.c.bf16 %v2147_v57, %v2142_v52  ;;  %v6667_v10 = vpack.c.bf16 %v2149_v61, %v2144_v58  ;;  %v2176_v52 = vld [vmem:[%s7764_s13 + $0x17e8] sm:$0xff]  ;;  %v2173_v57 = vld [vmem:[%s7764_s13 + $0x17d0] sm:$0xff]  ;;  %v2178_v61 = vld [vmem:[%s7764_s13 + $0x17f8] sm:$0xff] }
 0x2e2   : > { %v6041_v3 = vpack.c.bf16 %v2176_v52, %v2171_v51  ;;  %v6681_v9 = vpack.c.bf16 %v2178_v61, %v2173_v57  ;;  %v2219_v51 = vld [vmem:[%s7764_s13 + $0x1940] sm:$0xff] }
 0x2e3   : > { %6014 = vmatpush1.bf16.msra.mxu1 %v6013_v12  ;;  %v2152_v12 = vld [vmem:[%s7764_s13 + $0x1728] sm:$0xff]  ;;  %v2211_v61 = vld [vmem:[%s7764_s13 + $0x1900] sm:$0xff] }
 0x2e4   : > { %6654 = vmatpush1.bf16.msra.mxu0 %v6653_v32  ;;  %6016 = vmatprep.subr.bf16.mxu1 %v6015_v14  ;;  %v2157_v32 = vld [vmem:[%s7764_s13 + $0x1750] sm:$0xff]  ;;  %v2154_v14 = vld [vmem:[%s7764_s13 + $0x1738] sm:$0xff] }
 0x2e5   : > { %6656 = vmatprep.subr.bf16.mxu0 %v6655_v17  ;;  %v6031_v17 = vpack.c.bf16 %v2157_v32, %v2152_v12  ;;  %v6671_v20 = vpack.c.bf16 %v2159_v37, %v2154_v14  ;;  %v2186_v12 = vld [vmem:[%s7764_s13 + $0x1838] sm:$0xff]  ;;  %v2183_v32 = vld [vmem:[%s7764_s13 + $0x1820] sm:$0xff]  ;;  %v2188_v37 = vld [vmem:[%s7764_s13 + $0x1848] sm:$0xff] }
 0x2e6   : > { %v6045_v19 = vpack.c.bf16 %v2186_v12, %v2181_v11  ;;  %v6685_v7 = vpack.c.bf16 %v2188_v37, %v2183_v32  ;;  %v1380_v11 = vmul.f32 0.01, %v8102_v38  ;;  %v2224_v32 = vld [vmem:[%s7764_s13 + $0x1968] sm:$0xff] }
 0x2e7   : > { %6018 = vmatpush1.bf16.msra.mxu1 %v6017_v22  ;;  %v2162_v22 = vld [vmem:[%s7764_s13 + $0x1778] sm:$0xff] }
 0x2e8   : > { %6658 = vmatpush1.bf16.msra.mxu0 %v6657_v24  ;;  %6020 = vmatprep.subr.bf16.mxu1 %v6019_v29  ;;  %v2167_v24 = vld [vmem:[%s7764_s13 + $0x17a0] sm:$0xff]  ;;  %v2164_v29 = vld [vmem:[%s7764_s13 + $0x1788] sm:$0xff] }
 0x2e9   : > { %6660 = vmatprep.subr.bf16.mxu0 %v6659_v35  ;;  %v6035_v35 = vpack.c.bf16 %v2167_v24, %v2162_v22  ;;  %v6675_v43 = vpack.c.bf16 %v2169_v31, %v2164_v29  ;;  %v2196_v22 = vld [vmem:[%s7764_s13 + $0x1888] sm:$0xff]  ;;  %v2193_v24 = vld [vmem:[%s7764_s13 + $0x1870] sm:$0xff]  ;;  %v2198_v31 = vld [vmem:[%s7764_s13 + $0x1898] sm:$0xff] }
 0x2ea   : > { %v6049_v39 = vpack.c.bf16 %v2196_v22, %v2191_v21  ;;  %v6689_v40 = vpack.c.bf16 %v2198_v31, %v2193_v24  ;;  %v2237_v21 = vld [vmem:[%s7764_s13 + $0x19d0] sm:$0xff]  ;;  %v2234_v24 = vld [vmem:[%s7764_s13 + $0x19b8] sm:$0xff] }
 0x2eb   : > { %6022 = vmatpush1.bf16.msra.mxu1 %v6021_v23  ;;  %v2172_v23 = vld [vmem:[%s7764_s13 + $0x17c8] sm:$0xff] }
 0x2ec   : > { %6662 = vmatpush1.bf16.msra.mxu0 %v6661_v45  ;;  %6024 = vmatprep.subr.bf16.mxu1 %v6023_v46  ;;  %v2177_v45 = vld [vmem:[%s7764_s13 + $0x17f0] sm:$0xff]  ;;  %v2174_v46 = vld [vmem:[%s7764_s13 + $0x17d8] sm:$0xff] }
 0x2ed   : > { %6664 = vmatprep.subr.bf16.mxu0 %v6663_v50  ;;  %v6039_v50 = vpack.c.bf16 %v2177_v45, %v2172_v23  ;;  %v6679_v58 = vpack.c.bf16 %v2179_v47, %v2174_v46  ;;  %v2206_v23 = vld [vmem:[%s7764_s13 + $0x18d8] sm:$0xff]  ;;  %v2203_v45 = vld [vmem:[%s7764_s13 + $0x18c0] sm:$0xff]  ;;  %v2208_v47 = vld [vmem:[%s7764_s13 + $0x18e8] sm:$0xff] }
 0x2ee   : > { %v6053_v52 = vpack.c.bf16 %v2206_v23, %v2201_v44  ;;  %v6693_v57 = vpack.c.bf16 %v2208_v47, %v2203_v45  ;;  %v2247_v44 = vld [vmem:[%s7764_s13 + $0x1a20] sm:$0xff]  ;;  %v2244_v23 = vld [vmem:[%s7764_s13 + $0x1a08] sm:$0xff]  ;;  %v2249_v45 = vld [vmem:[%s7764_s13 + $0x1a30] sm:$0xff] }
 0x2ef   : > { %6026 = vmatpush1.bf16.msra.mxu1 %v6025_v62  ;;  %v2182_v62 = vld [vmem:[%s7764_s13 + $0x1818] sm:$0xff] }
 0x2f0   : > { %6666 = vmatpush1.bf16.msra.mxu0 %v6665_v63  ;;  %6028 = vmatprep.subr.bf16.mxu1 %v6027_v0  ;;  %v2187_v63 = vld [vmem:[%s7764_s13 + $0x1840] sm:$0xff]  ;;  %v2184_v0 = vld [vmem:[%s7764_s13 + $0x1828] sm:$0xff] }
 0x2f1   : > { %6668 = vmatprep.subr.bf16.mxu0 %v6667_v10  ;;  %v6043_v10 = vpack.c.bf16 %v2187_v63, %v2182_v62  ;;  %v6683_v14 = vpack.c.bf16 %v2189_v1, %v2184_v0  ;;  %v2216_v62 = vld [vmem:[%s7764_s13 + $0x1928] sm:$0xff]  ;;  %v1377_v63 = vmul.f32 0.01, %v8091_v25  ;;  %v2213_v1 = vld [vmem:[%s7764_s13 + $0x1910] sm:$0xff] }
 0x2f2   : > { %v6057_v12 = vpack.c.bf16 %v2216_v62, %v2211_v61  ;;  %v2257_v61 = vld [vmem:[%s7764_s13 + $0x1a70] sm:$0xff]  ;;  %v2254_v62 = vld [vmem:[%s7764_s13 + $0x1a58] sm:$0xff] }
 0x2f3   : > { %6030 = vmatpush1.bf16.msra.mxu1 %v6029_v15  ;;  %v2192_v15 = vld [vmem:[%s7764_s13 + $0x1868] sm:$0xff] }
 0x2f4   : > { %6670 = vmatpush1.bf16.msra.mxu0 %v6669_v16  ;;  %6032 = vmatprep.subr.bf16.mxu1 %v6031_v17  ;;  %v2197_v16 = vld [vmem:[%s7764_s13 + $0x1890] sm:$0xff]  ;;  %v2194_v17 = vld [vmem:[%s7764_s13 + $0x1878] sm:$0xff] }
 0x2f5   : > { %6672 = vmatprep.subr.bf16.mxu0 %v6671_v20  ;;  %v6047_v20 = vpack.c.bf16 %v2197_v16, %v2192_v15  ;;  %v6687_v29 = vpack.c.bf16 %v2199_v18, %v2194_v17  ;;  %v2221_v15 = vld [vmem:[%s7764_s13 + $0x1950] sm:$0xff]  ;;  %v2226_v16 = vld [vmem:[%s7764_s13 + $0x1978] sm:$0xff]  ;;  %v2223_v17 = vld [vmem:[%s7764_s13 + $0x1960] sm:$0xff]  ;;  %v8659_v18 = vsel %vm1357_vm12, %v8091_v25, %v1377_v63  ;;  %v8671_v25 = vsel %vm1360_vm13, %v8102_v38, %v1380_v11 }
 0x2f6   : > { %v6061_v31 = vpack.c.bf16 %v2226_v16, %v2221_v15  ;;  %v2238_v38 = vld [vmem:[%s7764_s13 + $0x19d8] sm:$0xff]  ;;  %v2259_v63 = vld [vmem:[%s7764_s13 + $0x1a80] sm:$0xff]  ;;  %v2253_v11 = vld [vmem:[%s7764_s13 + $0x1a50] sm:$0xff] }
 0x2f7   : > { %6034 = vmatpush1.bf16.msra.mxu1 %v6033_v33  ;;  %v2202_v33 = vld [vmem:[%s7764_s13 + $0x18b8] sm:$0xff]  ;;  %v2264_v15 = vld [vmem:[%s7764_s13 + $0x1aa8] sm:$0xff]  ;;  %v2269_v16 = vld [vmem:[%s7764_s13 + $0x1ad0] sm:$0xff] }
 0x2f8   : > { %6674 = vmatpush1.bf16.msra.mxu0 %v6673_v34  ;;  %6036 = vmatprep.subr.bf16.mxu1 %v6035_v35  ;;  %v2207_v34 = vld [vmem:[%s7764_s13 + $0x18e0] sm:$0xff]  ;;  %v2204_v35 = vld [vmem:[%s7764_s13 + $0x18c8] sm:$0xff] }
 0x2f9   : > { %6676 = vmatprep.subr.bf16.mxu0 %v6675_v43  ;;  %v6051_v43 = vpack.c.bf16 %v2207_v34, %v2202_v33  ;;  %v6691_v46 = vpack.c.bf16 %v2209_v36, %v2204_v35  ;;  %v2231_v35 = vld [vmem:[%s7764_s13 + $0x19a0] sm:$0xff]  ;;  %v2236_v36 = vld [vmem:[%s7764_s13 + $0x19c8] sm:$0xff] }
 0x2fb   : > { %6038 = vmatpush1.bf16.msra.mxu1 %v6037_v48  ;;  %v2212_v48 = vld [vmem:[%s7764_s13 + $0x1908] sm:$0xff] }
 0x2fc   : > { %6678 = vmatpush1.bf16.msra.mxu0 %v6677_v8  ;;  %6040 = vmatprep.subr.bf16.mxu1 %v6039_v50  ;;  %v2217_v8 = vld [vmem:[%s7764_s13 + $0x1930] sm:$0xff]  ;;  %v2214_v50 = vld [vmem:[%s7764_s13 + $0x1918] sm:$0xff] }
 0x2fd   : > { %6680 = vmatprep.subr.bf16.mxu0 %v6679_v58  ;;  %v6055_v58 = vpack.c.bf16 %v2217_v8, %v2212_v48  ;;  %v6695_v0 = vpack.c.bf16 %v2219_v51, %v2214_v50  ;;  %v2241_v8 = vld [vmem:[%s7764_s13 + $0x19f0] sm:$0xff]  ;;  %v2246_v50 = vld [vmem:[%s7764_s13 + $0x1a18] sm:$0xff]  ;;  %v2243_v51 = vld [vmem:[%s7764_s13 + $0x1a00] sm:$0xff] }
 0x2ff   : > { %6042 = vmatpush1.bf16.msra.mxu1 %v6041_v3  ;;  %v2218_v3 = vld [vmem:[%s7764_s13 + $0x1938] sm:$0xff] }
 0x300   : > { %6682 = vmatpush1.bf16.msra.mxu0 %v6681_v9  ;;  %6044 = vmatprep.subr.bf16.mxu1 %v6043_v10  ;;  %v2222_v9 = vld [vmem:[%s7764_s13 + $0x1958] sm:$0xff]  ;;  %v2227_v10 = vld [vmem:[%s7764_s13 + $0x1980] sm:$0xff]  ;;  %v6697_v37 = vpack.c.bf16 %v2218_v3, %v2213_v1 }
 0x301   : > { %6684 = vmatprep.subr.bf16.mxu0 %v6683_v14  ;;  %v2229_v14 = vld [vmem:[%s7764_s13 + $0x1990] sm:$0xff] }
 0x302   : > { %v6699_v22 = vpack.c.bf16 %v2229_v14, %v2224_v32  ;;  %v2258_v32 = vld [vmem:[%s7764_s13 + $0x1a78] sm:$0xff] }
 0x303   : > { %6046 = vmatpush1.bf16.msra.mxu1 %v6045_v19  ;;  %v6059_v19 = vpack.c.bf16 %v2227_v10, %v2222_v9  ;;  %v2251_v9 = vld [vmem:[%s7764_s13 + $0x1a40] sm:$0xff]  ;;  %v2256_v10 = vld [vmem:[%s7764_s13 + $0x1a68] sm:$0xff]  ;;  %v2262_v14 = vld [vmem:[%s7764_s13 + $0x1a98] sm:$0xff] }
 0x304   : > { %6686 = vmatpush1.bf16.msra.mxu0 %v6685_v7  ;;  %6048 = vmatprep.subr.bf16.mxu1 %v6047_v20  ;;  %v2228_v7 = vld [vmem:[%s7764_s13 + $0x1988] sm:$0xff] }
 0x305   : > { %6688 = vmatprep.subr.bf16.mxu0 %v6687_v29  ;;  %v2232_v20 = vld [vmem:[%s7764_s13 + $0x19a8] sm:$0xff]  ;;  %v2239_v29 = vld [vmem:[%s7764_s13 + $0x19e0] sm:$0xff]  ;;  %v6701_v33 = vpack.c.bf16 %v2228_v7, %v2223_v17  ;;  %v6073_v17 = vpack.c.bf16 %v2256_v10, %v2251_v9 }
 0x306   : > { %v6063_v34 = vpack.c.bf16 %v2237_v21, %v2232_v20  ;;  %v2261_v20 = vld [vmem:[%s7764_s13 + $0x1a90] sm:$0xff]  ;;  %v2266_v21 = vld [vmem:[%s7764_s13 + $0x1ab8] sm:$0xff]  ;;  %v2299_v9 = vld [vmem:[%s7764_s13 + $0x1bc0] sm:$0xff] }
 0x307   : > { %6050 = vmatpush1.bf16.msra.mxu1 %v6049_v39  ;;  %v2233_v39 = vld [vmem:[%s7764_s13 + $0x19b0] sm:$0xff] }
 0x308   : > { %6690 = vmatpush1.bf16.msra.mxu0 %v6689_v40  ;;  %6052 = vmatprep.subr.bf16.mxu1 %v6051_v43  ;;  %v6703_v40 = vpack.c.bf16 %v2239_v29, %v2234_v24  ;;  %v2242_v43 = vld [vmem:[%s7764_s13 + $0x19f8] sm:$0xff]  ;;  %v6705_v47 = vpack.c.bf16 %v2238_v38, %v2233_v39  ;;  %v6715_v24 = vpack.c.bf16 %v2269_v16, %v2264_v15  ;;  %v2268_v29 = vld [vmem:[%s7764_s13 + $0x1ac8] sm:$0xff]  ;;  %v2271_v38 = vld [vmem:[%s7764_s13 + $0x1ae0] sm:$0xff] }
 0x309   : > { %6692 = vmatprep.subr.bf16.mxu0 %v6691_v46  ;;  %v6065_v46 = vpack.c.bf16 %v2236_v36, %v2231_v35  ;;  %v6067_v48 = vpack.c.bf16 %v2247_v44, %v2242_v43  ;;  %v2279_v35 = vld [vmem:[%s7764_s13 + $0x1b20] sm:$0xff]  ;;  %v6077_v36 = vpack.c.bf16 %v2266_v21, %v2261_v20  ;;  %v2276_v43 = vld [vmem:[%s7764_s13 + $0x1b08] sm:$0xff]  ;;  %v2273_v44 = vld [vmem:[%s7764_s13 + $0x1af0] sm:$0xff] }
 0x30a   : > { %v2298_v16 = vld [vmem:[%s7764_s13 + $0x1bb8] sm:$0xff]  ;;  %v2309_v20 = vld [vmem:[%s7764_s13 + $0x1c10] sm:$0xff] }
 0x30b   : > { %6054 = vmatpush1.bf16.msra.mxu1 %v6053_v52  ;;  %v6707_v52 = vpack.c.bf16 %v2249_v45, %v2244_v23  ;;  %v2278_v45 = vld [vmem:[%s7764_s13 + $0x1b18] sm:$0xff] }
 0x30c   : > { %6694 = vmatpush1.bf16.msra.mxu0 %v6693_v57  ;;  %6056 = vmatprep.subr.bf16.mxu1 %v6055_v58  ;;  %v2248_v57 = vld [vmem:[%s7764_s13 + $0x1a28] sm:$0xff] }
 0x30d   : > { %6696 = vmatprep.subr.bf16.mxu0 %v6695_v0  ;;  %v2252_v58 = vld [vmem:[%s7764_s13 + $0x1a48] sm:$0xff]  ;;  %v6069_v0 = vpack.c.bf16 %v2246_v50, %v2241_v8  ;;  %v6709_v1 = vpack.c.bf16 %v2248_v57, %v2243_v51  ;;  %v2289_v8 = vld [vmem:[%s7764_s13 + $0x1b70] sm:$0xff]  ;;  %v6081_v50 = vpack.c.bf16 %v2276_v43, %v2271_v38  ;;  %v6721_v51 = vpack.c.bf16 %v2278_v45, %v2273_v44  ;;  %v2319_v38 = vld [vmem:[%s7764_s13 + $0x1c60] sm:$0xff] }
 0x30e   : > { %3360 = vmatmul.mubr.f32.vlgmr.msra.gmra.mrb[10].mxu1 %v8659_v18  ;;  %v6071_v3 = vpack.c.bf16 %v2257_v61, %v2252_v58  ;;  %v2281_v57 = vld [vmem:[%s7764_s13 + $0x1b30] sm:$0xff]  ;;  %v2286_v58 = vld [vmem:[%s7764_s13 + $0x1b58] sm:$0xff]  ;;  %v2283_v61 = vld [vmem:[%s7764_s13 + $0x1b40] sm:$0xff] }
 0x30f   : > { %4070 = vmatmul.mubr.f32.vlgmr.msra.gmra.mrb[12].mxu0 %v8659_v18  ;;  %6058 = vmatpush1.bf16.msra.mxu1 %v6057_v12  ;;  %v6711_v12 = vpack.c.bf16 %v2259_v63, %v2254_v62  ;;  %v2288_v63 = vld [vmem:[%s7764_s13 + $0x1b68] sm:$0xff]  ;;  %v6085_v10 = vpack.c.bf16 %v2286_v58, %v2281_v57  ;;  %v2311_v45 = vld [vmem:[%s7764_s13 + $0x1c20] sm:$0xff]  ;;  %v2329_v57 = vld [vmem:[%s7764_s13 + $0x1cb0] sm:$0xff] }
 0x310   : > { %3430 = vmatprep.mubr.f32.mxu1 %v8671_v25  ;;  %6698 = vmatpush1.bf16.msra.mxu0 %v6697_v37  ;;  %v2267_v37 = vld [vmem:[%s7764_s13 + $0x1ac0] sm:$0xff] }
 0x311   : > { %4140 = vmatprep.mubr.f32.mxu0 %v8671_v25  ;;  %6060 = vmatprep.subr.bf16.mxu1 %v6059_v19  ;;  %v6713_v19 = vpack.c.bf16 %v2258_v32, %v2253_v11  ;;  %v6075_v7 = vpack.c.bf16 %v2267_v37, %v2262_v14  ;;  %v6725_v11 = vpack.c.bf16 %v2288_v63, %v2283_v61  ;;  %v2291_v32 = vld [vmem:[%s7764_s13 + $0x1b80] sm:$0xff]  ;;  %v2296_v14 = vld [vmem:[%s7764_s13 + $0x1ba8] sm:$0xff]  ;;  %v2293_v37 = vld [vmem:[%s7764_s13 + $0x1b90] sm:$0xff] }
 0x312   : > { %6700 = vmatprep.subr.bf16.mxu0 %v6699_v22  ;;  %v2263_v22 = vld [vmem:[%s7764_s13 + $0x1aa0] sm:$0xff]  ;;  %v6089_v21 = vpack.c.bf16 %v2296_v14, %v2291_v32  ;;  %v2321_v63 = vld [vmem:[%s7764_s13 + $0x1c70] sm:$0xff] }
 0x313   : > { %6062 = vmatpush1.bf16.msra.mxu1 %v6061_v31  ;;  %v2272_v31 = vld [vmem:[%s7764_s13 + $0x1ae8] sm:$0xff]  ;;  %v6717_v39 = vpack.c.bf16 %v2268_v29, %v2263_v22  ;;  %v6729_v22 = vpack.c.bf16 %v2298_v16, %v2293_v37  ;;  %v2301_v29 = vld [vmem:[%s7764_s13 + $0x1bd0] sm:$0xff]  ;;  %v2339_v32 = vld [vmem:[%s7764_s13 + $0x1d00] sm:$0xff] }
 0x314   : > { %6702 = vmatpush1.bf16.msra.mxu0 %v6701_v33  ;;  %6064 = vmatprep.subr.bf16.mxu1 %v6063_v34  ;;  %v2277_v33 = vld [vmem:[%s7764_s13 + $0x1b10] sm:$0xff]  ;;  %v2274_v34 = vld [vmem:[%s7764_s13 + $0x1af8] sm:$0xff]  ;;  %v2331_v16 = vld [vmem:[%s7764_s13 + $0x1cc0] sm:$0xff] }
 0x315   : > { %6704 = vmatprep.subr.bf16.mxu0 %v6703_v40  ;;  %v6079_v40 = vpack.c.bf16 %v2277_v33, %v2272_v31  ;;  %v6719_v23 = vpack.c.bf16 %v2279_v35, %v2274_v34  ;;  %v2306_v31 = vld [vmem:[%s7764_s13 + $0x1bf8] sm:$0xff]  ;;  %v2303_v33 = vld [vmem:[%s7764_s13 + $0x1be0] sm:$0xff]  ;;  %v2308_v35 = vld [vmem:[%s7764_s13 + $0x1c08] sm:$0xff] }
 0x316   : > { %v6093_v43 = vpack.c.bf16 %v2306_v31, %v2301_v29  ;;  %v6733_v44 = vpack.c.bf16 %v2308_v35, %v2303_v33  ;;  %v2349_v29 = vld [vmem:[%s7764_s13 + $0x1d50] sm:$0xff] }
 0x317   : > { %6066 = vmatpush1.bf16.msra.mxu1 %v6065_v46  ;;  %v2282_v46 = vld [vmem:[%s7764_s13 + $0x1b38] sm:$0xff]  ;;  %v2341_v35 = vld [vmem:[%s7764_s13 + $0x1d10] sm:$0xff] }
 0x318   : > { %6706 = vmatpush1.bf16.msra.mxu0 %v6705_v47  ;;  %6068 = vmatprep.subr.bf16.mxu1 %v6067_v48  ;;  %v2287_v47 = vld [vmem:[%s7764_s13 + $0x1b60] sm:$0xff]  ;;  %v2284_v48 = vld [vmem:[%s7764_s13 + $0x1b48] sm:$0xff] }
 0x319   : > { %6708 = vmatprep.subr.bf16.mxu0 %v6707_v52  ;;  %v6083_v52 = vpack.c.bf16 %v2287_v47, %v2282_v46  ;;  %v6723_v62 = vpack.c.bf16 %v2289_v8, %v2284_v48  ;;  %v2316_v46 = vld [vmem:[%s7764_s13 + $0x1c48] sm:$0xff]  ;;  %v2313_v47 = vld [vmem:[%s7764_s13 + $0x1c30] sm:$0xff]  ;;  %v2318_v8 = vld [vmem:[%s7764_s13 + $0x1c58] sm:$0xff] }
 0x31a   : > { %v6097_v58 = vpack.c.bf16 %v2316_v46, %v2311_v45  ;;  %v6737_v61 = vpack.c.bf16 %v2318_v8, %v2313_v47  ;;  %v2359_v45 = vld [vmem:[%s7764_s13 + $0x1da0] sm:$0xff] }
 0x31b   : > { %6070 = vmatpush1.bf16.msra.mxu1 %v6069_v0  ;;  %v2292_v0 = vld [vmem:[%s7764_s13 + $0x1b88] sm:$0xff]  ;;  %v2351_v8 = vld [vmem:[%s7764_s13 + $0x1d60] sm:$0xff] }
 0x31c   : > { %6710 = vmatpush1.bf16.msra.mxu0 %v6709_v1  ;;  %6072 = vmatprep.subr.bf16.mxu1 %v6071_v3  ;;  %v2297_v1 = vld [vmem:[%s7764_s13 + $0x1bb0] sm:$0xff]  ;;  %v2294_v3 = vld [vmem:[%s7764_s13 + $0x1b98] sm:$0xff] }
 0x31d   : > { %6712 = vmatprep.subr.bf16.mxu0 %v6711_v12  ;;  %v6087_v12 = vpack.c.bf16 %v2297_v1, %v2292_v0  ;;  %v6727_v15 = vpack.c.bf16 %v2299_v9, %v2294_v3  ;;  %v2326_v0 = vld [vmem:[%s7764_s13 + $0x1c98] sm:$0xff]  ;;  %v2323_v1 = vld [vmem:[%s7764_s13 + $0x1c80] sm:$0xff]  ;;  %v2328_v9 = vld [vmem:[%s7764_s13 + $0x1ca8] sm:$0xff] }
 0x31e   : > { %v6101_v14 = vpack.c.bf16 %v2326_v0, %v2321_v63  ;;  %v6741_v37 = vpack.c.bf16 %v2328_v9, %v2323_v1  ;;  %v2369_v63 = vld [vmem:[%s7764_s13 + $0x1df0] sm:$0xff] }
 0x31f   : > { %6074 = vmatpush1.bf16.msra.mxu1 %v6073_v17  ;;  %v2302_v17 = vld [vmem:[%s7764_s13 + $0x1bd8] sm:$0xff]  ;;  %v2361_v9 = vld [vmem:[%s7764_s13 + $0x1db0] sm:$0xff] }
 0x320   : > { %6714 = vmatpush1.bf16.msra.mxu0 %v6713_v19  ;;  %6076 = vmatprep.subr.bf16.mxu1 %v6075_v7  ;;  %v2307_v19 = vld [vmem:[%s7764_s13 + $0x1c00] sm:$0xff]  ;;  %v2304_v7 = vld [vmem:[%s7764_s13 + $0x1be8] sm:$0xff] }
 0x321   : > { %6716 = vmatprep.subr.bf16.mxu0 %v6715_v24  ;;  %v6091_v24 = vpack.c.bf16 %v2307_v19, %v2302_v17  ;;  %v6731_v34 = vpack.c.bf16 %v2309_v20, %v2304_v7  ;;  %v2336_v17 = vld [vmem:[%s7764_s13 + $0x1ce8] sm:$0xff]  ;;  %v2333_v19 = vld [vmem:[%s7764_s13 + $0x1cd0] sm:$0xff]  ;;  %v2338_v20 = vld [vmem:[%s7764_s13 + $0x1cf8] sm:$0xff] }
 0x322   : > { %v6105_v31 = vpack.c.bf16 %v2336_v17, %v2331_v16  ;;  %v6745_v33 = vpack.c.bf16 %v2338_v20, %v2333_v19  ;;  %v2379_v16 = vld [vmem:[%s7764_s13 + $0x1e40] sm:$0xff] }
 0x323   : > { %6078 = vmatpush1.bf16.msra.mxu1 %v6077_v36  ;;  %v2312_v36 = vld [vmem:[%s7764_s13 + $0x1c28] sm:$0xff]  ;;  %v2371_v20 = vld [vmem:[%s7764_s13 + $0x1e00] sm:$0xff] }
 0x324   : > { %6718 = vmatpush1.bf16.msra.mxu0 %v6717_v39  ;;  %6080 = vmatprep.subr.bf16.mxu1 %v6079_v40  ;;  %v2317_v39 = vld [vmem:[%s7764_s13 + $0x1c50] sm:$0xff]  ;;  %v2314_v40 = vld [vmem:[%s7764_s13 + $0x1c38] sm:$0xff] }
 0x325   : > { %6720 = vmatprep.subr.bf16.mxu0 %v6719_v23  ;;  %v6095_v23 = vpack.c.bf16 %v2317_v39, %v2312_v36  ;;  %v6735_v48 = vpack.c.bf16 %v2319_v38, %v2314_v40  ;;  %v2346_v36 = vld [vmem:[%s7764_s13 + $0x1d38] sm:$0xff]  ;;  %v2343_v39 = vld [vmem:[%s7764_s13 + $0x1d20] sm:$0xff]  ;;  %v2348_v38 = vld [vmem:[%s7764_s13 + $0x1d48] sm:$0xff] }
 0x326   : > { %v6109_v46 = vpack.c.bf16 %v2346_v36, %v2341_v35  ;;  %v6749_v47 = vpack.c.bf16 %v2348_v38, %v2343_v39  ;;  %v1382_v35 = vmul.f32 0.01, %v8124_v4  ;;  %v2384_v39 = vld [vmem:[%s7764_s13 + $0x1e68] sm:$0xff] }
 0x327   : > { %6082 = vmatpush1.bf16.msra.mxu1 %v6081_v50  ;;  %v2322_v50 = vld [vmem:[%s7764_s13 + $0x1c78] sm:$0xff] }
 0x328   : > { %6722 = vmatpush1.bf16.msra.mxu0 %v6721_v51  ;;  %6084 = vmatprep.subr.bf16.mxu1 %v6083_v52  ;;  %v2327_v51 = vld [vmem:[%s7764_s13 + $0x1ca0] sm:$0xff]  ;;  %v2324_v52 = vld [vmem:[%s7764_s13 + $0x1c88] sm:$0xff] }
 0x329   : > { %6724 = vmatprep.subr.bf16.mxu0 %v6723_v62  ;;  %v6099_v62 = vpack.c.bf16 %v2327_v51, %v2322_v50  ;;  %v6739_v3 = vpack.c.bf16 %v2329_v57, %v2324_v52  ;;  %v2356_v50 = vld [vmem:[%s7764_s13 + $0x1d88] sm:$0xff]  ;;  %v2353_v51 = vld [vmem:[%s7764_s13 + $0x1d70] sm:$0xff]  ;;  %v2358_v57 = vld [vmem:[%s7764_s13 + $0x1d98] sm:$0xff] }
 0x32a   : > { %v6113_v0 = vpack.c.bf16 %v2356_v50, %v2351_v8  ;;  %v6753_v1 = vpack.c.bf16 %v2358_v57, %v2353_v51  ;;  %v2397_v8 = vld [vmem:[%s7764_s13 + $0x1ed0] sm:$0xff]  ;;  %v2394_v51 = vld [vmem:[%s7764_s13 + $0x1eb8] sm:$0xff] }
 0x32b   : > { %6086 = vmatpush1.bf16.msra.mxu1 %v6085_v10  ;;  %v2332_v10 = vld [vmem:[%s7764_s13 + $0x1cc8] sm:$0xff] }
 0x32c   : > { %6726 = vmatpush1.bf16.msra.mxu0 %v6725_v11  ;;  %6088 = vmatprep.subr.bf16.mxu1 %v6087_v12  ;;  %v2337_v11 = vld [vmem:[%s7764_s13 + $0x1cf0] sm:$0xff]  ;;  %v2334_v12 = vld [vmem:[%s7764_s13 + $0x1cd8] sm:$0xff] }
 0x32d   : > { %6728 = vmatprep.subr.bf16.mxu0 %v6727_v15  ;;  %v6103_v15 = vpack.c.bf16 %v2337_v11, %v2332_v10  ;;  %v6743_v7 = vpack.c.bf16 %v2339_v32, %v2334_v12  ;;  %v2366_v10 = vld [vmem:[%s7764_s13 + $0x1dd8] sm:$0xff]  ;;  %v2363_v11 = vld [vmem:[%s7764_s13 + $0x1dc0] sm:$0xff]  ;;  %v2368_v32 = vld [vmem:[%s7764_s13 + $0x1de8] sm:$0xff] }
 0x32e   : > { %v6117_v17 = vpack.c.bf16 %v2366_v10, %v2361_v9  ;;  %v6757_v19 = vpack.c.bf16 %v2368_v32, %v2363_v11  ;;  %v2407_v9 = vld [vmem:[%s7764_s13 + $0x1f20] sm:$0xff]  ;;  %v2404_v10 = vld [vmem:[%s7764_s13 + $0x1f08] sm:$0xff]  ;;  %v2409_v11 = vld [vmem:[%s7764_s13 + $0x1f30] sm:$0xff] }
 0x32f   : > { %6090 = vmatpush1.bf16.msra.mxu1 %v6089_v21  ;;  %v2342_v21 = vld [vmem:[%s7764_s13 + $0x1d18] sm:$0xff] }
 0x330   : > { %6730 = vmatpush1.bf16.msra.mxu0 %v6729_v22  ;;  %6092 = vmatprep.subr.bf16.mxu1 %v6091_v24  ;;  %v2347_v22 = vld [vmem:[%s7764_s13 + $0x1d40] sm:$0xff]  ;;  %v2344_v24 = vld [vmem:[%s7764_s13 + $0x1d28] sm:$0xff] }
 0x331   : > { %6732 = vmatprep.subr.bf16.mxu0 %v6731_v34  ;;  %v6107_v34 = vpack.c.bf16 %v2347_v22, %v2342_v21  ;;  %v6747_v40 = vpack.c.bf16 %v2349_v29, %v2344_v24  ;;  %v2376_v21 = vld [vmem:[%s7764_s13 + $0x1e28] sm:$0xff]  ;;  %v1379_v22 = vmul.f32 0.01, %v8093_v26  ;;  %v2373_v29 = vld [vmem:[%s7764_s13 + $0x1e10] sm:$0xff] }
 0x332   : > { %v6121_v36 = vpack.c.bf16 %v2376_v21, %v2371_v20  ;;  %v2417_v20 = vld [vmem:[%s7764_s13 + $0x1f70] sm:$0xff]  ;;  %v2414_v21 = vld [vmem:[%s7764_s13 + $0x1f58] sm:$0xff] }
 0x333   : > { %6094 = vmatpush1.bf16.msra.mxu1 %v6093_v43  ;;  %v2352_v43 = vld [vmem:[%s7764_s13 + $0x1d68] sm:$0xff] }
 0x334   : > { %6734 = vmatpush1.bf16.msra.mxu0 %v6733_v44  ;;  %6096 = vmatprep.subr.bf16.mxu1 %v6095_v23  ;;  %v2357_v44 = vld [vmem:[%s7764_s13 + $0x1d90] sm:$0xff]  ;;  %v2354_v23 = vld [vmem:[%s7764_s13 + $0x1d78] sm:$0xff] }
 0x335   : > { %6736 = vmatprep.subr.bf16.mxu0 %v6735_v48  ;;  %v6111_v48 = vpack.c.bf16 %v2357_v44, %v2352_v43  ;;  %v6751_v52 = vpack.c.bf16 %v2359_v45, %v2354_v23  ;;  %v2381_v43 = vld [vmem:[%s7764_s13 + $0x1e50] sm:$0xff]  ;;  %v2386_v44 = vld [vmem:[%s7764_s13 + $0x1e78] sm:$0xff]  ;;  %v2383_v23 = vld [vmem:[%s7764_s13 + $0x1e60] sm:$0xff]  ;;  %v8803_v45 = vsel %vm1359_vm14, %v8093_v26, %v1379_v22  ;;  %v8815_v26 = vsel %vm1362_vm15, %v8124_v4, %v1382_v35 }
 0x336   : > { %v6125_v57 = vpack.c.bf16 %v2386_v44, %v2381_v43  ;;  %v2398_v4 = vld [vmem:[%s7764_s13 + $0x1ed8] sm:$0xff]  ;;  %v2419_v22 = vld [vmem:[%s7764_s13 + $0x1f80] sm:$0xff]  ;;  %v2413_v35 = vld [vmem:[%s7764_s13 + $0x1f50] sm:$0xff] }
 0x337   : > { %6098 = vmatpush1.bf16.msra.mxu1 %v6097_v58  ;;  %v2362_v58 = vld [vmem:[%s7764_s13 + $0x1db8] sm:$0xff]  ;;  %v2424_v43 = vld [vmem:[%s7764_s13 + $0x1fa8] sm:$0xff]  ;;  %v2429_v44 = vld [vmem:[%s7764_s13 + $0x1fd0] sm:$0xff] }
 0x338   : > { %6738 = vmatpush1.bf16.msra.mxu0 %v6737_v61  ;;  %6100 = vmatprep.subr.bf16.mxu1 %v6099_v62  ;;  %v2367_v61 = vld [vmem:[%s7764_s13 + $0x1de0] sm:$0xff]  ;;  %v2364_v62 = vld [vmem:[%s7764_s13 + $0x1dc8] sm:$0xff] }
 0x339   : > { %6740 = vmatprep.subr.bf16.mxu0 %v6739_v3  ;;  %v6115_v3 = vpack.c.bf16 %v2367_v61, %v2362_v58  ;;  %v6755_v12 = vpack.c.bf16 %v2369_v63, %v2364_v62  ;;  %v2391_v62 = vld [vmem:[%s7764_s13 + $0x1ea0] sm:$0xff]  ;;  %v2396_v63 = vld [vmem:[%s7764_s13 + $0x1ec8] sm:$0xff] }
 0x33b   : > { %6102 = vmatpush1.bf16.msra.mxu1 %v6101_v14  ;;  %v2372_v14 = vld [vmem:[%s7764_s13 + $0x1e08] sm:$0xff] }
 0x33c   : > { %6742 = vmatpush1.bf16.msra.mxu0 %v6741_v37  ;;  %6104 = vmatprep.subr.bf16.mxu1 %v6103_v15  ;;  %v2377_v37 = vld [vmem:[%s7764_s13 + $0x1e30] sm:$0xff]  ;;  %v2374_v15 = vld [vmem:[%s7764_s13 + $0x1e18] sm:$0xff] }
 0x33d   : > { %6744 = vmatprep.subr.bf16.mxu0 %v6743_v7  ;;  %v6119_v7 = vpack.c.bf16 %v2377_v37, %v2372_v14  ;;  %v6759_v24 = vpack.c.bf16 %v2379_v16, %v2374_v15  ;;  %v2401_v37 = vld [vmem:[%s7764_s13 + $0x1ef0] sm:$0xff]  ;;  %v2406_v15 = vld [vmem:[%s7764_s13 + $0x1f18] sm:$0xff]  ;;  %v2403_v16 = vld [vmem:[%s7764_s13 + $0x1f00] sm:$0xff] }
 0x33f   : > { %6106 = vmatpush1.bf16.msra.mxu1 %v6105_v31  ;;  %v2378_v31 = vld [vmem:[%s7764_s13 + $0x1e38] sm:$0xff] }
 0x340   : > { %6746 = vmatpush1.bf16.msra.mxu0 %v6745_v33  ;;  %6108 = vmatprep.subr.bf16.mxu1 %v6107_v34  ;;  %v2382_v33 = vld [vmem:[%s7764_s13 + $0x1e58] sm:$0xff]  ;;  %v2387_v34 = vld [vmem:[%s7764_s13 + $0x1e80] sm:$0xff]  ;;  %v6761_v38 = vpack.c.bf16 %v2378_v31, %v2373_v29 }
 0x341   : > { %6748 = vmatprep.subr.bf16.mxu0 %v6747_v40  ;;  %v2389_v40 = vld [vmem:[%s7764_s13 + $0x1e90] sm:$0xff] }
 0x342   : > { %v6763_v50 = vpack.c.bf16 %v2389_v40, %v2384_v39  ;;  %v2418_v39 = vld [vmem:[%s7764_s13 + $0x1f78] sm:$0xff] }
 0x343   : > { %6110 = vmatpush1.bf16.msra.mxu1 %v6109_v46  ;;  %v6123_v46 = vpack.c.bf16 %v2387_v34, %v2382_v33  ;;  %v2411_v33 = vld [vmem:[%s7764_s13 + $0x1f40] sm:$0xff]  ;;  %v2416_v34 = vld [vmem:[%s7764_s13 + $0x1f68] sm:$0xff]  ;;  %v2422_v40 = vld [vmem:[%s7764_s13 + $0x1f98] sm:$0xff] }
 0x344   : > { %6750 = vmatpush1.bf16.msra.mxu0 %v6749_v47  ;;  %6112 = vmatprep.subr.bf16.mxu1 %v6111_v48  ;;  %v2388_v47 = vld [vmem:[%s7764_s13 + $0x1e88] sm:$0xff] }
 0x345   : > { %6752 = vmatprep.subr.bf16.mxu0 %v6751_v52  ;;  %v2392_v48 = vld [vmem:[%s7764_s13 + $0x1ea8] sm:$0xff]  ;;  %v2399_v52 = vld [vmem:[%s7764_s13 + $0x1ee0] sm:$0xff]  ;;  %v6765_v58 = vpack.c.bf16 %v2388_v47, %v2383_v23  ;;  %v6137_v23 = vpack.c.bf16 %v2416_v34, %v2411_v33 }
 0x346   : > { %v6127_v61 = vpack.c.bf16 %v2397_v8, %v2392_v48  ;;  %v2421_v48 = vld [vmem:[%s7764_s13 + $0x1f90] sm:$0xff]  ;;  %v2426_v8 = vld [vmem:[%s7764_s13 + $0x1fb8] sm:$0xff]  ;;  %v2459_v33 = vld [vmem:[%s7764_s13 + $0x20c0] sm:$0xff] }
 0x347   : > { %6114 = vmatpush1.bf16.msra.mxu1 %v6113_v0  ;;  %v2393_v0 = vld [vmem:[%s7764_s13 + $0x1eb0] sm:$0xff] }
 0x348   : > { %6754 = vmatpush1.bf16.msra.mxu0 %v6753_v1  ;;  %6116 = vmatprep.subr.bf16.mxu1 %v6115_v3  ;;  %v6767_v1 = vpack.c.bf16 %v2399_v52, %v2394_v51  ;;  %v2402_v3 = vld [vmem:[%s7764_s13 + $0x1ef8] sm:$0xff]  ;;  %v6769_v32 = vpack.c.bf16 %v2398_v4, %v2393_v0  ;;  %v6779_v51 = vpack.c.bf16 %v2429_v44, %v2424_v43  ;;  %v2428_v52 = vld [vmem:[%s7764_s13 + $0x1fc8] sm:$0xff]  ;;  %v2431_v4 = vld [vmem:[%s7764_s13 + $0x1fe0] sm:$0xff] }
 0x349   : > { %6756 = vmatprep.subr.bf16.mxu0 %v6755_v12  ;;  %v6129_v12 = vpack.c.bf16 %v2396_v63, %v2391_v62  ;;  %v6131_v14 = vpack.c.bf16 %v2407_v9, %v2402_v3  ;;  %v2439_v62 = vld [vmem:[%s7764_s13 + $0x2020] sm:$0xff]  ;;  %v6141_v63 = vpack.c.bf16 %v2426_v8, %v2421_v48  ;;  %v2436_v3 = vld [vmem:[%s7764_s13 + $0x2008] sm:$0xff]  ;;  %v2433_v9 = vld [vmem:[%s7764_s13 + $0x1ff0] sm:$0xff] }
 0x34a   : > { %v2458_v44 = vld [vmem:[%s7764_s13 + $0x20b8] sm:$0xff]  ;;  %v2469_v48 = vld [vmem:[%s7764_s13 + $0x2110] sm:$0xff] }
 0x34b   : > { %6118 = vmatpush1.bf16.msra.mxu1 %v6117_v17  ;;  %v6771_v17 = vpack.c.bf16 %v2409_v11, %v2404_v10  ;;  %v2438_v11 = vld [vmem:[%s7764_s13 + $0x2018] sm:$0xff] }
 0x34c   : > { %6758 = vmatpush1.bf16.msra.mxu0 %v6757_v19  ;;  %6120 = vmatprep.subr.bf16.mxu1 %v6119_v7  ;;  %v2408_v19 = vld [vmem:[%s7764_s13 + $0x1f28] sm:$0xff] }
 0x34d   : > { %6760 = vmatprep.subr.bf16.mxu0 %v6759_v24  ;;  %v2412_v7 = vld [vmem:[%s7764_s13 + $0x1f48] sm:$0xff]  ;;  %v6133_v24 = vpack.c.bf16 %v2406_v15, %v2401_v37  ;;  %v6773_v29 = vpack.c.bf16 %v2408_v19, %v2403_v16  ;;  %v2449_v37 = vld [vmem:[%s7764_s13 + $0x2070] sm:$0xff]  ;;  %v6145_v15 = vpack.c.bf16 %v2436_v3, %v2431_v4  ;;  %v6785_v16 = vpack.c.bf16 %v2438_v11, %v2433_v9  ;;  %v2479_v4 = vld [vmem:[%s7764_s13 + $0x2160] sm:$0xff] }
 0x34e   : > { %3431 = vmatmul.mubr.f32.vlgmr.msra.gmra.mrb[10].mxu1 %v8803_v45  ;;  %v6135_v31 = vpack.c.bf16 %v2417_v20, %v2412_v7  ;;  %v2441_v19 = vld [vmem:[%s7764_s13 + $0x2030] sm:$0xff]  ;;  %v2446_v7 = vld [vmem:[%s7764_s13 + $0x2058] sm:$0xff]  ;;  %v2443_v20 = vld [vmem:[%s7764_s13 + $0x2040] sm:$0xff] }
 0x34f   : > { %4141 = vmatmul.mubr.f32.vlgmr.msra.gmra.mrb[12].mxu0 %v8803_v45  ;;  %6122 = vmatpush1.bf16.msra.mxu1 %v6121_v36  ;;  %v6775_v36 = vpack.c.bf16 %v2419_v22, %v2414_v21  ;;  %v2448_v22 = vld [vmem:[%s7764_s13 + $0x2068] sm:$0xff]  ;;  %v6149_v34 = vpack.c.bf16 %v2446_v7, %v2441_v19  ;;  %v2471_v11 = vld [vmem:[%s7764_s13 + $0x2120] sm:$0xff]  ;;  %v2489_v19 = vld [vmem:[%s7764_s13 + $0x21b0] sm:$0xff] }
 0x350   : > { %3501 = vmatprep.mubr.f32.mxu1 %v8815_v26  ;;  %6762 = vmatpush1.bf16.msra.mxu0 %v6761_v38  ;;  %v2427_v38 = vld [vmem:[%s7764_s13 + $0x1fc0] sm:$0xff] }
 0x351   : > { %4211 = vmatprep.mubr.f32.mxu0 %v8815_v26  ;;  %6124 = vmatprep.subr.bf16.mxu1 %v6123_v46  ;;  %v6777_v46 = vpack.c.bf16 %v2418_v39, %v2413_v35  ;;  %v6139_v47 = vpack.c.bf16 %v2427_v38, %v2422_v40  ;;  %v6789_v35 = vpack.c.bf16 %v2448_v22, %v2443_v20  ;;  %v2451_v39 = vld [vmem:[%s7764_s13 + $0x2080] sm:$0xff]  ;;  %v2456_v40 = vld [vmem:[%s7764_s13 + $0x20a8] sm:$0xff]  ;;  %v2453_v38 = vld [vmem:[%s7764_s13 + $0x2090] sm:$0xff] }
 0x352   : > { %6764 = vmatprep.subr.bf16.mxu0 %v6763_v50  ;;  %v2423_v50 = vld [vmem:[%s7764_s13 + $0x1fa0] sm:$0xff]  ;;  %v6153_v8 = vpack.c.bf16 %v2456_v40, %v2451_v39  ;;  %v2481_v22 = vld [vmem:[%s7764_s13 + $0x2170] sm:$0xff] }
 0x353   : > { %6126 = vmatpush1.bf16.msra.mxu1 %v6125_v57  ;;  %v2432_v57 = vld [vmem:[%s7764_s13 + $0x1fe8] sm:$0xff]  ;;  %v6781_v0 = vpack.c.bf16 %v2428_v52, %v2423_v50  ;;  %v6793_v50 = vpack.c.bf16 %v2458_v44, %v2453_v38  ;;  %v2461_v52 = vld [vmem:[%s7764_s13 + $0x20d0] sm:$0xff]  ;;  %v2499_v39 = vld [vmem:[%s7764_s13 + $0x2200] sm:$0xff] }
 0x354   : > { %6766 = vmatpush1.bf16.msra.mxu0 %v6765_v58  ;;  %6128 = vmatprep.subr.bf16.mxu1 %v6127_v61  ;;  %v2437_v58 = vld [vmem:[%s7764_s13 + $0x2010] sm:$0xff]  ;;  %v2434_v61 = vld [vmem:[%s7764_s13 + $0x1ff8] sm:$0xff]  ;;  %v2491_v44 = vld [vmem:[%s7764_s13 + $0x21c0] sm:$0xff] }
 0x355   : > { %6768 = vmatprep.subr.bf16.mxu0 %v6767_v1  ;;  %v6143_v1 = vpack.c.bf16 %v2437_v58, %v2432_v57  ;;  %v6783_v10 = vpack.c.bf16 %v2439_v62, %v2434_v61  ;;  %v2466_v57 = vld [vmem:[%s7764_s13 + $0x20f8] sm:$0xff]  ;;  %v2463_v58 = vld [vmem:[%s7764_s13 + $0x20e0] sm:$0xff]  ;;  %v2468_v62 = vld [vmem:[%s7764_s13 + $0x2108] sm:$0xff] }
 0x356   : > { %v6157_v3 = vpack.c.bf16 %v2466_v57, %v2461_v52  ;;  %v6797_v9 = vpack.c.bf16 %v2468_v62, %v2463_v58  ;;  %v2509_v52 = vld [vmem:[%s7764_s13 + $0x2250] sm:$0xff] }
 0x357   : > { %6130 = vmatpush1.bf16.msra.mxu1 %v6129_v12  ;;  %v2442_v12 = vld [vmem:[%s7764_s13 + $0x2038] sm:$0xff]  ;;  %v2501_v62 = vld [vmem:[%s7764_s13 + $0x2210] sm:$0xff] }
 0x358   : > { %6770 = vmatpush1.bf16.msra.mxu0 %v6769_v32  ;;  %6132 = vmatprep.subr.bf16.mxu1 %v6131_v14  ;;  %v2447_v32 = vld [vmem:[%s7764_s13 + $0x2060] sm:$0xff]  ;;  %v2444_v14 = vld [vmem:[%s7764_s13 + $0x2048] sm:$0xff] }
 0x359   : > { %6772 = vmatprep.subr.bf16.mxu0 %v6771_v17  ;;  %v6147_v17 = vpack.c.bf16 %v2447_v32, %v2442_v12  ;;  %v6787_v21 = vpack.c.bf16 %v2449_v37, %v2444_v14  ;;  %v2476_v12 = vld [vmem:[%s7764_s13 + $0x2148] sm:$0xff]  ;;  %v2473_v32 = vld [vmem:[%s7764_s13 + $0x2130] sm:$0xff]  ;;  %v2478_v37 = vld [vmem:[%s7764_s13 + $0x2158] sm:$0xff] }
 0x35a   : > { %v6161_v7 = vpack.c.bf16 %v2476_v12, %v2471_v11  ;;  %v6801_v20 = vpack.c.bf16 %v2478_v37, %v2473_v32  ;;  %v2519_v11 = vld [vmem:[%s7764_s13 + $0x22a0] sm:$0xff] }
 0x35b   : > { %6134 = vmatpush1.bf16.msra.mxu1 %v6133_v24  ;;  %v2452_v24 = vld [vmem:[%s7764_s13 + $0x2088] sm:$0xff]  ;;  %v2511_v37 = vld [vmem:[%s7764_s13 + $0x2260] sm:$0xff] }
 0x35c   : > { %6774 = vmatpush1.bf16.msra.mxu0 %v6773_v29  ;;  %6136 = vmatprep.subr.bf16.mxu1 %v6135_v31  ;;  %v2457_v29 = vld [vmem:[%s7764_s13 + $0x20b0] sm:$0xff]  ;;  %v2454_v31 = vld [vmem:[%s7764_s13 + $0x2098] sm:$0xff] }
 0x35d   : > { %6776 = vmatprep.subr.bf16.mxu0 %v6775_v36  ;;  %v6151_v36 = vpack.c.bf16 %v2457_v29, %v2452_v24  ;;  %v6791_v43 = vpack.c.bf16 %v2459_v33, %v2454_v31  ;;  %v2486_v24 = vld [vmem:[%s7764_s13 + $0x2198] sm:$0xff]  ;;  %v2483_v29 = vld [vmem:[%s7764_s13 + $0x2180] sm:$0xff]  ;;  %v2488_v33 = vld [vmem:[%s7764_s13 + $0x21a8] sm:$0xff] }
 0x35e   : > { %v6165_v40 = vpack.c.bf16 %v2486_v24, %v2481_v22  ;;  %v6805_v38 = vpack.c.bf16 %v2488_v33, %v2483_v29  ;;  %v2529_v22 = vld [vmem:[%s7764_s13 + $0x22f0] sm:$0xff] }
 0x35f   : > { %6138 = vmatpush1.bf16.msra.mxu1 %v6137_v23  ;;  %v2462_v23 = vld [vmem:[%s7764_s13 + $0x20d8] sm:$0xff]  ;;  %v2521_v33 = vld [vmem:[%s7764_s13 + $0x22b0] sm:$0xff] }
 0x360   : > { %6778 = vmatpush1.bf16.msra.mxu0 %v6777_v46  ;;  %6140 = vmatprep.subr.bf16.mxu1 %v6139_v47  ;;  %v2467_v46 = vld [vmem:[%s7764_s13 + $0x2100] sm:$0xff]  ;;  %v2464_v47 = vld [vmem:[%s7764_s13 + $0x20e8] sm:$0xff] }
 0x361   : > { %6780 = vmatprep.subr.bf16.mxu0 %v6779_v51  ;;  %v6155_v51 = vpack.c.bf16 %v2467_v46, %v2462_v23  ;;  %v6795_v61 = vpack.c.bf16 %v2469_v48, %v2464_v47  ;;  %v2496_v23 = vld [vmem:[%s7764_s13 + $0x21e8] sm:$0xff]  ;;  %v2493_v46 = vld [vmem:[%s7764_s13 + $0x21d0] sm:$0xff]  ;;  %v2498_v48 = vld [vmem:[%s7764_s13 + $0x21f8] sm:$0xff] }
 0x362   : > { %v6169_v57 = vpack.c.bf16 %v2496_v23, %v2491_v44  ;;  %v6809_v58 = vpack.c.bf16 %v2498_v48, %v2493_v46  ;;  %v2539_v44 = vld [vmem:[%s7764_s13 + $0x2340] sm:$0xff] }
 0x363   : > { %6142 = vmatpush1.bf16.msra.mxu1 %v6141_v63  ;;  %v2472_v63 = vld [vmem:[%s7764_s13 + $0x2128] sm:$0xff]  ;;  %v2531_v48 = vld [vmem:[%s7764_s13 + $0x2300] sm:$0xff] }
 0x364   : > { %6782 = vmatpush1.bf16.msra.mxu0 %v6781_v0  ;;  %6144 = vmatprep.subr.bf16.mxu1 %v6143_v1  ;;  %v2477_v0 = vld [vmem:[%s7764_s13 + $0x2150] sm:$0xff]  ;;  %v2474_v1 = vld [vmem:[%s7764_s13 + $0x2138] sm:$0xff] }
 0x365   : > { %6784 = vmatprep.subr.bf16.mxu0 %v6783_v10  ;;  %v6159_v10 = vpack.c.bf16 %v2477_v0, %v2472_v63  ;;  %v6799_v14 = vpack.c.bf16 %v2479_v4, %v2474_v1  ;;  %v2506_v63 = vld [vmem:[%s7764_s13 + $0x2238] sm:$0xff]  ;;  %v2503_v0 = vld [vmem:[%s7764_s13 + $0x2220] sm:$0xff]  ;;  %v2508_v4 = vld [vmem:[%s7764_s13 + $0x2248] sm:$0xff] }
 0x366   : > { %v6173_v12 = vpack.c.bf16 %v2506_v63, %v2501_v62  ;;  %v6813_v32 = vpack.c.bf16 %v2508_v4, %v2503_v0  ;;  %v1384_v62 = vmul.f32 0.01, %v8126_v5  ;;  %v2544_v0 = vld [vmem:[%s7764_s13 + $0x2368] sm:$0xff] }
 0x367   : > { %6146 = vmatpush1.bf16.msra.mxu1 %v6145_v15  ;;  %v2482_v15 = vld [vmem:[%s7764_s13 + $0x2178] sm:$0xff] }
 0x368   : > { %6786 = vmatpush1.bf16.msra.mxu0 %v6785_v16  ;;  %6148 = vmatprep.subr.bf16.mxu1 %v6147_v17  ;;  %v2487_v16 = vld [vmem:[%s7764_s13 + $0x21a0] sm:$0xff]  ;;  %v2484_v17 = vld [vmem:[%s7764_s13 + $0x2188] sm:$0xff] }
 0x369   : > { %6788 = vmatprep.subr.bf16.mxu0 %v6787_v21  ;;  %v6163_v21 = vpack.c.bf16 %v2487_v16, %v2482_v15  ;;  %v6803_v31 = vpack.c.bf16 %v2489_v19, %v2484_v17  ;;  %v2516_v15 = vld [vmem:[%s7764_s13 + $0x2288] sm:$0xff]  ;;  %v2513_v16 = vld [vmem:[%s7764_s13 + $0x2270] sm:$0xff]  ;;  %v2518_v19 = vld [vmem:[%s7764_s13 + $0x2298] sm:$0xff] }
 0x36a   : > { %v6177_v24 = vpack.c.bf16 %v2516_v15, %v2511_v37  ;;  %v6817_v29 = vpack.c.bf16 %v2518_v19, %v2513_v16  ;;  %v2557_v37 = vld [vmem:[%s7764_s13 + $0x23d0] sm:$0xff]  ;;  %v2554_v16 = vld [vmem:[%s7764_s13 + $0x23b8] sm:$0xff] }
 0x36b   : > { %6150 = vmatpush1.bf16.msra.mxu1 %v6149_v34  ;;  %v2492_v34 = vld [vmem:[%s7764_s13 + $0x21c8] sm:$0xff] }
 0x36c   : > { %6790 = vmatpush1.bf16.msra.mxu0 %v6789_v35  ;;  %6152 = vmatprep.subr.bf16.mxu1 %v6151_v36  ;;  %v2497_v35 = vld [vmem:[%s7764_s13 + $0x21f0] sm:$0xff]  ;;  %v2494_v36 = vld [vmem:[%s7764_s13 + $0x21d8] sm:$0xff] }
 0x36d   : > { %6792 = vmatprep.subr.bf16.mxu0 %v6791_v43  ;;  %v6167_v43 = vpack.c.bf16 %v2497_v35, %v2492_v34  ;;  %v6807_v47 = vpack.c.bf16 %v2499_v39, %v2494_v36  ;;  %v2526_v34 = vld [vmem:[%s7764_s13 + $0x22d8] sm:$0xff]  ;;  %v2523_v35 = vld [vmem:[%s7764_s13 + $0x22c0] sm:$0xff]  ;;  %v2528_v39 = vld [vmem:[%s7764_s13 + $0x22e8] sm:$0xff] }
 0x36e   : > { %v6181_v23 = vpack.c.bf16 %v2526_v34, %v2521_v33  ;;  %v6821_v46 = vpack.c.bf16 %v2528_v39, %v2523_v35  ;;  %v2567_v33 = vld [vmem:[%s7764_s13 + $0x2420] sm:$0xff]  ;;  %v2564_v34 = vld [vmem:[%s7764_s13 + $0x2408] sm:$0xff]  ;;  %v2569_v35 = vld [vmem:[%s7764_s13 + $0x2430] sm:$0xff] }
 0x36f   : > { %6154 = vmatpush1.bf16.msra.mxu1 %v6153_v8  ;;  %v2502_v8 = vld [vmem:[%s7764_s13 + $0x2218] sm:$0xff] }
 0x370   : > { %6794 = vmatpush1.bf16.msra.mxu0 %v6793_v50  ;;  %6156 = vmatprep.subr.bf16.mxu1 %v6155_v51  ;;  %v2507_v50 = vld [vmem:[%s7764_s13 + $0x2240] sm:$0xff]  ;;  %v2504_v51 = vld [vmem:[%s7764_s13 + $0x2228] sm:$0xff] }
 0x371   : > { %6796 = vmatprep.subr.bf16.mxu0 %v6795_v61  ;;  %v6171_v61 = vpack.c.bf16 %v2507_v50, %v2502_v8  ;;  %v6811_v1 = vpack.c.bf16 %v2509_v52, %v2504_v51  ;;  %v2536_v8 = vld [vmem:[%s7764_s13 + $0x2328] sm:$0xff]  ;;  %v1381_v50 = vmul.f32 0.01, %v8115_v55  ;;  %v2533_v52 = vld [vmem:[%s7764_s13 + $0x2310] sm:$0xff] }
 0x372   : > { %v6185_v63 = vpack.c.bf16 %v2536_v8, %v2531_v48  ;;  %v2577_v48 = vld [vmem:[%s7764_s13 + $0x2470] sm:$0xff]  ;;  %v2574_v8 = vld [vmem:[%s7764_s13 + $0x2458] sm:$0xff] }
 0x373   : > { %6158 = vmatpush1.bf16.msra.mxu1 %v6157_v3  ;;  %v2512_v3 = vld [vmem:[%s7764_s13 + $0x2268] sm:$0xff] }
 0x374   : > { %6798 = vmatpush1.bf16.msra.mxu0 %v6797_v9  ;;  %6160 = vmatprep.subr.bf16.mxu1 %v6159_v10  ;;  %v2517_v9 = vld [vmem:[%s7764_s13 + $0x2290] sm:$0xff]  ;;  %v2514_v10 = vld [vmem:[%s7764_s13 + $0x2278] sm:$0xff] }
 0x375   : > { %6800 = vmatprep.subr.bf16.mxu0 %v6799_v14  ;;  %v6175_v14 = vpack.c.bf16 %v2517_v9, %v2512_v3  ;;  %v6815_v17 = vpack.c.bf16 %v2519_v11, %v2514_v10  ;;  %v2541_v3 = vld [vmem:[%s7764_s13 + $0x2350] sm:$0xff]  ;;  %v2546_v9 = vld [vmem:[%s7764_s13 + $0x2378] sm:$0xff]  ;;  %v2543_v10 = vld [vmem:[%s7764_s13 + $0x2360] sm:$0xff]  ;;  %v8947_v11 = vsel %vm1361_vm0, %v8115_v55, %v1381_v50  ;;  %v8959_v55 = vsel %vm1364_vm1, %v8126_v5, %v1384_v62 }
 0x376   : > { %v6189_v19 = vpack.c.bf16 %v2546_v9, %v2541_v3  ;;  %v2558_v5 = vld [vmem:[%s7764_s13 + $0x23d8] sm:$0xff]  ;;  %v2579_v50 = vld [vmem:[%s7764_s13 + $0x2480] sm:$0xff]  ;;  %v2573_v62 = vld [vmem:[%s7764_s13 + $0x2450] sm:$0xff] }
 0x377   : > { %6162 = vmatpush1.bf16.msra.mxu1 %v6161_v7  ;;  %v2522_v7 = vld [vmem:[%s7764_s13 + $0x22b8] sm:$0xff]  ;;  %v2584_v3 = vld [vmem:[%s7764_s13 + $0x24a8] sm:$0xff]  ;;  %v2589_v9 = vld [vmem:[%s7764_s13 + $0x24d0] sm:$0xff] }
 0x378   : > { %6802 = vmatpush1.bf16.msra.mxu0 %v6801_v20  ;;  %6164 = vmatprep.subr.bf16.mxu1 %v6163_v21  ;;  %v2527_v20 = vld [vmem:[%s7764_s13 + $0x22e0] sm:$0xff]  ;;  %v2524_v21 = vld [vmem:[%s7764_s13 + $0x22c8] sm:$0xff] }
 0x379   : > { %6804 = vmatprep.subr.bf16.mxu0 %v6803_v31  ;;  %v6179_v31 = vpack.c.bf16 %v2527_v20, %v2522_v7  ;;  %v6819_v36 = vpack.c.bf16 %v2529_v22, %v2524_v21  ;;  %v2551_v21 = vld [vmem:[%s7764_s13 + $0x23a0] sm:$0xff]  ;;  %v2556_v22 = vld [vmem:[%s7764_s13 + $0x23c8] sm:$0xff] }
 0x37b   : > { %6166 = vmatpush1.bf16.msra.mxu1 %v6165_v40  ;;  %v2532_v40 = vld [vmem:[%s7764_s13 + $0x2308] sm:$0xff] }
 0x37c   : > { %6806 = vmatpush1.bf16.msra.mxu0 %v6805_v38  ;;  %6168 = vmatprep.subr.bf16.mxu1 %v6167_v43  ;;  %v2537_v38 = vld [vmem:[%s7764_s13 + $0x2330] sm:$0xff]  ;;  %v2534_v43 = vld [vmem:[%s7764_s13 + $0x2318] sm:$0xff] }
 0x37d   : > { %6808 = vmatprep.subr.bf16.mxu0 %v6807_v47  ;;  %v6183_v47 = vpack.c.bf16 %v2537_v38, %v2532_v40  ;;  %v6823_v51 = vpack.c.bf16 %v2539_v44, %v2534_v43  ;;  %v2561_v38 = vld [vmem:[%s7764_s13 + $0x23f0] sm:$0xff]  ;;  %v2566_v43 = vld [vmem:[%s7764_s13 + $0x2418] sm:$0xff]  ;;  %v2563_v44 = vld [vmem:[%s7764_s13 + $0x2400] sm:$0xff] }
 0x37f   : > { %6170 = vmatpush1.bf16.msra.mxu1 %v6169_v57  ;;  %v2538_v57 = vld [vmem:[%s7764_s13 + $0x2338] sm:$0xff] }
 0x380   : > { %6810 = vmatpush1.bf16.msra.mxu0 %v6809_v58  ;;  %6172 = vmatprep.subr.bf16.mxu1 %v6171_v61  ;;  %v2542_v58 = vld [vmem:[%s7764_s13 + $0x2358] sm:$0xff]  ;;  %v2547_v61 = vld [vmem:[%s7764_s13 + $0x2380] sm:$0xff]  ;;  %v6825_v4 = vpack.c.bf16 %v2538_v57, %v2533_v52 }
 0x381   : > { %6812 = vmatprep.subr.bf16.mxu0 %v6811_v1  ;;  %v2549_v1 = vld [vmem:[%s7764_s13 + $0x2390] sm:$0xff] }
 0x382   : > { %v6827_v15 = vpack.c.bf16 %v2549_v1, %v2544_v0  ;;  %v2578_v0 = vld [vmem:[%s7764_s13 + $0x2478] sm:$0xff] }
 0x383   : > { %6174 = vmatpush1.bf16.msra.mxu1 %v6173_v12  ;;  %v6187_v12 = vpack.c.bf16 %v2547_v61, %v2542_v58  ;;  %v2571_v58 = vld [vmem:[%s7764_s13 + $0x2440] sm:$0xff]  ;;  %v2576_v61 = vld [vmem:[%s7764_s13 + $0x2468] sm:$0xff]  ;;  %v2582_v1 = vld [vmem:[%s7764_s13 + $0x2498] sm:$0xff] }
 0x384   : > { %6814 = vmatpush1.bf16.msra.mxu0 %v6813_v32  ;;  %6176 = vmatprep.subr.bf16.mxu1 %v6175_v14  ;;  %v2548_v32 = vld [vmem:[%s7764_s13 + $0x2388] sm:$0xff] }
 0x385   : > { %6816 = vmatprep.subr.bf16.mxu0 %v6815_v17  ;;  %v2552_v14 = vld [vmem:[%s7764_s13 + $0x23a8] sm:$0xff]  ;;  %v2559_v17 = vld [vmem:[%s7764_s13 + $0x23e0] sm:$0xff]  ;;  %v6829_v7 = vpack.c.bf16 %v2548_v32, %v2543_v10  ;;  %v6201_v10 = vpack.c.bf16 %v2576_v61, %v2571_v58 }
 0x386   : > { %v6191_v20 = vpack.c.bf16 %v2557_v37, %v2552_v14  ;;  %v2581_v14 = vld [vmem:[%s7764_s13 + $0x2490] sm:$0xff]  ;;  %v2586_v37 = vld [vmem:[%s7764_s13 + $0x24b8] sm:$0xff]  ;;  %v2619_v58 = vld [vmem:[%s7764_s13 + $0x25c0] sm:$0xff] }
 0x387   : > { %6178 = vmatpush1.bf16.msra.mxu1 %v6177_v24  ;;  %v2553_v24 = vld [vmem:[%s7764_s13 + $0x23b0] sm:$0xff] }
 0x388   : > { %6818 = vmatpush1.bf16.msra.mxu0 %v6817_v29  ;;  %6180 = vmatprep.subr.bf16.mxu1 %v6179_v31  ;;  %v6831_v29 = vpack.c.bf16 %v2559_v17, %v2554_v16  ;;  %v2562_v31 = vld [vmem:[%s7764_s13 + $0x23f8] sm:$0xff]  ;;  %v6833_v39 = vpack.c.bf16 %v2558_v5, %v2553_v24  ;;  %v6843_v16 = vpack.c.bf16 %v2589_v9, %v2584_v3  ;;  %v2588_v17 = vld [vmem:[%s7764_s13 + $0x24c8] sm:$0xff]  ;;  %v2591_v5 = vld [vmem:[%s7764_s13 + $0x24e0] sm:$0xff] }
 0x389   : > { %6820 = vmatprep.subr.bf16.mxu0 %v6819_v36  ;;  %v6193_v36 = vpack.c.bf16 %v2556_v22, %v2551_v21  ;;  %v6195_v40 = vpack.c.bf16 %v2567_v33, %v2562_v31  ;;  %v2599_v21 = vld [vmem:[%s7764_s13 + $0x2520] sm:$0xff]  ;;  %v6205_v22 = vpack.c.bf16 %v2586_v37, %v2581_v14  ;;  %v2596_v31 = vld [vmem:[%s7764_s13 + $0x2508] sm:$0xff]  ;;  %v2593_v33 = vld [vmem:[%s7764_s13 + $0x24f0] sm:$0xff] }
 0x38a   : > { %v2618_v9 = vld [vmem:[%s7764_s13 + $0x25b8] sm:$0xff]  ;;  %v2629_v14 = vld [vmem:[%s7764_s13 + $0x2610] sm:$0xff] }
 0x38b   : > { %6182 = vmatpush1.bf16.msra.mxu1 %v6181_v23  ;;  %v6835_v23 = vpack.c.bf16 %v2569_v35, %v2564_v34  ;;  %v2598_v35 = vld [vmem:[%s7764_s13 + $0x2518] sm:$0xff] }
 0x38c   : > { %6822 = vmatpush1.bf16.msra.mxu0 %v6821_v46  ;;  %6184 = vmatprep.subr.bf16.mxu1 %v6183_v47  ;;  %v2568_v46 = vld [vmem:[%s7764_s13 + $0x2428] sm:$0xff] }
 0x38d   : > { %6824 = vmatprep.subr.bf16.mxu0 %v6823_v51  ;;  %v2572_v47 = vld [vmem:[%s7764_s13 + $0x2448] sm:$0xff]  ;;  %v6197_v51 = vpack.c.bf16 %v2566_v43, %v2561_v38  ;;  %v6837_v52 = vpack.c.bf16 %v2568_v46, %v2563_v44  ;;  %v2609_v38 = vld [vmem:[%s7764_s13 + $0x2570] sm:$0xff]  ;;  %v6209_v43 = vpack.c.bf16 %v2596_v31, %v2591_v5  ;;  %v6849_v44 = vpack.c.bf16 %v2598_v35, %v2593_v33  ;;  %v2639_v5 = vld [vmem:[%s7764_s13 + $0x2660] sm:$0xff] }
 0x38e   : > { %3502 = vmatmul.mubr.f32.vlgmr.msra.gmra.mrb[10].mxu1 %v8947_v11  ;;  %v6199_v57 = vpack.c.bf16 %v2577_v48, %v2572_v47  ;;  %v2601_v46 = vld [vmem:[%s7764_s13 + $0x2530] sm:$0xff]  ;;  %v2606_v47 = vld [vmem:[%s7764_s13 + $0x2558] sm:$0xff]  ;;  %v2603_v48 = vld [vmem:[%s7764_s13 + $0x2540] sm:$0xff] }
 0x38f   : > { %4212 = vmatmul.mubr.f32.vlgmr.msra.gmra.mrb[12].mxu0 %v8947_v11  ;;  %6186 = vmatpush1.bf16.msra.mxu1 %v6185_v63  ;;  %v6839_v63 = vpack.c.bf16 %v2579_v50, %v2574_v8  ;;  %v2608_v50 = vld [vmem:[%s7764_s13 + $0x2568] sm:$0xff]  ;;  %v6213_v61 = vpack.c.bf16 %v2606_v47, %v2601_v46  ;;  %v2631_v35 = vld [vmem:[%s7764_s13 + $0x2620] sm:$0xff]  ;;  %v2649_v46 = vld [vmem:[%s7764_s13 + $0x26b0] sm:$0xff] }
 0x390   : > { %3572 = vmatprep.mubr.f32.mxu1 %v8959_v55  ;;  %6826 = vmatpush1.bf16.msra.mxu0 %v6825_v4  ;;  %v2587_v4 = vld [vmem:[%s7764_s13 + $0x24c0] sm:$0xff] }
 0x391   : > { %4282 = vmatprep.mubr.f32.mxu0 %v8959_v55  ;;  %6188 = vmatprep.subr.bf16.mxu1 %v6187_v12  ;;  %v6841_v12 = vpack.c.bf16 %v2578_v0, %v2573_v62  ;;  %v6203_v32 = vpack.c.bf16 %v2587_v4, %v2582_v1  ;;  %v6853_v62 = vpack.c.bf16 %v2608_v50, %v2603_v48  ;;  %v2611_v0 = vld [vmem:[%s7764_s13 + $0x2580] sm:$0xff]  ;;  %v2616_v1 = vld [vmem:[%s7764_s13 + $0x25a8] sm:$0xff]  ;;  %v2613_v4 = vld [vmem:[%s7764_s13 + $0x2590] sm:$0xff] }
 0x392   : > { %6828 = vmatprep.subr.bf16.mxu0 %v6827_v15  ;;  %v2583_v15 = vld [vmem:[%s7764_s13 + $0x24a0] sm:$0xff]  ;;  %v6217_v37 = vpack.c.bf16 %v2616_v1, %v2611_v0  ;;  %v2641_v50 = vld [vmem:[%s7764_s13 + $0x2670] sm:$0xff] }
 0x393   : > { %6190 = vmatpush1.bf16.msra.mxu1 %v6189_v19  ;;  %v2592_v19 = vld [vmem:[%s7764_s13 + $0x24e8] sm:$0xff]  ;;  %v6845_v24 = vpack.c.bf16 %v2588_v17, %v2583_v15  ;;  %v6857_v15 = vpack.c.bf16 %v2618_v9, %v2613_v4  ;;  %v2621_v17 = vld [vmem:[%s7764_s13 + $0x25d0] sm:$0xff]  ;;  %v2659_v0 = vld [vmem:[%s7764_s13 + $0x2700] sm:$0xff] }
 0x394   : > { %6830 = vmatpush1.bf16.msra.mxu0 %v6829_v7  ;;  %6192 = vmatprep.subr.bf16.mxu1 %v6191_v20  ;;  %v2597_v7 = vld [vmem:[%s7764_s13 + $0x2510] sm:$0xff]  ;;  %v2594_v20 = vld [vmem:[%s7764_s13 + $0x24f8] sm:$0xff]  ;;  %v2651_v9 = vld [vmem:[%s7764_s13 + $0x26c0] sm:$0xff] }
 0x395   : > { %6832 = vmatprep.subr.bf16.mxu0 %v6831_v29  ;;  %v6207_v29 = vpack.c.bf16 %v2597_v7, %v2592_v19  ;;  %v6847_v34 = vpack.c.bf16 %v2599_v21, %v2594_v20  ;;  %v2626_v19 = vld [vmem:[%s7764_s13 + $0x25f8] sm:$0xff]  ;;  %v2623_v7 = vld [vmem:[%s7764_s13 + $0x25e0] sm:$0xff]  ;;  %v2628_v21 = vld [vmem:[%s7764_s13 + $0x2608] sm:$0xff] }
 0x396   : > { %v6221_v31 = vpack.c.bf16 %v2626_v19, %v2621_v17  ;;  %v6861_v33 = vpack.c.bf16 %v2628_v21, %v2623_v7  ;;  %v2669_v17 = vld [vmem:[%s7764_s13 + $0x2750] sm:$0xff] }
 0x397   : > { %6194 = vmatpush1.bf16.msra.mxu1 %v6193_v36  ;;  %v2602_v36 = vld [vmem:[%s7764_s13 + $0x2538] sm:$0xff]  ;;  %v2661_v21 = vld [vmem:[%s7764_s13 + $0x2710] sm:$0xff] }
 0x398   : > { %6834 = vmatpush1.bf16.msra.mxu0 %v6833_v39  ;;  %6196 = vmatprep.subr.bf16.mxu1 %v6195_v40  ;;  %v2607_v39 = vld [vmem:[%s7764_s13 + $0x2560] sm:$0xff]  ;;  %v2604_v40 = vld [vmem:[%s7764_s13 + $0x2548] sm:$0xff] }
 0x399   : > { %6836 = vmatprep.subr.bf16.mxu0 %v6835_v23  ;;  %v6211_v23 = vpack.c.bf16 %v2607_v39, %v2602_v36  ;;  %v6851_v8 = vpack.c.bf16 %v2609_v38, %v2604_v40  ;;  %v2636_v36 = vld [vmem:[%s7764_s13 + $0x2648] sm:$0xff]  ;;  %v2633_v39 = vld [vmem:[%s7764_s13 + $0x2630] sm:$0xff]  ;;  %v2638_v38 = vld [vmem:[%s7764_s13 + $0x2658] sm:$0xff] }
 0x39a   : > { %v6225_v47 = vpack.c.bf16 %v2636_v36, %v2631_v35  ;;  %v6865_v48 = vpack.c.bf16 %v2638_v38, %v2633_v39  ;;  %v2679_v35 = vld [vmem:[%s7764_s13 + $0x27a0] sm:$0xff] }
 0x39b   : > { %6198 = vmatpush1.bf16.msra.mxu1 %v6197_v51  ;;  %v2612_v51 = vld [vmem:[%s7764_s13 + $0x2588] sm:$0xff]  ;;  %v2671_v38 = vld [vmem:[%s7764_s13 + $0x2760] sm:$0xff] }
 0x39c   : > { %6838 = vmatpush1.bf16.msra.mxu0 %v6837_v52  ;;  %6200 = vmatprep.subr.bf16.mxu1 %v6199_v57  ;;  %v2617_v52 = vld [vmem:[%s7764_s13 + $0x25b0] sm:$0xff]  ;;  %v2614_v57 = vld [vmem:[%s7764_s13 + $0x2598] sm:$0xff] }
 0x39d   : > { %6840 = vmatprep.subr.bf16.mxu0 %v6839_v63  ;;  %v6215_v63 = vpack.c.bf16 %v2617_v52, %v2612_v51  ;;  %v6855_v3 = vpack.c.bf16 %v2619_v58, %v2614_v57  ;;  %v2646_v51 = vld [vmem:[%s7764_s13 + $0x2698] sm:$0xff]  ;;  %v2643_v52 = vld [vmem:[%s7764_s13 + $0x2680] sm:$0xff]  ;;  %v2648_v58 = vld [vmem:[%s7764_s13 + $0x26a8] sm:$0xff] }
 0x39e   : > { %v6229_v1 = vpack.c.bf16 %v2646_v51, %v2641_v50  ;;  %v6869_v4 = vpack.c.bf16 %v2648_v58, %v2643_v52  ;;  %v2689_v50 = vld [vmem:[%s7764_s13 + $0x27f0] sm:$0xff] }
 0x39f   : > { %6202 = vmatpush1.bf16.msra.mxu1 %v6201_v10  ;;  %v2622_v10 = vld [vmem:[%s7764_s13 + $0x25d8] sm:$0xff]  ;;  %v2681_v58 = vld [vmem:[%s7764_s13 + $0x27b0] sm:$0xff] }
 0x3a0   : > { %6842 = vmatpush1.bf16.msra.mxu0 %v6841_v12  ;;  %6204 = vmatprep.subr.bf16.mxu1 %v6203_v32  ;;  %v2627_v12 = vld [vmem:[%s7764_s13 + $0x2600] sm:$0xff]  ;;  %v2624_v32 = vld [vmem:[%s7764_s13 + $0x25e8] sm:$0xff] }
 0x3a1   : > { %6844 = vmatprep.subr.bf16.mxu0 %v6843_v16  ;;  %v6219_v16 = vpack.c.bf16 %v2627_v12, %v2622_v10  ;;  %v6859_v20 = vpack.c.bf16 %v2629_v14, %v2624_v32  ;;  %v2656_v10 = vld [vmem:[%s7764_s13 + $0x26e8] sm:$0xff]  ;;  %v2653_v12 = vld [vmem:[%s7764_s13 + $0x26d0] sm:$0xff]  ;;  %v2658_v14 = vld [vmem:[%s7764_s13 + $0x26f8] sm:$0xff] }
 0x3a2   : > { %v6233_v19 = vpack.c.bf16 %v2656_v10, %v2651_v9  ;;  %v6873_v7 = vpack.c.bf16 %v2658_v14, %v2653_v12  ;;  %v2699_v9 = vld [vmem:[%s7764_s13 + $0x2840] sm:$0xff] }
 0x3a3   : > { %6206 = vmatpush1.bf16.msra.mxu1 %v6205_v22  ;;  %v2632_v22 = vld [vmem:[%s7764_s13 + $0x2628] sm:$0xff]  ;;  %v2691_v14 = vld [vmem:[%s7764_s13 + $0x2800] sm:$0xff] }
 0x3a4   : > { %6846 = vmatpush1.bf16.msra.mxu0 %v6845_v24  ;;  %6208 = vmatprep.subr.bf16.mxu1 %v6207_v29  ;;  %v2637_v24 = vld [vmem:[%s7764_s13 + $0x2650] sm:$0xff]  ;;  %v2634_v29 = vld [vmem:[%s7764_s13 + $0x2638] sm:$0xff] }
 0x3a5   : > { %6848 = vmatprep.subr.bf16.mxu0 %v6847_v34  ;;  %v6223_v34 = vpack.c.bf16 %v2637_v24, %v2632_v22  ;;  %v6863_v40 = vpack.c.bf16 %v2639_v5, %v2634_v29  ;;  %v2666_v22 = vld [vmem:[%s7764_s13 + $0x2738] sm:$0xff]  ;;  %v2663_v24 = vld [vmem:[%s7764_s13 + $0x2720] sm:$0xff]  ;;  %v2668_v5 = vld [vmem:[%s7764_s13 + $0x2748] sm:$0xff] }
 0x3a6   : > { %v6237_v36 = vpack.c.bf16 %v2666_v22, %v2661_v21  ;;  %v6877_v39 = vpack.c.bf16 %v2668_v5, %v2663_v24  ;;  %v1386_v21 = vmul.f32 0.01, %v8148_v41  ;;  %v2704_v24 = vld [vmem:[%s7764_s13 + $0x2868] sm:$0xff] }
 0x3a7   : > { %6210 = vmatpush1.bf16.msra.mxu1 %v6209_v43  ;;  %v2642_v43 = vld [vmem:[%s7764_s13 + $0x2678] sm:$0xff] }
 0x3a8   : > { %6850 = vmatpush1.bf16.msra.mxu0 %v6849_v44  ;;  %6212 = vmatprep.subr.bf16.mxu1 %v6211_v23  ;;  %v2647_v44 = vld [vmem:[%s7764_s13 + $0x26a0] sm:$0xff]  ;;  %v2644_v23 = vld [vmem:[%s7764_s13 + $0x2688] sm:$0xff] }
 0x3a9   : > { %6852 = vmatprep.subr.bf16.mxu0 %v6851_v8  ;;  %v6227_v8 = vpack.c.bf16 %v2647_v44, %v2642_v43  ;;  %v6867_v57 = vpack.c.bf16 %v2649_v46, %v2644_v23  ;;  %v2676_v43 = vld [vmem:[%s7764_s13 + $0x2788] sm:$0xff]  ;;  %v2673_v44 = vld [vmem:[%s7764_s13 + $0x2770] sm:$0xff]  ;;  %v2678_v46 = vld [vmem:[%s7764_s13 + $0x2798] sm:$0xff] }
 0x3aa   : > { %v6241_v51 = vpack.c.bf16 %v2676_v43, %v2671_v38  ;;  %v6881_v52 = vpack.c.bf16 %v2678_v46, %v2673_v44  ;;  %v2717_v38 = vld [vmem:[%s7764_s13 + $0x28d0] sm:$0xff]  ;;  %v2714_v44 = vld [vmem:[%s7764_s13 + $0x28b8] sm:$0xff] }
 0x3ab   : > { %6214 = vmatpush1.bf16.msra.mxu1 %v6213_v61  ;;  %v2652_v61 = vld [vmem:[%s7764_s13 + $0x26c8] sm:$0xff] }
 0x3ac   : > { %6854 = vmatpush1.bf16.msra.mxu0 %v6853_v62  ;;  %6216 = vmatprep.subr.bf16.mxu1 %v6215_v63  ;;  %v2657_v62 = vld [vmem:[%s7764_s13 + $0x26f0] sm:$0xff]  ;;  %v2654_v63 = vld [vmem:[%s7764_s13 + $0x26d8] sm:$0xff] }
 0x3ad   : > { %6856 = vmatprep.subr.bf16.mxu0 %v6855_v3  ;;  %v6231_v3 = vpack.c.bf16 %v2657_v62, %v2652_v61  ;;  %v6871_v32 = vpack.c.bf16 %v2659_v0, %v2654_v63  ;;  %v2686_v61 = vld [vmem:[%s7764_s13 + $0x27d8] sm:$0xff]  ;;  %v2683_v62 = vld [vmem:[%s7764_s13 + $0x27c0] sm:$0xff]  ;;  %v2688_v0 = vld [vmem:[%s7764_s13 + $0x27e8] sm:$0xff] }
 0x3ae   : > { %v6245_v10 = vpack.c.bf16 %v2686_v61, %v2681_v58  ;;  %v6885_v12 = vpack.c.bf16 %v2688_v0, %v2683_v62  ;;  %v2727_v58 = vld [vmem:[%s7764_s13 + $0x2920] sm:$0xff]  ;;  %v2724_v61 = vld [vmem:[%s7764_s13 + $0x2908] sm:$0xff]  ;;  %v2729_v62 = vld [vmem:[%s7764_s13 + $0x2930] sm:$0xff] }
 0x3af   : > { %6218 = vmatpush1.bf16.msra.mxu1 %v6217_v37  ;;  %v2662_v37 = vld [vmem:[%s7764_s13 + $0x2718] sm:$0xff] }
 0x3b0   : > { %6858 = vmatpush1.bf16.msra.mxu0 %v6857_v15  ;;  %6220 = vmatprep.subr.bf16.mxu1 %v6219_v16  ;;  %v2667_v15 = vld [vmem:[%s7764_s13 + $0x2740] sm:$0xff]  ;;  %v2664_v16 = vld [vmem:[%s7764_s13 + $0x2728] sm:$0xff] }
 0x3b1   : > { %6860 = vmatprep.subr.bf16.mxu0 %v6859_v20  ;;  %v6235_v20 = vpack.c.bf16 %v2667_v15, %v2662_v37  ;;  %v6875_v29 = vpack.c.bf16 %v2669_v17, %v2664_v16  ;;  %v2696_v37 = vld [vmem:[%s7764_s13 + $0x2828] sm:$0xff]  ;;  %v1383_v15 = vmul.f32 0.01, %v8117_v56  ;;  %v2693_v17 = vld [vmem:[%s7764_s13 + $0x2810] sm:$0xff] }
 0x3b2   : > { %v6249_v22 = vpack.c.bf16 %v2696_v37, %v2691_v14  ;;  %v2737_v14 = vld [vmem:[%s7764_s13 + $0x2970] sm:$0xff]  ;;  %v2734_v37 = vld [vmem:[%s7764_s13 + $0x2958] sm:$0xff] }
 0x3b3   : > { %6222 = vmatpush1.bf16.msra.mxu1 %v6221_v31  ;;  %v2672_v31 = vld [vmem:[%s7764_s13 + $0x2768] sm:$0xff] }
 0x3b4   : > { %6862 = vmatpush1.bf16.msra.mxu0 %v6861_v33  ;;  %6224 = vmatprep.subr.bf16.mxu1 %v6223_v34  ;;  %v2677_v33 = vld [vmem:[%s7764_s13 + $0x2790] sm:$0xff]  ;;  %v2674_v34 = vld [vmem:[%s7764_s13 + $0x2778] sm:$0xff] }
 0x3b5   : > { %6864 = vmatprep.subr.bf16.mxu0 %v6863_v40  ;;  %v6239_v40 = vpack.c.bf16 %v2677_v33, %v2672_v31  ;;  %v6879_v23 = vpack.c.bf16 %v2679_v35, %v2674_v34  ;;  %v2701_v31 = vld [vmem:[%s7764_s13 + $0x2850] sm:$0xff]  ;;  %v2706_v33 = vld [vmem:[%s7764_s13 + $0x2878] sm:$0xff]  ;;  %v2703_v34 = vld [vmem:[%s7764_s13 + $0x2860] sm:$0xff]  ;;  %v9091_v35 = vsel %vm1363_vm2, %v8117_v56, %v1383_v15  ;;  %v9103_v56 = vsel %vm1366_vm3, %v8148_v41, %v1386_v21 }
 0x3b6   : > { %v6253_v46 = vpack.c.bf16 %v2706_v33, %v2701_v31  ;;  %v2718_v41 = vld [vmem:[%s7764_s13 + $0x28d8] sm:$0xff]  ;;  %v2739_v15 = vld [vmem:[%s7764_s13 + $0x2980] sm:$0xff]  ;;  %v2733_v21 = vld [vmem:[%s7764_s13 + $0x2950] sm:$0xff] }
 0x3b7   : > { %6226 = vmatpush1.bf16.msra.mxu1 %v6225_v47  ;;  %v2682_v47 = vld [vmem:[%s7764_s13 + $0x27b8] sm:$0xff]  ;;  %v2744_v31 = vld [vmem:[%s7764_s13 + $0x29a8] sm:$0xff]  ;;  %v2749_v33 = vld [vmem:[%s7764_s13 + $0x29d0] sm:$0xff] }
 0x3b8   : > { %6866 = vmatpush1.bf16.msra.mxu0 %v6865_v48  ;;  %6228 = vmatprep.subr.bf16.mxu1 %v6227_v8  ;;  %v2687_v48 = vld [vmem:[%s7764_s13 + $0x27e0] sm:$0xff]  ;;  %v2684_v8 = vld [vmem:[%s7764_s13 + $0x27c8] sm:$0xff] }
 0x3b9   : > { %6868 = vmatprep.subr.bf16.mxu0 %v6867_v57  ;;  %v6243_v57 = vpack.c.bf16 %v2687_v48, %v2682_v47  ;;  %v6883_v63 = vpack.c.bf16 %v2689_v50, %v2684_v8  ;;  %v2711_v8 = vld [vmem:[%s7764_s13 + $0x28a0] sm:$0xff]  ;;  %v2716_v50 = vld [vmem:[%s7764_s13 + $0x28c8] sm:$0xff] }
 0x3bb   : > { %6230 = vmatpush1.bf16.msra.mxu1 %v6229_v1  ;;  %v2692_v1 = vld [vmem:[%s7764_s13 + $0x2808] sm:$0xff] }
 0x3bc   : > { %6870 = vmatpush1.bf16.msra.mxu0 %v6869_v4  ;;  %6232 = vmatprep.subr.bf16.mxu1 %v6231_v3  ;;  %v2697_v4 = vld [vmem:[%s7764_s13 + $0x2830] sm:$0xff]  ;;  %v2694_v3 = vld [vmem:[%s7764_s13 + $0x2818] sm:$0xff] }
 0x3bd   : > { %6872 = vmatprep.subr.bf16.mxu0 %v6871_v32  ;;  %v6247_v32 = vpack.c.bf16 %v2697_v4, %v2692_v1  ;;  %v6887_v16 = vpack.c.bf16 %v2699_v9, %v2694_v3  ;;  %v2721_v4 = vld [vmem:[%s7764_s13 + $0x28f0] sm:$0xff]  ;;  %v2726_v3 = vld [vmem:[%s7764_s13 + $0x2918] sm:$0xff]  ;;  %v2723_v9 = vld [vmem:[%s7764_s13 + $0x2900] sm:$0xff] }
 0x3bf   : > { %6234 = vmatpush1.bf16.msra.mxu1 %v6233_v19  ;;  %v2698_v19 = vld [vmem:[%s7764_s13 + $0x2838] sm:$0xff] }
 0x3c0   : > { %6874 = vmatpush1.bf16.msra.mxu0 %v6873_v7  ;;  %6236 = vmatprep.subr.bf16.mxu1 %v6235_v20  ;;  %v2702_v7 = vld [vmem:[%s7764_s13 + $0x2858] sm:$0xff]  ;;  %v2707_v20 = vld [vmem:[%s7764_s13 + $0x2880] sm:$0xff]  ;;  %v6889_v5 = vpack.c.bf16 %v2698_v19, %v2693_v17 }
 0x3c1   : > { %6876 = vmatprep.subr.bf16.mxu0 %v6875_v29  ;;  %v2709_v29 = vld [vmem:[%s7764_s13 + $0x2890] sm:$0xff] }
 0x3c2   : > { %v6891_v43 = vpack.c.bf16 %v2709_v29, %v2704_v24  ;;  %v2738_v24 = vld [vmem:[%s7764_s13 + $0x2978] sm:$0xff] }
 0x3c3   : > { %6238 = vmatpush1.bf16.msra.mxu1 %v6237_v36  ;;  %v6251_v36 = vpack.c.bf16 %v2707_v20, %v2702_v7  ;;  %v2731_v7 = vld [vmem:[%s7764_s13 + $0x2940] sm:$0xff]  ;;  %v2736_v20 = vld [vmem:[%s7764_s13 + $0x2968] sm:$0xff]  ;;  %v2742_v29 = vld [vmem:[%s7764_s13 + $0x2998] sm:$0xff] }
 0x3c4   : > { %6878 = vmatpush1.bf16.msra.mxu0 %v6877_v39  ;;  %6240 = vmatprep.subr.bf16.mxu1 %v6239_v40  ;;  %v2708_v39 = vld [vmem:[%s7764_s13 + $0x2888] sm:$0xff] }
 0x3c5   : > { %6880 = vmatprep.subr.bf16.mxu0 %v6879_v23  ;;  %v2712_v40 = vld [vmem:[%s7764_s13 + $0x28a8] sm:$0xff]  ;;  %v2719_v23 = vld [vmem:[%s7764_s13 + $0x28e0] sm:$0xff]  ;;  %v6893_v47 = vpack.c.bf16 %v2708_v39, %v2703_v34  ;;  %v6265_v34 = vpack.c.bf16 %v2736_v20, %v2731_v7 }
 0x3c6   : > { %v6255_v48 = vpack.c.bf16 %v2717_v38, %v2712_v40  ;;  %v2741_v40 = vld [vmem:[%s7764_s13 + $0x2990] sm:$0xff]  ;;  %v2746_v38 = vld [vmem:[%s7764_s13 + $0x29b8] sm:$0xff]  ;;  %v2779_v7 = vld [vmem:[%s7764_s13 + $0x2ac0] sm:$0xff] }
 0x3c7   : > { %6242 = vmatpush1.bf16.msra.mxu1 %v6241_v51  ;;  %v2713_v51 = vld [vmem:[%s7764_s13 + $0x28b0] sm:$0xff] }
 0x3c8   : > { %6882 = vmatpush1.bf16.msra.mxu0 %v6881_v52  ;;  %6244 = vmatprep.subr.bf16.mxu1 %v6243_v57  ;;  %v6895_v52 = vpack.c.bf16 %v2719_v23, %v2714_v44  ;;  %v2722_v57 = vld [vmem:[%s7764_s13 + $0x28f8] sm:$0xff]  ;;  %v6897_v0 = vpack.c.bf16 %v2718_v41, %v2713_v51  ;;  %v6907_v44 = vpack.c.bf16 %v2749_v33, %v2744_v31  ;;  %v2748_v23 = vld [vmem:[%s7764_s13 + $0x29c8] sm:$0xff]  ;;  %v2751_v41 = vld [vmem:[%s7764_s13 + $0x29e0] sm:$0xff] }
 0x3c9   : > { %6884 = vmatprep.subr.bf16.mxu0 %v6883_v63  ;;  %v6257_v63 = vpack.c.bf16 %v2716_v50, %v2711_v8  ;;  %v6259_v1 = vpack.c.bf16 %v2727_v58, %v2722_v57  ;;  %v2759_v8 = vld [vmem:[%s7764_s13 + $0x2a20] sm:$0xff]  ;;  %v6269_v50 = vpack.c.bf16 %v2746_v38, %v2741_v40  ;;  %v2756_v57 = vld [vmem:[%s7764_s13 + $0x2a08] sm:$0xff]  ;;  %v2753_v58 = vld [vmem:[%s7764_s13 + $0x29f0] sm:$0xff] }
 0x3ca   : > { %v2778_v33 = vld [vmem:[%s7764_s13 + $0x2ab8] sm:$0xff]  ;;  %v2789_v40 = vld [vmem:[%s7764_s13 + $0x2b10] sm:$0xff] }
 0x3cb   : > { %6246 = vmatpush1.bf16.msra.mxu1 %v6245_v10  ;;  %v6899_v10 = vpack.c.bf16 %v2729_v62, %v2724_v61  ;;  %v2758_v62 = vld [vmem:[%s7764_s13 + $0x2a18] sm:$0xff] }
 0x3cc   : > { %6886 = vmatpush1.bf16.msra.mxu0 %v6885_v12  ;;  %6248 = vmatprep.subr.bf16.mxu1 %v6247_v32  ;;  %v2728_v12 = vld [vmem:[%s7764_s13 + $0x2928] sm:$0xff] }
 0x3cd   : > { %6888 = vmatprep.subr.bf16.mxu0 %v6887_v16  ;;  %v2732_v32 = vld [vmem:[%s7764_s13 + $0x2948] sm:$0xff]  ;;  %v6261_v16 = vpack.c.bf16 %v2726_v3, %v2721_v4  ;;  %v6901_v17 = vpack.c.bf16 %v2728_v12, %v2723_v9  ;;  %v2769_v4 = vld [vmem:[%s7764_s13 + $0x2a70] sm:$0xff]  ;;  %v6273_v3 = vpack.c.bf16 %v2756_v57, %v2751_v41  ;;  %v6913_v9 = vpack.c.bf16 %v2758_v62, %v2753_v58  ;;  %v2799_v41 = vld [vmem:[%s7764_s13 + $0x2b60] sm:$0xff] }
 0x3ce   : > { %3573 = vmatmul.mubr.f32.vlgmr.msra.gmra.mrb[10].mxu1 %v9091_v35  ;;  %v6263_v19 = vpack.c.bf16 %v2737_v14, %v2732_v32  ;;  %v2761_v12 = vld [vmem:[%s7764_s13 + $0x2a30] sm:$0xff]  ;;  %v2766_v32 = vld [vmem:[%s7764_s13 + $0x2a58] sm:$0xff]  ;;  %v2763_v14 = vld [vmem:[%s7764_s13 + $0x2a40] sm:$0xff] }
 0x3cf   : > { %4283 = vmatmul.mubr.f32.vlgmr.msra.gmra.mrb[12].mxu0 %v9091_v35  ;;  %6250 = vmatpush1.bf16.msra.mxu1 %v6249_v22  ;;  %v6903_v22 = vpack.c.bf16 %v2739_v15, %v2734_v37  ;;  %v2768_v15 = vld [vmem:[%s7764_s13 + $0x2a68] sm:$0xff]  ;;  %v6277_v20 = vpack.c.bf16 %v2766_v32, %v2761_v12  ;;  %v2791_v62 = vld [vmem:[%s7764_s13 + $0x2b20] sm:$0xff]  ;;  %v2809_v12 = vld [vmem:[%s7764_s13 + $0x2bb0] sm:$0xff] }
 0x3d0   : > { %3643 = vmatprep.mubr.f32.mxu1 %v9103_v56  ;;  %6890 = vmatpush1.bf16.msra.mxu0 %v6889_v5  ;;  %v2747_v5 = vld [vmem:[%s7764_s13 + $0x29c0] sm:$0xff] }
 0x3d1   : > { %4353 = vmatprep.mubr.f32.mxu0 %v9103_v56  ;;  %6252 = vmatprep.subr.bf16.mxu1 %v6251_v36  ;;  %v6905_v36 = vpack.c.bf16 %v2738_v24, %v2733_v21  ;;  %v6267_v39 = vpack.c.bf16 %v2747_v5, %v2742_v29  ;;  %v6917_v21 = vpack.c.bf16 %v2768_v15, %v2763_v14  ;;  %v2771_v24 = vld [vmem:[%s7764_s13 + $0x2a80] sm:$0xff]  ;;  %v2776_v29 = vld [vmem:[%s7764_s13 + $0x2aa8] sm:$0xff]  ;;  %v2773_v5 = vld [vmem:[%s7764_s13 + $0x2a90] sm:$0xff] }
 0x3d2   : > { %6892 = vmatprep.subr.bf16.mxu0 %v6891_v43  ;;  %v2743_v43 = vld [vmem:[%s7764_s13 + $0x29a0] sm:$0xff]  ;;  %v6281_v38 = vpack.c.bf16 %v2776_v29, %v2771_v24  ;;  %v2801_v15 = vld [vmem:[%s7764_s13 + $0x2b70] sm:$0xff] }
 0x3d3   : > { %6254 = vmatpush1.bf16.msra.mxu1 %v6253_v46  ;;  %v2752_v46 = vld [vmem:[%s7764_s13 + $0x29e8] sm:$0xff]  ;;  %v6909_v51 = vpack.c.bf16 %v2748_v23, %v2743_v43  ;;  %v6921_v43 = vpack.c.bf16 %v2778_v33, %v2773_v5  ;;  %v2781_v23 = vld [vmem:[%s7764_s13 + $0x2ad0] sm:$0xff]  ;;  %v2819_v24 = vld [vmem:[%s7764_s13 + $0x2c00] sm:$0xff] }
 0x3d4   : > { %6894 = vmatpush1.bf16.msra.mxu0 %v6893_v47  ;;  %6256 = vmatprep.subr.bf16.mxu1 %v6255_v48  ;;  %v2757_v47 = vld [vmem:[%s7764_s13 + $0x2a10] sm:$0xff]  ;;  %v2754_v48 = vld [vmem:[%s7764_s13 + $0x29f8] sm:$0xff]  ;;  %v2811_v33 = vld [vmem:[%s7764_s13 + $0x2bc0] sm:$0xff] }
 0x3d5   : > { %6896 = vmatprep.subr.bf16.mxu0 %v6895_v52  ;;  %v6271_v52 = vpack.c.bf16 %v2757_v47, %v2752_v46  ;;  %v6911_v61 = vpack.c.bf16 %v2759_v8, %v2754_v48  ;;  %v2786_v46 = vld [vmem:[%s7764_s13 + $0x2af8] sm:$0xff]  ;;  %v2783_v47 = vld [vmem:[%s7764_s13 + $0x2ae0] sm:$0xff]  ;;  %v2788_v8 = vld [vmem:[%s7764_s13 + $0x2b08] sm:$0xff] }
 0x3d6   : > { %v6285_v57 = vpack.c.bf16 %v2786_v46, %v2781_v23  ;;  %v6925_v58 = vpack.c.bf16 %v2788_v8, %v2783_v47  ;;  %v2829_v23 = vld [vmem:[%s7764_s13 + $0x2c50] sm:$0xff] }
 0x3d7   : > { %6258 = vmatpush1.bf16.msra.mxu1 %v6257_v63  ;;  %v2762_v63 = vld [vmem:[%s7764_s13 + $0x2a38] sm:$0xff]  ;;  %v2821_v8 = vld [vmem:[%s7764_s13 + $0x2c10] sm:$0xff] }
 0x3d8   : > { %6898 = vmatpush1.bf16.msra.mxu0 %v6897_v0  ;;  %6260 = vmatprep.subr.bf16.mxu1 %v6259_v1  ;;  %v2767_v0 = vld [vmem:[%s7764_s13 + $0x2a60] sm:$0xff]  ;;  %v2764_v1 = vld [vmem:[%s7764_s13 + $0x2a48] sm:$0xff] }
 0x3d9   : > { %6900 = vmatprep.subr.bf16.mxu0 %v6899_v10  ;;  %v6275_v10 = vpack.c.bf16 %v2767_v0, %v2762_v63  ;;  %v6915_v37 = vpack.c.bf16 %v2769_v4, %v2764_v1  ;;  %v2796_v63 = vld [vmem:[%s7764_s13 + $0x2b48] sm:$0xff]  ;;  %v2793_v0 = vld [vmem:[%s7764_s13 + $0x2b30] sm:$0xff]  ;;  %v2798_v4 = vld [vmem:[%s7764_s13 + $0x2b58] sm:$0xff] }
 0x3da   : > { %v6289_v32 = vpack.c.bf16 %v2796_v63, %v2791_v62  ;;  %v6929_v14 = vpack.c.bf16 %v2798_v4, %v2793_v0  ;;  %v2839_v62 = vld [vmem:[%s7764_s13 + $0x2ca0] sm:$0xff] }
 0x3db   : > { %6262 = vmatpush1.bf16.msra.mxu1 %v6261_v16  ;;  %v2772_v16 = vld [vmem:[%s7764_s13 + $0x2a88] sm:$0xff]  ;;  %v2831_v4 = vld [vmem:[%s7764_s13 + $0x2c60] sm:$0xff] }
 0x3dc   : > { %6902 = vmatpush1.bf16.msra.mxu0 %v6901_v17  ;;  %6264 = vmatprep.subr.bf16.mxu1 %v6263_v19  ;;  %v2777_v17 = vld [vmem:[%s7764_s13 + $0x2ab0] sm:$0xff]  ;;  %v2774_v19 = vld [vmem:[%s7764_s13 + $0x2a98] sm:$0xff] }
 0x3dd   : > { %6904 = vmatprep.subr.bf16.mxu0 %v6903_v22  ;;  %v6279_v22 = vpack.c.bf16 %v2777_v17, %v2772_v16  ;;  %v6919_v31 = vpack.c.bf16 %v2779_v7, %v2774_v19  ;;  %v2806_v16 = vld [vmem:[%s7764_s13 + $0x2b98] sm:$0xff]  ;;  %v2803_v17 = vld [vmem:[%s7764_s13 + $0x2b80] sm:$0xff]  ;;  %v2808_v7 = vld [vmem:[%s7764_s13 + $0x2ba8] sm:$0xff] }
 0x3de   : > { %v6293_v29 = vpack.c.bf16 %v2806_v16, %v2801_v15  ;;  %v6933_v5 = vpack.c.bf16 %v2808_v7, %v2803_v17  ;;  %v2849_v15 = vld [vmem:[%s7764_s13 + $0x2cf0] sm:$0xff] }
 0x3df   : > { %6266 = vmatpush1.bf16.msra.mxu1 %v6265_v34  ;;  %v2782_v34 = vld [vmem:[%s7764_s13 + $0x2ad8] sm:$0xff]  ;;  %v2841_v7 = vld [vmem:[%s7764_s13 + $0x2cb0] sm:$0xff] }
 0x3e0   : > { %6906 = vmatpush1.bf16.msra.mxu0 %v6905_v36  ;;  %6268 = vmatprep.subr.bf16.mxu1 %v6267_v39  ;;  %v2787_v36 = vld [vmem:[%s7764_s13 + $0x2b00] sm:$0xff]  ;;  %v2784_v39 = vld [vmem:[%s7764_s13 + $0x2ae8] sm:$0xff] }
 0x3e1   : > { %6908 = vmatprep.subr.bf16.mxu0 %v6907_v44  ;;  %v6283_v44 = vpack.c.bf16 %v2787_v36, %v2782_v34  ;;  %v6923_v48 = vpack.c.bf16 %v2789_v40, %v2784_v39  ;;  %v2816_v34 = vld [vmem:[%s7764_s13 + $0x2be8] sm:$0xff]  ;;  %v2813_v36 = vld [vmem:[%s7764_s13 + $0x2bd0] sm:$0xff]  ;;  %v2818_v40 = vld [vmem:[%s7764_s13 + $0x2bf8] sm:$0xff] }
 0x3e2   : > { %v6297_v46 = vpack.c.bf16 %v2816_v34, %v2811_v33  ;;  %v6937_v47 = vpack.c.bf16 %v2818_v40, %v2813_v36  ;;  %v2859_v33 = vld [vmem:[%s7764_s13 + $0x2d40] sm:$0xff] }
 0x3e3   : > { %6270 = vmatpush1.bf16.msra.mxu1 %v6269_v50  ;;  %v2792_v50 = vld [vmem:[%s7764_s13 + $0x2b28] sm:$0xff]  ;;  %v2851_v40 = vld [vmem:[%s7764_s13 + $0x2d00] sm:$0xff] }
 0x3e4   : > { %6910 = vmatpush1.bf16.msra.mxu0 %v6909_v51  ;;  %6272 = vmatprep.subr.bf16.mxu1 %v6271_v52  ;;  %v2797_v51 = vld [vmem:[%s7764_s13 + $0x2b50] sm:$0xff]  ;;  %v2794_v52 = vld [vmem:[%s7764_s13 + $0x2b38] sm:$0xff] }
 0x3e5   : > { %6912 = vmatprep.subr.bf16.mxu0 %v6911_v61  ;;  %v6287_v61 = vpack.c.bf16 %v2797_v51, %v2792_v50  ;;  %v6927_v1 = vpack.c.bf16 %v2799_v41, %v2794_v52  ;;  %v2826_v50 = vld [vmem:[%s7764_s13 + $0x2c38] sm:$0xff]  ;;  %v2823_v51 = vld [vmem:[%s7764_s13 + $0x2c20] sm:$0xff]  ;;  %v2828_v41 = vld [vmem:[%s7764_s13 + $0x2c48] sm:$0xff] }
 0x3e6   : > { %v6301_v63 = vpack.c.bf16 %v2826_v50, %v2821_v8  ;;  %v6941_v0 = vpack.c.bf16 %v2828_v41, %v2823_v51  ;;  %v1388_v8 = vmul.f32 0.01, %v8150_v42  ;;  %v2864_v51 = vld [vmem:[%s7764_s13 + $0x2d68] sm:$0xff] }
 0x3e7   : > { %6274 = vmatpush1.bf16.msra.mxu1 %v6273_v3  ;;  %v2802_v3 = vld [vmem:[%s7764_s13 + $0x2b78] sm:$0xff] }
 0x3e8   : > { %6914 = vmatpush1.bf16.msra.mxu0 %v6913_v9  ;;  %6276 = vmatprep.subr.bf16.mxu1 %v6275_v10  ;;  %v2807_v9 = vld [vmem:[%s7764_s13 + $0x2ba0] sm:$0xff]  ;;  %v2804_v10 = vld [vmem:[%s7764_s13 + $0x2b88] sm:$0xff] }
 0x3e9   : > { %6916 = vmatprep.subr.bf16.mxu0 %v6915_v37  ;;  %v6291_v37 = vpack.c.bf16 %v2807_v9, %v2802_v3  ;;  %v6931_v19 = vpack.c.bf16 %v2809_v12, %v2804_v10  ;;  %v2836_v3 = vld [vmem:[%s7764_s13 + $0x2c88] sm:$0xff]  ;;  %v2833_v9 = vld [vmem:[%s7764_s13 + $0x2c70] sm:$0xff]  ;;  %v2838_v12 = vld [vmem:[%s7764_s13 + $0x2c98] sm:$0xff] }
 0x3ea   : > { %v6305_v16 = vpack.c.bf16 %v2836_v3, %v2831_v4  ;;  %v6945_v17 = vpack.c.bf16 %v2838_v12, %v2833_v9  ;;  %v2877_v4 = vld [vmem:[%s7764_s13 + $0x2dd0] sm:$0xff]  ;;  %v2874_v9 = vld [vmem:[%s7764_s13 + $0x2db8] sm:$0xff] }
 0x3eb   : > { %6278 = vmatpush1.bf16.msra.mxu1 %v6277_v20  ;;  %v2812_v20 = vld [vmem:[%s7764_s13 + $0x2bc8] sm:$0xff] }
 0x3ec   : > { %6918 = vmatpush1.bf16.msra.mxu0 %v6917_v21  ;;  %6280 = vmatprep.subr.bf16.mxu1 %v6279_v22  ;;  %v2817_v21 = vld [vmem:[%s7764_s13 + $0x2bf0] sm:$0xff]  ;;  %v2814_v22 = vld [vmem:[%s7764_s13 + $0x2bd8] sm:$0xff] }
 0x3ed   : > { %6920 = vmatprep.subr.bf16.mxu0 %v6919_v31  ;;  %v6295_v31 = vpack.c.bf16 %v2817_v21, %v2812_v20  ;;  %v6935_v39 = vpack.c.bf16 %v2819_v24, %v2814_v22  ;;  %v2846_v20 = vld [vmem:[%s7764_s13 + $0x2cd8] sm:$0xff]  ;;  %v2843_v21 = vld [vmem:[%s7764_s13 + $0x2cc0] sm:$0xff]  ;;  %v2848_v24 = vld [vmem:[%s7764_s13 + $0x2ce8] sm:$0xff] }
 0x3ee   : > { %v6309_v34 = vpack.c.bf16 %v2846_v20, %v2841_v7  ;;  %v6949_v36 = vpack.c.bf16 %v2848_v24, %v2843_v21  ;;  %v2887_v7 = vld [vmem:[%s7764_s13 + $0x2e20] sm:$0xff]  ;;  %v2884_v20 = vld [vmem:[%s7764_s13 + $0x2e08] sm:$0xff]  ;;  %v2889_v21 = vld [vmem:[%s7764_s13 + $0x2e30] sm:$0xff] }
 0x3ef   : > { %6282 = vmatpush1.bf16.msra.mxu1 %v6281_v38  ;;  %v2822_v38 = vld [vmem:[%s7764_s13 + $0x2c18] sm:$0xff] }
 0x3f0   : > { %6922 = vmatpush1.bf16.msra.mxu0 %v6921_v43  ;;  %6284 = vmatprep.subr.bf16.mxu1 %v6283_v44  ;;  %v2827_v43 = vld [vmem:[%s7764_s13 + $0x2c40] sm:$0xff]  ;;  %v2824_v44 = vld [vmem:[%s7764_s13 + $0x2c28] sm:$0xff] }
 0x3f1   : > { %6924 = vmatprep.subr.bf16.mxu0 %v6923_v48  ;;  %v6299_v48 = vpack.c.bf16 %v2827_v43, %v2822_v38  ;;  %v6939_v52 = vpack.c.bf16 %v2829_v23, %v2824_v44  ;;  %v2856_v38 = vld [vmem:[%s7764_s13 + $0x2d28] sm:$0xff]  ;;  %v1385_v43 = vmul.f32 0.01, %v8139_v27  ;;  %v2853_v23 = vld [vmem:[%s7764_s13 + $0x2d10] sm:$0xff] }
 0x3f2   : > { %v6313_v50 = vpack.c.bf16 %v2856_v38, %v2851_v40  ;;  %v2897_v40 = vld [vmem:[%s7764_s13 + $0x2e70] sm:$0xff]  ;;  %v2894_v38 = vld [vmem:[%s7764_s13 + $0x2e58] sm:$0xff] }
 0x3f3   : > { %6286 = vmatpush1.bf16.msra.mxu1 %v6285_v57  ;;  %v2832_v57 = vld [vmem:[%s7764_s13 + $0x2c68] sm:$0xff] }
 0x3f4   : > { %6926 = vmatpush1.bf16.msra.mxu0 %v6925_v58  ;;  %6288 = vmatprep.subr.bf16.mxu1 %v6287_v61  ;;  %v2837_v58 = vld [vmem:[%s7764_s13 + $0x2c90] sm:$0xff]  ;;  %v2834_v61 = vld [vmem:[%s7764_s13 + $0x2c78] sm:$0xff] }
 0x3f5   : > { %6928 = vmatprep.subr.bf16.mxu0 %v6927_v1  ;;  %v6303_v1 = vpack.c.bf16 %v2837_v58, %v2832_v57  ;;  %v6943_v10 = vpack.c.bf16 %v2839_v62, %v2834_v61  ;;  %v2861_v57 = vld [vmem:[%s7764_s13 + $0x2d50] sm:$0xff]  ;;  %v2866_v58 = vld [vmem:[%s7764_s13 + $0x2d78] sm:$0xff]  ;;  %v2863_v61 = vld [vmem:[%s7764_s13 + $0x2d60] sm:$0xff]  ;;  %v9235_v62 = vsel %vm1365_vm4, %v8139_v27, %v1385_v43  ;;  %v9247_v27 = vsel %vm1368_vm5, %v8150_v42, %v1388_v8 }
 0x3f6   : > { %v6317_v12 = vpack.c.bf16 %v2866_v58, %v2861_v57  ;;  %v2878_v42 = vld [vmem:[%s7764_s13 + $0x2dd8] sm:$0xff]  ;;  %v2899_v43 = vld [vmem:[%s7764_s13 + $0x2e80] sm:$0xff]  ;;  %v2893_v8 = vld [vmem:[%s7764_s13 + $0x2e50] sm:$0xff] }
 0x3f7   : > { %6290 = vmatpush1.bf16.msra.mxu1 %v6289_v32  ;;  %v2842_v32 = vld [vmem:[%s7764_s13 + $0x2cb8] sm:$0xff]  ;;  %v2904_v57 = vld [vmem:[%s7764_s13 + $0x2ea8] sm:$0xff]  ;;  %v2909_v58 = vld [vmem:[%s7764_s13 + $0x2ed0] sm:$0xff] }
 0x3f8   : > { %6930 = vmatpush1.bf16.msra.mxu0 %v6929_v14  ;;  %6292 = vmatprep.subr.bf16.mxu1 %v6291_v37  ;;  %v2847_v14 = vld [vmem:[%s7764_s13 + $0x2ce0] sm:$0xff]  ;;  %v2844_v37 = vld [vmem:[%s7764_s13 + $0x2cc8] sm:$0xff] }
 0x3f9   : > { %6932 = vmatprep.subr.bf16.mxu0 %v6931_v19  ;;  %v6307_v19 = vpack.c.bf16 %v2847_v14, %v2842_v32  ;;  %v6947_v22 = vpack.c.bf16 %v2849_v15, %v2844_v37  ;;  %v2871_v37 = vld [vmem:[%s7764_s13 + $0x2da0] sm:$0xff]  ;;  %v2876_v15 = vld [vmem:[%s7764_s13 + $0x2dc8] sm:$0xff] }
 0x3fb   : > { %6294 = vmatpush1.bf16.msra.mxu1 %v6293_v29  ;;  %v2852_v29 = vld [vmem:[%s7764_s13 + $0x2d08] sm:$0xff] }
 0x3fc   : > { %6934 = vmatpush1.bf16.msra.mxu0 %v6933_v5  ;;  %6296 = vmatprep.subr.bf16.mxu1 %v6295_v31  ;;  %v2857_v5 = vld [vmem:[%s7764_s13 + $0x2d30] sm:$0xff]  ;;  %v2854_v31 = vld [vmem:[%s7764_s13 + $0x2d18] sm:$0xff] }
 0x3fd   : > { %6936 = vmatprep.subr.bf16.mxu0 %v6935_v39  ;;  %v6311_v39 = vpack.c.bf16 %v2857_v5, %v2852_v29  ;;  %v6951_v44 = vpack.c.bf16 %v2859_v33, %v2854_v31  ;;  %v2881_v5 = vld [vmem:[%s7764_s13 + $0x2df0] sm:$0xff]  ;;  %v2886_v31 = vld [vmem:[%s7764_s13 + $0x2e18] sm:$0xff]  ;;  %v2883_v33 = vld [vmem:[%s7764_s13 + $0x2e00] sm:$0xff] }
 0x3ff   : > { %6298 = vmatpush1.bf16.msra.mxu1 %v6297_v46  ;;  %v2858_v46 = vld [vmem:[%s7764_s13 + $0x2d38] sm:$0xff] }
 0x400   : > { %6938 = vmatpush1.bf16.msra.mxu0 %v6937_v47  ;;  %6300 = vmatprep.subr.bf16.mxu1 %v6299_v48  ;;  %v2862_v47 = vld [vmem:[%s7764_s13 + $0x2d58] sm:$0xff]  ;;  %v2867_v48 = vld [vmem:[%s7764_s13 + $0x2d80] sm:$0xff]  ;;  %v6953_v41 = vpack.c.bf16 %v2858_v46, %v2853_v23 }
 0x401   : > { %6940 = vmatprep.subr.bf16.mxu0 %v6939_v52  ;;  %v2869_v52 = vld [vmem:[%s7764_s13 + $0x2d90] sm:$0xff] }
 0x402   : > { %v6955_v3 = vpack.c.bf16 %v2869_v52, %v2864_v51  ;;  %v2898_v51 = vld [vmem:[%s7764_s13 + $0x2e78] sm:$0xff] }
 0x403   : > { %6302 = vmatpush1.bf16.msra.mxu1 %v6301_v63  ;;  %v6315_v63 = vpack.c.bf16 %v2867_v48, %v2862_v47  ;;  %v2891_v47 = vld [vmem:[%s7764_s13 + $0x2e40] sm:$0xff]  ;;  %v2896_v48 = vld [vmem:[%s7764_s13 + $0x2e68] sm:$0xff]  ;;  %v2902_v52 = vld [vmem:[%s7764_s13 + $0x2e98] sm:$0xff] }
 0x404   : > { %6942 = vmatpush1.bf16.msra.mxu0 %v6941_v0  ;;  %6304 = vmatprep.subr.bf16.mxu1 %v6303_v1  ;;  %v2868_v0 = vld [vmem:[%s7764_s13 + $0x2d88] sm:$0xff] }
 0x405   : > { %6944 = vmatprep.subr.bf16.mxu0 %v6943_v10  ;;  %v2872_v1 = vld [vmem:[%s7764_s13 + $0x2da8] sm:$0xff]  ;;  %v2879_v10 = vld [vmem:[%s7764_s13 + $0x2de0] sm:$0xff]  ;;  %v6957_v32 = vpack.c.bf16 %v2868_v0, %v2863_v61  ;;  %v6329_v61 = vpack.c.bf16 %v2896_v48, %v2891_v47 }
 0x406   : > { %v6319_v14 = vpack.c.bf16 %v2877_v4, %v2872_v1  ;;  %v2901_v1 = vld [vmem:[%s7764_s13 + $0x2e90] sm:$0xff]  ;;  %v2906_v4 = vld [vmem:[%s7764_s13 + $0x2eb8] sm:$0xff]  ;;  %v2939_v47 = vld [vmem:[%s7764_s13 + $0x2fc0] sm:$0xff] }
 0x407   : > { %6306 = vmatpush1.bf16.msra.mxu1 %v6305_v16  ;;  %v2873_v16 = vld [vmem:[%s7764_s13 + $0x2db0] sm:$0xff] }
 0x408   : > { %6946 = vmatpush1.bf16.msra.mxu0 %v6945_v17  ;;  %6308 = vmatprep.subr.bf16.mxu1 %v6307_v19  ;;  %v6959_v17 = vpack.c.bf16 %v2879_v10, %v2874_v9  ;;  %v2882_v19 = vld [vmem:[%s7764_s13 + $0x2df8] sm:$0xff]  ;;  %v6961_v24 = vpack.c.bf16 %v2878_v42, %v2873_v16  ;;  %v6971_v9 = vpack.c.bf16 %v2909_v58, %v2904_v57  ;;  %v2908_v10 = vld [vmem:[%s7764_s13 + $0x2ec8] sm:$0xff]  ;;  %v2911_v42 = vld [vmem:[%s7764_s13 + $0x2ee0] sm:$0xff] }
 0x409   : > { %6948 = vmatprep.subr.bf16.mxu0 %v6947_v22  ;;  %v6321_v22 = vpack.c.bf16 %v2876_v15, %v2871_v37  ;;  %v6323_v29 = vpack.c.bf16 %v2887_v7, %v2882_v19  ;;  %v2919_v37 = vld [vmem:[%s7764_s13 + $0x2f20] sm:$0xff]  ;;  %v6333_v15 = vpack.c.bf16 %v2906_v4, %v2901_v1  ;;  %v2916_v19 = vld [vmem:[%s7764_s13 + $0x2f08] sm:$0xff]  ;;  %v2913_v7 = vld [vmem:[%s7764_s13 + $0x2ef0] sm:$0xff] }
 0x40a   : > { %v2938_v58 = vld [vmem:[%s7764_s13 + $0x2fb8] sm:$0xff]  ;;  %v2949_v1 = vld [vmem:[%s7764_s13 + $0x3010] sm:$0xff] }
 0x40b   : > { %6310 = vmatpush1.bf16.msra.mxu1 %v6309_v34  ;;  %v6963_v34 = vpack.c.bf16 %v2889_v21, %v2884_v20  ;;  %v2918_v21 = vld [vmem:[%s7764_s13 + $0x2f18] sm:$0xff] }
 0x40c   : > { %6950 = vmatpush1.bf16.msra.mxu0 %v6949_v36  ;;  %6312 = vmatprep.subr.bf16.mxu1 %v6311_v39  ;;  %v2888_v36 = vld [vmem:[%s7764_s13 + $0x2e28] sm:$0xff] }
 0x40d   : > { %6952 = vmatprep.subr.bf16.mxu0 %v6951_v44  ;;  %v2892_v39 = vld [vmem:[%s7764_s13 + $0x2e48] sm:$0xff]  ;;  %v6325_v44 = vpack.c.bf16 %v2886_v31, %v2881_v5  ;;  %v6965_v23 = vpack.c.bf16 %v2888_v36, %v2883_v33  ;;  %v2929_v5 = vld [vmem:[%s7764_s13 + $0x2f70] sm:$0xff]  ;;  %v6337_v31 = vpack.c.bf16 %v2916_v19, %v2911_v42  ;;  %v6977_v33 = vpack.c.bf16 %v2918_v21, %v2913_v7  ;;  %v2959_v42 = vld [vmem:[%s7764_s13 + $0x3060] sm:$0xff] }
 0x40e   : > { %3644 = vmatmul.mubr.f32.vlgmr.msra.gmra.mrb[10].mxu1 %v9235_v62  ;;  %v6327_v46 = vpack.c.bf16 %v2897_v40, %v2892_v39  ;;  %v2921_v36 = vld [vmem:[%s7764_s13 + $0x2f30] sm:$0xff]  ;;  %v2926_v39 = vld [vmem:[%s7764_s13 + $0x2f58] sm:$0xff]  ;;  %v2923_v40 = vld [vmem:[%s7764_s13 + $0x2f40] sm:$0xff] }
 0x40f   : > { %4354 = vmatmul.mubr.f32.vlgmr.msra.gmra.mrb[12].mxu0 %v9235_v62  ;;  %6314 = vmatpush1.bf16.msra.mxu1 %v6313_v50  ;;  %v6967_v50 = vpack.c.bf16 %v2899_v43, %v2894_v38  ;;  %v2928_v43 = vld [vmem:[%s7764_s13 + $0x2f68] sm:$0xff]  ;;  %v6341_v48 = vpack.c.bf16 %v2926_v39, %v2921_v36  ;;  %v2951_v21 = vld [vmem:[%s7764_s13 + $0x3020] sm:$0xff]  ;;  %v2969_v36 = vld [vmem:[%s7764_s13 + $0x30b0] sm:$0xff] }
 0x410   : > { %3714 = vmatprep.mubr.f32.mxu1 %v9247_v27  ;;  %6954 = vmatpush1.bf16.msra.mxu0 %v6953_v41  ;;  %v2907_v41 = vld [vmem:[%s7764_s13 + $0x2ec0] sm:$0xff] }
 0x411   : > { %4424 = vmatprep.mubr.f32.mxu0 %v9247_v27  ;;  %6316 = vmatprep.subr.bf16.mxu1 %v6315_v63  ;;  %v6969_v63 = vpack.c.bf16 %v2898_v51, %v2893_v8  ;;  %v6331_v0 = vpack.c.bf16 %v2907_v41, %v2902_v52  ;;  %v6981_v8 = vpack.c.bf16 %v2928_v43, %v2923_v40  ;;  %v2931_v51 = vld [vmem:[%s7764_s13 + $0x2f80] sm:$0xff]  ;;  %v2936_v52 = vld [vmem:[%s7764_s13 + $0x2fa8] sm:$0xff]  ;;  %v2933_v41 = vld [vmem:[%s7764_s13 + $0x2f90] sm:$0xff] }
 0x412   : > { %6956 = vmatprep.subr.bf16.mxu0 %v6955_v3  ;;  %v2903_v3 = vld [vmem:[%s7764_s13 + $0x2ea0] sm:$0xff]  ;;  %v6345_v4 = vpack.c.bf16 %v2936_v52, %v2931_v51  ;;  %v2961_v43 = vld [vmem:[%s7764_s13 + $0x3070] sm:$0xff] }
 0x413   : > { %6318 = vmatpush1.bf16.msra.mxu1 %v6317_v12  ;;  %v2912_v12 = vld [vmem:[%s7764_s13 + $0x2ee8] sm:$0xff]  ;;  %v6973_v16 = vpack.c.bf16 %v2908_v10, %v2903_v3  ;;  %v6985_v3 = vpack.c.bf16 %v2938_v58, %v2933_v41  ;;  %v2941_v10 = vld [vmem:[%s7764_s13 + $0x2fd0] sm:$0xff]  ;;  %v2979_v51 = vld [vmem:[%s7764_s13 + $0x3100] sm:$0xff] }
 0x414   : > { %6958 = vmatpush1.bf16.msra.mxu0 %v6957_v32  ;;  %6320 = vmatprep.subr.bf16.mxu1 %v6319_v14  ;;  %v2917_v32 = vld [vmem:[%s7764_s13 + $0x2f10] sm:$0xff]  ;;  %v2914_v14 = vld [vmem:[%s7764_s13 + $0x2ef8] sm:$0xff]  ;;  %v2971_v58 = vld [vmem:[%s7764_s13 + $0x30c0] sm:$0xff] }
 0x415   : > { %6960 = vmatprep.subr.bf16.mxu0 %v6959_v17  ;;  %v6335_v17 = vpack.c.bf16 %v2917_v32, %v2912_v12  ;;  %v6975_v20 = vpack.c.bf16 %v2919_v37, %v2914_v14  ;;  %v2946_v12 = vld [vmem:[%s7764_s13 + $0x2ff8] sm:$0xff]  ;;  %v2943_v32 = vld [vmem:[%s7764_s13 + $0x2fe0] sm:$0xff]  ;;  %v2948_v37 = vld [vmem:[%s7764_s13 + $0x3008] sm:$0xff] }
 0x416   : > { %v6349_v19 = vpack.c.bf16 %v2946_v12, %v2941_v10  ;;  %v6989_v7 = vpack.c.bf16 %v2948_v37, %v2943_v32  ;;  %v2989_v10 = vld [vmem:[%s7764_s13 + $0x3150] sm:$0xff] }
 0x417   : > { %6322 = vmatpush1.bf16.msra.mxu1 %v6321_v22  ;;  %v2922_v22 = vld [vmem:[%s7764_s13 + $0x2f38] sm:$0xff]  ;;  %v2981_v37 = vld [vmem:[%s7764_s13 + $0x3110] sm:$0xff] }
 0x418   : > { %6962 = vmatpush1.bf16.msra.mxu0 %v6961_v24  ;;  %6324 = vmatprep.subr.bf16.mxu1 %v6323_v29  ;;  %v2927_v24 = vld [vmem:[%s7764_s13 + $0x2f60] sm:$0xff]  ;;  %v2924_v29 = vld [vmem:[%s7764_s13 + $0x2f48] sm:$0xff] }
 0x419   : > { %6964 = vmatprep.subr.bf16.mxu0 %v6963_v34  ;;  %v6339_v34 = vpack.c.bf16 %v2927_v24, %v2922_v22  ;;  %v6979_v38 = vpack.c.bf16 %v2929_v5, %v2924_v29  ;;  %v2956_v22 = vld [vmem:[%s7764_s13 + $0x3048] sm:$0xff]  ;;  %v2953_v24 = vld [vmem:[%s7764_s13 + $0x3030] sm:$0xff]  ;;  %v2958_v5 = vld [vmem:[%s7764_s13 + $0x3058] sm:$0xff] }
 0x41a   : > { %v6353_v39 = vpack.c.bf16 %v2956_v22, %v2951_v21  ;;  %v6993_v40 = vpack.c.bf16 %v2958_v5, %v2953_v24  ;;  %v2999_v21 = vld [vmem:[%s7764_s13 + $0x31a0] sm:$0xff] }
 0x41b   : > { %6326 = vmatpush1.bf16.msra.mxu1 %v6325_v44  ;;  %v2932_v44 = vld [vmem:[%s7764_s13 + $0x2f88] sm:$0xff]  ;;  %v2991_v5 = vld [vmem:[%s7764_s13 + $0x3160] sm:$0xff] }
 0x41c   : > { %6966 = vmatpush1.bf16.msra.mxu0 %v6965_v23  ;;  %6328 = vmatprep.subr.bf16.mxu1 %v6327_v46  ;;  %v2937_v23 = vld [vmem:[%s7764_s13 + $0x2fb0] sm:$0xff]  ;;  %v2934_v46 = vld [vmem:[%s7764_s13 + $0x2f98] sm:$0xff] }
 0x41d   : > { %6968 = vmatprep.subr.bf16.mxu0 %v6967_v50  ;;  %v6343_v50 = vpack.c.bf16 %v2937_v23, %v2932_v44  ;;  %v6983_v57 = vpack.c.bf16 %v2939_v47, %v2934_v46  ;;  %v2966_v44 = vld [vmem:[%s7764_s13 + $0x3098] sm:$0xff]  ;;  %v2963_v23 = vld [vmem:[%s7764_s13 + $0x3080] sm:$0xff]  ;;  %v2968_v47 = vld [vmem:[%s7764_s13 + $0x30a8] sm:$0xff] }
 0x41e   : > { %v6357_v52 = vpack.c.bf16 %v2966_v44, %v2961_v43  ;;  %v6997_v41 = vpack.c.bf16 %v2968_v47, %v2963_v23  ;;  %v3009_v43 = vld [vmem:[%s7764_s13 + $0x31f0] sm:$0xff] }
 0x41f   : > { %6330 = vmatpush1.bf16.msra.mxu1 %v6329_v61  ;;  %v2942_v61 = vld [vmem:[%s7764_s13 + $0x2fd8] sm:$0xff]  ;;  %v3001_v47 = vld [vmem:[%s7764_s13 + $0x31b0] sm:$0xff] }
 0x420   : > { %6970 = vmatpush1.bf16.msra.mxu0 %v6969_v63  ;;  %6332 = vmatprep.subr.bf16.mxu1 %v6331_v0  ;;  %v2947_v63 = vld [vmem:[%s7764_s13 + $0x3000] sm:$0xff]  ;;  %v2944_v0 = vld [vmem:[%s7764_s13 + $0x2fe8] sm:$0xff] }
 0x421   : > { %6972 = vmatprep.subr.bf16.mxu0 %v6971_v9  ;;  %v6347_v9 = vpack.c.bf16 %v2947_v63, %v2942_v61  ;;  %v6987_v14 = vpack.c.bf16 %v2949_v1, %v2944_v0  ;;  %v2976_v61 = vld [vmem:[%s7764_s13 + $0x30e8] sm:$0xff]  ;;  %v2973_v63 = vld [vmem:[%s7764_s13 + $0x30d0] sm:$0xff]  ;;  %v2978_v1 = vld [vmem:[%s7764_s13 + $0x30f8] sm:$0xff] }
 0x422   : > { %v6361_v12 = vpack.c.bf16 %v2976_v61, %v2971_v58  ;;  %v7001_v32 = vpack.c.bf16 %v2978_v1, %v2973_v63  ;;  %v1660_v58 = vld [vmem:[%s7764_s13 + $0x7c8] sm:$0xff]  ;;  %v1415_v1 = vld [vmem:[%s7764_s13 + $0x20] sm:$0xff] }
 0x423   : > { %6334 = vmatpush1.bf16.msra.mxu1 %v6333_v15  ;;  %v2952_v15 = vld [vmem:[%s7764_s13 + $0x3028] sm:$0xff] }
 0x424   : > { %6974 = vmatpush1.bf16.msra.mxu0 %v6973_v16  ;;  %6336 = vmatprep.subr.bf16.mxu1 %v6335_v17  ;;  %v2957_v16 = vld [vmem:[%s7764_s13 + $0x3050] sm:$0xff]  ;;  %v2954_v17 = vld [vmem:[%s7764_s13 + $0x3038] sm:$0xff] }
 0x425   : > { %6976 = vmatprep.subr.bf16.mxu0 %v6975_v20  ;;  %v6351_v20 = vpack.c.bf16 %v2957_v16, %v2952_v15  ;;  %v6991_v29 = vpack.c.bf16 %v2959_v42, %v2954_v17  ;;  %v2986_v15 = vld [vmem:[%s7764_s13 + $0x3138] sm:$0xff]  ;;  %v2983_v16 = vld [vmem:[%s7764_s13 + $0x3120] sm:$0xff]  ;;  %v2988_v42 = vld [vmem:[%s7764_s13 + $0x3148] sm:$0xff] }
 0x426   : > { %v6365_v22 = vpack.c.bf16 %v2986_v15, %v2981_v37  ;;  %v7005_v24 = vpack.c.bf16 %v2988_v42, %v2983_v16  ;;  %v1665_v15 = vld [vmem:[%s7764_s13 + $0x7f0] sm:$0xff]  ;;  %v1670_v16 = vld [vmem:[%s7764_s13 + $0x818] sm:$0xff] }
 0x427   : > { %6338 = vmatpush1.bf16.msra.mxu1 %v6337_v31  ;;  %v2962_v31 = vld [vmem:[%s7764_s13 + $0x3078] sm:$0xff]  ;;  %v1425_v42 = vld [vmem:[%s7764_s13 + $0x70] sm:$0xff] }
 0x428   : > { %6978 = vmatpush1.bf16.msra.mxu0 %v6977_v33  ;;  %6340 = vmatprep.subr.bf16.mxu1 %v6339_v34  ;;  %v2967_v33 = vld [vmem:[%s7764_s13 + $0x30a0] sm:$0xff]  ;;  %v2964_v34 = vld [vmem:[%s7764_s13 + $0x3088] sm:$0xff] }
 0x429   : > { %6980 = vmatprep.subr.bf16.mxu0 %v6979_v38  ;;  %v6355_v38 = vpack.c.bf16 %v2967_v33, %v2962_v31  ;;  %v6995_v46 = vpack.c.bf16 %v2969_v36, %v2964_v34  ;;  %v2996_v31 = vld [vmem:[%s7764_s13 + $0x3188] sm:$0xff]  ;;  %v2993_v33 = vld [vmem:[%s7764_s13 + $0x3170] sm:$0xff]  ;;  %v2998_v36 = vld [vmem:[%s7764_s13 + $0x3198] sm:$0xff] }
 0x42a   : > { %v6369_v44 = vpack.c.bf16 %v2996_v31, %v2991_v5  ;;  %v7009_v23 = vpack.c.bf16 %v2998_v36, %v2993_v33  ;;  %v7051_v5 = vpack.c.bf16 %v1670_v16, %v1665_v15  ;;  %v1675_v31 = vld [vmem:[%s7764_s13 + $0x840] sm:$0xff]  ;;  %v1680_v33 = vld [vmem:[%s7764_s13 + $0x868] sm:$0xff]  ;;  %v1550_v15 = vld [vmem:[%s7764_s13 + $0x458] sm:$0xff] }
 0x42b   : > { %6342 = vmatpush1.bf16.msra.mxu1 %v6341_v48  ;;  %v2972_v48 = vld [vmem:[%s7764_s13 + $0x30c8] sm:$0xff]  ;;  %v1705_v16 = vld [vmem:[%s7764_s13 + $0x930] sm:$0xff] }
 0x42c   : > { %6982 = vmatpush1.bf16.msra.mxu0 %v6981_v8  ;;  %6344 = vmatprep.subr.bf16.mxu1 %v6343_v50  ;;  %v2977_v8 = vld [vmem:[%s7764_s13 + $0x30f0] sm:$0xff]  ;;  %v2974_v50 = vld [vmem:[%s7764_s13 + $0x30d8] sm:$0xff] }
 0x42d   : > { %6984 = vmatprep.subr.bf16.mxu0 %v6983_v57  ;;  %v6359_v57 = vpack.c.bf16 %v2977_v8, %v2972_v48  ;;  %v6999_v0 = vpack.c.bf16 %v2979_v51, %v2974_v50  ;;  %v3006_v48 = vld [vmem:[%s7764_s13 + $0x31d8] sm:$0xff]  ;;  %v3003_v8 = vld [vmem:[%s7764_s13 + $0x31c0] sm:$0xff]  ;;  %v3008_v51 = vld [vmem:[%s7764_s13 + $0x31e8] sm:$0xff] }
 0x42e   : > { %v6373_v61 = vpack.c.bf16 %v3006_v48, %v3001_v47  ;;  %v7013_v63 = vpack.c.bf16 %v3008_v51, %v3003_v8  ;;  %v1690_v47 = vld [vmem:[%s7764_s13 + $0x8b8] sm:$0xff] }
 0x42f   : > { %6346 = vmatpush1.bf16.msra.mxu1 %v6345_v4  ;;  %v2982_v4 = vld [vmem:[%s7764_s13 + $0x3118] sm:$0xff] }
 0x430   : > { %6986 = vmatpush1.bf16.msra.mxu0 %v6985_v3  ;;  %6348 = vmatprep.subr.bf16.mxu1 %v6347_v9  ;;  %v2987_v3 = vld [vmem:[%s7764_s13 + $0x3140] sm:$0xff]  ;;  %v2984_v9 = vld [vmem:[%s7764_s13 + $0x3128] sm:$0xff]  ;;  %v1450_v51 = vld [vmem:[%s7764_s13 + $0x138] sm:$0xff] }
 0x431   : > { %6988 = vmatprep.subr.bf16.mxu0 %v6987_v14  ;;  %v6363_v14 = vpack.c.bf16 %v2987_v3, %v2982_v4  ;;  %v7003_v17 = vpack.c.bf16 %v2989_v10, %v2984_v9  ;;  %v1420_v4 = vld [vmem:[%s7764_s13 + $0x48] sm:$0xff]  ;;  %v1387_v3 = vmul.f32 0.01, %v8141_v28  ;;  %v1575_v10 = vld [vmem:[%s7764_s13 + $0x520] sm:$0xff] }
 0x432   : > { %v7017_v37 = vpack.c.bf16 %v1420_v4, %v1415_v1 }
 0x433   : > { %6350 = vmatpush1.bf16.msra.mxu1 %v6349_v19  ;;  %v2992_v19 = vld [vmem:[%s7764_s13 + $0x3168] sm:$0xff] }
 0x434   : > { %6990 = vmatpush1.bf16.msra.mxu0 %v6989_v7  ;;  %6352 = vmatprep.subr.bf16.mxu1 %v6351_v20  ;;  %v2997_v7 = vld [vmem:[%s7764_s13 + $0x3190] sm:$0xff]  ;;  %v2994_v20 = vld [vmem:[%s7764_s13 + $0x3178] sm:$0xff] }
 0x435   : > { %6992 = vmatprep.subr.bf16.mxu0 %v6991_v29  ;;  %v6367_v29 = vpack.c.bf16 %v2997_v7, %v2992_v19  ;;  %v7007_v34 = vpack.c.bf16 %v2999_v21, %v2994_v20  ;;  %v1430_v19 = vld [vmem:[%s7764_s13 + $0x98] sm:$0xff]  ;;  %v1585_v7 = vld [vmem:[%s7764_s13 + $0x570] sm:$0xff]  ;;  %v9377_v20 = vsel %vm1367_vm6, %v8141_v28, %v1387_v3 }
 0x436   : > { %v7021_v28 = vpack.c.bf16 %v1430_v19, %v1425_v42 }
 0x437   : > { %6354 = vmatpush1.bf16.msra.mxu1 %v6353_v39  ;;  %v3002_v39 = vld [vmem:[%s7764_s13 + $0x31b8] sm:$0xff] }
 0x438   : > { %6994 = vmatpush1.bf16.msra.mxu0 %v6993_v40  ;;  %6356 = vmatprep.subr.bf16.mxu1 %v6355_v38  ;;  %v3007_v40 = vld [vmem:[%s7764_s13 + $0x31e0] sm:$0xff]  ;;  %v3004_v38 = vld [vmem:[%s7764_s13 + $0x31c8] sm:$0xff] }
 0x439   : > { %6996 = vmatprep.subr.bf16.mxu0 %v6995_v46  ;;  %v6371_v46 = vpack.c.bf16 %v3007_v40, %v3002_v39  ;;  %v7011_v50 = vpack.c.bf16 %v3009_v43, %v3004_v38  ;;  %v1435_v39 = vld [vmem:[%s7764_s13 + $0xc0] sm:$0xff]  ;;  %v1440_v40 = vld [vmem:[%s7764_s13 + $0xe8] sm:$0xff]  ;;  %v7055_v43 = vpack.c.bf16 %v1680_v33, %v1675_v31 }
 0x43a   : > { %v1595_v38 = vld [vmem:[%s7764_s13 + $0x5c0] sm:$0xff]  ;;  %v7025_v48 = vpack.c.bf16 %v1440_v40, %v1435_v39  ;;  %v1560_v33 = vld [vmem:[%s7764_s13 + $0x4a8] sm:$0xff] }
 0x43b   : > { %6358 = vmatpush1.bf16.msra.mxu1 %v6357_v52  ;;  %v1495_v52 = vld [vmem:[%s7764_s13 + $0x2a0] sm:$0xff] }
 0x43c   : > { %6998 = vmatpush1.bf16.msra.mxu0 %v6997_v41  ;;  %6360 = vmatprep.subr.bf16.mxu1 %v6359_v57  ;;  %v1500_v41 = vld [vmem:[%s7764_s13 + $0x2c8] sm:$0xff]  ;;  %v1655_v57 = vld [vmem:[%s7764_s13 + $0x7a0] sm:$0xff] }
 0x43d   : > { %7000 = vmatprep.subr.bf16.mxu0 %v6999_v0  ;;  %v7015_v0 = vpack.c.bf16 %v1500_v41, %v1495_v52  ;;  %v7047_v9 = vpack.c.bf16 %v1660_v58, %v1655_v57  ;;  %v1605_v52 = vld [vmem:[%s7764_s13 + $0x610] sm:$0xff]  ;;  %v1610_v57 = vld [vmem:[%s7764_s13 + $0x638] sm:$0xff]  ;;  %v1535_v58 = vld [vmem:[%s7764_s13 + $0x3e0] sm:$0xff] }
 0x43e   : > { %v7061_v4 = vpack.c.bf16 %v1610_v57, %v1605_v52  ;;  %v1555_v31 = vld [vmem:[%s7764_s13 + $0x480] sm:$0xff]  ;;  %v1485_v52 = vld [vmem:[%s7764_s13 + $0x250] sm:$0xff] }
 0x43f   : > { %6362 = vmatpush1.bf16.msra.mxu1 %v6361_v12  ;;  %v1580_v12 = vld [vmem:[%s7764_s13 + $0x548] sm:$0xff]  ;;  %v7039_v40 = vpack.c.bf16 %v1560_v33, %v1555_v31  ;;  %v1645_v57 = vld [vmem:[%s7764_s13 + $0x750] sm:$0xff]  ;;  %v1910_v31 = vld [vmem:[%s7764_s13 + $0xf98] sm:$0xff] }
 0x440   : > { %7002 = vmatpush1.bf16.msra.mxu0 %v7001_v32  ;;  %6364 = vmatprep.subr.bf16.mxu1 %v6363_v14  ;;  %v1505_v32 = vld [vmem:[%s7764_s13 + $0x2f0] sm:$0xff]  ;;  %v1510_v14 = vld [vmem:[%s7764_s13 + $0x318] sm:$0xff]  ;;  %v1835_v33 = vld [vmem:[%s7764_s13 + $0xd40] sm:$0xff] }
 0x441   : > { %7004 = vmatprep.subr.bf16.mxu0 %v7003_v17  ;;  %v7049_v17 = vpack.c.bf16 %v1580_v12, %v1575_v10  ;;  %v7019_v21 = vpack.c.bf16 %v1510_v14, %v1505_v32  ;;  %v1460_v10 = vld [vmem:[%s7764_s13 + $0x188] sm:$0xff]  ;;  %v1615_v12 = vld [vmem:[%s7764_s13 + $0x660] sm:$0xff] }
 0x442   : > { %v1620_v14 = vld [vmem:[%s7764_s13 + $0x688] sm:$0xff] }
 0x443   : > { %6366 = vmatpush1.bf16.msra.mxu1 %v6365_v22  ;;  %v1590_v22 = vld [vmem:[%s7764_s13 + $0x598] sm:$0xff]  ;;  %v7065_v19 = vpack.c.bf16 %v1620_v14, %v1615_v12  ;;  %v1735_v12 = vld [vmem:[%s7764_s13 + $0xa20] sm:$0xff] }
 0x444   : > { %7006 = vmatpush1.bf16.msra.mxu0 %v7005_v24  ;;  %6368 = vmatprep.subr.bf16.mxu1 %v6367_v29  ;;  %v1515_v24 = vld [vmem:[%s7764_s13 + $0x340] sm:$0xff]  ;;  %v1520_v29 = vld [vmem:[%s7764_s13 + $0x368] sm:$0xff] }
 0x445   : > { %7008 = vmatprep.subr.bf16.mxu0 %v7007_v34  ;;  %v7053_v34 = vpack.c.bf16 %v1590_v22, %v1585_v7  ;;  %v7023_v36 = vpack.c.bf16 %v1520_v29, %v1515_v24  ;;  %v1470_v22 = vld [vmem:[%s7764_s13 + $0x1d8] sm:$0xff]  ;;  %v1625_v24 = vld [vmem:[%s7764_s13 + $0x6b0] sm:$0xff] }
 0x447   : > { %6370 = vmatpush1.bf16.msra.mxu1 %v6369_v44  ;;  %v1600_v44 = vld [vmem:[%s7764_s13 + $0x5e8] sm:$0xff] }
 0x448   : > { %7010 = vmatpush1.bf16.msra.mxu0 %v7009_v23  ;;  %6372 = vmatprep.subr.bf16.mxu1 %v6371_v46  ;;  %v1525_v23 = vld [vmem:[%s7764_s13 + $0x390] sm:$0xff]  ;;  %v1530_v46 = vld [vmem:[%s7764_s13 + $0x3b8] sm:$0xff] }
 0x449   : > { %7012 = vmatprep.subr.bf16.mxu0 %v7011_v50  ;;  %v7027_v8 = vpack.c.bf16 %v1530_v46, %v1525_v23  ;;  %v1445_v50 = vld [vmem:[%s7764_s13 + $0x110] sm:$0xff]  ;;  %v1640_v46 = vld [vmem:[%s7764_s13 + $0x728] sm:$0xff] }
 0x44a   : > { %v7029_v1 = vpack.c.bf16 %v1450_v51, %v1445_v50 }
 0x44b   : > { %6374 = vmatpush1.bf16.msra.mxu1 %v6373_v61  ;;  %v1540_v61 = vld [vmem:[%s7764_s13 + $0x408] sm:$0xff] }
 0x44c   : > { %7014 = vmatpush1.bf16.msra.mxu0 %v7013_v63  ;;  %7016 = vmatprep.subr.bf16.mxu1 %v7015_v0  ;;  %v1695_v63 = vld [vmem:[%s7764_s13 + $0x8e0] sm:$0xff]  ;;  %v1700_v0 = vld [vmem:[%s7764_s13 + $0x908] sm:$0xff]  ;;  %v7031_v3 = vpack.c.bf16 %v1540_v61, %v1535_v58  ;;  %v1650_v61 = vld [vmem:[%s7764_s13 + $0x778] sm:$0xff] }
 0x44d   : > { %7048 = vmatprep.subr.bf16.mxu0 %v7047_v9  ;;  %v1455_v9 = vld [vmem:[%s7764_s13 + $0x160] sm:$0xff]  ;;  %v7063_v32 = vpack.c.bf16 %v1700_v0, %v1695_v63  ;;  %v1820_v0 = vld [vmem:[%s7764_s13 + $0xcc8] sm:$0xff] }
 0x44e   : > { %3715 = vmatmul.mubr.f32.vlgmr.msra.gmra.mrb[10].mxu1 %v9377_v20  ;;  %v7033_v42 = vpack.c.bf16 %v1460_v10, %v1455_v9  ;;  %v1815_v63 = vld [vmem:[%s7764_s13 + $0xca0] sm:$0xff]  ;;  %v7077_v9 = vpack.c.bf16 %v1650_v61, %v1645_v57  ;;  %v1930_v57 = vld [vmem:[%s7764_s13 + $0x1038] sm:$0xff]  ;;  %v1860_v61 = vld [vmem:[%s7764_s13 + $0xe08] sm:$0xff] }
 0x44f   : > { %4425 = vmatmul.mubr.f32.vlgmr.msra.gmra.mrb[12].mxu0 %v9377_v20  ;;  %7018 = vmatpush3.bf16.msra.mxu1 %v7017_v37  ;;  %v1545_v37 = vld [vmem:[%s7764_s13 + $0x430] sm:$0xff]  ;;  %v7079_v10 = vpack.c.bf16 %v1820_v0, %v1815_v63  ;;  %v2015_v63 = vld [vmem:[%s7764_s13 + $0x12e0] sm:$0xff]  ;;  %v2020_v0 = vld [vmem:[%s7764_s13 + $0x1308] sm:$0xff] }
 0x450   : > { %4495 = vmatprep.mubr.f32.mxu1 %v8047_v49  ;;  %7050 = vmatpush3.bf16.msra.mxu0 %v7049_v17  ;;  %v1685_v49 = vld [vmem:[%s7764_s13 + $0x890] sm:$0xff]  ;;  %v1710_v17 = vld [vmem:[%s7764_s13 + $0x958] sm:$0xff]  ;;  %v7035_v7 = vpack.c.bf16 %v1550_v15, %v1545_v37  ;;  %v1895_v37 = vld [vmem:[%s7764_s13 + $0xf20] sm:$0xff] }
 0x451   : > { %4565 = vmatprep.mubr.f32.mxu0 %v8067_v60  ;;  %7020 = vmatprep.subr.bf16.mxu1 %v7019_v21  ;;  %v7057_v60 = vpack.c.bf16 %v1600_v44, %v1595_v38  ;;  %v7059_v41 = vpack.c.bf16 %v1690_v47, %v1685_v49  ;;  %v1465_v21 = vld [vmem:[%s7764_s13 + $0x1b0] sm:$0xff]  ;;  %v7067_v29 = vpack.c.bf16 %v1710_v17, %v1705_v16  ;;  %v1475_v38 = vld [vmem:[%s7764_s13 + $0x200] sm:$0xff]  ;;  %v1570_v47 = vld [vmem:[%s7764_s13 + $0x4f8] sm:$0xff] }
 0x452   : > { %7052 = vmatprep.subr.bf16.mxu0 %v7051_v5  ;;  %v1630_v5 = vld [vmem:[%s7764_s13 + $0x6d8] sm:$0xff]  ;;  %v1635_v44 = vld [vmem:[%s7764_s13 + $0x700] sm:$0xff]  ;;  %v1565_v49 = vld [vmem:[%s7764_s13 + $0x4d0] sm:$0xff] }
 0x453   : > { %7022 = vmatpush3.bf16.msra.mxu1 %v7021_v28  ;;  %v1715_v28 = vld [vmem:[%s7764_s13 + $0x980] sm:$0xff]  ;;  %v7069_v39 = vpack.c.bf16 %v1630_v5, %v1625_v24  ;;  %v7073_v50 = vpack.c.bf16 %v1640_v46, %v1635_v44  ;;  %v7043_v51 = vpack.c.bf16 %v1570_v47, %v1565_v49  ;;  %v1900_v15 = vld [vmem:[%s7764_s13 + $0xf48] sm:$0xff]  ;;  %v1825_v16 = vld [vmem:[%s7764_s13 + $0xcf0] sm:$0xff] }
 0x454   : > { %7054 = vmatpush3.bf16.msra.mxu0 %v7053_v34  ;;  %7024 = vmatprep.subr.bf16.mxu1 %v7023_v36  ;;  %v1720_v34 = vld [vmem:[%s7764_s13 + $0x9a8] sm:$0xff]  ;;  %v7037_v36 = vpack.c.bf16 %v1470_v22, %v1465_v21  ;;  %v1830_v17 = vld [vmem:[%s7764_s13 + $0xd18] sm:$0xff]  ;;  %v7113_v21 = vpack.c.bf16 %v1900_v15, %v1895_v37  ;;  %v1745_v22 = vld [vmem:[%s7764_s13 + $0xa70] sm:$0xff] }
 0x455   : > { %7056 = vmatprep.subr.bf16.mxu0 %v7055_v43  ;;  %v1480_v43 = vld [vmem:[%s7764_s13 + $0x228] sm:$0xff]  ;;  %v7071_v23 = vpack.c.bf16 %v1720_v34, %v1715_v28  ;;  %v1750_v24 = vld [vmem:[%s7764_s13 + $0xa98] sm:$0xff]  ;;  %v7083_v5 = vpack.c.bf16 %v1830_v17, %v1825_v16  ;;  %v1755_v44 = vld [vmem:[%s7764_s13 + $0xac0] sm:$0xff] }
 0x456   : > { %v1840_v28 = vld [vmem:[%s7764_s13 + $0xd68] sm:$0xff]  ;;  %v1845_v49 = vld [vmem:[%s7764_s13 + $0xd90] sm:$0xff]  ;;  %v1850_v47 = vld [vmem:[%s7764_s13 + $0xdb8] sm:$0xff] }
 0x457   : > { %7026 = vmatpush3.bf16.msra.mxu1 %v7025_v48  ;;  %v1725_v48 = vld [vmem:[%s7764_s13 + $0x9d0] sm:$0xff]  ;;  %v1870_v15 = vld [vmem:[%s7764_s13 + $0xe58] sm:$0xff] }
 0x458   : > { %7058 = vmatpush3.bf16.msra.mxu0 %v7057_v60  ;;  %7028 = vmatprep.subr.bf16.mxu1 %v7027_v8  ;;  %v1730_v60 = vld [vmem:[%s7764_s13 + $0x9f8] sm:$0xff]  ;;  %v7041_v8 = vpack.c.bf16 %v1480_v43, %v1475_v38  ;;  %v7087_v43 = vpack.c.bf16 %v1840_v28, %v1835_v33  ;;  %v1865_v37 = vld [vmem:[%s7764_s13 + $0xe30] sm:$0xff]  ;;  %v1880_v33 = vld [vmem:[%s7764_s13 + $0xea8] sm:$0xff] }
 0x459   : > { %7060 = vmatprep.subr.bf16.mxu0 %v7059_v41  ;;  %v1490_v41 = vld [vmem:[%s7764_s13 + $0x278] sm:$0xff]  ;;  %v7075_v58 = vpack.c.bf16 %v1730_v60, %v1725_v48  ;;  %v2025_v16 = vld [vmem:[%s7764_s13 + $0x1330] sm:$0xff]  ;;  %v2035_v28 = vld [vmem:[%s7764_s13 + $0x1380] sm:$0xff] }
 0x45a   : > { %v2010_v48 = vld [vmem:[%s7764_s13 + $0x12b8] sm:$0xff] }
 0x45b   : > { %7030 = vmatpush3.bf16.msra.mxu1 %v7029_v1  ;;  %v1975_v1 = vld [vmem:[%s7764_s13 + $0x11a0] sm:$0xff]  ;;  %v2030_v17 = vld [vmem:[%s7764_s13 + $0x1358] sm:$0xff] }
 0x45c   : > { %7062 = vmatpush3.bf16.msra.mxu0 %v7061_v4  ;;  %7032 = vmatprep.subr.bf16.mxu1 %v7031_v3  ;;  %v1980_v4 = vld [vmem:[%s7764_s13 + $0x11c8] sm:$0xff]  ;;  %v7045_v3 = vpack.c.bf16 %v1490_v41, %v1485_v52  ;;  %v1925_v52 = vld [vmem:[%s7764_s13 + $0x1010] sm:$0xff] }
 0x45d   : > { %7064 = vmatprep.subr.bf16.mxu0 %v7063_v32  ;;  %v1740_v32 = vld [vmem:[%s7764_s13 + $0xa48] sm:$0xff]  ;;  %v7111_v14 = vpack.c.bf16 %v1980_v4, %v1975_v1  ;;  %v7125_v4 = vpack.c.bf16 %v1930_v57, %v1925_v52  ;;  %v1970_v52 = vld [vmem:[%s7764_s13 + $0x1178] sm:$0xff] }
 0x45e   : > { %v2140_v57 = vld [vmem:[%s7764_s13 + $0x16c8] sm:$0xff] }
 0x45f   : > { %7034 = vmatpush3.bf16.msra.mxu1 %v7033_v42  ;;  %v7081_v42 = vpack.c.bf16 %v1740_v32, %v1735_v12  ;;  %v1935_v12 = vld [vmem:[%s7764_s13 + $0x1060] sm:$0xff]  ;;  %v7127_v32 = vpack.c.bf16 %v2020_v0, %v2015_v63 }
 0x460   : > { %7066 = vmatpush3.bf16.msra.mxu0 %v7065_v19  ;;  %7036 = vmatprep.subr.bf16.mxu1 %v7035_v7  ;;  %v1985_v19 = vld [vmem:[%s7764_s13 + $0x11f0] sm:$0xff]  ;;  %v1990_v7 = vld [vmem:[%s7764_s13 + $0x1218] sm:$0xff] }
 0x461   : > { %7068 = vmatprep.subr.bf16.mxu0 %v7067_v29  ;;  %v1905_v29 = vld [vmem:[%s7764_s13 + $0xf70] sm:$0xff]  ;;  %v7115_v34 = vpack.c.bf16 %v1990_v7, %v1985_v19  ;;  %v7099_v7 = vpack.c.bf16 %v1870_v15, %v1865_v37 }
 0x462   : > { %v7117_v38 = vpack.c.bf16 %v1910_v31, %v1905_v29  ;;  %v7131_v29 = vpack.c.bf16 %v2030_v17, %v2025_v16  ;;  %v1875_v31 = vld [vmem:[%s7764_s13 + $0xe80] sm:$0xff]  ;;  %v2305_v15 = vld [vmem:[%s7764_s13 + $0x1bf0] sm:$0xff]  ;;  %v2310_v16 = vld [vmem:[%s7764_s13 + $0x1c18] sm:$0xff] }
 0x463   : > { %7038 = vmatpush3.bf16.msra.mxu1 %v7037_v36  ;;  %v1995_v36 = vld [vmem:[%s7764_s13 + $0x1240] sm:$0xff] }
 0x464   : > { %7070 = vmatpush3.bf16.msra.mxu0 %v7069_v39  ;;  %7040 = vmatprep.subr.bf16.mxu1 %v7039_v40  ;;  %v2000_v39 = vld [vmem:[%s7764_s13 + $0x1268] sm:$0xff]  ;;  %v7085_v40 = vpack.c.bf16 %v1750_v24, %v1745_v22  ;;  %v1790_v22 = vld [vmem:[%s7764_s13 + $0xbd8] sm:$0xff]  ;;  %v1945_v24 = vld [vmem:[%s7764_s13 + $0x10b0] sm:$0xff] }
 0x465   : > { %7072 = vmatprep.subr.bf16.mxu0 %v7071_v23  ;;  %v1760_v23 = vld [vmem:[%s7764_s13 + $0xae8] sm:$0xff]  ;;  %v7119_v46 = vpack.c.bf16 %v2000_v39, %v1995_v36 }
 0x466   : > { %v7089_v60 = vpack.c.bf16 %v1760_v23, %v1755_v44  ;;  %v1955_v44 = vld [vmem:[%s7764_s13 + $0x1100] sm:$0xff] }
 0x467   : > { %7042 = vmatpush3.bf16.msra.mxu1 %v7041_v8  ;;  %v7091_v8 = vpack.c.bf16 %v1850_v47, %v1845_v49  ;;  %v2045_v49 = vld [vmem:[%s7764_s13 + $0x13d0] sm:$0xff]  ;;  %v2050_v47 = vld [vmem:[%s7764_s13 + $0x13f8] sm:$0xff] }
 0x468   : > { %7074 = vmatpush3.bf16.msra.mxu0 %v7073_v50  ;;  %7044 = vmatprep.subr.bf16.mxu1 %v7043_v51  ;;  %v1765_v50 = vld [vmem:[%s7764_s13 + $0xb10] sm:$0xff]  ;;  %v1770_v51 = vld [vmem:[%s7764_s13 + $0xb38] sm:$0xff] }
 0x469   : > { %7076 = vmatprep.subr.bf16.mxu0 %v7075_v58  ;;  %v1855_v58 = vld [vmem:[%s7764_s13 + $0xde0] sm:$0xff]  ;;  %v7093_v1 = vpack.c.bf16 %v1770_v51, %v1765_v50  ;;  %v1965_v50 = vld [vmem:[%s7764_s13 + $0x1150] sm:$0xff]  ;;  %v7139_v51 = vpack.c.bf16 %v2050_v47, %v2045_v49  ;;  %v2090_v49 = vld [vmem:[%s7764_s13 + $0x1538] sm:$0xff] }
 0x46a   : > { %v7141_v0 = vpack.c.bf16 %v1970_v52, %v1965_v50  ;;  %v2245_v47 = vld [vmem:[%s7764_s13 + $0x1a10] sm:$0xff]  ;;  %v2340_v50 = vld [vmem:[%s7764_s13 + $0x1d08] sm:$0xff] }
 0x46b   : > { %7046 = vmatpush3.bf16.msra.mxu1 %v7045_v3  ;;  %v7095_v3 = vpack.c.bf16 %v1860_v61, %v1855_v58  ;;  %v2295_v58 = vld [vmem:[%s7764_s13 + $0x1ba0] sm:$0xff]  ;;  %v2300_v61 = vld [vmem:[%s7764_s13 + $0x1bc8] sm:$0xff] }
 0x46c   : > { %7078 = vmatpush3.bf16.msra.mxu0 %v7077_v9  ;;  %7080 = vmatprep.subr.bf16.mxu1 %v7079_v10  ;;  %v1775_v9 = vld [vmem:[%s7764_s13 + $0xb60] sm:$0xff]  ;;  %v1780_v10 = vld [vmem:[%s7764_s13 + $0xb88] sm:$0xff] }
 0x46d   : > { %7112 = vmatprep.subr.bf16.mxu0 %v7111_v14  ;;  %v1940_v14 = vld [vmem:[%s7764_s13 + $0x1088] sm:$0xff] }
 0x46e   : > { %4496 = vmatmul.mubr.f32.vlgmr.msra.gmra.mrb[12].mxu1 %v8055_v53  ;;  %v1915_v53 = vld [vmem:[%s7764_s13 + $0xfc0] sm:$0xff]  ;;  %v7129_v19 = vpack.c.bf16 %v1940_v14, %v1935_v12  ;;  %v2220_v12 = vld [vmem:[%s7764_s13 + $0x1948] sm:$0xff]  ;;  %v2150_v14 = vld [vmem:[%s7764_s13 + $0x1718] sm:$0xff] }
 0x46f   : > { %4566 = vmatmul.mubr.f32.vlgmr.msra.gmra.mrb[14].mxu0 %v8227_v2  ;;  %7082 = vmatpush3.bf16.msra.mxu1 %v7081_v42  ;;  %v1920_v2 = vld [vmem:[%s7764_s13 + $0xfe8] sm:$0xff]  ;;  %v7097_v42 = vpack.c.bf16 %v1780_v10, %v1775_v9  ;;  %v7175_v9 = vpack.c.bf16 %v2300_v61, %v2295_v58  ;;  %v2215_v10 = vld [vmem:[%s7764_s13 + $0x1920] sm:$0xff] }
 0x470   : > { %4635 = vmatprep.mubr.f32.mxu1 %v8237_v13  ;;  %7114 = vmatpush3.bf16.msra.mxu0 %v7113_v21  ;;  %v2005_v13 = vld [vmem:[%s7764_s13 + $0x1290] sm:$0xff]  ;;  %v7177_v17 = vpack.c.bf16 %v2220_v12, %v2215_v10  ;;  %v2100_v58 = vld [vmem:[%s7764_s13 + $0x1588] sm:$0xff]  ;;  %v2255_v61 = vld [vmem:[%s7764_s13 + $0x1a60] sm:$0xff] }
 0x471   : > { %4705 = vmatprep.mubr.f32.mxu0 %v8383_v6  ;;  %7084 = vmatprep.subr.bf16.mxu1 %v7083_v5  ;;  %v7121_v6 = vpack.c.bf16 %v1920_v2, %v1915_v53  ;;  %v7123_v41 = vpack.c.bf16 %v2010_v48, %v2005_v13  ;;  %v1785_v21 = vld [vmem:[%s7764_s13 + $0xbb0] sm:$0xff]  ;;  %v1950_v5 = vld [vmem:[%s7764_s13 + $0x10d8] sm:$0xff]  ;;  %v1960_v53 = vld [vmem:[%s7764_s13 + $0x1128] sm:$0xff] }
 0x472   : > { %7116 = vmatprep.subr.bf16.mxu0 %v7115_v34  ;;  %v2040_v34 = vld [vmem:[%s7764_s13 + $0x13a8] sm:$0xff]  ;;  %v7101_v36 = vpack.c.bf16 %v1790_v22, %v1785_v21  ;;  %v7133_v39 = vpack.c.bf16 %v1950_v5, %v1945_v24  ;;  %v1890_v2 = vld [vmem:[%s7764_s13 + $0xef8] sm:$0xff]  ;;  %v7137_v48 = vpack.c.bf16 %v1960_v53, %v1955_v44  ;;  %v2155_v24 = vld [vmem:[%s7764_s13 + $0x1740] sm:$0xff]  ;;  %v7179_v5 = vpack.c.bf16 %v2310_v16, %v2305_v15 }
 0x473   : > { %7086 = vmatpush3.bf16.msra.mxu1 %v7085_v40  ;;  %v7103_v40 = vpack.c.bf16 %v1880_v33, %v1875_v31  ;;  %v7135_v23 = vpack.c.bf16 %v2040_v34, %v2035_v28  ;;  %v2230_v22 = vld [vmem:[%s7764_s13 + $0x1998] sm:$0xff]  ;;  %v2315_v31 = vld [vmem:[%s7764_s13 + $0x1c40] sm:$0xff]  ;;  %v2320_v33 = vld [vmem:[%s7764_s13 + $0x1c68] sm:$0xff] }
 0x474   : > { %7118 = vmatpush3.bf16.msra.mxu0 %v7117_v38  ;;  %7088 = vmatprep.subr.bf16.mxu1 %v7087_v43  ;;  %v1795_v38 = vld [vmem:[%s7764_s13 + $0xc00] sm:$0xff]  ;;  %v1800_v43 = vld [vmem:[%s7764_s13 + $0xc28] sm:$0xff]  ;;  %v2170_v44 = vld [vmem:[%s7764_s13 + $0x17b8] sm:$0xff] }
 0x475   : > { %7120 = vmatprep.subr.bf16.mxu0 %v7119_v46  ;;  %v1885_v46 = vld [vmem:[%s7764_s13 + $0xed0] sm:$0xff]  ;;  %v7105_v13 = vpack.c.bf16 %v1800_v43, %v1795_v38  ;;  %v7183_v38 = vpack.c.bf16 %v2320_v33, %v2315_v31  ;;  %v2120_v31 = vld [vmem:[%s7764_s13 + $0x1628] sm:$0xff]  ;;  %v2275_v33 = vld [vmem:[%s7764_s13 + $0x1b00] sm:$0xff] }
 0x476   : > { %v2165_v43 = vld [vmem:[%s7764_s13 + $0x1790] sm:$0xff] }
 0x477   : > { %7090 = vmatpush3.bf16.msra.mxu1 %v7089_v60  ;;  %v7107_v60 = vpack.c.bf16 %v1890_v2, %v1885_v46  ;;  %v7155_v46 = vpack.c.bf16 %v2170_v44, %v2165_v43  ;;  %v2085_v2 = vld [vmem:[%s7764_s13 + $0x1510] sm:$0xff] }
 0x478   : > { %7122 = vmatpush3.bf16.msra.mxu0 %v7121_v6  ;;  %7092 = vmatprep.subr.bf16.mxu1 %v7091_v8  ;;  %v1805_v6 = vld [vmem:[%s7764_s13 + $0xc50] sm:$0xff]  ;;  %v1810_v8 = vld [vmem:[%s7764_s13 + $0xc78] sm:$0xff] }
 0x479   : > { %7124 = vmatprep.subr.bf16.mxu0 %v7123_v41  ;;  %v2135_v41 = vld [vmem:[%s7764_s13 + $0x16a0] sm:$0xff]  ;;  %v7109_v63 = vpack.c.bf16 %v1810_v8, %v1805_v6  ;;  %v2180_v6 = vld [vmem:[%s7764_s13 + $0x1808] sm:$0xff]  ;;  %v2265_v15 = vld [vmem:[%s7764_s13 + $0x1ab0] sm:$0xff] }
 0x47a   : > { %v2335_v8 = vld [vmem:[%s7764_s13 + $0x1ce0] sm:$0xff]  ;;  %v2125_v44 = vld [vmem:[%s7764_s13 + $0x1650] sm:$0xff] }
 0x47b   : > { %7094 = vmatpush3.bf16.msra.mxu1 %v7093_v1  ;;  %v7143_v1 = vpack.c.bf16 %v2140_v57, %v2135_v41  ;;  %v2095_v57 = vld [vmem:[%s7764_s13 + $0x1560] sm:$0xff] }
 0x47c   : > { %7126 = vmatpush3.bf16.msra.mxu0 %v7125_v4  ;;  %7096 = vmatprep.subr.bf16.mxu1 %v7095_v3  ;;  %v2055_v4 = vld [vmem:[%s7764_s13 + $0x1420] sm:$0xff]  ;;  %v2060_v3 = vld [vmem:[%s7764_s13 + $0x1448] sm:$0xff]  ;;  %v7161_v10 = vpack.c.bf16 %v2100_v58, %v2095_v57  ;;  %v2470_v57 = vld [vmem:[%s7764_s13 + $0x2118] sm:$0xff] }
 0x47d   : > { %7128 = vmatprep.subr.bf16.mxu0 %v7127_v32  ;;  %v2145_v32 = vld [vmem:[%s7764_s13 + $0x16f0] sm:$0xff]  ;;  %v7145_v37 = vpack.c.bf16 %v2060_v3, %v2055_v4  ;;  %v2190_v4 = vld [vmem:[%s7764_s13 + $0x1858] sm:$0xff] }
 0x47e   : > { %v7147_v21 = vpack.c.bf16 %v2150_v14, %v2145_v32  ;;  %v2345_v3 = vld [vmem:[%s7764_s13 + $0x1d30] sm:$0xff] }
 0x47f   : > { %7098 = vmatpush3.bf16.msra.mxu1 %v7097_v42  ;;  %v2065_v42 = vld [vmem:[%s7764_s13 + $0x1470] sm:$0xff] }
 0x480   : > { %7130 = vmatpush3.bf16.msra.mxu0 %v7129_v19  ;;  %7100 = vmatprep.subr.bf16.mxu1 %v7099_v7  ;;  %v2070_v19 = vld [vmem:[%s7764_s13 + $0x1498] sm:$0xff]  ;;  %v2225_v7 = vld [vmem:[%s7764_s13 + $0x1970] sm:$0xff] }
 0x481   : > { %7132 = vmatprep.subr.bf16.mxu0 %v7131_v29  ;;  %v2160_v29 = vld [vmem:[%s7764_s13 + $0x1768] sm:$0xff]  ;;  %v7149_v28 = vpack.c.bf16 %v2070_v19, %v2065_v42  ;;  %v7181_v34 = vpack.c.bf16 %v2230_v22, %v2225_v7  ;;  %v2105_v14 = vld [vmem:[%s7764_s13 + $0x15b0] sm:$0xff]  ;;  %v2195_v42 = vld [vmem:[%s7764_s13 + $0x1880] sm:$0xff] }
 0x482   : > { %v2200_v19 = vld [vmem:[%s7764_s13 + $0x18a8] sm:$0xff]  ;;  %v2355_v7 = vld [vmem:[%s7764_s13 + $0x1d80] sm:$0xff] }
 0x483   : > { %7102 = vmatpush3.bf16.msra.mxu1 %v7101_v36  ;;  %v7151_v36 = vpack.c.bf16 %v2160_v29, %v2155_v24  ;;  %v7167_v29 = vpack.c.bf16 %v2200_v19, %v2195_v42  ;;  %v2395_v19 = vld [vmem:[%s7764_s13 + $0x1ec0] sm:$0xff] }
 0x484   : > { %7134 = vmatpush3.bf16.msra.mxu0 %v7133_v39  ;;  %7104 = vmatprep.subr.bf16.mxu1 %v7103_v40  ;;  %v2075_v39 = vld [vmem:[%s7764_s13 + $0x14c0] sm:$0xff]  ;;  %v2080_v40 = vld [vmem:[%s7764_s13 + $0x14e8] sm:$0xff] }
 0x485   : > { %7136 = vmatprep.subr.bf16.mxu0 %v7135_v23  ;;  %v2330_v23 = vld [vmem:[%s7764_s13 + $0x1cb8] sm:$0xff]  ;;  %v7153_v53 = vpack.c.bf16 %v2080_v40, %v2075_v39  ;;  %v2365_v40 = vld [vmem:[%s7764_s13 + $0x1dd0] sm:$0xff] }
 0x486   : > { %v2210_v39 = vld [vmem:[%s7764_s13 + $0x18f8] sm:$0xff] }
 0x487   : > { %7106 = vmatpush3.bf16.msra.mxu1 %v7105_v13 }
 0x488   : > { %7138 = vmatpush3.bf16.msra.mxu0 %v7137_v48  ;;  %7108 = vmatprep.subr.bf16.mxu1 %v7107_v60  ;;  %v2250_v48 = vld [vmem:[%s7764_s13 + $0x1a38] sm:$0xff]  ;;  %v2175_v60 = vld [vmem:[%s7764_s13 + $0x17e0] sm:$0xff] }
 0x489   : > { %7140 = vmatprep.subr.bf16.mxu0 %v7139_v51  ;;  %v7157_v51 = vpack.c.bf16 %v2090_v49, %v2085_v2  ;;  %v7189_v52 = vpack.c.bf16 %v2250_v48, %v2245_v47  ;;  %v7159_v41 = vpack.c.bf16 %v2180_v6, %v2175_v60  ;;  %v2460_v2 = vld [vmem:[%s7764_s13 + $0x20c8] sm:$0xff]  ;;  %v2615_v49 = vld [vmem:[%s7764_s13 + $0x25a0] sm:$0xff] }
 0x48a   : > { %v2620_v47 = vld [vmem:[%s7764_s13 + $0x25c8] sm:$0xff]  ;;  %v2375_v6 = vld [vmem:[%s7764_s13 + $0x1e20] sm:$0xff] }
 0x48b   : > { %7110 = vmatpush3.bf16.msra.mxu1 %v7109_v63  ;;  %v7191_v63 = vpack.c.bf16 %v2340_v50, %v2335_v8  ;;  %v2380_v8 = vld [vmem:[%s7764_s13 + $0x1e48] sm:$0xff]  ;;  %v7239_v50 = vpack.c.bf16 %v2620_v47, %v2615_v49  ;;  %v2505_v49 = vld [vmem:[%s7764_s13 + $0x2230] sm:$0xff]  ;;  %v2510_v47 = vld [vmem:[%s7764_s13 + $0x2258] sm:$0xff] }
 0x48c   : > { %7142 = vmatpush3.bf16.msra.mxu0 %v7141_v0  ;;  %7144 = vmatprep.subr.bf16.mxu1 %v7143_v1  ;;  %v2260_v0 = vld [vmem:[%s7764_s13 + $0x1a88] sm:$0xff]  ;;  %v2185_v1 = vld [vmem:[%s7764_s13 + $0x1830] sm:$0xff]  ;;  %v7209_v58 = vpack.c.bf16 %v2380_v8, %v2375_v6  ;;  %v7227_v8 = vpack.c.bf16 %v2510_v47, %v2505_v49  ;;  %v2870_v49 = vld [vmem:[%s7764_s13 + $0x2d98] sm:$0xff] }
 0x48d   : > { %7176 = vmatprep.subr.bf16.mxu0 %v7175_v9  ;;  %v2350_v9 = vld [vmem:[%s7764_s13 + $0x1d58] sm:$0xff]  ;;  %v7193_v12 = vpack.c.bf16 %v2260_v0, %v2255_v61  ;;  %v7163_v32 = vpack.c.bf16 %v2190_v4, %v2185_v1  ;;  %v2625_v61 = vld [vmem:[%s7764_s13 + $0x25f0] sm:$0xff]  ;;  %v2795_v47 = vld [vmem:[%s7764_s13 + $0x2b40] sm:$0xff] }
 0x48e   : > { %4636 = vmatmul.mubr.f32.vlgmr.msra.gmra.mrb[14].mxu1 %v8371_v30  ;;  %v2235_v30 = vld [vmem:[%s7764_s13 + $0x19c0] sm:$0xff]  ;;  %v7195_v16 = vpack.c.bf16 %v2350_v9, %v2345_v3  ;;  %v2385_v1 = vld [vmem:[%s7764_s13 + $0x1e70] sm:$0xff]  ;;  %v2390_v4 = vld [vmem:[%s7764_s13 + $0x1e98] sm:$0xff] }
 0x48f   : > { %4706 = vmatmul.mubr.f32.vlgmr.msra.gmra.mrb[16].mxu0 %v8515_v54  ;;  %7146 = vmatpush3.bf16.msra.mxu1 %v7145_v37  ;;  %v2240_v54 = vld [vmem:[%s7764_s13 + $0x19e8] sm:$0xff]  ;;  %v2110_v37 = vld [vmem:[%s7764_s13 + $0x15d8] sm:$0xff]  ;;  %v2545_v3 = vld [vmem:[%s7764_s13 + $0x2370] sm:$0xff] }
 0x490   : > { %4775 = vmatprep.mubr.f32.mxu1 %v8527_v59  ;;  %7178 = vmatpush3.bf16.msra.mxu0 %v7177_v17  ;;  %v2325_v59 = vld [vmem:[%s7764_s13 + $0x1c90] sm:$0xff]  ;;  %v2270_v17 = vld [vmem:[%s7764_s13 + $0x1ad8] sm:$0xff]  ;;  %v7165_v22 = vpack.c.bf16 %v2110_v37, %v2105_v14  ;;  %v2635_v37 = vld [vmem:[%s7764_s13 + $0x2640] sm:$0xff] }
 0x491   : > { %4845 = vmatprep.mubr.f32.mxu0 %v8671_v25  ;;  %7148 = vmatprep.subr.bf16.mxu1 %v7147_v21  ;;  %v7185_v25 = vpack.c.bf16 %v2240_v54, %v2235_v30  ;;  %v7187_v13 = vpack.c.bf16 %v2330_v23, %v2325_v59  ;;  %v2360_v21 = vld [vmem:[%s7764_s13 + $0x1da8] sm:$0xff]  ;;  %v7197_v24 = vpack.c.bf16 %v2270_v17, %v2265_v15  ;;  %v2370_v30 = vld [vmem:[%s7764_s13 + $0x1df8] sm:$0xff]  ;;  %v2285_v23 = vld [vmem:[%s7764_s13 + $0x1b50] sm:$0xff] }
 0x492   : > { %7180 = vmatprep.subr.bf16.mxu0 %v7179_v5  ;;  %v2115_v5 = vld [vmem:[%s7764_s13 + $0x1600] sm:$0xff]  ;;  %v2130_v59 = vld [vmem:[%s7764_s13 + $0x1678] sm:$0xff]  ;;  %v2640_v15 = vld [vmem:[%s7764_s13 + $0x2668] sm:$0xff] }
 0x493   : > { %7150 = vmatpush3.bf16.msra.mxu1 %v7149_v28  ;;  %v7199_v28 = vpack.c.bf16 %v2360_v21, %v2355_v7  ;;  %v2400_v7 = vld [vmem:[%s7764_s13 + $0x1ee8] sm:$0xff]  ;;  %v7247_v21 = vpack.c.bf16 %v2640_v15, %v2635_v37  ;;  %v2525_v37 = vld [vmem:[%s7764_s13 + $0x22d0] sm:$0xff]  ;;  %v2530_v15 = vld [vmem:[%s7764_s13 + $0x22f8] sm:$0xff] }
 0x494   : > { %7182 = vmatpush3.bf16.msra.mxu0 %v7181_v34  ;;  %7152 = vmatprep.subr.bf16.mxu1 %v7151_v36  ;;  %v2280_v34 = vld [vmem:[%s7764_s13 + $0x1b28] sm:$0xff]  ;;  %v2205_v36 = vld [vmem:[%s7764_s13 + $0x18d0] sm:$0xff] }
 0x495   : > { %7184 = vmatprep.subr.bf16.mxu0 %v7183_v38  ;;  %v7169_v38 = vpack.c.bf16 %v2120_v31, %v2115_v5  ;;  %v7201_v54 = vpack.c.bf16 %v2280_v34, %v2275_v33  ;;  %v7171_v43 = vpack.c.bf16 %v2210_v39, %v2205_v36  ;;  %v7217_v5 = vpack.c.bf16 %v2400_v7, %v2395_v19  ;;  %v2405_v33 = vld [vmem:[%s7764_s13 + $0x1f10] sm:$0xff]  ;;  %v2570_v39 = vld [vmem:[%s7764_s13 + $0x2438] sm:$0xff] }
 0x496   : > { %v2565_v34 = vld [vmem:[%s7764_s13 + $0x2410] sm:$0xff]  ;;  %v7235_v7 = vpack.c.bf16 %v2530_v15, %v2525_v37  ;;  %v2975_v37 = vld [vmem:[%s7764_s13 + $0x30e0] sm:$0xff]  ;;  %v2980_v15 = vld [vmem:[%s7764_s13 + $0x3108] sm:$0xff] }
 0x497   : > { %7154 = vmatpush3.bf16.msra.mxu1 %v7153_v53  ;;  %v7203_v53 = vpack.c.bf16 %v2370_v30, %v2365_v40  ;;  %v2495_v40 = vld [vmem:[%s7764_s13 + $0x21e0] sm:$0xff]  ;;  %v2500_v30 = vld [vmem:[%s7764_s13 + $0x2208] sm:$0xff] }
 0x498   : > { %7186 = vmatpush3.bf16.msra.mxu0 %v7185_v25  ;;  %7156 = vmatprep.subr.bf16.mxu1 %v7155_v46  ;;  %v2290_v25 = vld [vmem:[%s7764_s13 + $0x1b78] sm:$0xff]  ;;  %v2455_v46 = vld [vmem:[%s7764_s13 + $0x20a0] sm:$0xff] }
 0x499   : > { %7188 = vmatprep.subr.bf16.mxu0 %v7187_v13  ;;  %v7173_v13 = vpack.c.bf16 %v2130_v59, %v2125_v44  ;;  %v7205_v48 = vpack.c.bf16 %v2290_v25, %v2285_v23  ;;  %v7207_v60 = vpack.c.bf16 %v2460_v2, %v2455_v46  ;;  %v7253_v44 = vpack.c.bf16 %v2570_v39, %v2565_v34  ;;  %v2415_v23 = vld [vmem:[%s7764_s13 + $0x1f60] sm:$0xff]  ;;  %v2580_v2 = vld [vmem:[%s7764_s13 + $0x2488] sm:$0xff] }
 0x49a   : > { %v7223_v59 = vpack.c.bf16 %v2500_v30, %v2495_v40  ;;  %v2575_v25 = vld [vmem:[%s7764_s13 + $0x2460] sm:$0xff]  ;;  %v2860_v30 = vld [vmem:[%s7764_s13 + $0x2d48] sm:$0xff] }
 0x49b   : > { %7158 = vmatpush3.bf16.msra.mxu1 %v7157_v51  ;;  %v2535_v51 = vld [vmem:[%s7764_s13 + $0x2320] sm:$0xff]  ;;  %v7257_v6 = vpack.c.bf16 %v2580_v2, %v2575_v25  ;;  %v2710_v25 = vld [vmem:[%s7764_s13 + $0x2898] sm:$0xff] }
 0x49c   : > { %7190 = vmatpush3.bf16.msra.mxu0 %v7189_v52  ;;  %7160 = vmatprep.subr.bf16.mxu1 %v7159_v41  ;;  %v2540_v52 = vld [vmem:[%s7764_s13 + $0x2348] sm:$0xff]  ;;  %v2465_v41 = vld [vmem:[%s7764_s13 + $0x20f0] sm:$0xff]  ;;  %v2695_v34 = vld [vmem:[%s7764_s13 + $0x2820] sm:$0xff] }
 0x49d   : > { %7192 = vmatprep.subr.bf16.mxu0 %v7191_v63  ;;  %v2630_v63 = vld [vmem:[%s7764_s13 + $0x2618] sm:$0xff]  ;;  %v7241_v0 = vpack.c.bf16 %v2540_v52, %v2535_v51  ;;  %v7211_v9 = vpack.c.bf16 %v2470_v57, %v2465_v41  ;;  %v2585_v52 = vld [vmem:[%s7764_s13 + $0x24b0] sm:$0xff]  ;;  %v2855_v40 = vld [vmem:[%s7764_s13 + $0x2d20] sm:$0xff] }
 0x49e   : > { %v7243_v14 = vpack.c.bf16 %v2630_v63, %v2625_v61  ;;  %v2430_v51 = vld [vmem:[%s7764_s13 + $0x1fd8] sm:$0xff]  ;;  %v2520_v61 = vld [vmem:[%s7764_s13 + $0x22a8] sm:$0xff]  ;;  %v2675_v63 = vld [vmem:[%s7764_s13 + $0x2780] sm:$0xff] }
 0x49f   : > { %7162 = vmatpush3.bf16.msra.mxu1 %v7161_v10  ;;  %v2550_v10 = vld [vmem:[%s7764_s13 + $0x2398] sm:$0xff] }
 0x4a0   : > { %7194 = vmatpush3.bf16.msra.mxu0 %v7193_v12  ;;  %7164 = vmatprep.subr.bf16.mxu1 %v7163_v32  ;;  %v2475_v12 = vld [vmem:[%s7764_s13 + $0x2140] sm:$0xff]  ;;  %v2480_v32 = vld [vmem:[%s7764_s13 + $0x2168] sm:$0xff]  ;;  %v7245_v17 = vpack.c.bf16 %v2550_v10, %v2545_v3  ;;  %v2590_v57 = vld [vmem:[%s7764_s13 + $0x24d8] sm:$0xff] }
 0x4a1   : > { %7196 = vmatprep.subr.bf16.mxu0 %v7195_v16  ;;  %v7213_v16 = vpack.c.bf16 %v2390_v4, %v2385_v1  ;;  %v7215_v42 = vpack.c.bf16 %v2480_v32, %v2475_v12  ;;  %v7261_v4 = vpack.c.bf16 %v2590_v57, %v2585_v52  ;;  %v2440_v10 = vld [vmem:[%s7764_s13 + $0x2028] sm:$0xff]  ;;  %v2595_v12 = vld [vmem:[%s7764_s13 + $0x2500] sm:$0xff] }
 0x4a2   : > { %v2715_v52 = vld [vmem:[%s7764_s13 + $0x28c0] sm:$0xff] }
 0x4a3   : > { %7166 = vmatpush3.bf16.msra.mxu1 %v7165_v22  ;;  %v2485_v22 = vld [vmem:[%s7764_s13 + $0x2190] sm:$0xff] }
 0x4a4   : > { %7198 = vmatpush3.bf16.msra.mxu0 %v7197_v24  ;;  %7168 = vmatprep.subr.bf16.mxu1 %v7167_v29  ;;  %v2490_v24 = vld [vmem:[%s7764_s13 + $0x21b8] sm:$0xff] }
 0x4a5   : > { %7200 = vmatprep.subr.bf16.mxu0 %v7199_v28  ;;  %v2650_v29 = vld [vmem:[%s7764_s13 + $0x26b8] sm:$0xff]  ;;  %v7219_v31 = vpack.c.bf16 %v2490_v24, %v2485_v22 }
 0x4a6   : > { %v2410_v28 = vld [vmem:[%s7764_s13 + $0x1f38] sm:$0xff] }
 0x4a7   : > { %7170 = vmatpush3.bf16.msra.mxu1 %v7169_v38  ;;  %v2655_v38 = vld [vmem:[%s7764_s13 + $0x26e0] sm:$0xff]  ;;  %v2610_v24 = vld [vmem:[%s7764_s13 + $0x2578] sm:$0xff] }
 0x4a8   : > { %7202 = vmatpush3.bf16.msra.mxu0 %v7201_v54  ;;  %7172 = vmatprep.subr.bf16.mxu1 %v7171_v43  ;;  %v2660_v54 = vld [vmem:[%s7764_s13 + $0x2708] sm:$0xff]  ;;  %v7221_v43 = vpack.c.bf16 %v2410_v28, %v2405_v33 }
 0x4a9   : > { %7204 = vmatprep.subr.bf16.mxu0 %v7203_v53  ;;  %v2420_v53 = vld [vmem:[%s7764_s13 + $0x1f88] sm:$0xff]  ;;  %v7255_v46 = vpack.c.bf16 %v2660_v54, %v2655_v38  ;;  %v2785_v38 = vld [vmem:[%s7764_s13 + $0x2af0] sm:$0xff]  ;;  %v2790_v54 = vld [vmem:[%s7764_s13 + $0x2b18] sm:$0xff] }
 0x4aa   : > { %v7275_v2 = vpack.c.bf16 %v2790_v54, %v2785_v38  ;;  %v2995_v38 = vld [vmem:[%s7764_s13 + $0x3180] sm:$0xff]  ;;  %v3000_v54 = vld [vmem:[%s7764_s13 + $0x31a8] sm:$0xff] }
 0x4ab   : > { %7174 = vmatpush3.bf16.msra.mxu1 %v7173_v13  ;;  %v2665_v13 = vld [vmem:[%s7764_s13 + $0x2730] sm:$0xff] }
 0x4ac   : > { %7206 = vmatpush3.bf16.msra.mxu0 %v7205_v48  ;;  %7208 = vmatprep.subr.bf16.mxu1 %v7207_v60  ;;  %v2670_v48 = vld [vmem:[%s7764_s13 + $0x2758] sm:$0xff]  ;;  %v7225_v60 = vpack.c.bf16 %v2420_v53, %v2415_v23  ;;  %v7305_v23 = vpack.c.bf16 %v2860_v30, %v2855_v40  ;;  %v2705_v53 = vld [vmem:[%s7764_s13 + $0x2870] sm:$0xff]  ;;  %v2835_v40 = vld [vmem:[%s7764_s13 + $0x2c80] sm:$0xff] }
 0x4ad   : > { %7240 = vmatprep.subr.bf16.mxu0 %v7239_v50  ;;  %v2425_v50 = vld [vmem:[%s7764_s13 + $0x1fb0] sm:$0xff]  ;;  %v7259_v41 = vpack.c.bf16 %v2670_v48, %v2665_v13  ;;  %v2800_v13 = vld [vmem:[%s7764_s13 + $0x2b68] sm:$0xff] }
 0x4ae   : > { %4776 = vmatmul.mubr.f32.vlgmr.msra.gmra.mrb[16].mxu1 %v8659_v18  ;;  %v2555_v18 = vld [vmem:[%s7764_s13 + $0x23c0] sm:$0xff]  ;;  %v7229_v1 = vpack.c.bf16 %v2430_v51, %v2425_v50  ;;  %v7279_v51 = vpack.c.bf16 %v2800_v13, %v2795_v47  ;;  %v2840_v30 = vld [vmem:[%s7764_s13 + $0x2ca8] sm:$0xff]  ;;  %v2850_v47 = vld [vmem:[%s7764_s13 + $0x2cf8] sm:$0xff] }
 0x4af   : > { %4846 = vmatmul.mubr.f32.vlgmr.msra.gmra.mrb[18].mxu0 %v8803_v45  ;;  %7210 = vmatpush3.bf16.msra.mxu1 %v7209_v58  ;;  %v2560_v45 = vld [vmem:[%s7764_s13 + $0x23e8] sm:$0xff]  ;;  %v2515_v58 = vld [vmem:[%s7764_s13 + $0x2280] sm:$0xff]  ;;  %v3005_v13 = vld [vmem:[%s7764_s13 + $0x31d0] sm:$0xff] }
 0x4b0   : > { %4915 = vmatprep.mubr.f32.mxu1 %v8815_v26  ;;  %7242 = vmatpush3.bf16.msra.mxu0 %v7241_v0  ;;  %v2645_v26 = vld [vmem:[%s7764_s13 + $0x2690] sm:$0xff]  ;;  %v2680_v0 = vld [vmem:[%s7764_s13 + $0x27a8] sm:$0xff]  ;;  %v7231_v3 = vpack.c.bf16 %v2520_v61, %v2515_v58  ;;  %v2810_v61 = vld [vmem:[%s7764_s13 + $0x2bb8] sm:$0xff] }
 0x4b1   : > { %4985 = vmatprep.mubr.f32.mxu0 %v8959_v55  ;;  %7212 = vmatprep.subr.bf16.mxu1 %v7211_v9  ;;  %v7249_v55 = vpack.c.bf16 %v2560_v45, %v2555_v18  ;;  %v7251_v36 = vpack.c.bf16 %v2650_v29, %v2645_v26  ;;  %v2435_v9 = vld [vmem:[%s7764_s13 + $0x2000] sm:$0xff]  ;;  %v7263_v32 = vpack.c.bf16 %v2680_v0, %v2675_v63  ;;  %v2445_v18 = vld [vmem:[%s7764_s13 + $0x2050] sm:$0xff]  ;;  %v2780_v29 = vld [vmem:[%s7764_s13 + $0x2ac8] sm:$0xff] }
 0x4b2   : > { %7244 = vmatprep.subr.bf16.mxu0 %v7243_v14  ;;  %v2600_v14 = vld [vmem:[%s7764_s13 + $0x2528] sm:$0xff]  ;;  %v2605_v45 = vld [vmem:[%s7764_s13 + $0x2550] sm:$0xff]  ;;  %v2775_v26 = vld [vmem:[%s7764_s13 + $0x2aa0] sm:$0xff] }
 0x4b3   : > { %7214 = vmatpush3.bf16.msra.mxu1 %v7213_v16  ;;  %v2685_v16 = vld [vmem:[%s7764_s13 + $0x27d0] sm:$0xff]  ;;  %v7265_v19 = vpack.c.bf16 %v2600_v14, %v2595_v12  ;;  %v7269_v33 = vpack.c.bf16 %v2610_v24, %v2605_v45  ;;  %v7271_v28 = vpack.c.bf16 %v2780_v29, %v2775_v26  ;;  %v2970_v63 = vld [vmem:[%s7764_s13 + $0x30b8] sm:$0xff]  ;;  %v2820_v14 = vld [vmem:[%s7764_s13 + $0x2c08] sm:$0xff] }
 0x4b4   : > { %7246 = vmatpush3.bf16.msra.mxu0 %v7245_v17  ;;  %7216 = vmatprep.subr.bf16.mxu1 %v7215_v42  ;;  %v2690_v17 = vld [vmem:[%s7764_s13 + $0x27f8] sm:$0xff]  ;;  %v7233_v42 = vpack.c.bf16 %v2440_v10, %v2435_v9  ;;  %v2805_v58 = vld [vmem:[%s7764_s13 + $0x2b90] sm:$0xff]  ;;  %v2900_v45 = vld [vmem:[%s7764_s13 + $0x2e88] sm:$0xff] }
 0x4b5   : > { %7248 = vmatprep.subr.bf16.mxu0 %v7247_v21  ;;  %v2450_v21 = vld [vmem:[%s7764_s13 + $0x2078] sm:$0xff]  ;;  %v7267_v22 = vpack.c.bf16 %v2690_v17, %v2685_v16  ;;  %v2885_v9 = vld [vmem:[%s7764_s13 + $0x2e10] sm:$0xff] }
 0x4b6   : > { %v2890_v12 = vld [vmem:[%s7764_s13 + $0x2e38] sm:$0xff]  ;;  %v2985_v26 = vld [vmem:[%s7764_s13 + $0x3130] sm:$0xff] }
 0x4b7   : > { %7218 = vmatpush3.bf16.msra.mxu1 %v7217_v5  ;;  %v2935_v5 = vld [vmem:[%s7764_s13 + $0x2fa0] sm:$0xff]  ;;  %v7317_v17 = vpack.c.bf16 %v2890_v12, %v2885_v9  ;;  %v2830_v24 = vld [vmem:[%s7764_s13 + $0x2c58] sm:$0xff] }
 0x4b8   : > { %7250 = vmatpush3.bf16.msra.mxu0 %v7249_v55  ;;  %7220 = vmatprep.subr.bf16.mxu1 %v7219_v31  ;;  %v2940_v55 = vld [vmem:[%s7764_s13 + $0x2fc8] sm:$0xff]  ;;  %v7237_v31 = vpack.c.bf16 %v2450_v21, %v2445_v18  ;;  %v2895_v18 = vld [vmem:[%s7764_s13 + $0x2e60] sm:$0xff]  ;;  %v7319_v21 = vpack.c.bf16 %v2980_v15, %v2975_v37  ;;  %v2990_v29 = vld [vmem:[%s7764_s13 + $0x3158] sm:$0xff] }
 0x4b9   : > { %7252 = vmatprep.subr.bf16.mxu0 %v7251_v36  ;;  %v2700_v36 = vld [vmem:[%s7764_s13 + $0x2848] sm:$0xff]  ;;  %v7303_v39 = vpack.c.bf16 %v2940_v55, %v2935_v5  ;;  %v7321_v55 = vpack.c.bf16 %v2900_v45, %v2895_v18  ;;  %v1409_v37 = vld [vmem:[%s7759_s10] sm:$0xff] }
 0x4bb   : > { %7222 = vmatpush3.bf16.msra.mxu1 %v7221_v43  ;;  %v7273_v43 = vpack.c.bf16 %v2700_v36, %v2695_v34  ;;  %v2905_v34 = vld [vmem:[%s7764_s13 + $0x2eb0] sm:$0xff]  ;;  %v7323_v36 = vpack.c.bf16 %v2990_v29, %v2985_v26 }
 0x4bc   : > { %7254 = vmatpush3.bf16.msra.mxu0 %v7253_v44  ;;  %7224 = vmatprep.subr.bf16.mxu1 %v7223_v59  ;;  %v2945_v44 = vld [vmem:[%s7764_s13 + $0x2ff0] sm:$0xff]  ;;  %v2950_v59 = vld [vmem:[%s7764_s13 + $0x3018] sm:$0xff] }
 0x4bd   : > { %7256 = vmatprep.subr.bf16.mxu0 %v7255_v46  ;;  %v2865_v46 = vld [vmem:[%s7764_s13 + $0x2d70] sm:$0xff]  ;;  %v7307_v48 = vpack.c.bf16 %v2950_v59, %v2945_v44  ;;  %v7295_v59 = vpack.c.bf16 %v2840_v30, %v2835_v40 }
 0x4be   : > { %v7309_v50 = vpack.c.bf16 %v2870_v49, %v2865_v46  ;;  %v7327_v46 = vpack.c.bf16 %v3000_v54, %v2995_v38  ;;  %v2845_v49 = vld [vmem:[%s7764_s13 + $0x2cd0] sm:$0xff] }
 0x4bf   : > { %7226 = vmatpush3.bf16.msra.mxu1 %v7225_v60  ;;  %v2955_v60 = vld [vmem:[%s7764_s13 + $0x3040] sm:$0xff] }
 0x4c0   : > { %7258 = vmatpush3.bf16.msra.mxu0 %v7257_v6  ;;  %7228 = vmatprep.subr.bf16.mxu1 %v7227_v8  ;;  %v2960_v6 = vld [vmem:[%s7764_s13 + $0x3068] sm:$0xff]  ;;  %v7277_v8 = vpack.c.bf16 %v2710_v25, %v2705_v53  ;;  %v2915_v25 = vld [vmem:[%s7764_s13 + $0x2f00] sm:$0xff] }
 0x4c1   : > { %7260 = vmatprep.subr.bf16.mxu0 %v7259_v41  ;;  %v2720_v41 = vld [vmem:[%s7764_s13 + $0x28e8] sm:$0xff]  ;;  %v7311_v57 = vpack.c.bf16 %v2960_v6, %v2955_v60 }
 0x4c2   : > { %v7281_v0 = vpack.c.bf16 %v2720_v41, %v2715_v52  ;;  %v2760_v53 = vld [vmem:[%s7764_s13 + $0x2a28] sm:$0xff]  ;;  %v2925_v41 = vld [vmem:[%s7764_s13 + $0x2f50] sm:$0xff] }
 0x4c3   : > { %7230 = vmatpush3.bf16.msra.mxu1 %v7229_v1  ;;  %v7283_v1 = vpack.c.bf16 %v2810_v61, %v2805_v58  ;;  %v7496_v58 = vmov 1983009808  }
 0x4c4   : > { %7262 = vmatpush3.bf16.msra.mxu0 %v7261_v4  ;;  %7232 = vmatprep.subr.bf16.mxu1 %v7231_v3  ;;  %v2725_v4 = vld [vmem:[%s7764_s13 + $0x2910] sm:$0xff]  ;;  %v2730_v3 = vld [vmem:[%s7764_s13 + $0x2938] sm:$0xff]  ;;  %v5139_v61 = vunpack.c.l.s4 %v7496_v58 }
 0x4c5   : > { %7264 = vmatprep.subr.bf16.mxu0 %v7263_v32  ;;  %v2815_v32 = vld [vmem:[%s7764_s13 + $0x2be0] sm:$0xff]  ;;  %v7285_v16 = vpack.c.bf16 %v2730_v3, %v2725_v4 }
 0x4c7   : > { %7234 = vmatpush3.bf16.msra.mxu1 %v7233_v42  ;;  %v7287_v42 = vpack.c.bf16 %v2820_v14, %v2815_v32 }
 0x4c8   : > { %7266 = vmatpush3.bf16.msra.mxu0 %v7265_v19  ;;  %7236 = vmatprep.subr.bf16.mxu1 %v7235_v7  ;;  %v2735_v19 = vld [vmem:[%s7764_s13 + $0x2960] sm:$0xff]  ;;  %v2740_v7 = vld [vmem:[%s7764_s13 + $0x2988] sm:$0xff] }
 0x4c9   : > { %7268 = vmatprep.subr.bf16.mxu0 %v7267_v22  ;;  %v2825_v22 = vld [vmem:[%s7764_s13 + $0x2c30] sm:$0xff]  ;;  %v7289_v5 = vpack.c.bf16 %v2740_v7, %v2735_v19 }
 0x4cb   : > { %7238 = vmatpush3.bf16.msra.mxu1 %v7237_v31  ;;  %v7291_v31 = vpack.c.bf16 %v2830_v24, %v2825_v22 }
 0x4cc   : > { %7270 = vmatpush3.bf16.msra.mxu0 %v7269_v33  ;;  %7272 = vmatprep.subr.bf16.mxu1 %v7271_v28  ;;  %v2745_v33 = vld [vmem:[%s7764_s13 + $0x29b0] sm:$0xff]  ;;  %v2750_v28 = vld [vmem:[%s7764_s13 + $0x29d8] sm:$0xff] }
 0x4cd   : > { %7304 = vmatprep.subr.bf16.mxu0 %v7303_v39  ;;  %v2910_v39 = vld [vmem:[%s7764_s13 + $0x2ed8] sm:$0xff] }
 0x4ce   : > { %4916 = vmatmul.mubr.f32.vlgmr.msra.gmra.mrb[18].mxu1 %v8947_v11  ;;  %v2875_v11 = vld [vmem:[%s7764_s13 + $0x2dc0] sm:$0xff]  ;;  %v7325_v44 = vpack.c.bf16 %v2910_v39, %v2905_v34 }
 0x4cf   : > { %4986 = vmatmul.mubr.f32.vlgmr.msra.gmra.mrb[20].mxu0 %v9091_v35  ;;  %7274 = vmatpush3.bf16.msra.mxu1 %v7273_v43  ;;  %v2880_v35 = vld [vmem:[%s7764_s13 + $0x2de8] sm:$0xff]  ;;  %v7293_v43 = vpack.c.bf16 %v2750_v28, %v2745_v33 }
 0x4d0   : > { %5055 = vmatprep.mubr.f32.mxu1 %v9103_v56  ;;  %7306 = vmatpush3.bf16.msra.mxu0 %v7305_v23  ;;  %v2965_v56 = vld [vmem:[%s7764_s13 + $0x3090] sm:$0xff]  ;;  %v2755_v23 = vld [vmem:[%s7764_s13 + $0x2a00] sm:$0xff] }
 0x4d1   : > { %5125 = vmatprep.mubr.f32.mxu0 %v9247_v27  ;;  %7276 = vmatprep.subr.bf16.mxu1 %v7275_v2  ;;  %v7313_v27 = vpack.c.bf16 %v2880_v35, %v2875_v11  ;;  %v7315_v10 = vpack.c.bf16 %v2970_v63, %v2965_v56  ;;  %v2920_v2 = vld [vmem:[%s7764_s13 + $0x2f28] sm:$0xff]  ;;  %v7297_v60 = vpack.c.bf16 %v2760_v53, %v2755_v23  ;;  %v2930_v11 = vld [vmem:[%s7764_s13 + $0x2f78] sm:$0xff]  ;;  %v5141_v56 = vlaneseq }
 0x4d2   : > { %7308 = vmatprep.subr.bf16.mxu0 %v7307_v48  ;;  %v3010_v48 = vld [vmem:[%s7764_s13 + $0x31f8] sm:$0xff]  ;;  %v7329_v6 = vpack.c.bf16 %v2920_v2, %v2915_v25  ;;  %v7333_v35 = vpack.c.bf16 %v2930_v11, %v2925_v41  ;;  %v5140_v63 = vunpack.c.0.s8 %v5139_v61 }
 0x4d3   : > { %7278 = vmatpush3.bf16.msra.mxu1 %v7277_v8  ;;  %v7299_v8 = vpack.c.bf16 %v2850_v47, %v2845_v49  ;;  %v7331_v52 = vpack.c.bf16 %v3010_v48, %v3005_v13 }
 0x4d4   : > { %7310 = vmatpush3.bf16.msra.mxu0 %v7309_v50  ;;  %7280 = vmatprep.subr.bf16.mxu1 %v7279_v51  ;;  %v2765_v50 = vld [vmem:[%s7764_s13 + $0x2a50] sm:$0xff]  ;;  %v2770_v51 = vld [vmem:[%s7764_s13 + $0x2a78] sm:$0xff] }
 0x4d5   : > { %7312 = vmatprep.subr.bf16.mxu0 %v7311_v57  ;;  %v7301_v57 = vpack.c.bf16 %v2770_v51, %v2765_v50 }
 0x4d7   : > { %7282 = vmatpush3.bf16.msra.mxu1 %v7281_v0  ;;  %v5142_v0 = vshrl.u32 %v5141_v56, 7 }
 0x4d8   : > { %7314 = vmatpush3.bf16.msra.mxu0 %v7313_v27  ;;  %7284 = vmatprep.subr.bf16.mxu1 %v7283_v1 }
 0x4d9   : > { %7316 = vmatprep.subr.bf16.mxu0 %v7315_v10  ;;  %v5143_v1 = vsub.s32 %v5140_v63, %v5142_v0 }
 0x4db   : > { %7286 = vmatpush3.bf16.msra.mxu1 %v7285_v16 }
 0x4dc   : > { %7318 = vmatpush3.bf16.msra.mxu0 %v7317_v17  ;;  %7288 = vmatprep.subr.bf16.mxu1 %v7287_v42 }
 0x4dd   : > { %7320 = vmatprep.subr.bf16.mxu0 %v7319_v21 }
 0x4df   : > { %7290 = vmatpush3.bf16.msra.mxu1 %v7289_v5 }
 0x4e0   : > { %7322 = vmatpush3.bf16.msra.mxu0 %v7321_v55  ;;  %7292 = vmatprep.subr.bf16.mxu1 %v7291_v31 }
 0x4e1   : > { %7324 = vmatprep.subr.bf16.mxu0 %v7323_v36 }
 0x4e3   : > { %7294 = vmatpush3.bf16.msra.mxu1 %v7293_v43 }
 0x4e4   : > { %7326 = vmatpush3.bf16.msra.mxu0 %v7325_v44  ;;  %7296 = vmatprep.subr.bf16.mxu1 %v7295_v59 }
 0x4e5   : > { %7328 = vmatprep.subr.bf16.mxu0 %v7327_v46 }
 0x4e7   : > { %7298 = vmatpush3.bf16.msra.mxu1 %v7297_v60 }
 0x4e8   : > { %7330 = vmatpush3.bf16.msra.mxu0 %v7329_v6  ;;  %7300 = vmatprep.subr.bf16.mxu1 %v7299_v8  ;;  %v1410_v8 = vld [vmem:[%s7759_s10 + $0x8] sm:$0x3] }
 0x4e9   : > { %7332 = vmatprep.subr.bf16.mxu0 %v7331_v52 }
 0x4eb   : > { %7302 = vmatpush3.bf16.msra.mxu1 %v7301_v57 }
 0x4ec   : > { %7334 = vmatpush3.bf16.msra.mxu0 %v7333_v35 }
 0x4ee   : > { %5056 = vmatmul.mubr.f32.vlgmr.msra.gmra.mrb[20].mxu1 %v9235_v62 }
 0x4ef   : > { %5126 = vmatmul.mubr.f32.vlgmr.msra.gmra.mrb[22].mxu0 %v9377_v20 }
 0x521   : > { %v3716_v27 = vpop.f32.mrb[10].mxu1 }
 0x522   : > { %v4426_v4 = vpop.f32.mrb[12].mxu0  ;;  %v3718_v3 = vpop.f32.mrb[11].mxu1 }
 0x523   : > { %v5136_v9 = vcombine.low %v3716_v27, %v3718_v3  ;;  %v4428_v10 = vpop.f32.mrb[13].mxu0 }
 0x524   : > { %v5137_v12 = vcombine.low %v4426_v4, %v4428_v10 }
 0x525   : > { %v5144_v32 = vrot.slane %v5136_v9, %v5143_v1 }
 0x526   : > { %v5151_v14 = vrot.slane %v5137_v12, %v5143_v1 }
 0x528   : > { %v5152_v62 = vcombine.low %v5144_v32, %v5151_v14 }
 0x52a   : > { %v5162_v15 = vadd.f32 %v5152_v62, %v1409_v37 }
 0x52c   : > { %5164 = vst [vmem:[%s7759_s10] sm:$0xff] %v5162_v15 }
 0x541   : > { %v5320_v20 = vpop.f32.mrb[12].mxu1 }
 0x542   : > { %v5355_v16 = vpop.f32.mrb[14].mxu0  ;;  %v5321_v17 = vpop.f32.mrb[13].mxu1 }
 0x543   : > { %v5322_v42 = vadd.f32 %v5321_v17, %v5320_v20  ;;  %v5356_v19 = vpop.f32.mrb[15].mxu0 }
 0x544   : > { %v5357_v7 = vadd.f32 %v5356_v19, %v5355_v16 }
 0x546   : > { %v4568_v18 = vadd.f32 %v5357_v7, %v5322_v42 }
 0x561   : > { %v5390_v21 = vpop.f32.mrb[14].mxu1 }
 0x562   : > { %v5425_v45 = vpop.f32.mrb[16].mxu0  ;;  %v5391_v22 = vpop.f32.mrb[15].mxu1 }
 0x563   : > { %v5392_v24 = vadd.f32 %v5391_v22, %v5390_v21  ;;  %v5426_v26 = vpop.f32.mrb[17].mxu0 }
 0x564   : > { %v5427_v29 = vadd.f32 %v5426_v26, %v5425_v45 }
 0x565   : > { %v4638_v5 = vadd.f32 %v5392_v24, %v4568_v18 }
 0x567   : > { %v4708_v55 = vadd.f32 %v5427_v29, %v4638_v5 }
 0x581   : > { %v5460_v31 = vpop.f32.mrb[16].mxu1 }
 0x582   : > { %v5495_v33 = vpop.f32.mrb[18].mxu0  ;;  %v5461_v28 = vpop.f32.mrb[17].mxu1 }
 0x583   : > { %v5462_v34 = vadd.f32 %v5461_v28, %v5460_v31  ;;  %v5496_v36 = vpop.f32.mrb[19].mxu0 }
 0x584   : > { %v5497_v39 = vadd.f32 %v5496_v36, %v5495_v33 }
 0x585   : > { %v4778_v40 = vadd.f32 %v5462_v34, %v4708_v55 }
 0x587   : > { %v4848_v30 = vadd.f32 %v5497_v39, %v4778_v40 }
 0x5a1   : > { %v5530_v38 = vpop.f32.mrb[18].mxu1 }
 0x5a2   : > { %v5565_v54 = vpop.f32.mrb[20].mxu0  ;;  %v5531_v43 = vpop.f32.mrb[19].mxu1 }
 0x5a3   : > { %v5532_v44 = vadd.f32 %v5531_v43, %v5530_v38  ;;  %v5566_v59 = vpop.f32.mrb[21].mxu0 }
 0x5a4   : > { %v5567_v23 = vadd.f32 %v5566_v59, %v5565_v54 }
 0x5a5   : > { %v4918_v53 = vadd.f32 %v5532_v44, %v4848_v30 }
 0x5a7   : > { %v4988_v25 = vadd.f32 %v5567_v23, %v4918_v53 }
 0x5c1   : > { %v5600_v46 = vpop.f32.mrb[20].mxu1 }
 0x5c2   : > { %v5635_v2 = vpop.f32.mrb[22].mxu0  ;;  %v5601_v49 = vpop.f32.mrb[21].mxu1 }
 0x5c3   : > { %v5602_v47 = vadd.f32 %v5601_v49, %v5600_v46  ;;  %v5636_v13 = vpop.f32.mrb[23].mxu0 }
 0x5c4   : > { %v5637_v48 = vadd.f32 %v5636_v13, %v5635_v2 }
 0x5c5   : > { %v5058_v60 = vadd.f32 %v5602_v47, %v4988_v25 }
 0x5c7   : > { %v5128_v6 = vadd.f32 %v5637_v48, %v5058_v60 }
 0x5c9   : > { %v5159_v50 = vrot.slane %v5128_v6, %v5143_v1 }
 0x5cb   : > { %v5163_v51 = vadd.f32 %v5159_v50, %v1410_v8 }
 0x5cd   : > { %5166 = vst.msk [vmem:[%s7759_s10 + $0x8] sm:$0x3] %vm5165_vm7, %v5163_v51 }
 0x5ce PF: > { %s15_s24 = sadd.s32 1, %s7490_s24   ;;  %s9737_s18 = smov %s7470_s19 }
 0x5cf   : > { %p12_p13 = scmp.ge.s32.totalorder %s15_s24, 6   ;;  %s9738_s19 = smov %s7578_s8 }
 0x5d0   : > { %s9739_s20 = smov %s7482_s22  ;;  %s9740_s21 = smov %s7486_s23 }
 0x5d1   : > { %s9741_s22 = smov %s9744_s25  ;;  %s9742_s23 = smov %s9748_s26 }
 0x5d2   :  { %14 = sbr.rel (!%p12_p13) target bundleno = 4 (0x4), region = 105 }

</bundles_post_ra>
